<compile_context>
chip_gen: v6e
topology: v6e:2x2x1
jax: 0.10.0
libtpu: 0.0.40
codegen_flags: <defaults>
</compile_context>

<pallas_src>
import jax
import jax.numpy as jnp
from jax import lax
from jax.experimental import pallas as pl
from jax.experimental.pallas import tpu as pltpu


# --------------------------------------------------------------------------- kernels

def _elu(x):
    # ELU(alpha=1.0); exp only evaluated on the non-positive branch values.
    return jnp.where(x > 0, x, jnp.exp(jnp.minimum(x, 0.0)) - 1.0)


def _pool_and_stats(acc, t, l_conv, c_out, y_ref, stat_ref):
    # MaxPool1d(kernel_size=2, stride=2) over the length axis (floor), then the per-tile
    # per-channel sum / sum-of-squares packed into a single (1, 2, c_out) block.
    l_pool = l_conv // 2
    pairs = acc[:, :2 * l_pool, :].reshape(t, l_pool, 2, c_out)
    pooled = jnp.maximum(pairs[:, :, 0, :], pairs[:, :, 1, :])
    y_ref[...] = pooled.astype(y_ref.dtype)
    s = jnp.sum(jnp.sum(pooled, axis=1), axis=0)
    ss = jnp.sum(jnp.sum(pooled * pooled, axis=1), axis=0)
    stat_ref[...] = jnp.concatenate(
        [s.reshape(1, 1, c_out), ss.reshape(1, 1, c_out)], axis=1)


def conv_block1_kernel(x_ref, w_ref, b_ref, y_ref, stat_ref):
    # Fused: mean-subtraction -> Conv1d(c_in=1) -> bias -> ELU -> pool -> partial stats.
    t, l_in = x_ref.shape
    k, c_out = w_ref.shape
    l_conv = l_in - k + 1

    # MeanSubtractionLayer: accumulate and subtract the row mean in f32.
    x = x_ref[...].astype(jnp.float32)
    x = x - jnp.mean(x, axis=-1, keepdims=True)

    w = w_ref[...]
    # Degenerate contraction (c_in == 1): VPU broadcast-multiply, no MXU needed.
    acc = jnp.zeros((t, l_conv, c_out), jnp.float32) + b_ref[0, :]
    for kk in range(k):
        acc = acc + x[:, kk:kk + l_conv].reshape(t, l_conv, 1) * w[kk, :]

    acc = _elu(acc)
    _pool_and_stats(acc, t, l_conv, c_out, y_ref, stat_ref)


def conv_block_kernel(x_ref, scale_ref, shift_ref, w_ref, b_ref, y_ref, stat_ref):
    # Fused: previous block's BatchNorm (per-channel affine) -> im2col conv (one matmul)
    # -> bias -> ELU -> pool -> partial stats.
    t, l_in, c_in = x_ref.shape
    kc_in, c_out = w_ref.shape
    k = kc_in // c_in
    l_conv = l_in - k + 1

    x = x_ref[...].astype(jnp.float32) * scale_ref[0, :] + shift_ref[0, :]

    # im2col built once: single concat along the lane axis, single reshape, ONE MXU
    # matmul over the full K*c_in contraction (instead of K relayouts + K short matmuls).
    cols = jnp.concatenate([x[:, kk:kk + l_conv, :] for kk in range(k)], axis=-1)
    acc = jnp.dot(cols.reshape(t * l_conv, kc_in), w_ref[...],
                  preferred_element_type=jnp.float32,
                  precision=lax.Precision.HIGH)
    acc = acc.reshape(t, l_conv, c_out) + b_ref[0, :]

    acc = _elu(acc)
    _pool_and_stats(acc, t, l_conv, c_out, y_ref, stat_ref)


def bn_flatten_kernel(x_ref, scale_ref, shift_ref, o_ref):
    # Final BatchNorm affine fused with torch's (N, C, L) channel-major Flatten;
    # output block is lane-dense (tn, C*L).
    t, l, c = x_ref.shape
    y = x_ref[...].astype(jnp.float32) * scale_ref[0, :] + shift_ref[0, :]
    o_ref[...] = jnp.transpose(y, (0, 2, 1)).reshape(t, c * l).astype(o_ref.dtype)


# -------------------------------------------------------------------------- wrappers

def _vmem_budget():
    """Per-generation VMEM limit: ~70% of physical capacity, capped at 96 MiB
    (=> ~89 MiB on v5e/v6e's 128 MiB, ~44 MiB on v7x's 64 MiB)."""
    try:
        cap = int(pltpu.get_tpu_info().vmem_capacity_bytes)
    except Exception:
        cap = 64 << 20
    return max(16 << 20, min(int(cap * 0.7), 96 << 20))


def _pick_tile_n(n, max_rows, align=8, min_tiles=2):
    """Largest multiple-of-`align` divisor of n that is <= max_rows, additionally capped
    so the grid has >= min_tiles steps when n allows it (keeps both v7x TCs busy under
    dimension_semantics=('parallel',)).  Falls back to n (full extent) if needed."""
    if min_tiles > 1 and n >= min_tiles * align:
        max_rows = min(max_rows, max(align, (n // min_tiles) // align * align))
    if n <= max_rows:
        return n
    t = (max_rows // align) * align
    while t >= align:
        if n % t == 0:
            return t
        t -= align
    # TODO(synk): for prime/odd N a masked tail grid would be needed to keep the partial
    # BN statistics exact; the full-extent fallback is correct but VMEM-hungry.
    return n


def conv_block1(x2, w, b, *, act_dtype=jnp.float32, vmem_limit=None):
    """Fused mean-subtraction + Conv1d(c_in=1) + ELU + MaxPool1d(2,2); also returns the
    packed per-tile (sum, sum-of-squares) BatchNorm partials.  x2: (N, L)."""
    if vmem_limit is None:
        vmem_limit = _vmem_budget()
    n, l_in = x2.shape
    k, c1, c_out = w.shape
    assert c1 == 1
    l_conv = l_in - k + 1
    l_pool = l_conv // 2
    assert l_pool >= 1, "sequence too short for this conv/pool stack"
    w2 = w.reshape(k, c_out)

    out_sz = jnp.dtype(act_dtype).itemsize
    row_bytes = (2 * l_in * x2.dtype.itemsize            # double-buffered input DMA
                 + 2 * l_pool * c_out * out_sz           # double-buffered output DMA
                 + 4 * (l_in + 2 * l_conv * c_out + 2 * l_pool * c_out))  # f32 working set
    max_rows = max(8, min(1024, (vmem_limit // 2) // max(row_bytes, 1)))
    tn = _pick_tile_n(n, max_rows)
    grid_n = n // tn

    y, stats = pl.pallas_call(
        conv_block1_kernel,
        grid=(grid_n,),
        in_specs=[
            pl.BlockSpec((tn, l_in), lambda i: (i, 0)),
            pl.BlockSpec((k, c_out), lambda i: (0, 0)),
            pl.BlockSpec((1, c_out), lambda i: (0, 0)),
        ],
        out_specs=(
            pl.BlockSpec((tn, l_pool, c_out), lambda i: (i, 0, 0)),
            pl.BlockSpec((1, 2, c_out), lambda i: (i, 0, 0)),
        ),
        out_shape=(
            jax.ShapeDtypeStruct((n, l_pool, c_out), act_dtype),
            jax.ShapeDtypeStruct((grid_n, 2, c_out), jnp.float32),
        ),
        compiler_params=pltpu.CompilerParams(
            dimension_semantics=("parallel",), vmem_limit_bytes=vmem_limit),
    )(x2, w2, b)
    return y, stats


def conv_block(h, in_scale, in_shift, w, b, *, act_dtype=jnp.float32, vmem_limit=None):
    """Fused (input affine) -> Conv1d (im2col, one MXU matmul) -> ELU -> MaxPool1d(2,2);
    also returns packed per-tile BatchNorm partials."""
    if vmem_limit is None:
        vmem_limit = _vmem_budget()
    n, l_in, c_in = h.shape
    k, wc_in, c_out = w.shape
    assert wc_in == c_in
    l_conv = l_in - k + 1
    l_pool = l_conv // 2
    assert l_pool >= 1, "sequence too short for this conv/pool stack"
    # Weight pre-reshaped in the wrapper for the single im2col matmul.
    w2 = w.reshape(k * c_in, c_out)

    out_sz = jnp.dtype(act_dtype).itemsize
    row_bytes = (2 * l_in * c_in * h.dtype.itemsize       # double-buffered input DMA
                 + 2 * l_pool * c_out * out_sz            # double-buffered output DMA
                 + 4 * (l_in * c_in                       # affined x (f32)
                        + k * l_conv * c_in               # im2col buffer
                        + 2 * l_conv * c_out              # matmul acc + reshape copy
                        + 2 * l_pool * c_out))            # pooled
    max_rows = max(8, min(512, (vmem_limit // 2) // max(row_bytes, 1)))
    tn = _pick_tile_n(n, max_rows)
    grid_n = n // tn

    y, stats = pl.pallas_call(
        conv_block_kernel,
        grid=(grid_n,),
        in_specs=[
            pl.BlockSpec((tn, l_in, c_in), lambda i: (i, 0, 0)),
            pl.BlockSpec((1, c_in), lambda i: (0, 0)),
            pl.BlockSpec((1, c_in), lambda i: (0, 0)),
            pl.BlockSpec((k * c_in, c_out), lambda i: (0, 0)),
            pl.BlockSpec((1, c_out), lambda i: (0, 0)),
        ],
        out_specs=(
            pl.BlockSpec((tn, l_pool, c_out), lambda i: (i, 0, 0)),
            pl.BlockSpec((1, 2, c_out), lambda i: (i, 0, 0)),
        ),
        out_shape=(
            jax.ShapeDtypeStruct((n, l_pool, c_out), act_dtype),
            jax.ShapeDtypeStruct((grid_n, 2, c_out), jnp.float32),
        ),
        compiler_params=pltpu.CompilerParams(
            dimension_semantics=("parallel",), vmem_limit_bytes=vmem_limit),
    )(h, in_scale, in_shift, w2, b)
    return y, stats


def bn_flatten(h, scale, shift, out_dtype, *, vmem_limit=None):
    """Final BatchNorm affine fused with torch's (N, C, L) transpose + Flatten."""
    if vmem_limit is None:
        vmem_limit = _vmem_budget()
    n, l, c = h.shape
    row_bytes = (2 * l * c * h.dtype.itemsize
                 + 2 * l * c * jnp.dtype(out_dtype).itemsize
                 + 4 * 2 * l * c)
    max_rows = max(8, min(2048, (vmem_limit // 2) // max(row_bytes, 1)))
    tn = _pick_tile_n(n, max_rows)
    return pl.pallas_call(
        bn_flatten_kernel,
        grid=(n // tn,),
        in_specs=[
            pl.BlockSpec((tn, l, c), lambda i: (i, 0, 0)),
            pl.BlockSpec((1, c), lambda i: (0, 0)),
            pl.BlockSpec((1, c), lambda i: (0, 0)),
        ],
        out_specs=pl.BlockSpec((tn, c * l), lambda i: (i, 0)),
        out_shape=jax.ShapeDtypeStruct((n, c * l), out_dtype),
        compiler_params=pltpu.CompilerParams(
            dimension_semantics=("parallel",), vmem_limit_bytes=vmem_limit),
    )(h, scale, shift)


def _bn_scale_shift(stats, count, gamma, beta, eps):
    """Fold training-mode BatchNorm1d (batch stats, biased variance) into per-channel
    (scale, shift): y = x * scale + shift.  `stats` is the tiny (grid_n, 2, C) partials."""
    total = jnp.sum(stats[:, 0, :], axis=0)
    total_sq = jnp.sum(stats[:, 1, :], axis=0)
    mean = total / count
    var = jnp.maximum(total_sq / count - mean * mean, 0.0)
    inv = lax.rsqrt(var + eps)
    scale = gamma * inv
    shift = beta - mean * scale
    return (scale.reshape(1, -1).astype(jnp.float32),
            shift.reshape(1, -1).astype(jnp.float32))


def cnn_embedding_forward(x, params, *, eps=1e-5, act_dtype=None):
    """x: (N, 1, L) -> (N, C_last * L_final), matching CNNEmbedding.forward.
    Pass act_dtype=jnp.bfloat16 to halve the HBM traffic of inter-block activations."""
    n, c1, l = x.shape
    assert c1 == 1, "CNNEmbedding expects input shaped (N, 1, L)"
    out_dtype = x.dtype
    if act_dtype is None:
        act_dtype = x.dtype
    vmem_limit = _vmem_budget()

    # Block 1: fused mean-subtraction + Conv1d(c_in=1) + ELU + pool + partial BN stats.
    (w0, b0, g0, be0) = params[0]
    h, stats = conv_block1(x.reshape(n, l), w0, b0,
                           act_dtype=act_dtype, vmem_limit=vmem_limit)
    scale, shift = _bn_scale_shift(stats, h.shape[0] * h.shape[1], g0, be0, eps)

    # Remaining blocks; BatchNorm of block i is folded into block i+1's input affine.
    for (w, b, gamma, beta) in params[1:]:
        h, stats = conv_block(h, scale, shift, w, b,
                              act_dtype=act_dtype, vmem_limit=vmem_limit)
        scale, shift = _bn_scale_shift(stats, h.shape[0] * h.shape[1], gamma, beta, eps)

    # BatchNorm of the last block fused with the torch (N, C, L) Flatten.
    return bn_flatten(h, scale, shift, out_dtype, vmem_limit=vmem_limit)


# ------------------------------------------------------------------- params & reference

def init_params(key):
    layer_specs = [(1, 256, 3), (256, 128, 5), (128, 64, 7)]   # (C_in, C_out, K)
    params = []
    for c_in, c_out, k in layer_specs:
        key, kw, kb, kg, kbe = jax.random.split(key, 5)
        bound = 1.0 / (c_in * k) ** 0.5
        w = jax.random.uniform(kw, (k, c_in, c_out), jnp.float32, -bound, bound)
        b = jax.random.uniform(kb, (1, c_out), jnp.float32, -bound, bound)
        gamma = 1.0 + 0.1 * jax.random.normal(kg, (c_out,), jnp.float32)
        beta = 0.1 * jax.random.normal(kbe, (c_out,), jnp.float32)
        params.append((w, b, gamma, beta))
    return params


def ref_forward(x, params, *, eps=1e-5):
    """Pure-JAX reference with the exact PyTorch forward semantics."""
    n, _, _ = x.shape
    h = jnp.transpose(x - jnp.mean(x, axis=-1).reshape(-1, 1, 1), (0, 2, 1))
    h = h.astype(jnp.float32)
    for (w, b, gamma, beta) in params:
        k, _, c_out = w.shape
        lc = h.shape[1] - k + 1
        acc = jnp.zeros((n, lc, c_out), jnp.float32) + b[0]
        for kk in range(k):
            acc = acc + jnp.einsum('nlc,cd->nld', h[:, kk:kk + lc, :], w[kk],
                                   precision=lax.Precision.HIGHEST)
        acc = jnp.where(acc > 0, acc, jnp.exp(jnp.minimum(acc, 0.0)) - 1.0)   # ELU
        lp = lc // 2
        pairs = acc[:, :2 * lp, :].reshape(n, lp, 2, c_out)
        pooled = jnp.maximum(pairs[:, :, 0, :], pairs[:, :, 1, :])            # MaxPool1d
        mean = jnp.mean(pooled, axis=(0, 1))
        var = jnp.var(pooled, axis=(0, 1))
        h = (pooled - mean) * lax.rsqrt(var + eps) * gamma + beta             # BatchNorm1d
    return jnp.transpose(h, (0, 2, 1)).reshape(n, -1)                         # Flatten


if __name__ == "__main__":
    key = jax.random.PRNGKey(0)
    kx, kp = jax.random.split(key)
    N, L = 8, 64
    x = jax.random.normal(kx, (N, 1, L), dtype=jnp.float32)
    params = init_params(kp)

    # Full CNNEmbedding forward (f32 inter-block activations).
    y = cnn_embedding_forward(x, params)
    jax.block_until_ready(y)

    ref = ref_forward(x, params)
    assert y.shape == ref.shape == (N, 64 * 3), (y.shape, ref.shape)
    max_err = float(jnp.max(jnp.abs(y - ref)))
    assert max_err < 2e-3, f"max abs err {max_err}"

    # bf16 inter-block activation storage (halves HBM traffic of the intermediates);
    # checked with a correspondingly looser tolerance.
    y_bf16 = cnn_embedding_forward(x, params, act_dtype=jnp.bfloat16)
    jax.block_until_ready(y_bf16)
    assert y_bf16.shape == ref.shape
    bf16_err = float(jnp.max(jnp.abs(y_bf16.astype(jnp.float32) - ref)))
    assert bf16_err < 1.5e-1, f"bf16-path max abs err {bf16_err}"

    print("KERNEL_OK")
</pallas_src>

<mosaic_0001>
module attributes {stable_mosaic.version = 11 : i64} {
  func.func @conv_block1_kernel(%arg0: i32, %arg1: memref<8x64xf32, #tpu.memory_space<vmem>>, %arg2: memref<3x256xf32, #tpu.memory_space<vmem>>, %arg3: memref<1x256xf32, #tpu.memory_space<vmem>>, %arg4: memref<8x31x256xf32, #tpu.memory_space<vmem>>, %arg5: memref<1x2x256xf32, #tpu.memory_space<vmem>>) attributes {dimension_semantics = [#tpu.dimension_semantics<parallel>], iteration_bounds = array<i64: 1>, scalar_prefetch = 0 : i64, scratch_operands = 0 : i64, tpu.core_type = #tpu.core_type<tc>, window_params = [{transform_indices = @transform_0, window_bounds = array<i64: 8, 64>}, {pipeline_mode = #tpu.pipeline_mode<synchronous>, transform_indices = @transform_1, window_bounds = array<i64: 3, 256>}, {pipeline_mode = #tpu.pipeline_mode<synchronous>, transform_indices = @transform_2, window_bounds = array<i64: 1, 256>}, {transform_indices = @transform_3, window_bounds = array<i64: 8, 31, 256>}, {transform_indices = @transform_4, window_bounds = array<i64: 1, 2, 256>}]} {
    %c0 = arith.constant 0 : index
    %c0_0 = arith.constant 0 : index
    %0 = vector.load %arg1[%c0, %c0_0] : memref<8x64xf32, #tpu.memory_space<vmem>>, vector<8x64xf32>
    %cst = arith.constant dense<0.000000e+00> : vector<8xf32>
    %1 = vector.multi_reduction <add>, %0, %cst [1] : vector<8x64xf32> to vector<8xf32>
    %2 = vector.shape_cast %1 : vector<8xf32> to vector<8x1xf32>
    %cst_1 = arith.constant 6.400000e+01 : f32
    %3 = vector.broadcast %cst_1 : f32 to vector<8x1xf32>
    %4 = arith.divf %2, %3 : vector<8x1xf32>
    %5 = vector.broadcast %4 : vector<8x1xf32> to vector<8x64xf32>
    %6 = arith.subf %0, %5 : vector<8x64xf32>
    %c0_2 = arith.constant 0 : index
    %c0_3 = arith.constant 0 : index
    %7 = vector.load %arg2[%c0_2, %c0_3] : memref<3x256xf32, #tpu.memory_space<vmem>>, vector<3x256xf32>
    %cst_4 = arith.constant 0.000000e+00 : f32
    %8 = vector.broadcast %cst_4 : f32 to vector<8x62x256xf32>
    %c0_5 = arith.constant 0 : index
    %c0_6 = arith.constant 0 : index
    %9 = vector.load %arg3[%c0_5, %c0_6] : memref<1x256xf32, #tpu.memory_space<vmem>>, vector<1x256xf32>
    %10 = vector.shape_cast %9 : vector<1x256xf32> to vector<256xf32>
    %11 = vector.shape_cast %10 : vector<256xf32> to vector<1x1x256xf32>
    %12 = vector.broadcast %11 : vector<1x1x256xf32> to vector<8x62x256xf32>
    %13 = arith.addf %8, %12 : vector<8x62x256xf32>
    %14 = vector.extract_strided_slice %6 {offsets = [0, 0], sizes = [8, 62], strides = [1, 1]} : vector<8x64xf32> to vector<8x62xf32>
    %15 = vector.shape_cast %14 : vector<8x62xf32> to vector<8x62x1xf32>
    %16 = vector.extract_strided_slice %7 {offsets = [0, 0], sizes = [1, 256], strides = [1, 1]} : vector<3x256xf32> to vector<1x256xf32>
    %17 = vector.shape_cast %16 : vector<1x256xf32> to vector<256xf32>
    %18 = vector.shape_cast %17 : vector<256xf32> to vector<1x1x256xf32>
    %19 = vector.broadcast %15 : vector<8x62x1xf32> to vector<8x62x256xf32>
    %20 = vector.broadcast %18 : vector<1x1x256xf32> to vector<8x62x256xf32>
    %21 = arith.mulf %19, %20 : vector<8x62x256xf32>
    %22 = arith.addf %13, %21 : vector<8x62x256xf32>
    %23 = vector.extract_strided_slice %6 {offsets = [0, 1], sizes = [8, 62], strides = [1, 1]} : vector<8x64xf32> to vector<8x62xf32>
    %24 = vector.shape_cast %23 : vector<8x62xf32> to vector<8x62x1xf32>
    %25 = vector.extract_strided_slice %7 {offsets = [1, 0], sizes = [1, 256], strides = [1, 1]} : vector<3x256xf32> to vector<1x256xf32>
    %26 = vector.shape_cast %25 : vector<1x256xf32> to vector<256xf32>
    %27 = vector.shape_cast %26 : vector<256xf32> to vector<1x1x256xf32>
    %28 = vector.broadcast %24 : vector<8x62x1xf32> to vector<8x62x256xf32>
    %29 = vector.broadcast %27 : vector<1x1x256xf32> to vector<8x62x256xf32>
    %30 = arith.mulf %28, %29 : vector<8x62x256xf32>
    %31 = arith.addf %22, %30 : vector<8x62x256xf32>
    %32 = vector.extract_strided_slice %6 {offsets = [0, 2], sizes = [8, 62], strides = [1, 1]} : vector<8x64xf32> to vector<8x62xf32>
    %33 = vector.shape_cast %32 : vector<8x62xf32> to vector<8x62x1xf32>
    %34 = vector.extract_strided_slice %7 {offsets = [2, 0], sizes = [1, 256], strides = [1, 1]} : vector<3x256xf32> to vector<1x256xf32>
    %35 = vector.shape_cast %34 : vector<1x256xf32> to vector<256xf32>
    %36 = vector.shape_cast %35 : vector<256xf32> to vector<1x1x256xf32>
    %37 = vector.broadcast %33 : vector<8x62x1xf32> to vector<8x62x256xf32>
    %38 = vector.broadcast %36 : vector<1x1x256xf32> to vector<8x62x256xf32>
    %39 = arith.mulf %37, %38 : vector<8x62x256xf32>
    %40 = arith.addf %31, %39 : vector<8x62x256xf32>
    %cst_7 = arith.constant 0.000000e+00 : f32
    %41 = vector.broadcast %cst_7 : f32 to vector<8x62x256xf32>
    %42 = arith.cmpf ogt, %40, %41 : vector<8x62x256xf32>
    %cst_8 = arith.constant 0.000000e+00 : f32
    %43 = vector.broadcast %cst_8 : f32 to vector<8x62x256xf32>
    %44 = arith.minimumf %40, %43 : vector<8x62x256xf32>
    %45 = math.exp %44 : vector<8x62x256xf32>
    %cst_9 = arith.constant 1.000000e+00 : f32
    %46 = vector.broadcast %cst_9 : f32 to vector<8x62x256xf32>
    %47 = arith.subf %45, %46 : vector<8x62x256xf32>
    %48 = arith.select %42, %40, %47 : vector<8x62x256xi1>, vector<8x62x256xf32>
    %49 = vector.shape_cast %48 : vector<8x62x256xf32> to vector<8x31x2x256xf32>
    %50 = vector.extract_strided_slice %49 {offsets = [0, 0, 0, 0], sizes = [8, 31, 1, 256], strides = [1, 1, 1, 1]} : vector<8x31x2x256xf32> to vector<8x31x1x256xf32>
    %51 = vector.shape_cast %50 : vector<8x31x1x256xf32> to vector<8x31x256xf32>
    %52 = vector.extract_strided_slice %49 {offsets = [0, 0, 1, 0], sizes = [8, 31, 1, 256], strides = [1, 1, 1, 1]} : vector<8x31x2x256xf32> to vector<8x31x1x256xf32>
    %53 = vector.shape_cast %52 : vector<8x31x1x256xf32> to vector<8x31x256xf32>
    %54 = arith.maximumf %51, %53 : vector<8x31x256xf32>
    %c0_10 = arith.constant 0 : index
    %c0_11 = arith.constant 0 : index
    %c0_12 = arith.constant 0 : index
    %55 = vector.load %arg4[%c0_10, %c0_11, %c0_12] : memref<8x31x256xf32, #tpu.memory_space<vmem>>, vector<8x31x256xf32>
    tpu.vector_store %arg4[%c0_10, %c0_11, %c0_12], %54 {strides = array<i32>} : memref<8x31x256xf32, #tpu.memory_space<vmem>>, vector<8x31x256xf32>,
    %cst_13 = arith.constant dense<0.000000e+00> : vector<8x256xf32>
    %56 = vector.multi_reduction <add>, %54, %cst_13 [1] : vector<8x31x256xf32> to vector<8x256xf32>
    %cst_14 = arith.constant dense<0.000000e+00> : vector<256xf32>
    %57 = vector.multi_reduction <add>, %56, %cst_14 [0] : vector<8x256xf32> to vector<256xf32>
    %58 = arith.mulf %54, %54 : vector<8x31x256xf32>
    %cst_15 = arith.constant dense<0.000000e+00> : vector<8x256xf32>
    %59 = vector.multi_reduction <add>, %58, %cst_15 [1] : vector<8x31x256xf32> to vector<8x256xf32>
    %cst_16 = arith.constant dense<0.000000e+00> : vector<256xf32>
    %60 = vector.multi_reduction <add>, %59, %cst_16 [0] : vector<8x256xf32> to vector<256xf32>
    %61 = vector.shape_cast %57 : vector<256xf32> to vector<1x1x256xf32>
    %62 = vector.shape_cast %60 : vector<256xf32> to vector<1x1x256xf32>
    %63 = tpu.concatenate %61, %62 in 1 : vector<1x1x256xf32>, vector<1x1x256xf32> -> vector<1x2x256xf32>
    %c0_17 = arith.constant 0 : index
    %c0_18 = arith.constant 0 : index
    %c0_19 = arith.constant 0 : index
    %64 = vector.load %arg5[%c0_17, %c0_18, %c0_19] : memref<1x2x256xf32, #tpu.memory_space<vmem>>, vector<1x2x256xf32>
    tpu.vector_store %arg5[%c0_17, %c0_18, %c0_19], %63 {strides = array<i32>} : memref<1x2x256xf32, #tpu.memory_space<vmem>>, vector<1x2x256xf32>,
    return
  }
  func.func @transform_0(%arg0: i32) -> (i32, i32) {
    %c0_i32 = arith.constant 0 : i32
    %c0_i32_0 = arith.constant 0 : i32
    return %arg0, %c0_i32 : i32, i32
  }
  func.func @transform_1(%arg0: i32) -> (i32, i32) {
    %c0_i32 = arith.constant 0 : i32
    %c0_i32_0 = arith.constant 0 : i32
    %c0_i32_1 = arith.constant 0 : i32
    return %c0_i32, %c0_i32_0 : i32, i32
  }
  func.func @transform_2(%arg0: i32) -> (i32, i32) {
    %c0_i32 = arith.constant 0 : i32
    %c0_i32_0 = arith.constant 0 : i32
    %c0_i32_1 = arith.constant 0 : i32
    return %c0_i32, %c0_i32_0 : i32, i32
  }
  func.func @transform_3(%arg0: i32) -> (i32, i32, i32) {
    %c0_i32 = arith.constant 0 : i32
    %c0_i32_0 = arith.constant 0 : i32
    %c0_i32_1 = arith.constant 0 : i32
    return %arg0, %c0_i32, %c0_i32_0 : i32, i32, i32
  }
  func.func @transform_4(%arg0: i32) -> (i32, i32, i32) {
    %c0_i32 = arith.constant 0 : i32
    %c0_i32_0 = arith.constant 0 : i32
    %c0_i32_1 = arith.constant 0 : i32
    return %arg0, %c0_i32, %c0_i32_0 : i32, i32, i32
  }
}

</mosaic_0001>

<bundles_post_ra>
// kernel: tpu_custom_call.1
= control target key start
LH: loop header
LB: loop body
LE: loop exit
PB: predicated region body
PF: predicated region fallthrough
CT: control target
= control target key end

     0   :  { %10 = vsyncpa [#allocation3], 0  ;;  %s19391_s0 = inlined_call_operand.hbm [shape: f32[8,64], index: 0, kind: input, shape index: {}]   ;;  %s19392_s1 = inlined_call_operand.hbm [shape: f32[3,256], index: 1, kind: input, shape index: {}]   ;;  %s19393_s2 = inlined_call_operand.vmem [shape: f32[1,256], index: 2, kind: input, shape index: {}]   ;;  %s19394_s3 = inlined_call_operand.vmem [shape: f32[8,31,256], index: 3, kind: output, shape index: {0}]   ;;  %s19395_s4 = inlined_call_operand.hbm [shape: f32[1,2,256], index: 4, kind: output, shape index: {1}]  }
   0x1   :  { %11 = vsyncpa [#allocation6], 0 }
   0x2   :  { %12 = vsyncpa [#allocation4], 0  ;;  %s11935_s15 = smov [#allocation2]   ;;  %s11936_s17 = smov [#allocation5]  }
   0x3   :  { %s19_s16 = sshll.u32 %s11935_s15, 4  ;;  %s29_s18 = sshll.u32 %s11936_s17, 4  ;;  %s20_s16 = int_to_ptr.vmem [resolvable:$true] %s19_s16  ;;  %s30_s18 = int_to_ptr.vmem [resolvable:$true] %s29_s18 }
   0x4   :  { %s11877_s19 = scalar_lea.vmem %s20_s16, 128  ;;  %p11882_p1 = scmp.lt.s32.totalorder %s20_s16, %s20_s16 }
   0x5   :  { %p11878_p0 = scmp.ne.s32.totalorder %s20_s16, %s11877_s19  ;;  %p11883_p2 = scmp.lt.s32.totalorder %s11877_s19, %s11877_s19 }
   0x7   :  { %p11884_p3 = por %p11883_p2, %p11882_p1 }
   0x9   :  { %p11885_p4 = pnand %p11884_p3, %p11878_p0 }
   0xb   :  { %11888 = shalt.err (!%p11885_p4)
}
   0xc   :  { %22 = dma.hbm_to_vmem [thread:$0]  %s19391_s0, 128, %s20_s16, [#allocation3]  }
   0xd   :  { %s11897_s22 = scalar_lea.vmem %s30_s18, 128  ;;  %p11902_p6 = scmp.lt.s32.totalorder %s30_s18, %s30_s18 }
   0xe   :  { %p11898_p5 = scmp.ne.s32.totalorder %s30_s18, %s11897_s22  ;;  %p11903_p7 = scmp.lt.s32.totalorder %s11897_s22, %s11897_s22 }
  0x10   :  { %p11904_p8 = por %p11903_p7, %p11902_p6 }
  0x12   :  { %p11905_p9 = pnand %p11904_p8, %p11898_p5 }
  0x14   :  { %11908 = shalt.err (!%p11905_p9)
}
  0x15   :  { %32 = dma.hbm_to_vmem [thread:$0]  %s19392_s1, 128, %s30_s18, [#allocation6]  }
  0x16   :  { %11929 = dma.done.wait [#allocation3], 128  }
  0x17   :  { %11930 = vsyncadd [#allocation3], 4294967168 }
  0x18   :  { %11931 = dma.done.wait [#allocation6], 128  }
  0x19   :  { %11932 = vsyncadd [#allocation6], 4294967168  ;;  %vm42_vm0 = vcmask 523264   ;;  %v41_v0 = vld [vmem:[#allocation2] sm:$0xff]  ;;  %v52_v2 = vlaneseq  ;;  %vm7191_vm4 = vcmask 1041409   ;;  %vm7193_vm5 = vcmask 1042434  }
  0x1a   :  { %v43_v1 = vsel %vm42_vm0, %v41_v0, 0.0  ;;  %vm7195_vm7 = vcmask 1043459  }
  0x1b   :  { %44 = vadd.xlane.f32.xlu0 %v43_v1  ;;  %v11970_v3 = vshrl.u32 %v52_v2, 7 }
  0x1d   :  { %v11973_v5 = vsub.s32 0, %v11970_v3  ;;  %v311_v7 = vsub.s32 7, %v11970_v3  ;;  %v11977_v9 = vsub.s32 1, %v11970_v3  ;;  %v11996_v13 = vsub.s32 2, %v11970_v3 }
  0x1e   :  { %v171_v15 = vsub.s32 3, %v11970_v3  ;;  %v19398_v17 = vsub.s32 4, %v11970_v3  ;;  %v19397_v19 = vsub.s32 5, %v11970_v3  ;;  %v19396_v21 = vsub.s32 6, %v11970_v3 }
  0x1f   :  { %19465 = vst [vmem:[#allocation11_spill] sm:$0xff] %v11973_v5  ;;  %19466 = vst [vmem:[#allocation12_spill] sm:$0xff] %v11996_v13 }
  0xa4   :  { %v45_v4 = vpop.xlane.xlu0 %44 }
  0xa5   :  { %v47_v6 = vmul.f32 0.015625, %v45_v4 }
  0xa7   :  { %v48_v8 = vsub.f32 %v41_v0, %v47_v6 }
  0xa9   :  { %v11980_v10 = vrot.slane %v48_v8, %v11973_v5  ;;  %v11982_v11 = vrot.slane %v48_v8, %v311_v7  ;;  %v11987_v12 = vrot.slane %v48_v8, %v11977_v9  ;;  %v12001_v14 = vrot.slane %v48_v8, %v11996_v13 }
  0xaa   :  { %v12012_v16 = vrot.slane %v48_v8, %v171_v15  ;;  %v12025_v18 = vrot.slane %v48_v8, %v19398_v17  ;;  %v12038_v20 = vrot.slane %v48_v8, %v19397_v19  ;;  %v12051_v22 = vrot.slane %v48_v8, %v19396_v21 }
  0xab   :  { %73 = vbcast.lane.b32.xlu1 %v11980_v10, 264  ;;  %69 = vbcast.lane.b32.xlu0 %v11980_v10, 256 }
  0xaf   :  { %77 = vbcast.lane.b32.xlu1 %v11980_v10, 272  ;;  %104 = vbcast.lane.b32.xlu0 %v11987_v12, 256 }
  0xb3   :  { %81 = vbcast.lane.b32.xlu1 %v11980_v10, 280  ;;  %112 = vbcast.lane.b32.xlu0 %v11987_v12, 272 }
  0xb7   :  { %85 = vbcast.lane.b32.xlu1 %v11980_v10, 288  ;;  %120 = vbcast.lane.b32.xlu0 %v11987_v12, 288 }
  0xbb   :  { %89 = vbcast.lane.b32.xlu1 %v11980_v10, 296  ;;  %128 = vbcast.lane.b32.xlu0 %v11987_v12, 304 }
  0xbf   :  { %93 = vbcast.lane.b32.xlu1 %v11980_v10, 304  ;;  %139 = vbcast.lane.b32.xlu0 %v12001_v14, 256 }
  0xc3   :  { %97 = vbcast.lane.b32.xlu1 %v11980_v10, 312  ;;  %147 = vbcast.lane.b32.xlu0 %v12001_v14, 272 }
  0xc7   :  { %108 = vbcast.lane.b32.xlu1 %v11987_v12, 264  ;;  %155 = vbcast.lane.b32.xlu0 %v12001_v14, 288 }
  0xcb   :  { %116 = vbcast.lane.b32.xlu1 %v11987_v12, 280  ;;  %163 = vbcast.lane.b32.xlu0 %v12001_v14, 304 }
  0xcf   :  { %124 = vbcast.lane.b32.xlu1 %v11987_v12, 296  ;;  %174 = vbcast.lane.b32.xlu0 %v12012_v16, 256 }
  0xd3   :  { %132 = vbcast.lane.b32.xlu1 %v11987_v12, 312  ;;  %182 = vbcast.lane.b32.xlu0 %v12012_v16, 272 }
  0xd7   :  { %143 = vbcast.lane.b32.xlu1 %v12001_v14, 264  ;;  %190 = vbcast.lane.b32.xlu0 %v12012_v16, 288 }
  0xdb   :  { %151 = vbcast.lane.b32.xlu1 %v12001_v14, 280  ;;  %198 = vbcast.lane.b32.xlu0 %v12012_v16, 304 }
  0xdf   :  { %159 = vbcast.lane.b32.xlu1 %v12001_v14, 296  ;;  %209 = vbcast.lane.b32.xlu0 %v12025_v18, 256 }
  0xe3   :  { %167 = vbcast.lane.b32.xlu1 %v12001_v14, 312  ;;  %217 = vbcast.lane.b32.xlu0 %v12025_v18, 272 }
  0xe7   :  { %178 = vbcast.lane.b32.xlu1 %v12012_v16, 264  ;;  %225 = vbcast.lane.b32.xlu0 %v12025_v18, 288 }
  0xeb   :  { %186 = vbcast.lane.b32.xlu1 %v12012_v16, 280  ;;  %233 = vbcast.lane.b32.xlu0 %v12025_v18, 304 }
  0xef   :  { %194 = vbcast.lane.b32.xlu1 %v12012_v16, 296  ;;  %244 = vbcast.lane.b32.xlu0 %v12038_v20, 256 }
  0xf3   :  { %202 = vbcast.lane.b32.xlu1 %v12012_v16, 312  ;;  %252 = vbcast.lane.b32.xlu0 %v12038_v20, 272 }
  0xf7   :  { %213 = vbcast.lane.b32.xlu1 %v12025_v18, 264  ;;  %260 = vbcast.lane.b32.xlu0 %v12038_v20, 288 }
  0xfb   :  { %221 = vbcast.lane.b32.xlu1 %v12025_v18, 280  ;;  %268 = vbcast.lane.b32.xlu0 %v12038_v20, 304 }
  0xff   :  { %229 = vbcast.lane.b32.xlu1 %v12025_v18, 296  ;;  %279 = vbcast.lane.b32.xlu0 %v12051_v22, 256 }
 0x103   :  { %237 = vbcast.lane.b32.xlu1 %v12025_v18, 312  ;;  %287 = vbcast.lane.b32.xlu0 %v12051_v22, 272 }
 0x107   :  { %248 = vbcast.lane.b32.xlu1 %v12038_v20, 264  ;;  %295 = vbcast.lane.b32.xlu0 %v12051_v22, 288 }
 0x10b   :  { %256 = vbcast.lane.b32.xlu1 %v12038_v20, 280  ;;  %303 = vbcast.lane.b32.xlu0 %v12051_v22, 304 }
 0x10f   :  { %264 = vbcast.lane.b32.xlu1 %v12038_v20, 296  ;;  %314 = vbcast.lane.b32.xlu0 %v11982_v11, 256 }
 0x113   :  { %272 = vbcast.lane.b32.xlu1 %v12038_v20, 312  ;;  %322 = vbcast.lane.b32.xlu0 %v11982_v11, 272 }
 0x117   :  { %283 = vbcast.lane.b32.xlu1 %v12051_v22, 264  ;;  %330 = vbcast.lane.b32.xlu0 %v11982_v11, 288 }
 0x11b   :  { %291 = vbcast.lane.b32.xlu1 %v12051_v22, 280  ;;  %338 = vbcast.lane.b32.xlu0 %v11982_v11, 304 }
 0x11d   :  { %v12069_v23 = vpop.permute.xlu1 %73  ;;  %v12071_v24 = vpop.permute.xlu0 %69 }
 0x11f   :  { %299 = vbcast.lane.b32.xlu1 %v12051_v22, 296  ;;  %621 = vbcast.lane.b32.xlu0 %v11980_v10, 257 }
 0x121   :  { %v12075_v25 = vpop.permute.xlu1 %77  ;;  %v12077_v26 = vpop.permute.xlu0 %104 }
 0x123   :  { %307 = vbcast.lane.b32.xlu1 %v12051_v22, 312  ;;  %629 = vbcast.lane.b32.xlu0 %v11980_v10, 273 }
 0x125   :  { %v12081_v27 = vpop.permute.xlu1 %81  ;;  %v12083_v28 = vpop.permute.xlu0 %112 }
 0x127   :  { %318 = vbcast.lane.b32.xlu1 %v11982_v11, 264  ;;  %637 = vbcast.lane.b32.xlu0 %v11980_v10, 289 }
 0x129   :  { %v12087_v29 = vpop.permute.xlu1 %85  ;;  %v12089_v30 = vpop.permute.xlu0 %120 }
 0x12b   :  { %326 = vbcast.lane.b32.xlu1 %v11982_v11, 280  ;;  %645 = vbcast.lane.b32.xlu0 %v11980_v10, 305 }
 0x12d   :  { %v12093_v31 = vpop.permute.xlu1 %89  ;;  %v12095_v32 = vpop.permute.xlu0 %128 }
 0x12f   :  { %334 = vbcast.lane.b32.xlu1 %v11982_v11, 296  ;;  %653 = vbcast.lane.b32.xlu0 %v11987_v12, 257 }
 0x131   :  { %v12099_v33 = vpop.permute.xlu1 %93  ;;  %v12101_v34 = vpop.permute.xlu0 %139 }
 0x133   :  { %342 = vbcast.lane.b32.xlu1 %v11982_v11, 312  ;;  %661 = vbcast.lane.b32.xlu0 %v11987_v12, 273 }
 0x135   :  { %v12105_v35 = vpop.permute.xlu1 %97  ;;  %v12107_v36 = vpop.permute.xlu0 %147 }
 0x137   :  { %625 = vbcast.lane.b32.xlu1 %v11980_v10, 265  ;;  %669 = vbcast.lane.b32.xlu0 %v11987_v12, 289 }
 0x139   :  { %v12111_v37 = vpop.permute.xlu1 %108  ;;  %v12113_v38 = vpop.permute.xlu0 %155 }
 0x13b   :  { %633 = vbcast.lane.b32.xlu1 %v11980_v10, 281  ;;  %677 = vbcast.lane.b32.xlu0 %v11987_v12, 305 }
 0x13d   :  { %v12117_v39 = vpop.permute.xlu1 %116  ;;  %v12119_v40 = vpop.permute.xlu0 %163 }
 0x13f   :  { %641 = vbcast.lane.b32.xlu1 %v11980_v10, 297  ;;  %685 = vbcast.lane.b32.xlu0 %v12001_v14, 257 }
 0x141   :  { %v12123_v41 = vpop.permute.xlu1 %124  ;;  %v12125_v42 = vpop.permute.xlu0 %174 }
 0x143   :  { %649 = vbcast.lane.b32.xlu1 %v11980_v10, 313  ;;  %693 = vbcast.lane.b32.xlu0 %v12001_v14, 273 }
 0x145   :  { %v12129_v43 = vpop.permute.xlu1 %132  ;;  %v12131_v44 = vpop.permute.xlu0 %182 }
 0x147   :  { %657 = vbcast.lane.b32.xlu1 %v11987_v12, 265  ;;  %701 = vbcast.lane.b32.xlu0 %v12001_v14, 289 }
 0x149   :  { %v12135_v45 = vpop.permute.xlu1 %143  ;;  %v12137_v46 = vpop.permute.xlu0 %190 }
 0x14b   :  { %665 = vbcast.lane.b32.xlu1 %v11987_v12, 281  ;;  %709 = vbcast.lane.b32.xlu0 %v12001_v14, 305 }
 0x14d   :  { %v12141_v47 = vpop.permute.xlu1 %151  ;;  %v12143_v48 = vpop.permute.xlu0 %198 }
 0x14f   :  { %673 = vbcast.lane.b32.xlu1 %v11987_v12, 297  ;;  %717 = vbcast.lane.b32.xlu0 %v12012_v16, 257 }
 0x151   :  { %v12147_v49 = vpop.permute.xlu1 %159  ;;  %v12149_v50 = vpop.permute.xlu0 %209 }
 0x153   :  { %681 = vbcast.lane.b32.xlu1 %v11987_v12, 313  ;;  %725 = vbcast.lane.b32.xlu0 %v12012_v16, 273 }
 0x155   :  { %v12153_v51 = vpop.permute.xlu1 %167  ;;  %v12155_v52 = vpop.permute.xlu0 %217 }
 0x157   :  { %689 = vbcast.lane.b32.xlu1 %v12001_v14, 265  ;;  %733 = vbcast.lane.b32.xlu0 %v12012_v16, 289 }
 0x159   :  { %v12159_v53 = vpop.permute.xlu1 %178  ;;  %v12161_v54 = vpop.permute.xlu0 %225 }
 0x15b   :  { %697 = vbcast.lane.b32.xlu1 %v12001_v14, 281  ;;  %741 = vbcast.lane.b32.xlu0 %v12012_v16, 305 }
 0x15d   :  { %v12165_v55 = vpop.permute.xlu1 %186  ;;  %v12167_v56 = vpop.permute.xlu0 %233 }
 0x15f   :  { %705 = vbcast.lane.b32.xlu1 %v12001_v14, 297  ;;  %749 = vbcast.lane.b32.xlu0 %v12025_v18, 257 }
 0x161   :  { %v12171_v57 = vpop.permute.xlu1 %194  ;;  %v12173_v58 = vpop.permute.xlu0 %244 }
 0x162   :  { %19467 = vst [vmem:[#allocation13_spill] sm:$0xff] %v12173_v58 }
 0x163   :  { %713 = vbcast.lane.b32.xlu1 %v12001_v14, 313  ;;  %757 = vbcast.lane.b32.xlu0 %v12025_v18, 273 }
 0x165   :  { %v12177_v59 = vpop.permute.xlu1 %202  ;;  %v12179_v60 = vpop.permute.xlu0 %252 }
 0x166   :  { %19468 = vst [vmem:[#allocation14_spill] sm:$0xff] %v12177_v59  ;;  %19469 = vst [vmem:[#allocation15_spill] sm:$0xff] %v12179_v60 }
 0x167   :  { %721 = vbcast.lane.b32.xlu1 %v12012_v16, 265  ;;  %765 = vbcast.lane.b32.xlu0 %v12025_v18, 289 }
 0x169   :  { %v12183_v61 = vpop.permute.xlu1 %213  ;;  %v12185_v62 = vpop.permute.xlu0 %260 }
 0x16a   :  { %19470 = vst [vmem:[#allocation16_spill] sm:$0xff] %v12183_v61  ;;  %19471 = vst [vmem:[#allocation17_spill] sm:$0xff] %v12185_v62  ;;  %v19496_v61 = vsub.s32 6, %v11970_v3 }
 0x16b   :  { %729 = vbcast.lane.b32.xlu1 %v12012_v16, 281  ;;  %773 = vbcast.lane.b32.xlu0 %v12025_v18, 305 }
 0x16d   :  { %v12189_v63 = vpop.permute.xlu1 %221  ;;  %v12191_v0 = vpop.permute.xlu0 %268 }
 0x16e   :  { %19472 = vst [vmem:[#allocation18_spill] sm:$0xff] %v12189_v63  ;;  %19473 = vst [vmem:[#allocation19_spill] sm:$0xff] %v12191_v0  ;;  %v19495_v63 = vsub.s32 5, %v11970_v3 }
 0x16f   :  { %737 = vbcast.lane.b32.xlu1 %v12012_v16, 297  ;;  %781 = vbcast.lane.b32.xlu0 %v12038_v20, 257 }
 0x171   :  { %v12195_v1 = vpop.permute.xlu1 %229  ;;  %v12197_v2 = vpop.permute.xlu0 %279 }
 0x172   :  { %19474 = vst [vmem:[#allocation20_spill] sm:$0xff] %v12195_v1  ;;  %19475 = vst [vmem:[#allocation21_spill] sm:$0xff] %v12197_v2 }
 0x173   :  { %745 = vbcast.lane.b32.xlu1 %v12012_v16, 313  ;;  %789 = vbcast.lane.b32.xlu0 %v12038_v20, 273 }
 0x175   :  { %v12201_v4 = vpop.permute.xlu1 %237  ;;  %v12203_v6 = vpop.permute.xlu0 %287 }
 0x176   :  { %19476 = vst [vmem:[#allocation22_spill] sm:$0xff] %v12201_v4  ;;  %19477 = vst [vmem:[#allocation23_spill] sm:$0xff] %v12203_v6  ;;  %v11937_v4 = vmov 1983009808  }
 0x177   :  { %753 = vbcast.lane.b32.xlu1 %v12025_v18, 265  ;;  %797 = vbcast.lane.b32.xlu0 %v12038_v20, 289 }
 0x179   :  { %v12207_v7 = vpop.permute.xlu1 %248  ;;  %v12209_v8 = vpop.permute.xlu0 %295 }
 0x17a   :  { %19478 = vst [vmem:[#allocation24_spill] sm:$0xff] %v12207_v7  ;;  %19479 = vst [vmem:[#allocation25_spill] sm:$0xff] %v12209_v8 }
 0x17b   :  { %761 = vbcast.lane.b32.xlu1 %v12025_v18, 281  ;;  %805 = vbcast.lane.b32.xlu0 %v12038_v20, 305 }
 0x17d   :  { %v12213_v15 = vpop.permute.xlu1 %256  ;;  %v12215_v21 = vpop.permute.xlu0 %303 }
 0x17e   :  { %19480 = vst [vmem:[#allocation26_spill] sm:$0xff] %v12213_v15  ;;  %19481 = vst [vmem:[#allocation27_spill] sm:$0xff] %v12215_v21 }
 0x17f   :  { %769 = vbcast.lane.b32.xlu1 %v12025_v18, 297  ;;  %813 = vbcast.lane.b32.xlu0 %v12051_v22, 257 }
 0x181   :  { %v12219_v19 = vpop.permute.xlu1 %264  ;;  %v12221_v17 = vpop.permute.xlu0 %314 }
 0x182   :  { %19482 = vst [vmem:[#allocation28_spill] sm:$0xff] %v12219_v19  ;;  %19483 = vst [vmem:[#allocation29_spill] sm:$0xff] %v12221_v17  ;;  %v49_v17 = vld [vmem:[#allocation5] sm:$0x77] }
 0x183   :  { %777 = vbcast.lane.b32.xlu1 %v12025_v18, 313  ;;  %821 = vbcast.lane.b32.xlu0 %v12051_v22, 273  ;;  %v882_v62 = vrot.slane %v49_v17, %v19495_v63 }
 0x185   :  { %v12225_v8 = vpop.permute.xlu1 %272  ;;  %v12227_v7 = vpop.permute.xlu0 %322  ;;  %v12298_v58 = vrot.slane %v882_v62, %v11977_v9 }
 0x186   :  { %19484 = vst [vmem:[#allocation30_spill] sm:$0xff] %v12225_v8  ;;  %19485 = vst [vmem:[#allocation31_spill] sm:$0xff] %v12227_v7  ;;  %v348_v7 = vrot.slane %v49_v17, %v11973_v5  ;;  %v19490_v8 = vsub.s32 4, %v11970_v3 }
 0x187   :  { %785 = vbcast.lane.b32.xlu1 %v12038_v20, 265  ;;  %829 = vbcast.lane.b32.xlu0 %v12051_v22, 289  ;;  %19499 = vst [vmem:[#allocation42_spill] sm:$0xff] %v12298_v58 }
 0x189   :  { %v12231_v21 = vpop.permute.xlu1 %283  ;;  %v12233_v15 = vpop.permute.xlu0 %330 }
 0x18a   :  { %19486 = vst [vmem:[#allocation32_spill] sm:$0xff] %v12231_v21  ;;  %19487 = vst [vmem:[#allocation33_spill] sm:$0xff] %v12233_v15  ;;  %v352_v21 = vrot.slane %v49_v17, %v19490_v8  ;;  %v2578_v15 = vunpack.c.l.s4 %v11937_v4  ;;  %v50_v8 = vld [vmem:[%s19393_s2] sm:$0x3]  ;;  %v878_v4 = vrot.slane %v49_v17, %v11977_v9 }
 0x18b   :  { %793 = vbcast.lane.b32.xlu1 %v12038_v20, 281  ;;  %1183 = vbcast.lane.b32.xlu0 %v11987_v12, 258  ;;  %v12274_v60 = vrot.slane %v50_v8, %v11977_v9 }
 0x18c   :  { %v2579_v0 = vunpack.c.0.s8 %v2578_v15  ;;  %v12277_v15 = vrot.slane %v50_v8, %v11973_v5 }
 0x18d   :  { %v12237_v19 = vpop.permute.xlu1 %291  ;;  %v12239_v6 = vpop.permute.xlu0 %338 }
 0x18e   :  { %19488 = vst [vmem:[#allocation34_spill] sm:$0xff] %v12237_v19  ;;  %19489 = vst [vmem:[#allocation35_spill] sm:$0xff] %v12239_v6  ;;  %v12253_v6 = vrot.slane %v348_v7, %v11973_v5  ;;  %v12256_v19 = vrot.slane %v352_v21, %v11973_v5  ;;  %v1408_v7 = vrot.slane %v49_v17, %v11996_v13 }
 0x18f   :  { %801 = vbcast.lane.b32.xlu1 %v12038_v20, 297  ;;  %1215 = vbcast.lane.b32.xlu0 %v12001_v14, 258  ;;  %v1412_v21 = vrot.slane %v49_v17, %v19496_v61  ;;  %v12287_v17 = vsub.s32 %v2579_v0, %v11970_v3 }
 0x190   :  { %v366_v63 = vmul.f32 %v12256_v19, %v12069_v23  ;;  %v363_v61 = vmul.f32 %v12253_v6, %v12071_v24  ;;  %v364_v59 = vmul.f32 %v12256_v19, %v12071_v24  ;;  %v367_v3 = vmul.f32 %v12253_v6, %v12075_v25 }
 0x191   :  { %v12246_v2 = vpop.permute.xlu1 %299  ;;  %v12248_v1 = vpop.permute.xlu0 %621  ;;  %19498 = vst [vmem:[#allocation41_spill] sm:$0xff] %v12287_v17  ;;  %v368_v0 = vmul.f32 %v12256_v19, %v12075_v25  ;;  %v379_v24 = vmul.f32 %v12253_v6, %v12077_v26  ;;  %v380_v17 = vmul.f32 %v12256_v19, %v12077_v26  ;;  %v370_v25 = vmul.f32 %v12256_v19, %v12081_v27 }
 0x192   :  { %19491 = vst [vmem:[#allocation36_spill] sm:$0xff] %v12246_v2  ;;  %19492 = vst [vmem:[#allocation37_spill] sm:$0xff] %v12248_v1  ;;  %v12320_v62 = vadd.f32 %v366_v63, %v12274_v60  ;;  %v12330_v26 = vadd.f32 %v364_v59, %v12274_v60  ;;  %v372_v59 = vmul.f32 %v12256_v19, %v12087_v29 }
 0x193   :  { %809 = vbcast.lane.b32.xlu1 %v12038_v20, 313  ;;  %1151 = vbcast.lane.b32.xlu0 %v11980_v10, 258 }
 0x194   :  { %19503 = vst [vmem:[#allocation46_spill] sm:$0xff] %v12320_v62  ;;  %v12350_v62 = vadd.f32 %v368_v0, %v12274_v60  ;;  %v388_v0 = vmul.f32 %v12256_v19, %v12089_v30 }
 0x195   :  { %v12262_v2 = vpop.permute.xlu1 %307  ;;  %v12264_v1 = vpop.permute.xlu0 %629 }
 0x196   :  { %19493 = vst [vmem:[#allocation38_spill] sm:$0xff] %v12262_v2  ;;  %19494 = vst [vmem:[#allocation39_spill] sm:$0xff] %v12264_v1  ;;  %v365_v1 = vmul.f32 %v12253_v6, %v12069_v23  ;;  %v12284_v2 = vrot.slane %v878_v4, %v11977_v9  ;;  %v12301_v23 = vrot.slane %v1408_v7, %v11996_v13 }
 0x197   :  { %817 = vbcast.lane.b32.xlu1 %v12051_v22, 265  ;;  %1199 = vbcast.lane.b32.xlu0 %v11987_v12, 290  ;;  %v12304_v4 = vrot.slane %v1412_v21, %v11996_v13  ;;  %v369_v7 = vmul.f32 %v12253_v6, %v12081_v27  ;;  %v12327_v21 = vadd.f32 %v363_v61, %v12277_v15 }
 0x198   :  { %19497 = vst [vmem:[#allocation40_spill] sm:$0xff] %v12284_v2  ;;  %19500 = vst [vmem:[#allocation43_spill] sm:$0xff] %v12301_v23  ;;  %v12317_v9 = vadd.f32 %v365_v1, %v12277_v15  ;;  %v383_v13 = vmul.f32 %v12253_v6, %v12083_v28  ;;  %v384_v1 = vmul.f32 %v12256_v19, %v12083_v28 }
 0x199   :  { %v12293_v8 = vpop.permute.xlu1 %318  ;;  %v12295_v5 = vpop.permute.xlu0 %637  ;;  %19501 = vst [vmem:[#allocation44_spill] sm:$0xff] %v12304_v4  ;;  %v12341_v23 = vadd.f32 %v367_v3, %v12277_v15  ;;  %v371_v27 = vmul.f32 %v12253_v6, %v12087_v29  ;;  %v387_v61 = vmul.f32 %v12253_v6, %v12089_v30  ;;  %v12353_v28 = vadd.f32 %v379_v24, %v12277_v15 }
 0x19a   :  { %19502 = vst [vmem:[#allocation45_spill] sm:$0xff] %v12317_v9  ;;  %v12356_v9 = vadd.f32 %v380_v17, %v12274_v60  ;;  %v12361_v3 = vadd.f32 %v369_v7, %v12277_v15  ;;  %v12364_v29 = vadd.f32 %v370_v25, %v12274_v60  ;;  %v373_v24 = vmul.f32 %v12253_v6, %v12093_v31 }
 0x19b   :  { %825 = vbcast.lane.b32.xlu1 %v12051_v22, 281  ;;  %1255 = vbcast.lane.b32.xlu0 %v12012_v16, 274  ;;  %19504 = vst [vmem:[#allocation47_spill] sm:$0xff] %v12353_v28  ;;  %v12371_v28 = vadd.f32 %v383_v13, %v12277_v15  ;;  %v12374_v17 = vadd.f32 %v384_v1, %v12274_v60 }
 0x19c   :  { %19505 = vst [vmem:[#allocation48_spill] sm:$0xff] %v12356_v9  ;;  %19506 = vst [vmem:[#allocation49_spill] sm:$0xff] %v12361_v3  ;;  %v374_v9 = vmul.f32 %v12256_v19, %v12093_v31  ;;  %v391_v7 = vmul.f32 %v12253_v6, %v12095_v32  ;;  %v12385_v30 = vadd.f32 %v371_v27, %v12277_v15 }
 0x19d   :  { %v12336_v63 = vpop.permute.xlu1 %326  ;;  %v12338_v4 = vpop.permute.xlu0 %645  ;;  %19507 = vst [vmem:[#allocation50_spill] sm:$0xff] %v12364_v29  ;;  %19508 = vst [vmem:[#allocation51_spill] sm:$0xff] %v12371_v28  ;;  %v12388_v3 = vadd.f32 %v372_v59, %v12274_v60  ;;  %v12391_v13 = vadd.f32 %v387_v61, %v12277_v15  ;;  %v392_v1 = vmul.f32 %v12256_v19, %v12095_v32 }
 0x19e   :  { %19509 = vst [vmem:[#allocation52_spill] sm:$0xff] %v12374_v17  ;;  %v375_v31 = vmul.f32 %v12253_v6, %v12099_v33  ;;  %v376_v17 = vmul.f32 %v12256_v19, %v12099_v33  ;;  %v395_v28 = vmul.f32 %v12253_v6, %v12101_v34  ;;  %v12404_v27 = vadd.f32 %v388_v0, %v12274_v60 }
 0x19f   :  { %833 = vbcast.lane.b32.xlu1 %v12051_v22, 297  ;;  %1279 = vbcast.lane.b32.xlu0 %v12025_v18, 258  ;;  %19510 = vst [vmem:[#allocation53_spill] sm:$0xff] %v12388_v3  ;;  %19511 = vst [vmem:[#allocation54_spill] sm:$0xff] %v12391_v13  ;;  %v12407_v59 = vadd.f32 %v373_v24, %v12277_v15  ;;  %v396_v32 = vmul.f32 %v12256_v19, %v12101_v34 }
 0x1a0   :  { %19512 = vst [vmem:[#allocation55_spill] sm:$0xff] %v12404_v27  ;;  %v377_v61 = vmul.f32 %v12253_v6, %v12105_v35  ;;  %v12414_v33 = vadd.f32 %v374_v9, %v12274_v60  ;;  %v12417_v13 = vadd.f32 %v391_v7, %v12277_v15  ;;  %v378_v3 = vmul.f32 %v12256_v19, %v12105_v35 }
 0x1a1   :  { %v12380_v25 = vpop.permute.xlu1 %334  ;;  %v12382_v29 = vpop.permute.xlu0 %653  ;;  %19513 = vst [vmem:[#allocation56_spill] sm:$0xff] %v12407_v59  ;;  %v399_v0 = vmul.f32 %v12253_v6, %v12107_v36  ;;  %v12428_v34 = vadd.f32 %v392_v1, %v12274_v60  ;;  %v400_v9 = vmul.f32 %v12256_v19, %v12107_v36  ;;  %v381_v7 = vmul.f32 %v12253_v6, %v12111_v37 }
 0x1a2   :  { %19514 = vst [vmem:[#allocation57_spill] sm:$0xff] %v12414_v33  ;;  %19515 = vst [vmem:[#allocation58_spill] sm:$0xff] %v12417_v13  ;;  %v382_v33 = vmul.f32 %v12256_v19, %v12111_v37  ;;  %v12437_v35 = vadd.f32 %v375_v31, %v12277_v15  ;;  %v12440_v13 = vadd.f32 %v376_v17, %v12274_v60 }
 0x1a3   :  { %1191 = vbcast.lane.b32.xlu1 %v11987_v12, 274  ;;  %845 = vbcast.lane.b32.xlu0 %v11982_v11, 257  ;;  %v12443_v27 = vadd.f32 %v395_v28, %v12277_v15  ;;  %v12448_v36 = vadd.f32 %v396_v32, %v12274_v60  ;;  %v12451_v1 = vadd.f32 %v377_v61, %v12277_v15 }
 0x1a4   :  { %v403_v37 = vmul.f32 %v12253_v6, %v12113_v38  ;;  %v404_v17 = vmul.f32 %v12256_v19, %v12113_v38  ;;  %v12458_v31 = vadd.f32 %v378_v3, %v12274_v60  ;;  %v12461_v28 = vadd.f32 %v399_v0, %v12277_v15 }
 0x1a5   :  { %v12423_v24 = vpop.permute.xlu1 %342  ;;  %v12425_v59 = vpop.permute.xlu0 %661  ;;  %19516 = vst [vmem:[#allocation59_spill] sm:$0xff] %v12443_v27  ;;  %19517 = vst [vmem:[#allocation60_spill] sm:$0xff] %v12448_v36  ;;  %v385_v27 = vmul.f32 %v12253_v6, %v12117_v39  ;;  %v386_v32 = vmul.f32 %v12256_v19, %v12117_v39  ;;  %v12472_v36 = vadd.f32 %v400_v9, %v12274_v60 }
 0x1a6   :  { %19518 = vst [vmem:[#allocation61_spill] sm:$0xff] %v12451_v1  ;;  %19519 = vst [vmem:[#allocation62_spill] sm:$0xff] %v12458_v31  ;;  %v12475_v38 = vadd.f32 %v381_v7, %v12277_v15  ;;  %v12478_v3 = vadd.f32 %v382_v33, %v12274_v60  ;;  %v407_v0 = vmul.f32 %v12253_v6, %v12119_v40 }
 0x1a7   :  { %1223 = vbcast.lane.b32.xlu1 %v12001_v14, 274  ;;  %1167 = vbcast.lane.b32.xlu0 %v11980_v10, 290  ;;  %19520 = vst [vmem:[#allocation63_spill] sm:$0xff] %v12461_v28  ;;  %v408_v28 = vmul.f32 %v12256_v19, %v12119_v40  ;;  %v389_v39 = vmul.f32 %v12253_v6, %v12123_v41 }
 0x1a8   :  { %19521 = vst [vmem:[#allocation64_spill] sm:$0xff] %v12475_v38  ;;  %19522 = vst [vmem:[#allocation65_spill] sm:$0xff] %v12478_v3  ;;  %v390_v31 = vmul.f32 %v12256_v19, %v12123_v41  ;;  %v12491_v9 = vadd.f32 %v403_v37, %v12277_v15  ;;  %v12494_v33 = vadd.f32 %v404_v17, %v12274_v60 }
 0x1a9   :  { %v12467_v61 = vpop.permute.xlu1 %625  ;;  %v12469_v1 = vpop.permute.xlu0 %669  ;;  %v411_v7 = vmul.f32 %v12253_v6, %v12125_v42  ;;  %v412_v40 = vmul.f32 %v12256_v19, %v12125_v42  ;;  %v12501_v3 = vadd.f32 %v385_v27, %v12277_v15  ;;  %v12504_v41 = vadd.f32 %v386_v32, %v12274_v60 }
 0x1aa   :  { %19523 = vst [vmem:[#allocation66_spill] sm:$0xff] %v12491_v9  ;;  %19524 = vst [vmem:[#allocation67_spill] sm:$0xff] %v12494_v33  ;;  %v393_v38 = vmul.f32 %v12253_v6, %v12129_v43  ;;  %v394_v37 = vmul.f32 %v12256_v19, %v12129_v43  ;;  %v12515_v9 = vadd.f32 %v407_v0, %v12277_v15 }
 0x1ab   :  { %1159 = vbcast.lane.b32.xlu1 %v11980_v10, 274  ;;  %1195 = vbcast.lane.b32.xlu0 %v11987_v12, 282  ;;  %19525 = vst [vmem:[#allocation68_spill] sm:$0xff] %v12501_v3  ;;  %19526 = vst [vmem:[#allocation69_spill] sm:$0xff] %v12504_v41  ;;  %v415_v42 = vmul.f32 %v12253_v6, %v12131_v44  ;;  %v416_v27 = vmul.f32 %v12256_v19, %v12131_v44 }
 0x1ac   :  { %19527 = vst [vmem:[#allocation70_spill] sm:$0xff] %v12515_v9  ;;  %v397_v32 = vmul.f32 %v12253_v6, %v12135_v45  ;;  %v12524_v41 = vadd.f32 %v408_v28, %v12274_v60  ;;  %v12527_v43 = vadd.f32 %v389_v39, %v12277_v15  ;;  %v12530_v3 = vadd.f32 %v390_v31, %v12274_v60 }
 0x1ad   :  { %v12510_v17 = vpop.permute.xlu1 %633  ;;  %v12512_v33 = vpop.permute.xlu0 %677  ;;  %v12535_v0 = vadd.f32 %v411_v7, %v12277_v15  ;;  %v12538_v44 = vadd.f32 %v412_v40, %v12274_v60  ;;  %v398_v28 = vmul.f32 %v12256_v19, %v12135_v45  ;;  %v419_v39 = vmul.f32 %v12253_v6, %v12137_v46 }
 0x1ae   :  { %19528 = vst [vmem:[#allocation71_spill] sm:$0xff] %v12524_v41  ;;  %19529 = vst [vmem:[#allocation72_spill] sm:$0xff] %v12527_v43  ;;  %v12545_v43 = vadd.f32 %v393_v38, %v12277_v15  ;;  %v12548_v31 = vadd.f32 %v394_v37, %v12274_v60  ;;  %v401_v7 = vmul.f32 %v12253_v6, %v12141_v47  ;;  %v19583_v41 = vld [vmem:[#allocation22_spill] sm:$0xff] }
 0x1af   :  { %19530 = vst [vmem:[#allocation73_spill] sm:$0xff] %v12530_v3  ;;  %1247 = vbcast.lane.b32.xlu1 %v12012_v16, 258  ;;  %1263 = vbcast.lane.b32.xlu0 %v12012_v16, 290  ;;  %19531 = vst [vmem:[#allocation74_spill] sm:$0xff] %v12535_v0  ;;  %v420_v3 = vmul.f32 %v12256_v19, %v12137_v46  ;;  %v12559_v45 = vadd.f32 %v415_v42, %v12277_v15 }
 0x1b0   :  { %19532 = vst [vmem:[#allocation75_spill] sm:$0xff] %v12538_v44  ;;  %19533 = vst [vmem:[#allocation76_spill] sm:$0xff] %v12545_v43  ;;  %v12562_v0 = vadd.f32 %v416_v27, %v12274_v60  ;;  %v12565_v38 = vadd.f32 %v397_v32, %v12277_v15  ;;  %v402_v37 = vmul.f32 %v12256_v19, %v12141_v47 }
 0x1b1   :  { %19534 = vst [vmem:[#allocation77_spill] sm:$0xff] %v12548_v31  ;;  %v12554_v40 = vpop.permute.xlu1 %641  ;;  %v12556_v44 = vpop.permute.xlu0 %685  ;;  %19535 = vst [vmem:[#allocation78_spill] sm:$0xff] %v12559_v45  ;;  %v423_v46 = vmul.f32 %v12253_v6, %v12143_v48  ;;  %v424_v31 = vmul.f32 %v12256_v19, %v12143_v48  ;;  %v405_v43 = vmul.f32 %v12253_v6, %v12147_v49 }
 0x1b2   :  { %19536 = vst [vmem:[#allocation79_spill] sm:$0xff] %v12562_v0  ;;  %19537 = vst [vmem:[#allocation80_spill] sm:$0xff] %v12565_v38  ;;  %v12578_v42 = vadd.f32 %v398_v28, %v12274_v60  ;;  %v12581_v27 = vadd.f32 %v419_v39, %v12277_v15  ;;  %v406_v47 = vmul.f32 %v12256_v19, %v12147_v49 }
 0x1b3   :  { %1231 = vbcast.lane.b32.xlu1 %v12001_v14, 290  ;;  %1319 = vbcast.lane.b32.xlu0 %v12038_v20, 274  ;;  %v427_v32 = vmul.f32 %v12253_v6, %v12149_v50  ;;  %v12588_v48 = vadd.f32 %v420_v3, %v12274_v60  ;;  %v12591_v38 = vadd.f32 %v401_v7, %v12277_v15 }
 0x1b4   :  { %19538 = vst [vmem:[#allocation81_spill] sm:$0xff] %v12578_v42  ;;  %19539 = vst [vmem:[#allocation82_spill] sm:$0xff] %v12581_v27  ;;  %v428_v0 = vmul.f32 %v12256_v19, %v12149_v50  ;;  %v409_v28 = vmul.f32 %v12253_v6, %v12153_v51  ;;  %v12602_v49 = vadd.f32 %v402_v37, %v12274_v60 }
 0x1b5   :  { %19540 = vst [vmem:[#allocation83_spill] sm:$0xff] %v12588_v48  ;;  %19541 = vst [vmem:[#allocation84_spill] sm:$0xff] %v12591_v38  ;;  %v12597_v39 = vpop.permute.xlu1 %649  ;;  %v12599_v27 = vpop.permute.xlu0 %693  ;;  %v410_v3 = vmul.f32 %v12256_v19, %v12153_v51  ;;  %v431_v7 = vmul.f32 %v12253_v6, %v12155_v52  ;;  %v432_v38 = vmul.f32 %v12256_v19, %v12155_v52 }
 0x1b6   :  { %19542 = vst [vmem:[#allocation85_spill] sm:$0xff] %v12602_v49  ;;  %v12611_v50 = vadd.f32 %v423_v46, %v12277_v15  ;;  %v12614_v48 = vadd.f32 %v424_v31, %v12274_v60  ;;  %v12617_v42 = vadd.f32 %v405_v43, %v12277_v15  ;;  %v12622_v51 = vadd.f32 %v406_v47, %v12274_v60  ;;  %v19574_v49 = vld [vmem:[#allocation19_spill] sm:$0xff] }
 0x1b7   :  { %1287 = vbcast.lane.b32.xlu1 %v12025_v18, 274  ;;  %1227 = vbcast.lane.b32.xlu0 %v12001_v14, 282  ;;  %v12625_v37 = vadd.f32 %v427_v32, %v12277_v15  ;;  %v413_v52 = vmul.f32 %v12253_v6, %v12159_v53  ;;  %v414_v31 = vmul.f32 %v12256_v19, %v12159_v53 }
 0x1b8   :  { %19543 = vst [vmem:[#allocation86_spill] sm:$0xff] %v12611_v50  ;;  %19544 = vst [vmem:[#allocation87_spill] sm:$0xff] %v12614_v48  ;;  %v12632_v46 = vadd.f32 %v428_v0, %v12274_v60  ;;  %v12635_v43 = vadd.f32 %v409_v28, %v12277_v15  ;;  %v436_v47 = vmul.f32 %v12256_v19, %v12161_v54 }
 0x1b9   :  { %19545 = vst [vmem:[#allocation88_spill] sm:$0xff] %v12617_v42  ;;  %19546 = vst [vmem:[#allocation89_spill] sm:$0xff] %v12622_v51  ;;  %v435_v42 = vmul.f32 %v12253_v6, %v12161_v54  ;;  %v12641_v32 = vpop.permute.xlu1 %657  ;;  %v12646_v51 = vadd.f32 %v410_v3, %v12274_v60  ;;  %v12649_v53 = vadd.f32 %v431_v7, %v12277_v15 }
 0x1ba   :  { %19547 = vst [vmem:[#allocation90_spill] sm:$0xff] %v12625_v37  ;;  %19548 = vst [vmem:[#allocation91_spill] sm:$0xff] %v12632_v46  ;;  %v12643_v37 = vpop.permute.xlu0 %701  ;;  %v12652_v0 = vadd.f32 %v432_v38, %v12274_v60  ;;  %v417_v28 = vmul.f32 %v12253_v6, %v12165_v55  ;;  %v439_v54 = vmul.f32 %v12253_v6, %v12167_v56 }
 0x1bb   :  { %19549 = vst [vmem:[#allocation92_spill] sm:$0xff] %v12635_v43  ;;  %19550 = vst [vmem:[#allocation93_spill] sm:$0xff] %v12646_v51  ;;  %v418_v43 = vmul.f32 %v12256_v19, %v12165_v55  ;;  %v440_v46 = vmul.f32 %v12256_v19, %v12167_v56  ;;  %853 = vbcast.lane.b32.xlu1 %v11982_v11, 273  ;;  %1295 = vbcast.lane.b32.xlu0 %v12025_v18, 290 }
 0x1bc   :  { %19551 = vst [vmem:[#allocation94_spill] sm:$0xff] %v12649_v53  ;;  %19552 = vst [vmem:[#allocation95_spill] sm:$0xff] %v12652_v0  ;;  %v12665_v3 = vadd.f32 %v413_v52, %v12277_v15  ;;  %v12668_v38 = vadd.f32 %v414_v31, %v12274_v60  ;;  %v421_v7 = vmul.f32 %v12253_v6, %v12171_v57  ;;  %v19557_v53 = vld [vmem:[#allocation13_spill] sm:$0xff] }
 0x1bd   :  { %v422_v55 = vmul.f32 %v12256_v19, %v12171_v57  ;;  %v12675_v0 = vadd.f32 %v435_v42, %v12277_v15  ;;  %v12678_v56 = vadd.f32 %v436_v47, %v12274_v60  ;;  %v443_v51 = vmul.f32 %v12253_v6, %v19557_v53  ;;  %v12684_v31 = vpop.permute.xlu1 %665  ;;  %v19559_v57 = vld [vmem:[#allocation14_spill] sm:$0xff] }
 0x1be   :  { %19553 = vst [vmem:[#allocation96_spill] sm:$0xff] %v12665_v3  ;;  %19554 = vst [vmem:[#allocation97_spill] sm:$0xff] %v12668_v38  ;;  %v444_v52 = vmul.f32 %v12256_v19, %v19557_v53  ;;  %v12686_v38 = vpop.permute.xlu0 %709  ;;  %v12689_v3 = vadd.f32 %v417_v28, %v12277_v15  ;;  %v425_v42 = vmul.f32 %v12253_v6, %v19559_v57 }
 0x1bf   :  { %19555 = vst [vmem:[#allocation98_spill] sm:$0xff] %v12675_v0  ;;  %19556 = vst [vmem:[#allocation99_spill] sm:$0xff] %v12678_v56  ;;  %v426_v47 = vmul.f32 %v12256_v19, %v19559_v57  ;;  %v19560_v56 = vld [vmem:[#allocation15_spill] sm:$0xff]  ;;  %v12698_v48 = vadd.f32 %v418_v43, %v12274_v60  ;;  %v12701_v53 = vadd.f32 %v439_v54, %v12277_v15  ;;  %1187 = vbcast.lane.b32.xlu1 %v11987_v12, 266 }
 0x1c0   :  { %19558 = vst [vmem:[#allocation13_spill] sm:$0xff] %v12689_v3  ;;  %v447_v0 = vmul.f32 %v12253_v6, %v19560_v56  ;;  %v12704_v50 = vadd.f32 %v440_v46, %v12274_v60  ;;  %1351 = vbcast.lane.b32.xlu0 %v12051_v22, 274  ;;  %v12709_v28 = vadd.f32 %v421_v7, %v12277_v15  ;;  %v19569_v7 = vld [vmem:[#allocation17_spill] sm:$0xff] }
 0x1c1   :  { %19561 = vst [vmem:[#allocation14_spill] sm:$0xff] %v12698_v48  ;;  %19562 = vst [vmem:[#allocation15_spill] sm:$0xff] %v12701_v53  ;;  %v12712_v57 = vadd.f32 %v422_v55, %v12274_v60  ;;  %v448_v43 = vmul.f32 %v12256_v19, %v19560_v56  ;;  %v19566_v48 = vld [vmem:[#allocation16_spill] sm:$0xff]  ;;  %v12719_v53 = vadd.f32 %v443_v51, %v12277_v15 }
 0x1c2   :  { %19563 = vst [vmem:[#allocation100_spill] sm:$0xff] %v12704_v50  ;;  %19564 = vst [vmem:[#allocation101_spill] sm:$0xff] %v12709_v28  ;;  %v429_v54 = vmul.f32 %v12253_v6, %v19566_v48  ;;  %v12722_v46 = vadd.f32 %v444_v52, %v12274_v60  ;;  %v430_v50 = vmul.f32 %v12256_v19, %v19566_v48  ;;  %v12728_v55 = vpop.permute.xlu0 %717  ;;  %v19573_v48 = vld [vmem:[#allocation18_spill] sm:$0xff] }
 0x1c3   :  { %19565 = vst [vmem:[#allocation102_spill] sm:$0xff] %v12712_v57  ;;  %19567 = vst [vmem:[#allocation16_spill] sm:$0xff] %v12719_v53  ;;  %v451_v28 = vmul.f32 %v12253_v6, %v19569_v7  ;;  %v12731_v57 = vadd.f32 %v425_v42, %v12277_v15  ;;  %v12734_v56 = vadd.f32 %v426_v47, %v12274_v60  ;;  %1207 = vbcast.lane.b32.xlu1 %v11987_v12, 306 }
 0x1c4   :  { %19568 = vst [vmem:[#allocation103_spill] sm:$0xff] %v12722_v46  ;;  %v12737_v51 = vadd.f32 %v447_v0, %v12277_v15  ;;  %v452_v52 = vmul.f32 %v12256_v19, %v19569_v7  ;;  %v12741_v46 = vpop.permute.xlu1 %673  ;;  %v433_v53 = vmul.f32 %v12253_v6, %v19573_v48  ;;  %v434_v3 = vmul.f32 %v12256_v19, %v19573_v48 }
 0x1c5   :  { %19570 = vst [vmem:[#allocation17_spill] sm:$0xff] %v12731_v57  ;;  %19571 = vst [vmem:[#allocation104_spill] sm:$0xff] %v12734_v56  ;;  %v455_v42 = vmul.f32 %v12253_v6, %v19574_v49  ;;  %1155 = vbcast.lane.b32.xlu0 %v11980_v10, 266  ;;  %v12752_v0 = vadd.f32 %v448_v43, %v12274_v60  ;;  %v12755_v47 = vadd.f32 %v429_v54, %v12277_v15  ;;  %v19580_v43 = vld [vmem:[#allocation21_spill] sm:$0xff] }
 0x1c6   :  { %19572 = vst [vmem:[#allocation105_spill] sm:$0xff] %v12737_v51  ;;  %v456_v7 = vmul.f32 %v12256_v19, %v19574_v49  ;;  %v19577_v51 = vld [vmem:[#allocation20_spill] sm:$0xff]  ;;  %v12762_v48 = vadd.f32 %v430_v50, %v12274_v60  ;;  %v12765_v57 = vadd.f32 %v451_v28, %v12277_v15  ;;  %v12771_v54 = vpop.permute.xlu0 %725  ;;  %v460_v49 = vmul.f32 %v12256_v19, %v19580_v43 }
 0x1c7   :  { %19575 = vst [vmem:[#allocation18_spill] sm:$0xff] %v12752_v0  ;;  %19576 = vst [vmem:[#allocation19_spill] sm:$0xff] %v12755_v47  ;;  %v437_v56 = vmul.f32 %v12253_v6, %v19577_v51  ;;  %v438_v45 = vmul.f32 %v12256_v19, %v19577_v51  ;;  %v459_v0 = vmul.f32 %v12253_v6, %v19580_v43  ;;  %1311 = vbcast.lane.b32.xlu1 %v12038_v20, 258 }
 0x1c8   :  { %19578 = vst [vmem:[#allocation20_spill] sm:$0xff] %v12762_v48  ;;  %19579 = vst [vmem:[#allocation106_spill] sm:$0xff] %v12765_v57  ;;  %v12774_v47 = vadd.f32 %v452_v52, %v12274_v60  ;;  %v441_v50 = vmul.f32 %v12253_v6, %v19583_v41  ;;  %v442_v28 = vmul.f32 %v12256_v19, %v19583_v41  ;;  %v19589_v41 = vld [vmem:[#allocation23_spill] sm:$0xff] }
 0x1c9   :  { %19581 = vst [vmem:[#allocation21_spill] sm:$0xff] %v12771_v54  ;;  %v12783_v57 = vadd.f32 %v433_v53, %v12277_v15  ;;  %v12786_v51 = vadd.f32 %v434_v3, %v12274_v60  ;;  %v12789_v48 = vadd.f32 %v455_v42, %v12277_v15  ;;  %1175 = vbcast.lane.b32.xlu0 %v11980_v10, 306 }
 0x1ca   :  { %19582 = vst [vmem:[#allocation107_spill] sm:$0xff] %v12774_v47  ;;  %v12794_v52 = vadd.f32 %v456_v7, %v12274_v60  ;;  %v12797_v43 = vadd.f32 %v437_v56, %v12277_v15  ;;  %v463_v53 = vmul.f32 %v12253_v6, %v19589_v41  ;;  %v464_v3 = vmul.f32 %v12256_v19, %v19589_v41  ;;  %v19598_v47 = vld [vmem:[#allocation26_spill] sm:$0xff] }
 0x1cb   :  { %19584 = vst [vmem:[#allocation22_spill] sm:$0xff] %v12783_v57  ;;  %19585 = vst [vmem:[#allocation108_spill] sm:$0xff] %v12786_v51  ;;  %v12803_v51 = vpop.permute.xlu1 %681  ;;  %v12806_v42 = vadd.f32 %v438_v45, %v12274_v60  ;;  %v19592_v57 = vld [vmem:[#allocation24_spill] sm:$0xff]  ;;  %v12821_v41 = vadd.f32 %v441_v50, %v12277_v15  ;;  %v12824_v45 = vadd.f32 %v442_v28, %v12274_v60  ;;  %1219 = vbcast.lane.b32.xlu1 %v12001_v14, 266  ;;  %v19601_v28 = vld [vmem:[#allocation27_spill] sm:$0xff] }
 0x1cc   :  { %19586 = vst [vmem:[#allocation109_spill] sm:$0xff] %v12789_v48  ;;  %19587 = vst [vmem:[#allocation110_spill] sm:$0xff] %v12794_v52  ;;  %v12809_v48 = vadd.f32 %v459_v0, %v12277_v15  ;;  %v445_v7 = vmul.f32 %v12253_v6, %v19592_v57  ;;  %v446_v56 = vmul.f32 %v12256_v19, %v19592_v57 }
 0x1cd   :  { %19588 = vst [vmem:[#allocation111_spill] sm:$0xff] %v12797_v43  ;;  %19590 = vst [vmem:[#allocation23_spill] sm:$0xff] %v12806_v42  ;;  %v12815_v43 = vpop.permute.xlu0 %733  ;;  %v12818_v52 = vadd.f32 %v460_v49, %v12274_v60  ;;  %v19597_v42 = vld [vmem:[#allocation25_spill] sm:$0xff]  ;;  %v449_v57 = vmul.f32 %v12253_v6, %v19598_v47  ;;  %1251 = vbcast.lane.b32.xlu0 %v12012_v16, 266  ;;  %v12837_v49 = vadd.f32 %v463_v53, %v12277_v15 }
 0x1ce   :  { %19591 = vst [vmem:[#allocation112_spill] sm:$0xff] %v12809_v48  ;;  %19593 = vst [vmem:[#allocation24_spill] sm:$0xff] %v12815_v43  ;;  %v467_v0 = vmul.f32 %v12253_v6, %v19597_v42  ;;  %v468_v48 = vmul.f32 %v12256_v19, %v19597_v42  ;;  %v450_v43 = vmul.f32 %v12256_v19, %v19598_v47 }
 0x1cf   :  { %19594 = vst [vmem:[#allocation113_spill] sm:$0xff] %v12818_v52  ;;  %19595 = vst [vmem:[#allocation114_spill] sm:$0xff] %v12821_v41  ;;  %v12840_v50 = vadd.f32 %v464_v3, %v12274_v60  ;;  %v472_v42 = vmul.f32 %v12256_v19, %v19601_v28  ;;  %v12847_v41 = vadd.f32 %v445_v7, %v12277_v15  ;;  %v19604_v52 = vld [vmem:[#allocation28_spill] sm:$0xff]  ;;  %1239 = vbcast.lane.b32.xlu1 %v12001_v14, 306 }
 0x1d0   :  { %19596 = vst [vmem:[#allocation115_spill] sm:$0xff] %v12824_v45  ;;  %19599 = vst [vmem:[#allocation25_spill] sm:$0xff] %v12837_v49  ;;  %v471_v45 = vmul.f32 %v12253_v6, %v19601_v28  ;;  %v12850_v47 = vadd.f32 %v446_v56, %v12274_v60  ;;  %v453_v54 = vmul.f32 %v12253_v6, %v19604_v52  ;;  %v19607_v49 = vld [vmem:[#allocation29_spill] sm:$0xff] }
 0x1d1   :  { %19600 = vst [vmem:[#allocation26_spill] sm:$0xff] %v12840_v50  ;;  %19602 = vst [vmem:[#allocation27_spill] sm:$0xff] %v12847_v41  ;;  %v454_v53 = vmul.f32 %v12256_v19, %v19604_v52  ;;  %v12856_v3 = vpop.permute.xlu0 %741  ;;  %v12859_v50 = vadd.f32 %v467_v0, %v12277_v15  ;;  %v475_v28 = vmul.f32 %v12253_v6, %v19607_v49  ;;  %v19608_v41 = vld [vmem:[#allocation30_spill] sm:$0xff]  ;;  %1271 = vbcast.lane.b32.xlu0 %v12012_v16, 306 }
 0x1d2   :  { %19603 = vst [vmem:[#allocation116_spill] sm:$0xff] %v12850_v47  ;;  %19605 = vst [vmem:[#allocation28_spill] sm:$0xff] %v12856_v3  ;;  %v476_v7 = vmul.f32 %v12256_v19, %v19607_v49  ;;  %v457_v56 = vmul.f32 %v12253_v6, %v19608_v41  ;;  %v12867_v47 = vpop.permute.xlu1 %689  ;;  %v12870_v9 = vadd.f32 %v468_v48, %v12274_v60  ;;  %v19624_v3 = vld [vmem:[#allocation34_spill] sm:$0xff] }
 0x1d3   :  { %19606 = vst [vmem:[#allocation117_spill] sm:$0xff] %v12859_v50  ;;  %19609 = vst [vmem:[#allocation29_spill] sm:$0xff] %v12867_v47  ;;  %v12873_v52 = vadd.f32 %v449_v57, %v12277_v15  ;;  %v12876_v0 = vadd.f32 %v450_v43, %v12274_v60  ;;  %v12881_v49 = vadd.f32 %v471_v45, %v12277_v15  ;;  %v19618_v45 = vld [vmem:[#allocation32_spill] sm:$0xff]  ;;  %1343 = vbcast.lane.b32.xlu1 %v12051_v22, 258  ;;  %v19632_v47 = vld [vmem:[#allocation37_spill] sm:$0xff] }
 0x1d4   :  { %19610 = vst [vmem:[#allocation30_spill] sm:$0xff] %v12870_v9  ;;  %v12884_v50 = vadd.f32 %v472_v42, %v12274_v60  ;;  %v458_v48 = vmul.f32 %v12256_v19, %v19608_v41  ;;  %v19615_v9 = vld [vmem:[#allocation31_spill] sm:$0xff]  ;;  %v12894_v43 = vadd.f32 %v454_v53, %v12274_v60  ;;  %v12906_v41 = vadd.f32 %v476_v7, %v12274_v60 }
 0x1d5   :  { %19611 = vst [vmem:[#allocation118_spill] sm:$0xff] %v12873_v52  ;;  %19612 = vst [vmem:[#allocation119_spill] sm:$0xff] %v12876_v0  ;;  %v479_v57 = vmul.f32 %v12253_v6, %v19615_v9  ;;  %v12891_v52 = vadd.f32 %v453_v54, %v12277_v15  ;;  %v480_v0 = vmul.f32 %v12256_v19, %v19615_v9  ;;  %v12900_v42 = vpop.permute.xlu0 %749  ;;  %1375 = vbcast.lane.b32.xlu0 %v11982_v11, 258 }
 0x1d6   :  { %19613 = vst [vmem:[#allocation120_spill] sm:$0xff] %v12881_v49  ;;  %19614 = vst [vmem:[#allocation121_spill] sm:$0xff] %v12884_v50  ;;  %v461_v49 = vmul.f32 %v12253_v6, %v19618_v45  ;;  %v12903_v50 = vadd.f32 %v475_v28, %v12277_v15  ;;  %v12909_v54 = vadd.f32 %v457_v56, %v12277_v15 }
 0x1d7   :  { %19616 = vst [vmem:[#allocation31_spill] sm:$0xff] %v12891_v52  ;;  %19617 = vst [vmem:[#allocation122_spill] sm:$0xff] %v12894_v43  ;;  %v462_v53 = vmul.f32 %v12256_v19, %v19618_v45  ;;  %v19623_v43 = vld [vmem:[#allocation33_spill] sm:$0xff]  ;;  %v12922_v28 = vadd.f32 %v458_v48, %v12274_v60  ;;  %v12925_v7 = vadd.f32 %v479_v57, %v12277_v15  ;;  %v19627_v45 = vld [vmem:[#allocation35_spill] sm:$0xff]  ;;  %861 = vbcast.lane.b32.xlu1 %v11982_v11, 289 }
 0x1d8   :  { %19619 = vst [vmem:[#allocation32_spill] sm:$0xff] %v12900_v42  ;;  %19620 = vst [vmem:[#allocation123_spill] sm:$0xff] %v12903_v50  ;;  %v483_v9 = vmul.f32 %v12253_v6, %v19623_v43  ;;  %v484_v52 = vmul.f32 %v12256_v19, %v19623_v43  ;;  %v465_v42 = vmul.f32 %v12253_v6, %v19624_v3  ;;  %v12931_v43 = vpop.permute.xlu1 %697 }
 0x1d9   :  { %19621 = vst [vmem:[#allocation124_spill] sm:$0xff] %v12906_v41  ;;  %19622 = vst [vmem:[#allocation125_spill] sm:$0xff] %v12909_v54  ;;  %v466_v56 = vmul.f32 %v12256_v19, %v19624_v3  ;;  %v487_v41 = vmul.f32 %v12253_v6, %v19627_v45  ;;  %v12934_v50 = vadd.f32 %v480_v0, %v12274_v60  ;;  %837 = vbcast.lane.b32.xlu0 %v12051_v22, 305 }
 0x1da   :  { %19625 = vst [vmem:[#allocation33_spill] sm:$0xff] %v12922_v28  ;;  %19626 = vst [vmem:[#allocation34_spill] sm:$0xff] %v12925_v7  ;;  %v12937_v54 = vadd.f32 %v461_v49, %v12277_v15  ;;  %v488_v48 = vmul.f32 %v12256_v19, %v19627_v45  ;;  %v19631_v28 = vld [vmem:[#allocation36_spill] sm:$0xff]  ;;  %v12943_v7 = vpop.permute.xlu0 %757  ;;  %v12946_v3 = vadd.f32 %v462_v53, %v12274_v60 }
 0x1db   :  { %19628 = vst [vmem:[#allocation35_spill] sm:$0xff] %v12931_v43  ;;  %19629 = vst [vmem:[#allocation126_spill] sm:$0xff] %v12934_v50  ;;  %v469_v57 = vmul.f32 %v12253_v6, %v19631_v28  ;;  %v470_v43 = vmul.f32 %v12256_v19, %v19631_v28  ;;  %v893_v0 = vmul.f32 %v12284_v2, %v19632_v47  ;;  %1163 = vbcast.lane.b32.xlu1 %v11980_v10, 282 }
 0x1dc   :  { %19630 = vst [vmem:[#allocation127_spill] sm:$0xff] %v12937_v54  ;;  %v894_v49 = vmul.f32 %v12298_v58, %v19632_v47  ;;  %v12955_v50 = vadd.f32 %v483_v9, %v12277_v15  ;;  %v12958_v45 = vadd.f32 %v484_v52, %v12274_v60  ;;  %v12961_v54 = vadd.f32 %v465_v42, %v12277_v15  ;;  %v19638_v47 = vld [vmem:[#allocation38_spill] sm:$0xff] }
 0x1dd   :  { %v12966_v53 = vadd.f32 %v466_v56, %v12274_v60  ;;  %v12969_v28 = vadd.f32 %v487_v41, %v12277_v15  ;;  %v473_v9 = vmul.f32 %v12253_v6, %v19638_v47  ;;  %v474_v52 = vmul.f32 %v12256_v19, %v19638_v47  ;;  %v12998_v47 = vpop.permute.xlu1 %705  ;;  %1283 = vbcast.lane.b32.xlu0 %v12025_v18, 266 }
 0x1de   :  { %19633 = vst [vmem:[#allocation36_spill] sm:$0xff] %v12955_v50  ;;  %19634 = vst [vmem:[#allocation37_spill] sm:$0xff] %v12958_v45  ;;  %v12976_v45 = vadd.f32 %v488_v48, %v12274_v60  ;;  %v12979_v42 = vadd.f32 %v469_v57, %v12277_v15  ;;  %v19640_v50 = vld [vmem:[#allocation39_spill] sm:$0xff]  ;;  %v12985_v41 = vpop.permute.xlu0 %765  ;;  %v12994_v48 = vadd.f32 %v894_v49, %v12330_v26 }
 0x1df   :  { %19635 = vst [vmem:[#allocation128_spill] sm:$0xff] %v12961_v54  ;;  %19636 = vst [vmem:[#allocation129_spill] sm:$0xff] %v12966_v53  ;;  %v897_v54 = vmul.f32 %v12284_v2, %v19640_v50  ;;  %v898_v56 = vmul.f32 %v12298_v58, %v19640_v50  ;;  %v12991_v53 = vadd.f32 %v893_v0, %v12327_v21  ;;  %1203 = vbcast.lane.b32.xlu1 %v11987_v12, 298 }
 0x1e0   :  { %19637 = vst [vmem:[#allocation130_spill] sm:$0xff] %v12969_v28  ;;  %19639 = vst [vmem:[#allocation38_spill] sm:$0xff] %v12976_v45  ;;  %v12988_v28 = vadd.f32 %v470_v43, %v12274_v60  ;;  %v477_v57 = vmul.f32 %v12253_v6, %v12293_v8  ;;  %v478_v45 = vmul.f32 %v12256_v19, %v12293_v8 }
 0x1e1   :  { %v901_v50 = vmul.f32 %v12284_v2, %v12295_v5  ;;  %v902_v43 = vmul.f32 %v12298_v58, %v12295_v5  ;;  %v13009_v21 = vadd.f32 %v473_v9, %v12277_v15  ;;  %v13012_v26 = vadd.f32 %v474_v52, %v12274_v60  ;;  %1303 = vbcast.lane.b32.xlu0 %v12025_v18, 306 }
 0x1e2   :  { %19641 = vst [vmem:[#allocation39_spill] sm:$0xff] %v12988_v28  ;;  %v481_v0 = vmul.f32 %v12253_v6, %v12336_v63  ;;  %v482_v8 = vmul.f32 %v12256_v19, %v12336_v63  ;;  %v13019_v49 = vadd.f32 %v897_v54, %v12341_v23  ;;  %v13022_v5 = vadd.f32 %v898_v56, %v12350_v62  ;;  %v13028_v52 = vpop.permute.xlu0 %773 }
 0x1e3   :  { %19642 = vst [vmem:[#allocation131_spill] sm:$0xff] %v13009_v21  ;;  %19643 = vst [vmem:[#allocation132_spill] sm:$0xff] %v13012_v26  ;;  %v905_v28 = vmul.f32 %v12284_v2, %v12338_v4  ;;  %v906_v9 = vmul.f32 %v12298_v58, %v12338_v4  ;;  %v13031_v26 = vadd.f32 %v477_v57, %v12277_v15  ;;  %v19647_v4 = vld [vmem:[#allocation53_spill] sm:$0xff]  ;;  %1259 = vbcast.lane.b32.xlu1 %v12012_v16, 282 }
 0x1e4   :  { %19644 = vst [vmem:[#allocation133_spill] sm:$0xff] %v13022_v5  ;;  %v485_v63 = vmul.f32 %v12253_v6, %v12380_v25  ;;  %v486_v23 = vmul.f32 %v12256_v19, %v12380_v25  ;;  %v909_v62 = vmul.f32 %v12284_v2, %v12382_v29  ;;  %v13040_v54 = vadd.f32 %v478_v45, %v12274_v60 }
 0x1e5   :  { %19645 = vst [vmem:[#allocation134_spill] sm:$0xff] %v13031_v26  ;;  %v13043_v56 = vadd.f32 %v901_v50, %v12385_v30  ;;  %v13046_v21 = vadd.f32 %v902_v43, %v19647_v4  ;;  %v13051_v57 = vadd.f32 %v481_v0, %v12277_v15  ;;  %v13054_v25 = vadd.f32 %v482_v8, %v12274_v60  ;;  %v13060_v50 = vpop.permute.xlu1 %713  ;;  %v19666_v26 = vld [vmem:[#allocation49_spill] sm:$0xff] }
 0x1e6   :  { %19646 = vst [vmem:[#allocation135_spill] sm:$0xff] %v13040_v54  ;;  %v910_v45 = vmul.f32 %v12298_v58, %v12382_v29  ;;  %v489_v30 = vmul.f32 %v12253_v6, %v12423_v24  ;;  %v13063_v43 = vadd.f32 %v905_v28, %v12437_v35  ;;  %v13066_v4 = vadd.f32 %v906_v9, %v12440_v13  ;;  %v19655_v9 = vld [vmem:[#allocation48_spill] sm:$0xff]  ;;  %v19664_v54 = vld [vmem:[#allocation54_spill] sm:$0xff] }
 0x1e7   :  { %19648 = vst [vmem:[#allocation53_spill] sm:$0xff] %v13051_v57  ;;  %19649 = vst [vmem:[#allocation136_spill] sm:$0xff] %v13054_v25  ;;  %v490_v0 = vmul.f32 %v12256_v19, %v12423_v24  ;;  %v913_v8 = vmul.f32 %v12284_v2, %v12425_v59  ;;  %v13072_v25 = vpop.permute.xlu0 %781  ;;  %v13075_v29 = vadd.f32 %v485_v63, %v12277_v15  ;;  %v19654_v57 = vld [vmem:[#allocation47_spill] sm:$0xff]  ;;  %849 = vbcast.lane.b32.xlu0 %v11982_v11, 265 }
 0x1e8   :  { %19650 = vst [vmem:[#allocation137_spill] sm:$0xff] %v13063_v43  ;;  %19651 = vst [vmem:[#allocation138_spill] sm:$0xff] %v13066_v4  ;;  %v13078_v6 = vadd.f32 %v486_v23, %v12274_v60  ;;  %v13081_v35 = vadd.f32 %v909_v62, %v19654_v57  ;;  %v914_v13 = vmul.f32 %v12298_v58, %v12425_v59  ;;  %v19658_v57 = vld [vmem:[#allocation51_spill] sm:$0xff]  ;;  %1327 = vbcast.lane.b32.xlu1 %v12038_v20, 290 }
 0x1e9   :  { %19652 = vst [vmem:[#allocation139_spill] sm:$0xff] %v13075_v29  ;;  %v895_v19 = vmul.f32 %v12284_v2, %v12467_v61  ;;  %v896_v24 = vmul.f32 %v12298_v58, %v12467_v61  ;;  %v917_v28 = vmul.f32 %v12284_v2, %v12469_v1  ;;  %v13094_v63 = vadd.f32 %v910_v45, %v19655_v9 }
 0x1ea   :  { %19653 = vst [vmem:[#allocation140_spill] sm:$0xff] %v13078_v6  ;;  %v13097_v23 = vadd.f32 %v489_v30, %v12277_v15  ;;  %v918_v59 = vmul.f32 %v12298_v58, %v12469_v1  ;;  %v899_v62 = vmul.f32 %v12284_v2, %v12510_v17  ;;  %v13104_v61 = vadd.f32 %v490_v0, %v12274_v60  ;;  %v19659_v30 = vld [vmem:[#allocation52_spill] sm:$0xff] }
 0x1eb   :  { %v13107_v6 = vadd.f32 %v913_v8, %v19658_v57  ;;  %v900_v29 = vmul.f32 %v12298_v58, %v12510_v17  ;;  %v921_v45 = vmul.f32 %v12284_v2, %v12512_v33  ;;  %v13113_v15 = vpop.permute.xlu0 %789  ;;  %v13116_v9 = vadd.f32 %v914_v13, %v19659_v30  ;;  %v13124_v8 = vpop.permute.xlu1 %721  ;;  %v19660_v17 = vld [vmem:[#allocation45_spill] sm:$0xff]  ;;  %869 = vbcast.lane.b32.xlu0 %v11982_v11, 305 }
 0x1ec   :  { %19656 = vst [vmem:[#allocation47_spill] sm:$0xff] %v13097_v23  ;;  %19657 = vst [vmem:[#allocation48_spill] sm:$0xff] %v13104_v61  ;;  %v922_v1 = vmul.f32 %v12298_v58, %v12512_v33  ;;  %v903_v60 = vmul.f32 %v12284_v2, %v12554_v40  ;;  %v904_v0 = vmul.f32 %v12298_v58, %v12554_v40  ;;  %v19662_v61 = vld [vmem:[#allocation46_spill] sm:$0xff]  ;;  %v19665_v33 = vld [vmem:[#allocation55_spill] sm:$0xff]  ;;  %1383 = vbcast.lane.b32.xlu1 %v11982_v11, 274 }
 0x1ed   :  { %v13127_v57 = vadd.f32 %v895_v19, %v19660_v17  ;;  %v13130_v23 = vadd.f32 %v896_v24, %v19662_v61  ;;  %v13133_v13 = vadd.f32 %v917_v28, %v19664_v54  ;;  %v13138_v30 = vadd.f32 %v918_v59, %v19665_v33  ;;  %v19668_v61 = vld [vmem:[#allocation50_spill] sm:$0xff]  ;;  %v19673_v33 = vld [vmem:[#allocation56_spill] sm:$0xff] }
 0x1ee   :  { %v13141_v40 = vadd.f32 %v899_v62, %v19666_v26  ;;  %v925_v19 = vmul.f32 %v12284_v2, %v12556_v44  ;;  %v926_v24 = vmul.f32 %v12298_v58, %v12556_v44  ;;  %v13148_v17 = vadd.f32 %v900_v29, %v19668_v61  ;;  %v19670_v54 = vld [vmem:[#allocation58_spill] sm:$0xff]  ;;  %v19675_v44 = vld [vmem:[#allocation57_spill] sm:$0xff] }
 0x1ef   :  { %19661 = vst [vmem:[#allocation51_spill] sm:$0xff] %v13127_v57  ;;  %19663 = vst [vmem:[#allocation52_spill] sm:$0xff] %v13130_v23  ;;  %v13151_v28 = vadd.f32 %v921_v45, %v19670_v54  ;;  %v907_v4 = vmul.f32 %v12284_v2, %v12597_v39  ;;  %v908_v59 = vmul.f32 %v12298_v58, %v12597_v39  ;;  %v13157_v26 = vpop.permute.xlu0 %797  ;;  %1211 = vbcast.lane.b32.xlu0 %v11987_v12, 314 }
 0x1f0   :  { %19667 = vst [vmem:[#allocation45_spill] sm:$0xff] %v13141_v40  ;;  %19669 = vst [vmem:[#allocation46_spill] sm:$0xff] %v13148_v17  ;;  %v13160_v62 = vadd.f32 %v922_v1, %v12428_v34  ;;  %v13163_v40 = vadd.f32 %v903_v60, %v19673_v33  ;;  %v13166_v29 = vadd.f32 %v904_v0, %v19675_v44  ;;  %v19677_v34 = vld [vmem:[#allocation59_spill] sm:$0xff]  ;;  %v19678_v60 = vld [vmem:[#allocation60_spill] sm:$0xff]  ;;  %v13188_v44 = vpop.permute.xlu1 %729  ;;  %1235 = vbcast.lane.b32.xlu1 %v12001_v14, 298 }
 0x1f1   :  { %19671 = vst [vmem:[#allocation54_spill] sm:$0xff] %v13151_v28  ;;  %v929_v45 = vmul.f32 %v12284_v2, %v12599_v27  ;;  %v930_v61 = vmul.f32 %v12298_v58, %v12599_v27  ;;  %v911_v39 = vmul.f32 %v12284_v2, %v12641_v32  ;;  %v912_v54 = vmul.f32 %v12298_v58, %v12641_v32 }
 0x1f2   :  { %19672 = vst [vmem:[#allocation55_spill] sm:$0xff] %v13160_v62  ;;  %19674 = vst [vmem:[#allocation49_spill] sm:$0xff] %v13163_v40  ;;  %v13179_v1 = vadd.f32 %v925_v19, %v19677_v34  ;;  %v13182_v0 = vadd.f32 %v926_v24, %v19678_v60  ;;  %v933_v33 = vmul.f32 %v12284_v2, %v12643_v37  ;;  %v19681_v40 = vld [vmem:[#allocation62_spill] sm:$0xff]  ;;  %v19683_v34 = vld [vmem:[#allocation63_spill] sm:$0xff] }
 0x1f3   :  { %19676 = vst [vmem:[#allocation50_spill] sm:$0xff] %v13166_v29  ;;  %v934_v27 = vmul.f32 %v12298_v58, %v12643_v37  ;;  %v19679_v29 = vld [vmem:[#allocation61_spill] sm:$0xff]  ;;  %v13194_v17 = vadd.f32 %v908_v59, %v19681_v40  ;;  %v915_v12 = vmul.f32 %v12284_v2, %v12684_v31  ;;  %v916_v19 = vmul.f32 %v12298_v58, %v12684_v31  ;;  %v13200_v24 = vpop.permute.xlu0 %805  ;;  %v19700_v62 = vld [vmem:[#allocation72_spill] sm:$0xff] }
 0x1f4   :  { %v13191_v32 = vadd.f32 %v907_v4, %v19679_v29  ;;  %v13203_v60 = vadd.f32 %v929_v45, %v19683_v34  ;;  %v937_v37 = vmul.f32 %v12284_v2, %v12686_v38  ;;  %v938_v4 = vmul.f32 %v12298_v58, %v12686_v38  ;;  %v19684_v29 = vld [vmem:[#allocation64_spill] sm:$0xff]  ;;  %v19686_v31 = vld [vmem:[#allocation65_spill] sm:$0xff]  ;;  %1315 = vbcast.lane.b32.xlu0 %v12038_v20, 266  ;;  %v19688_v45 = vld [vmem:[#allocation66_spill] sm:$0xff] }
 0x1f5   :  { %19682 = vst [vmem:[#allocation56_spill] sm:$0xff] %v13194_v17  ;;  %v919_v40 = vmul.f32 %v12284_v2, %v12741_v46  ;;  %v13212_v59 = vadd.f32 %v930_v61, %v12472_v36  ;;  %v13215_v17 = vadd.f32 %v911_v39, %v19684_v29  ;;  %v13223_v34 = vadd.f32 %v933_v33, %v19688_v45  ;;  %v19690_v38 = vld [vmem:[#allocation67_spill] sm:$0xff]  ;;  %v19692_v39 = vld [vmem:[#allocation68_spill] sm:$0xff]  ;;  %v19696_v45 = vld [vmem:[#allocation70_spill] sm:$0xff] }
 0x1f6   :  { %19680 = vst [vmem:[#allocation58_spill] sm:$0xff] %v13191_v32  ;;  %v13218_v32 = vadd.f32 %v912_v54, %v19686_v31  ;;  %v13226_v43 = vadd.f32 %v934_v27, %v19690_v38  ;;  %v920_v36 = vmul.f32 %v12298_v58, %v12741_v46  ;;  %v941_v61 = vmul.f32 %v12284_v2, %v12728_v55  ;;  %v19694_v54 = vld [vmem:[#allocation69_spill] sm:$0xff]  ;;  %v19698_v46 = vld [vmem:[#allocation71_spill] sm:$0xff] }
 0x1f7   :  { %19685 = vst [vmem:[#allocation57_spill] sm:$0xff] %v13215_v17  ;;  %19689 = vst [vmem:[#allocation60_spill] sm:$0xff] %v13223_v34  ;;  %v13233_v29 = vadd.f32 %v915_v12, %v19692_v39  ;;  %v13236_v31 = vadd.f32 %v916_v19, %v19694_v54  ;;  %v942_v23 = vmul.f32 %v12298_v58, %v12728_v55  ;;  %v13242_v27 = vpop.permute.xlu0 %813  ;;  %v13255_v39 = vpop.permute.xlu1 %737  ;;  %v19702_v55 = vld [vmem:[#allocation21_spill] sm:$0xff]  ;;  %1291 = vbcast.lane.b32.xlu1 %v12025_v18, 282  ;;  %v19716_v34 = vld [vmem:[#allocation28_spill] sm:$0xff] }
 0x1f8   :  { %19687 = vst [vmem:[#allocation59_spill] sm:$0xff] %v13218_v32  ;;  %19691 = vst [vmem:[#allocation61_spill] sm:$0xff] %v13226_v43  ;;  %v923_v33 = vmul.f32 %v12284_v2, %v12803_v51  ;;  %v13245_v38 = vadd.f32 %v937_v37, %v19696_v45  ;;  %v13248_v57 = vadd.f32 %v938_v4, %v19698_v46  ;;  %v19703_v32 = vld [vmem:[#allocation29_spill] sm:$0xff]  ;;  %1335 = vbcast.lane.b32.xlu0 %v12038_v20, 306  ;;  %v19708_v46 = vld [vmem:[#allocation24_spill] sm:$0xff] }
 0x1f9   :  { %19693 = vst [vmem:[#allocation62_spill] sm:$0xff] %v13233_v29  ;;  %19695 = vst [vmem:[#allocation63_spill] sm:$0xff] %v13236_v31  ;;  %v13251_v12 = vadd.f32 %v919_v40, %v19700_v62  ;;  %v924_v19 = vmul.f32 %v12298_v58, %v12803_v51  ;;  %v945_v54 = vmul.f32 %v12284_v2, %v19702_v55  ;;  %v19704_v62 = vld [vmem:[#allocation73_spill] sm:$0xff]  ;;  %v19706_v40 = vld [vmem:[#allocation74_spill] sm:$0xff] }
 0x1fa   :  { %19697 = vst [vmem:[#allocation64_spill] sm:$0xff] %v13245_v38  ;;  %19699 = vst [vmem:[#allocation65_spill] sm:$0xff] %v13248_v57  ;;  %v946_v28 = vmul.f32 %v12298_v58, %v19702_v55  ;;  %v927_v37 = vmul.f32 %v12284_v2, %v19703_v32  ;;  %v13266_v4 = vadd.f32 %v920_v36, %v19704_v62  ;;  %v19709_v55 = vld [vmem:[#allocation75_spill] sm:$0xff]  ;;  %v19711_v38 = vld [vmem:[#allocation76_spill] sm:$0xff] }
 0x1fb   :  { %19701 = vst [vmem:[#allocation66_spill] sm:$0xff] %v13251_v12  ;;  %v13269_v51 = vadd.f32 %v941_v61, %v19706_v40  ;;  %v928_v45 = vmul.f32 %v12298_v58, %v19703_v32  ;;  %v949_v12 = vmul.f32 %v12284_v2, %v19708_v46  ;;  %v13276_v57 = vadd.f32 %v942_v23, %v19709_v55  ;;  %v19713_v36 = vld [vmem:[#allocation35_spill] sm:$0xff]  ;;  %v13285_v61 = vpop.permute.xlu0 %821  ;;  %v19714_v40 = vld [vmem:[#allocation77_spill] sm:$0xff] }
 0x1fc   :  { %19705 = vst [vmem:[#allocation67_spill] sm:$0xff] %v13266_v4  ;;  %v13279_v17 = vadd.f32 %v923_v33, %v19711_v38  ;;  %v950_v43 = vmul.f32 %v12298_v58, %v19708_v46  ;;  %v931_v62 = vmul.f32 %v12284_v2, %v19713_v36  ;;  %v13288_v4 = vadd.f32 %v924_v19, %v19714_v40  ;;  %v19717_v38 = vld [vmem:[#allocation78_spill] sm:$0xff]  ;;  %v19718_v46 = vld [vmem:[#allocation79_spill] sm:$0xff]  ;;  %v19721_v19 = vld [vmem:[#allocation81_spill] sm:$0xff] }
 0x1fd   :  { %19707 = vst [vmem:[#allocation68_spill] sm:$0xff] %v13269_v51  ;;  %19710 = vst [vmem:[#allocation69_spill] sm:$0xff] %v13276_v57  ;;  %v932_v32 = vmul.f32 %v12298_v58, %v19713_v36  ;;  %v953_v23 = vmul.f32 %v12284_v2, %v19716_v34  ;;  %v954_v33 = vmul.f32 %v12298_v58, %v19716_v34  ;;  %v19719_v57 = vld [vmem:[#allocation80_spill] sm:$0xff]  ;;  %1359 = vbcast.lane.b32.xlu1 %v12051_v22, 290  ;;  %v19723_v40 = vld [vmem:[#allocation82_spill] sm:$0xff] }
 0x1fe   :  { %19712 = vst [vmem:[#allocation70_spill] sm:$0xff] %v13279_v17  ;;  %19715 = vst [vmem:[#allocation71_spill] sm:$0xff] %v13288_v4  ;;  %v13297_v55 = vadd.f32 %v945_v54, %v19717_v38  ;;  %v13300_v17 = vadd.f32 %v946_v28, %v19718_v46  ;;  %v13303_v51 = vadd.f32 %v927_v37, %v19719_v57  ;;  %1243 = vbcast.lane.b32.xlu0 %v12001_v14, 314  ;;  %v13317_v54 = vpop.permute.xlu1 %745  ;;  %v19725_v57 = vld [vmem:[#allocation83_spill] sm:$0xff]  ;;  %v19727_v38 = vld [vmem:[#allocation84_spill] sm:$0xff] }
 0x1ff   :  { %v13308_v36 = vadd.f32 %v928_v45, %v19721_v19  ;;  %v13311_v4 = vadd.f32 %v949_v12, %v19723_v40  ;;  %v935_v34 = vmul.f32 %v12284_v2, %v12998_v47  ;;  %v936_v28 = vmul.f32 %v12298_v58, %v12998_v47  ;;  %v19729_v14 = vld [vmem:[#allocation32_spill] sm:$0xff]  ;;  %v13329_v19 = vpop.permute.xlu0 %829  ;;  %v19730_v40 = vld [vmem:[#allocation85_spill] sm:$0xff]  ;;  %v19732_v47 = vld [vmem:[#allocation86_spill] sm:$0xff] }
 0x200   :  { %19720 = vst [vmem:[#allocation72_spill] sm:$0xff] %v13303_v51  ;;  %v13320_v37 = vadd.f32 %v950_v43, %v19725_v57  ;;  %v13323_v46 = vadd.f32 %v931_v62, %v19727_v38  ;;  %v957_v45 = vmul.f32 %v12284_v2, %v19729_v14  ;;  %v958_v12 = vmul.f32 %v12298_v58, %v19729_v14  ;;  %v19750_v29 = vld [vmem:[#allocation95_spill] sm:$0xff] }
 0x201   :  { %19722 = vst [vmem:[#allocation21_spill] sm:$0xff] %v13308_v36  ;;  %19724 = vst [vmem:[#allocation29_spill] sm:$0xff] %v13311_v4  ;;  %v13332_v36 = vadd.f32 %v932_v32, %v19730_v40  ;;  %v13335_v51 = vadd.f32 %v953_v23, %v19732_v47  ;;  %v19734_v4 = vld [vmem:[#allocation87_spill] sm:$0xff]  ;;  %v939_v62 = vmul.f32 %v12284_v2, %v13060_v50  ;;  %857 = vbcast.lane.b32.xlu1 %v11982_v11, 281  ;;  %v19736_v32 = vld [vmem:[#allocation88_spill] sm:$0xff] }
 0x202   :  { %19726 = vst [vmem:[#allocation73_spill] sm:$0xff] %v13320_v37  ;;  %19728 = vst [vmem:[#allocation74_spill] sm:$0xff] %v13323_v46  ;;  %v13338_v43 = vadd.f32 %v954_v33, %v19734_v4  ;;  %v940_v57 = vmul.f32 %v12298_v58, %v13060_v50  ;;  %v961_v38 = vmul.f32 %v12284_v2, %v12943_v7  ;;  %1347 = vbcast.lane.b32.xlu0 %v12051_v22, 266  ;;  %v19738_v4 = vld [vmem:[#allocation89_spill] sm:$0xff]  ;;  %v19740_v47 = vld [vmem:[#allocation90_spill] sm:$0xff] }
 0x203   :  { %19731 = vst [vmem:[#allocation24_spill] sm:$0xff] %v13332_v36  ;;  %19733 = vst [vmem:[#allocation75_spill] sm:$0xff] %v13335_v51  ;;  %v962_v14 = vmul.f32 %v12298_v58, %v12943_v7  ;;  %v13351_v23 = vadd.f32 %v935_v34, %v19736_v32  ;;  %v13354_v33 = vadd.f32 %v936_v28, %v19738_v4  ;;  %v19741_v7 = vld [vmem:[#allocation91_spill] sm:$0xff]  ;;  %v1184_v28 = vpop.permute.xlu0 %1183  ;;  %v19742_v32 = vld [vmem:[#allocation92_spill] sm:$0xff] }
 0x204   :  { %19735 = vst [vmem:[#allocation76_spill] sm:$0xff] %v13338_v43  ;;  %v943_v40 = vmul.f32 %v12284_v2, %v13124_v8  ;;  %v944_v50 = vmul.f32 %v12298_v58, %v13124_v8  ;;  %v13361_v43 = vadd.f32 %v957_v45, %v19740_v47  ;;  %v13364_v51 = vadd.f32 %v958_v12, %v19741_v7  ;;  %v754_v8 = vpop.permute.xlu1 %753  ;;  %v19745_v47 = vld [vmem:[#allocation44_spill] sm:$0xff]  ;;  %v19746_v12 = vld [vmem:[#allocation93_spill] sm:$0xff]  ;;  %v19748_v37 = vld [vmem:[#allocation94_spill] sm:$0xff] }
 0x205   :  { %19737 = vst [vmem:[#allocation35_spill] sm:$0xff] %v13351_v23  ;;  %19739 = vst [vmem:[#allocation77_spill] sm:$0xff] %v13354_v33  ;;  %v965_v36 = vmul.f32 %v12284_v2, %v12985_v41  ;;  %v966_v34 = vmul.f32 %v12298_v58, %v12985_v41  ;;  %v13371_v4 = vadd.f32 %v939_v62, %v19742_v32  ;;  %v19744_v23 = vld [vmem:[#allocation43_spill] sm:$0xff]  ;;  %1171 = vbcast.lane.b32.xlu1 %v11980_v10, 298  ;;  %v19752_v62 = vld [vmem:[#allocation96_spill] sm:$0xff] }
 0x206   :  { %v947_v33 = vmul.f32 %v12284_v2, %v13188_v44  ;;  %v1439_v45 = vmul.f32 %v19744_v23, %v1184_v28  ;;  %v1440_v46 = vmul.f32 %v19745_v47, %v1184_v28  ;;  %v13378_v7 = vadd.f32 %v940_v57, %v19746_v12  ;;  %1367 = vbcast.lane.b32.xlu0 %v12051_v22, 306 }
 0x207   :  { %19743 = vst [vmem:[#allocation28_spill] sm:$0xff] %v13371_v4  ;;  %v13381_v31 = vadd.f32 %v961_v38, %v19748_v37  ;;  %v13384_v41 = vadd.f32 %v962_v14, %v19750_v29  ;;  %v13389_v32 = vadd.f32 %v943_v40, %v19752_v62  ;;  %v19754_v4 = vld [vmem:[#allocation97_spill] sm:$0xff]  ;;  %v19756_v37 = vld [vmem:[#allocation98_spill] sm:$0xff]  ;;  %v19758_v29 = vld [vmem:[#allocation99_spill] sm:$0xff]  ;;  %v948_v12 = vmul.f32 %v12298_v58, %v13188_v44 }
 0x208   :  { %19747 = vst [vmem:[#allocation78_spill] sm:$0xff] %v13378_v7  ;;  %v13392_v5 = vadd.f32 %v944_v50, %v19754_v4  ;;  %v13395_v28 = vadd.f32 %v1439_v45, %v13081_v35  ;;  %v13398_v57 = vadd.f32 %v1440_v46, %v13094_v63  ;;  %v13401_v38 = vadd.f32 %v965_v36, %v19756_v37  ;;  %v1216_v50 = vpop.permute.xlu0 %1215  ;;  %v19760_v4 = vld [vmem:[#allocation13_spill] sm:$0xff]  ;;  %v762_v37 = vpop.permute.xlu1 %761  ;;  %v19762_v7 = vld [vmem:[#allocation14_spill] sm:$0xff] }
 0x209   :  { %19749 = vst [vmem:[#allocation79_spill] sm:$0xff] %v13381_v31  ;;  %19751 = vst [vmem:[#allocation80_spill] sm:$0xff] %v13384_v41  ;;  %v13404_v14 = vadd.f32 %v966_v34, %v19758_v29  ;;  %v969_v40 = vmul.f32 %v12284_v2, %v13028_v52  ;;  %v13411_v62 = vadd.f32 %v947_v33, %v19760_v4  ;;  %1267 = vbcast.lane.b32.xlu1 %v12012_v16, 298 }
 0x20a   :  { %19753 = vst [vmem:[#allocation81_spill] sm:$0xff] %v13389_v32  ;;  %19755 = vst [vmem:[#allocation82_spill] sm:$0xff] %v13392_v5  ;;  %v970_v35 = vmul.f32 %v12298_v58, %v13028_v52  ;;  %v1823_v63 = vmin.f32 %v13395_v28, 0.0  ;;  %v1824_v36 = vmin.f32 %v13398_v57, 0.0  ;;  %v951_v46 = vmul.f32 %v12284_v2, %v13255_v39  ;;  %1179 = vbcast.lane.b32.xlu0 %v11980_v10, 314 }
 0x20b   :  { %19757 = vst [vmem:[#allocation83_spill] sm:$0xff] %v13401_v38  ;;  %19759 = vst [vmem:[#allocation84_spill] sm:$0xff] %v13404_v14  ;;  %v952_v44 = vmul.f32 %v12298_v58, %v13255_v39  ;;  %v1455_v34 = vmul.f32 %v19744_v23, %v1216_v50  ;;  %v1456_v45 = vmul.f32 %v19745_v47, %v1216_v50  ;;  %v19764_v39 = vld [vmem:[#allocation15_spill] sm:$0xff]  ;;  %v19766_v38 = vld [vmem:[#allocation100_spill] sm:$0xff]  ;;  %vm1695_vm1 = vcmp.gt.f32.partialorder %v13395_v28, 0.0 }
 0x20c   :  { %19761 = vst [vmem:[#allocation32_spill] sm:$0xff] %v13411_v62  ;;  %v973_v33 = vmul.f32 %v12284_v2, %v13072_v25  ;;  %v974_v52 = vmul.f32 %v12298_v58, %v13072_v25  ;;  %v1967_v29 = vmul.f32 1.442695, %v1823_v63  ;;  %v1969_v4 = vmul.f32 1.442695, %v1824_v36  ;;  %v1152_v14 = vpop.permute.xlu0 %1151 }
 0x20d   :  { %v13430_v62 = vadd.f32 %v948_v12, %v19762_v7  ;;  %v13433_v5 = vadd.f32 %v969_v40, %v19764_v39  ;;  %v13436_v50 = vadd.f32 %v1455_v34, %v13179_v1  ;;  %v13439_v32 = vadd.f32 %v1456_v45, %v13182_v0  ;;  %v19768_v7 = vld [vmem:[#allocation101_spill] sm:$0xff]  ;;  %v19770_v40 = vld [vmem:[#allocation102_spill] sm:$0xff]  ;;  %1323 = vbcast.lane.b32.xlu1 %v12038_v20, 282  ;;  %v19772_v0 = vld [vmem:[#allocation16_spill] sm:$0xff] }
 0x20e   :  { %v13442_v25 = vadd.f32 %v970_v35, %v19766_v38  ;;  %v955_v63 = vmul.f32 %v12284_v2, %v13317_v54  ;;  %11593 = vpow2.f32 %v1967_v29  ;;  %v1423_v10 = vmul.f32 %v19744_v23, %v1152_v14  ;;  %v19774_v35 = vld [vmem:[#allocation103_spill] sm:$0xff]  ;;  %1331 = vbcast.lane.b32.xlu0 %v12038_v20, 298 }
 0x20f   :  { %19763 = vst [vmem:[#allocation85_spill] sm:$0xff] %v13430_v62  ;;  %19765 = vst [vmem:[#allocation86_spill] sm:$0xff] %v13433_v5  ;;  %v13448_v12 = vadd.f32 %v951_v46, %v19768_v7  ;;  %v13451_v36 = vadd.f32 %v952_v44, %v19770_v40  ;;  %11595 = vpow2.f32 %v1969_v4  ;;  %v1839_v1 = vmin.f32 %v13436_v50, 0.0  ;;  %v19776_v7 = vld [vmem:[#allocation17_spill] sm:$0xff]  ;;  %v19786_v62 = vld [vmem:[#allocation20_spill] sm:$0xff] }
 0x210   :  { %19767 = vst [vmem:[#allocation87_spill] sm:$0xff] %v13442_v25  ;;  %v13456_v38 = vadd.f32 %v973_v33, %v19772_v0  ;;  %v13459_v34 = vadd.f32 %v974_v52, %v19774_v35  ;;  %v1840_v45 = vmin.f32 %v13439_v32, 0.0  ;;  %v1424_v29 = vmul.f32 %v19745_v47, %v1152_v14  ;;  %v1200_v33 = vpop.permute.xlu0 %1199  ;;  %v770_v14 = vpop.permute.xlu1 %769 }
 0x211   :  { %19769 = vst [vmem:[#allocation88_spill] sm:$0xff] %v13448_v12  ;;  %19771 = vst [vmem:[#allocation89_spill] sm:$0xff] %v13451_v36  ;;  %v956_v46 = vmul.f32 %v12298_v58, %v13317_v54  ;;  %v977_v44 = vmul.f32 %v12284_v2, %v13113_v15  ;;  %v1999_v4 = vmul.f32 1.442695, %v1839_v1  ;;  %v13469_v39 = vadd.f32 %v1423_v10, %v12991_v53  ;;  %v19782_v12 = vld [vmem:[#allocation18_spill] sm:$0xff] }
 0x212   :  { %19773 = vst [vmem:[#allocation90_spill] sm:$0xff] %v13456_v38  ;;  %19775 = vst [vmem:[#allocation91_spill] sm:$0xff] %v13459_v34  ;;  %v13472_v52 = vadd.f32 %v955_v63, %v19776_v7  ;;  %v978_v40 = vmul.f32 %v12298_v58, %v13113_v15  ;;  %v2001_v0 = vmul.f32 1.442695, %v1840_v45  ;;  %v13477_v35 = vadd.f32 %v1424_v29, %v12994_v48  ;;  %v19778_v48 = vld [vmem:[#allocation104_spill] sm:$0xff]  ;;  %v19780_v7 = vld [vmem:[#allocation105_spill] sm:$0xff] }
 0x213   :  { %v959_v54 = vmul.f32 %v12284_v2, %v754_v8  ;;  %v960_v36 = vmul.f32 %v12298_v58, %v754_v8  ;;  %11597 = vpow2.f32 %v1999_v4  ;;  %v1807_v53 = vmin.f32 %v13469_v39, 0.0  ;;  %1391 = vbcast.lane.b32.xlu1 %v11982_v11, 290  ;;  %1387 = vbcast.lane.b32.xlu0 %v11982_v11, 282 }
 0x214   :  { %19777 = vst [vmem:[#allocation92_spill] sm:$0xff] %v13472_v52  ;;  %v981_v63 = vmul.f32 %v12284_v2, %v13157_v26  ;;  %v982_v15 = vmul.f32 %v12298_v58, %v13157_v26  ;;  %11599 = vpow2.f32 %v2001_v0  ;;  %v1808_v10 = vmin.f32 %v13477_v35, 0.0  ;;  %v13494_v4 = vpop.permute.xlu0 %1255  ;;  %v778_v5 = vpop.permute.xlu1 %777 }
 0x215   :  { %v13490_v1 = vadd.f32 %v956_v46, %v19778_v48  ;;  %v963_v8 = vmul.f32 %v12284_v2, %v762_v37  ;;  %v964_v45 = vmul.f32 %v12298_v58, %v762_v37  ;;  %v1935_v29 = vmul.f32 1.442695, %v1807_v53  ;;  %v19784_v48 = vld [vmem:[#allocation19_spill] sm:$0xff] }
 0x216   :  { %v13497_v52 = vadd.f32 %v977_v44, %v19780_v7  ;;  %v13500_v26 = vadd.f32 %v978_v40, %v19782_v12  ;;  %v985_v0 = vmul.f32 %v12284_v2, %v13200_v24  ;;  %v986_v46 = vmul.f32 %v12298_v58, %v13200_v24  ;;  %v19788_v12 = vld [vmem:[#allocation106_spill] sm:$0xff]  ;;  %v19790_v7 = vld [vmem:[#allocation107_spill] sm:$0xff] }
 0x217   :  { %19779 = vst [vmem:[#allocation44_spill] sm:$0xff] %v13490_v1  ;;  %v13507_v1 = vadd.f32 %v959_v54, %v19784_v48  ;;  %v13510_v37 = vadd.f32 %v960_v36, %v19786_v62  ;;  %v967_v53 = vmul.f32 %v12284_v2, %v770_v14  ;;  %v968_v44 = vmul.f32 %v12298_v58, %v770_v14  ;;  %v19792_v54 = vld [vmem:[#allocation22_spill] sm:$0xff]  ;;  %v19794_v36 = vld [vmem:[#allocation108_spill] sm:$0xff] }
 0x218   :  { %19781 = vst [vmem:[#allocation93_spill] sm:$0xff] %v13497_v52  ;;  %19783 = vst [vmem:[#allocation94_spill] sm:$0xff] %v13500_v26  ;;  %1299 = vbcast.lane.b32.xlu1 %v12025_v18, 298  ;;  %v13516_v40 = vadd.f32 %v981_v63, %v19788_v12  ;;  %v13519_v25 = vadd.f32 %v982_v15, %v19790_v7  ;;  %11601 = vpow2.f32 %v1935_v29  ;;  %v1937_v24 = vmul.f32 1.442695, %v1808_v10  ;;  %v1280_v63 = vpop.permute.xlu0 %1279  ;;  %v19796_v12 = vld [vmem:[#allocation109_spill] sm:$0xff] }
 0x219   :  { %19785 = vst [vmem:[#allocation95_spill] sm:$0xff] %v13507_v1  ;;  %19787 = vst [vmem:[#allocation96_spill] sm:$0xff] %v13510_v37  ;;  %841 = vbcast.lane.b32.xlu0 %v12051_v22, 313  ;;  %v13523_v62 = vadd.f32 %v963_v8, %v19792_v54  ;;  %v13526_v48 = vadd.f32 %v964_v45, %v19794_v36  ;;  %v1447_v14 = vmul.f32 %v19744_v23, %v1200_v33  ;;  %v19798_v15 = vld [vmem:[#allocation110_spill] sm:$0xff]  ;;  %v19800_v54 = vld [vmem:[#allocation111_spill] sm:$0xff] }
 0x21a   :  { %19789 = vst [vmem:[#allocation97_spill] sm:$0xff] %v13516_v40  ;;  %19791 = vst [vmem:[#allocation98_spill] sm:$0xff] %v13519_v25  ;;  %v1448_v37 = vmul.f32 %v19745_v47, %v1200_v33  ;;  %v13531_v40 = vadd.f32 %v985_v0, %v19796_v12  ;;  %v13534_v7 = vadd.f32 %v986_v46, %v19798_v15  ;;  %v19802_v36 = vld [vmem:[#allocation23_spill] sm:$0xff]  ;;  %11603 = vpow2.f32 %v1937_v24  ;;  %v19804_v24 = vld [vmem:[#allocation112_spill] sm:$0xff] }
 0x21b   :  { %19793 = vst [vmem:[#allocation99_spill] sm:$0xff] %v13523_v62  ;;  %19795 = vst [vmem:[#allocation13_spill] sm:$0xff] %v13526_v48  ;;  %v989_v10 = vmul.f32 %v12284_v2, %v13242_v27  ;;  %v1487_v8 = vmul.f32 %v19744_v23, %v1280_v63  ;;  %v11594_v29 = vpop.eup %11593  ;;  %v13540_v45 = vadd.f32 %v967_v53, %v19800_v54  ;;  %vm1696_vm2 = vcmp.gt.f32.partialorder %v13398_v57, 0.0 }
 0x21c   :  { %19797 = vst [vmem:[#allocation14_spill] sm:$0xff] %v13531_v40  ;;  %19799 = vst [vmem:[#allocation15_spill] sm:$0xff] %v13534_v7  ;;  %v13543_v48 = vadd.f32 %v968_v44, %v19802_v36  ;;  %v990_v33 = vmul.f32 %v12298_v58, %v13242_v27  ;;  %v971_v0 = vmul.f32 %v12284_v2, %v778_v5  ;;  %1355 = vbcast.lane.b32.xlu1 %v12051_v22, 282  ;;  %v11596_v46 = vpop.eup %11595 }
 0x21d   :  { %19801 = vst [vmem:[#allocation100_spill] sm:$0xff] %v13540_v45  ;;  %v972_v12 = vmul.f32 %v12298_v58, %v778_v5  ;;  %v993_v15 = vmul.f32 %v12284_v2, %v13285_v61  ;;  %v11228_v62 = vadd.f32 -1.0, %v11594_v29  ;;  %1363 = vbcast.lane.b32.xlu0 %v12051_v22, 298  ;;  %v11229_v53 = vadd.f32 -1.0, %v11596_v46 }
 0x21e   :  { %19803 = vst [vmem:[#allocation101_spill] sm:$0xff] %v13543_v48  ;;  %v13555_v44 = vadd.f32 %v1447_v14, %v13133_v13  ;;  %v13558_v27 = vadd.f32 %v1448_v37, %v13138_v30  ;;  %v1488_v54 = vmul.f32 %v19745_v47, %v1280_v63  ;;  %v13564_v29 = vadd.f32 %v1487_v8, %v13361_v43  ;;  %v19806_v48 = vld [vmem:[#allocation113_spill] sm:$0xff]  ;;  %v786_v30 = vpop.permute.xlu1 %785  ;;  %v19810_v8 = vld [vmem:[#allocation115_spill] sm:$0xff] }
 0x21f   :  { %v2335_v5 = vsel %vm1695_vm1, %v13395_v28, %v11228_v62  ;;  %v13567_v36 = vadd.f32 %v989_v10, %v19804_v24  ;;  %v13570_v46 = vadd.f32 %v990_v33, %v19806_v48  ;;  %v13574_v13 = vmul.f32 %v12298_v58, %v13285_v61  ;;  %v19808_v62 = vld [vmem:[#allocation114_spill] sm:$0xff]  ;;  %v19812_v33 = vld [vmem:[#allocation25_spill] sm:$0xff] }
 0x220   :  { %v2336_v37 = vsel %vm1696_vm2, %v13398_v57, %v11229_v53  ;;  %865 = vbcast.lane.b32.xlu1 %v11982_v11, 297  ;;  %v11598_v28 = vpop.eup %11597  ;;  %v13579_v14 = vadd.f32 %v971_v0, %v19808_v62  ;;  %v13582_v10 = vadd.f32 %v1488_v54, %v13364_v51  ;;  %v13586_v61 = vadd.f32 %v972_v12, %v19810_v8  ;;  %v19814_v51 = vld [vmem:[#allocation41_spill] sm:$0xff] }
 0x221   :  { %19805 = vst [vmem:[#allocation102_spill] sm:$0xff] %v13567_v36  ;;  %19807 = vst [vmem:[#allocation16_spill] sm:$0xff] %v13570_v46  ;;  %v2718_v43 = vcombine.low %v2335_v5, %v2336_v37  ;;  %v2719_v63 = vcombine.high %v2335_v5, %v2336_v37  ;;  %1339 = vbcast.lane.b32.xlu0 %v12038_v20, 314  ;;  %v11600_v48 = vpop.eup %11599  ;;  %v13589_v24 = vadd.f32 %v993_v15, %v19812_v33 }
 0x222   :  { %19809 = vst [vmem:[#allocation103_spill] sm:$0xff] %v13579_v14  ;;  %19811 = vst [vmem:[#allocation17_spill] sm:$0xff] %v13586_v61  ;;  %v1831_v57 = vmin.f32 %v13555_v44, 0.0  ;;  %v1832_v53 = vmin.f32 %v13558_v27, 0.0  ;;  %v13594_v0 = vmul.f32 %v12284_v2, %v786_v30  ;;  %v13597_v5 = vmul.f32 %v12298_v58, %v786_v30 }
 0x223   :  { %19813 = vst [vmem:[#allocation104_spill] sm:$0xff] %v13589_v24  ;;  %v2726_v54 = vrot.slane %v2718_v43, %v19814_v51  ;;  %v2733_v20 = vrot.slane %v2719_v63, %v19814_v51  ;;  %v11244_v37 = vadd.f32 -1.0, %v11598_v28  ;;  %v11245_v12 = vadd.f32 -1.0, %v11600_v48  ;;  %v794_v48 = vpop.permute.xlu1 %793 }
 0x224   :  { %v1475_v15 = vmul.f32 %v19744_v23, %v13494_v4  ;;  %v1476_v62 = vmul.f32 %v19745_v47, %v13494_v4  ;;  %1275 = vbcast.lane.b32.xlu1 %v12012_v16, 314  ;;  %v13609_v43 = vmul.f32 %v12284_v2, %v13329_v19  ;;  %vm1711_vm3 = vcmp.gt.f32.partialorder %v13436_v50, 0.0 }
 0x225   :  { %v2734_v8 = vcombine.high %v2726_v54, %v2726_v54  ;;  %v2735_v33 = vcombine.high %v2733_v20, %v2733_v20  ;;  %v11371_v61 = vrot.slane %v2726_v54, 9  ;;  %v11373_v14 = vrot.slane %v2733_v20, 9  ;;  %1371 = vbcast.lane.b32.xlu0 %v12051_v22, 314  ;;  %v11602_v30 = vpop.eup %11601 }
 0x226   :  { %v1983_v28 = vmul.f32 1.442695, %v1831_v57  ;;  %v1985_v63 = vmul.f32 1.442695, %v1832_v53  ;;  %vm1712_vm6 = vcmp.gt.f32.partialorder %v13439_v32, 0.0  ;;  %v2351_v22 = vsel %vm1711_vm3, %v13436_v50, %v11244_v37 }
 0x227   :  { %v11372_v4 = vrot.slane %v2734_v8, 9  ;;  %v11374_v45 = vrot.slane %v2735_v33, 9  ;;  %v13612_v16 = vmax.f32 %v2726_v54, %v11371_v61  ;;  %v13614_v7 = vmax.f32 %v2733_v20, %v11373_v14  ;;  %v11604_v54 = vpop.eup %11603  ;;  %v802_v46 = vpop.permute.xlu1 %801 }
 0x228   :  { %v13619_v40 = vadd.f32 %v1475_v15, %v13297_v55  ;;  %v13622_v25 = vadd.f32 %v1476_v62, %v13300_v17  ;;  %1379 = vbcast.lane.b32.xlu1 %v11982_v11, 266  ;;  %v2352_v14 = vsel %vm1712_vm6, %v13439_v32, %v11245_v12  ;;  %v11212_v53 = vadd.f32 -1.0, %v11602_v30 }
 0x229   :  { %v13625_v57 = vmax.f32 %v2734_v8, %v11372_v4  ;;  %v13627_v61 = vmax.f32 %v2735_v33, %v11374_v45  ;;  %v998_v50 = vmul.f32 %v12298_v58, %v13329_v19  ;;  %v979_v55 = vmul.f32 %v12284_v2, %v794_v48  ;;  %v19815_v33 = vld [vmem:[#allocation11_spill] sm:$0xff] }
 0x22a   :  { %v8008_v17 = vmul.f32 %v13612_v16, %v13612_v16  ;;  %11605 = vpow2.f32 %v1983_v28  ;;  %v8010_v20 = vmul.f32 %v13614_v7, %v13614_v7  ;;  %vm1679_vm8 = vcmp.gt.f32.partialorder %v13469_v39, 0.0  ;;  %v19816_v28 = vld [vmem:[#allocation12_spill] sm:$0xff] }
 0x22b   :  { %vm1680_vm9 = vcmp.gt.f32.partialorder %v13477_v35, 0.0  ;;  %11607 = vpow2.f32 %v1985_v63  ;;  %v8009_v32 = vmul.f32 %v13625_v57, %v13625_v57  ;;  %v8011_v19 = vmul.f32 %v13627_v61, %v13627_v61 }
 0x22c   :  { %v2861_v45 = vcombine.low %v2351_v22, %v2352_v14  ;;  %v2862_v37 = vcombine.high %v2351_v22, %v2352_v14  ;;  %1399 = vbcast.lane.b32.xlu1 %v11982_v11, 306  ;;  %v11213_v12 = vadd.f32 -1.0, %v11604_v54  ;;  %v2319_v15 = vsel %vm1679_vm8, %v13469_v39, %v11212_v53 }
 0x22d   :  { %v1859_v62 = vmin.f32 %v13619_v40, 0.0  ;;  %v1860_v8 = vmin.f32 %v13622_v25, 0.0  ;;  %v8724_v30 = vrot.slane %v8008_v17, %v19815_v33  ;;  %v8728_v63 = vrot.slane %v8008_v17, %v19816_v28 }
 0x22e   :  { %v8732_v4 = vrot.slane %v8009_v32, %v19815_v33  ;;  %v8736_v1 = vrot.slane %v8009_v32, %v19816_v28  ;;  %v8740_v22 = vrot.slane %v8010_v20, %v19815_v33  ;;  %v8744_v14 = vrot.slane %v8010_v20, %v19816_v28 }
 0x22f   :  { %v8748_v54 = vrot.slane %v8011_v19, %v19815_v33  ;;  %v8752_v39 = vrot.slane %v8011_v19, %v19816_v28  ;;  %v2869_v34 = vrot.slane %v2861_v45, %v19814_v51  ;;  %v2876_v17 = vrot.slane %v2862_v37, %v19814_v51 }
 0x230   :  { %v10511_v53 = vsel %vm7191_vm4, %v8732_v4, %v8724_v30  ;;  %v10518_v36 = vsel %vm7191_vm4, %v8736_v1, %v8728_v63  ;;  %1307 = vbcast.lane.b32.xlu1 %v12025_v18, 314  ;;  %v2320_v20 = vsel %vm1680_vm9, %v13477_v35, %v11213_v12  ;;  %v2039_v24 = vmul.f32 1.442695, %v1859_v62  ;;  %v19819_v12 = vld [vmem:[#allocation26_spill] sm:$0xff] }
 0x231   :  { %v10512_v32 = vsel %vm7193_vm5, %v8740_v22, %v10511_v53  ;;  %v10519_v38 = vsel %vm7193_vm5, %v8744_v14, %v10518_v36  ;;  %v2877_v45 = vcombine.high %v2869_v34, %v2869_v34  ;;  %v2878_v30 = vcombine.high %v2876_v17, %v2876_v17  ;;  %v13672_v53 = vpop.permute.xlu1 %809 }
 0x232   :  { %v13666_v19 = vsel %vm7195_vm7, %v8748_v54, %v10512_v32  ;;  %v13669_v1 = vsel %vm7195_vm7, %v8752_v39, %v10519_v38  ;;  %v11402_v37 = vrot.slane %v2869_v34, 9  ;;  %v11404_v63 = vrot.slane %v2876_v17, 9  ;;  %v19821_v39 = vld [vmem:[#allocation27_spill] sm:$0xff] }
 0x233   :  { %19817 = vst [vmem:[#allocation105_spill] sm:$0xff] %v13666_v19  ;;  %19818 = vst [vmem:[#allocation18_spill] sm:$0xff] %v13669_v1  ;;  %v2575_v18 = vcombine.low %v2319_v15, %v2320_v20  ;;  %v2576_v4 = vcombine.high %v2319_v15, %v2320_v20  ;;  %v980_v22 = vmul.f32 %v12298_v58, %v794_v48  ;;  %v11403_v36 = vrot.slane %v2877_v45, 9  ;;  %v19823_v1 = vld [vmem:[#allocation116_spill] sm:$0xff] }
 0x234   :  { %v11405_v14 = vrot.slane %v2878_v30, 9  ;;  %v2041_v35 = vmul.f32 1.442695, %v1860_v8  ;;  %873 = vbcast.lane.b32.xlu1 %v11982_v11, 313  ;;  %v13677_v62 = vadd.f32 %v13574_v13, %v19819_v12  ;;  %v13679_v38 = vmax.f32 %v2869_v34, %v11402_v37  ;;  %v19825_v34 = vld [vmem:[#allocation117_spill] sm:$0xff] }
 0x235   :  { %v13681_v54 = vmax.f32 %v2876_v17, %v11404_v63  ;;  %11609 = vpow2.f32 %v2039_v24  ;;  %v13685_v15 = vadd.f32 %v13594_v0, %v19821_v39  ;;  %v13687_v48 = vmax.f32 %v2877_v45, %v11403_v36  ;;  %v19827_v24 = vld [vmem:[#allocation30_spill] sm:$0xff]  ;;  %v19831_v36 = vld [vmem:[#allocation119_spill] sm:$0xff] }
 0x236   :  { %19820 = vst [vmem:[#allocation19_spill] sm:$0xff] %v13677_v62  ;;  %v13689_v32 = vmax.f32 %v2878_v30, %v11405_v14  ;;  %v2583_v8 = vrot.slane %v2575_v18, %v19814_v51  ;;  %v13694_v13 = vadd.f32 %v13597_v5, %v19823_v1  ;;  %v13698_v17 = vadd.f32 %v13609_v43, %v19825_v34  ;;  %v19829_v63 = vld [vmem:[#allocation118_spill] sm:$0xff] }
 0x237   :  { %19822 = vst [vmem:[#allocation20_spill] sm:$0xff] %v13685_v15  ;;  %v11606_v20 = vpop.eup %11605  ;;  %v13701_v37 = vadd.f32 %v998_v50, %v19827_v24  ;;  %v2590_v0 = vrot.slane %v2576_v4, %v19814_v51  ;;  %v13705_v30 = vadd.f32 %v979_v55, %v19829_v63  ;;  %v13708_v18 = vadd.f32 %v980_v22, %v19831_v36  ;;  %v818_v22 = vpop.permute.xlu1 %817 }
 0x238   :  { %19824 = vst [vmem:[#allocation106_spill] sm:$0xff] %v13694_v13  ;;  %19826 = vst [vmem:[#allocation107_spill] sm:$0xff] %v13698_v17  ;;  %v11608_v45 = vpop.eup %11607  ;;  %v13711_v14 = vmul.f32 %v12284_v2, %v802_v46  ;;  %11611 = vpow2.f32 %v2041_v35  ;;  %1395 = vbcast.lane.b32.xlu1 %v11982_v11, 298  ;;  %v8039_v5 = vmul.f32 %v13679_v38, %v13679_v38  ;;  %vm1703_vm10 = vcmp.gt.f32.partialorder %v13555_v44, 0.0 }
 0x239   :  { %19828 = vst [vmem:[#allocation22_spill] sm:$0xff] %v13701_v37  ;;  %19830 = vst [vmem:[#allocation108_spill] sm:$0xff] %v13705_v30  ;;  %v8040_v43 = vmul.f32 %v13687_v48, %v13687_v48  ;;  %v8041_v50 = vmul.f32 %v13681_v54, %v13681_v54  ;;  %v8042_v55 = vmul.f32 %v13689_v32, %v13689_v32  ;;  %vm1704_vm11 = vcmp.gt.f32.partialorder %v13558_v27, 0.0 }
 0x23a   :  { %19832 = vst [vmem:[#allocation109_spill] sm:$0xff] %v13708_v18  ;;  %v13723_v1 = vmul.f32 %v12298_v58, %v802_v46  ;;  %v2591_v4 = vcombine.high %v2583_v8, %v2583_v8  ;;  %v2592_v35 = vcombine.high %v2590_v0, %v2590_v0  ;;  %v11236_v12 = vadd.f32 -1.0, %v11606_v20 }
 0x23b   :  { %v11237_v39 = vadd.f32 -1.0, %v11608_v45  ;;  %v1871_v34 = vmin.f32 %v13564_v29, 0.0  ;;  %v8972_v24 = vrot.slane %v8039_v5, %v19815_v33  ;;  %v8976_v63 = vrot.slane %v8039_v5, %v19816_v28 }
 0x23c   :  { %v8980_v36 = vrot.slane %v8040_v43, %v19815_v33  ;;  %v8984_v46 = vrot.slane %v8040_v43, %v19816_v28  ;;  %1403 = vbcast.lane.b32.xlu1 %v11982_v11, 314  ;;  %v8988_v18 = vrot.slane %v8041_v50, %v19815_v33  ;;  %v8992_v30 = vrot.slane %v8041_v50, %v19816_v28 }
 0x23d   :  { %v8996_v37 = vrot.slane %v8042_v55, %v19815_v33  ;;  %v9000_v20 = vrot.slane %v8042_v55, %v19816_v28  ;;  %v11340_v13 = vrot.slane %v2583_v8, 9  ;;  %v11341_v5 = vrot.slane %v2591_v4, 9 }
 0x23e   :  { %v10565_v45 = vsel %vm7191_vm4, %v8980_v36, %v8972_v24  ;;  %v10572_v17 = vsel %vm7191_vm4, %v8984_v46, %v8976_v63  ;;  %v11342_v19 = vrot.slane %v2590_v0, 9  ;;  %v11343_v11 = vrot.slane %v2592_v35, 9  ;;  %v826_v24 = vpop.permute.xlu1 %825 }
 0x23f   :  { %v10566_v15 = vsel %vm7193_vm5, %v8988_v18, %v10565_v45  ;;  %v10573_v43 = vsel %vm7193_vm5, %v8992_v30, %v10572_v17  ;;  %v13747_v41 = vmax.f32 %v2583_v8, %v11340_v13  ;;  %v13749_v55 = vmax.f32 %v2591_v4, %v11341_v5 }
 0x240   :  { %v13742_v62 = vsel %vm7195_vm7, %v8996_v37, %v10566_v15  ;;  %v13745_v50 = vsel %vm7195_vm7, %v9000_v20, %v10573_v43  ;;  %v13751_v63 = vmax.f32 %v2590_v0, %v11342_v19  ;;  %v13753_v36 = vmax.f32 %v2592_v35, %v11343_v11 }
 0x241   :  { %19833 = vst [vmem:[#allocation110_spill] sm:$0xff] %v13742_v62  ;;  %19834 = vst [vmem:[#allocation111_spill] sm:$0xff] %v13745_v50  ;;  %v2343_v17 = vsel %vm1703_vm10, %v13555_v44, %v11236_v12  ;;  %v2344_v15 = vsel %vm1704_vm11, %v13558_v27, %v11237_v39  ;;  %v987_v8 = vmul.f32 %v12284_v2, %v13672_v53  ;;  %v1872_v19 = vmin.f32 %v13582_v10, 0.0 }
 0x242   :  { %v11610_v37 = vpop.eup %11609  ;;  %v988_v13 = vmul.f32 %v12298_v58, %v13672_v53  ;;  %v2063_v0 = vmul.f32 1.442695, %v1871_v34  ;;  %v991_v30 = vmul.f32 %v12284_v2, %v818_v22  ;;  %v992_v18 = vmul.f32 %v12298_v58, %v818_v22 }
 0x243   :  { %v995_v44 = vmul.f32 %v12284_v2, %v826_v24  ;;  %vm1731_vm12 = vcmp.gt.f32.partialorder %v13619_v40, 0.0  ;;  %v7977_v27 = vmul.f32 %v13747_v41, %v13747_v41  ;;  %v7978_v4 = vmul.f32 %v13749_v55, %v13749_v55 }
 0x244   :  { %v2790_v35 = vcombine.low %v2343_v17, %v2344_v15  ;;  %v2791_v12 = vcombine.high %v2343_v17, %v2344_v15  ;;  %v7979_v39 = vmul.f32 %v13751_v63, %v13751_v63  ;;  %v7980_v34 = vmul.f32 %v13753_v36, %v13753_v36 }
 0x245   :  { %v11612_v53 = vpop.eup %11611  ;;  %vm1732_vm13 = vcmp.gt.f32.partialorder %v13622_v25, 0.0  ;;  %v11264_v22 = vadd.f32 -1.0, %v11610_v37  ;;  %v8476_v46 = vrot.slane %v7977_v27, %v19815_v33  ;;  %v8480_v20 = vrot.slane %v7977_v27, %v19816_v28 }
 0x246   :  { %11613 = vpow2.f32 %v2063_v0  ;;  %v2065_v45 = vmul.f32 1.442695, %v1872_v19  ;;  %v8484_v5 = vrot.slane %v7978_v4, %v19815_v33  ;;  %v8488_v43 = vrot.slane %v7978_v4, %v19816_v28 }
 0x247   :  { %v8492_v11 = vrot.slane %v7979_v39, %v19815_v33  ;;  %v8496_v17 = vrot.slane %v7979_v39, %v19816_v28  ;;  %v8500_v15 = vrot.slane %v7980_v34, %v19815_v33  ;;  %v8504_v50 = vrot.slane %v7980_v34, %v19816_v28  ;;  %v834_v34 = vpop.permute.xlu1 %833 }
 0x248   :  { %v2798_v37 = vrot.slane %v2790_v35, %v19814_v51  ;;  %v2805_v62 = vrot.slane %v2791_v12, %v19814_v51  ;;  %v10457_v27 = vsel %vm7191_vm4, %v8484_v5, %v8476_v46  ;;  %v10464_v19 = vsel %vm7191_vm4, %v8488_v43, %v8480_v20 }
 0x249   :  { %v11265_v0 = vadd.f32 -1.0, %v11612_v53  ;;  %v2371_v4 = vsel %vm1731_vm12, %v13619_v40, %v11264_v22  ;;  %v10458_v31 = vsel %vm7193_vm5, %v8492_v11, %v10457_v27  ;;  %v10465_v39 = vsel %vm7193_vm5, %v8496_v17, %v10464_v19  ;;  %v19837_v19 = vld [vmem:[#allocation31_spill] sm:$0xff] }
 0x24a   :  { %v2806_v26 = vcombine.high %v2798_v37, %v2798_v37  ;;  %v2807_v52 = vcombine.high %v2805_v62, %v2805_v62  ;;  %v13797_v35 = vsel %vm7195_vm7, %v8500_v15, %v10458_v31  ;;  %v13800_v12 = vsel %vm7195_vm7, %v8504_v50, %v10465_v39 }
 0x24b   :  { %19835 = vst [vmem:[#allocation23_spill] sm:$0xff] %v13797_v35  ;;  %19836 = vst [vmem:[#allocation112_spill] sm:$0xff] %v13800_v12  ;;  %v11387_v46 = vrot.slane %v2798_v37, 9  ;;  %v11389_v20 = vrot.slane %v2805_v62, 9  ;;  %v2372_v40 = vsel %vm1732_vm13, %v13622_v25, %v11265_v0  ;;  %11615 = vpow2.f32 %v2065_v45  ;;  %v19839_v25 = vld [vmem:[#allocation122_spill] sm:$0xff]  ;;  %v19843_v0 = vld [vmem:[#allocation33_spill] sm:$0xff] }
 0x24c   :  { %v11388_v53 = vrot.slane %v2806_v26, 9  ;;  %v11390_v5 = vrot.slane %v2807_v52, 9  ;;  %v996_v11 = vmul.f32 %v12298_v58, %v826_v24  ;;  %v999_v31 = vmul.f32 %v12284_v2, %v834_v34 }
 0x24d   :  { %v13805_v22 = vmax.f32 %v2798_v37, %v11387_v46  ;;  %v13807_v43 = vmax.f32 %v2805_v62, %v11389_v20  ;;  %v3040_v15 = vcombine.low %v2371_v4, %v2372_v40  ;;  %v3041_v27 = vcombine.high %v2371_v4, %v2372_v40  ;;  %v19841_v62 = vld [vmem:[#allocation125_spill] sm:$0xff] }
 0x24e   :  { %v13811_v17 = vmax.f32 %v2806_v26, %v11388_v53  ;;  %v13813_v50 = vmax.f32 %v2807_v52, %v11390_v5  ;;  %v13817_v39 = vadd.f32 %v13711_v14, %v19837_v19  ;;  %v13821_v45 = vadd.f32 %v13723_v1, %v19839_v25  ;;  %v19845_v52 = vld [vmem:[#allocation127_spill] sm:$0xff]  ;;  %v19848_v14 = vld [vmem:[#allocation128_spill] sm:$0xff]  ;;  %v1192_v53 = vpop.permute.xlu1 %1191 }
 0x24f   :  { %v13824_v37 = vadd.f32 %v987_v8, %v19841_v62  ;;  %v1000_v24 = vmul.f32 %v12298_v58, %v834_v34  ;;  %v13828_v26 = vadd.f32 %v988_v13, %v19843_v0  ;;  %v13831_v46 = vadd.f32 %v991_v30, %v19845_v52  ;;  %v19850_v34 = vld [vmem:[#allocation129_spill] sm:$0xff]  ;;  %v19853_v25 = vld [vmem:[#allocation39_spill] sm:$0xff] }
 0x250   :  { %19838 = vst [vmem:[#allocation113_spill] sm:$0xff] %v13817_v39  ;;  %19840 = vst [vmem:[#allocation114_spill] sm:$0xff] %v13821_v45  ;;  %v13834_v4 = vadd.f32 %v992_v18, %v12946_v3  ;;  %v13837_v20 = vadd.f32 %v995_v44, %v19848_v14  ;;  %v8024_v1 = vmul.f32 %v13805_v22, %v13805_v22  ;;  %vm1743_vm14 = vcmp.gt.f32.partialorder %v13564_v29, 0.0 }
 0x251   :  { %19842 = vst [vmem:[#allocation115_spill] sm:$0xff] %v13824_v37  ;;  %19844 = vst [vmem:[#allocation25_spill] sm:$0xff] %v13828_v26  ;;  %v8025_v8 = vmul.f32 %v13811_v17, %v13811_v17  ;;  %v8026_v13 = vmul.f32 %v13807_v43, %v13807_v43  ;;  %v8027_v30 = vmul.f32 %v13813_v50, %v13813_v50  ;;  %vm1744_vm15 = vcmp.gt.f32.partialorder %v13582_v10, 0.0 }
 0x252   :  { %19846 = vst [vmem:[#allocation41_spill] sm:$0xff] %v13831_v46  ;;  %19847 = vst [vmem:[#allocation11_spill] sm:$0xff] %v13834_v4  ;;  %v13848_v5 = vadd.f32 %v996_v11, %v19850_v34  ;;  %v3048_v3 = vrot.slane %v3040_v15, %v19814_v51  ;;  %v3055_v18 = vrot.slane %v3041_v27, %v19814_v51  ;;  %vm7197_vm13 = vcmask 1044484  }
 0x253   :  { %19849 = vst [vmem:[#allocation12_spill] sm:$0xff] %v13837_v20  ;;  %v13853_v44 = vadd.f32 %v999_v31, %v12979_v42  ;;  %v11614_v40 = vpop.eup %11613  ;;  %v5466_v19 = vrot.slane %v13625_v57, %v19815_v33  ;;  %v13858_v62 = vadd.f32 %v1000_v24, %v19853_v25  ;;  %v1443_v0 = vmul.f32 %v19744_v23, %v1192_v53 }
 0x254   :  { %19851 = vst [vmem:[#allocation26_spill] sm:$0xff] %v13848_v5  ;;  %v1444_v52 = vmul.f32 %v19745_v47, %v1192_v53  ;;  %v8852_v11 = vrot.slane %v8024_v1, %v19815_v33  ;;  %v8856_v15 = vrot.slane %v8024_v1, %v19816_v28  ;;  %v8860_v27 = vrot.slane %v8025_v8, %v19815_v33 }
 0x255   :  { %19852 = vst [vmem:[#allocation27_spill] sm:$0xff] %v13853_v44  ;;  %19854 = vst [vmem:[#allocation116_spill] sm:$0xff] %v13858_v62  ;;  %v8864_v42 = vrot.slane %v8025_v8, %v19816_v28  ;;  %v8868_v31 = vrot.slane %v8026_v13, %v19815_v33  ;;  %v8872_v14 = vrot.slane %v8026_v13, %v19816_v28  ;;  %v11441_v44 = vrot.slane %v3048_v3, 9 }
 0x256   :  { %v8876_v34 = vrot.slane %v8027_v30, %v19815_v33  ;;  %v8880_v24 = vrot.slane %v8027_v30, %v19816_v28  ;;  %v10539_v25 = vsel %vm7191_vm4, %v8860_v27, %v8852_v11  ;;  %v3056_v26 = vcombine.high %v3048_v3, %v3048_v3 }
 0x257   :  { %v10546_v53 = vsel %vm7191_vm4, %v8864_v42, %v8856_v15  ;;  %v3057_v37 = vcombine.high %v3055_v18, %v3055_v18  ;;  %v10540_v1 = vsel %vm7193_vm5, %v8868_v31, %v10539_v25  ;;  %v11443_v8 = vrot.slane %v3055_v18, 9 }
 0x258   :  { %v10547_v62 = vsel %vm7193_vm5, %v8872_v14, %v10546_v53  ;;  %v13875_v5 = vsel %vm7195_vm7, %v8876_v34, %v10540_v1  ;;  %v11442_v20 = vrot.slane %v3056_v26, 9  ;;  %v11616_v45 = vpop.eup %11615  ;;  %v5458_v11 = vrot.slane %v13612_v16, %v19815_v33 }
 0x259   :  { %19855 = vst [vmem:[#allocation117_spill] sm:$0xff] %v13875_v5  ;;  %v13878_v13 = vsel %vm7195_vm7, %v8880_v24, %v10547_v62  ;;  %v11444_v30 = vrot.slane %v3057_v37, 9  ;;  %v13882_v15 = vmax.f32 %v3048_v3, %v11441_v44  ;;  %v13884_v27 = vmax.f32 %v3055_v18, %v11443_v8 }
 0x25a   :  { %19856 = vst [vmem:[#allocation30_spill] sm:$0xff] %v13878_v13  ;;  %v5470_v42 = vrot.slane %v13625_v57, %v19816_v28  ;;  %v13889_v31 = vmax.f32 %v3056_v26, %v11442_v20  ;;  %v13894_v62 = vadd.f32 %v1443_v0, %v13107_v6  ;;  %v7252_v34 = vsel %vm7191_vm4, %v5466_v19, %v5458_v11 }
 0x25b   :  { %v13891_v14 = vmax.f32 %v3057_v37, %v11444_v30  ;;  %v11276_v24 = vadd.f32 -1.0, %v11614_v40  ;;  %v11277_v25 = vadd.f32 -1.0, %v11616_v45  ;;  %v13898_v3 = vadd.f32 %v1444_v52, %v13116_v9 }
 0x25c   :  { %v5462_v18 = vrot.slane %v13612_v16, %v19816_v28  ;;  %v5474_v57 = vrot.slane %v13614_v7, %v19815_v33  ;;  %v5478_v37 = vrot.slane %v13614_v7, %v19816_v28  ;;  %v8078_v6 = vmul.f32 %v13882_v15, %v13882_v15 }
 0x25d   :  { %v8079_v45 = vmul.f32 %v13889_v31, %v13889_v31  ;;  %v8080_v9 = vmul.f32 %v13884_v27, %v13884_v27  ;;  %v8081_v16 = vmul.f32 %v13891_v14, %v13891_v14  ;;  %v2383_v40 = vsel %vm1743_vm14, %v13564_v29, %v11276_v24 }
 0x25e   :  { %v13920_v20 = vsel %vm7193_vm5, %v5474_v57, %v7252_v34  ;;  %v7259_v44 = vsel %vm7191_vm4, %v5470_v42, %v5462_v18  ;;  %v2384_v19 = vsel %vm1744_vm15, %v13582_v10, %v11277_v25  ;;  %v1827_v0 = vmin.f32 %v13894_v62, 0.0  ;;  %v13937_v34 = vpop.permute.xlu0 %845 }
 0x25f   :  { %v1828_v52 = vmin.f32 %v13898_v3, 0.0  ;;  %v9284_v53 = vrot.slane %v8078_v6, %v19815_v33  ;;  %v9288_v1 = vrot.slane %v8078_v6, %v19816_v28  ;;  %v9292_v8 = vrot.slane %v8079_v45, %v19815_v33  ;;  %v1224_v6 = vpop.permute.xlu1 %1223 }
 0x260   :  { %v9296_v30 = vrot.slane %v8079_v45, %v19816_v28  ;;  %v9300_v11 = vrot.slane %v8080_v9, %v19815_v33  ;;  %v9304_v42 = vrot.slane %v8080_v9, %v19816_v28  ;;  %v9308_v29 = vrot.slane %v8081_v16, %v19815_v33 }
 0x261   :  { %v9312_v10 = vrot.slane %v8081_v16, %v19816_v28  ;;  %v10633_v24 = vsel %vm7191_vm4, %v9292_v8, %v9284_v53  ;;  %v3147_v18 = vcombine.low %v2383_v40, %v2384_v19  ;;  %v3148_v57 = vcombine.high %v2383_v40, %v2384_v19 }
 0x262   :  { %v10640_v25 = vsel %vm7191_vm4, %v9296_v30, %v9288_v1  ;;  %v10634_v7 = vsel %vm7193_vm5, %v9300_v11, %v10633_v24  ;;  %v1975_v26 = vmul.f32 1.442695, %v1827_v0  ;;  %v1977_v39 = vmul.f32 1.442695, %v1828_v52 }
 0x263   :  { %v10641_v45 = vsel %vm7193_vm5, %v9304_v42, %v10640_v25  ;;  %v13944_v9 = vsel %vm7195_vm7, %v9308_v29, %v10634_v7  ;;  %v3155_v4 = vrot.slane %v3147_v18, %v19814_v51  ;;  %v3162_v53 = vrot.slane %v3148_v57, %v19814_v51 }
 0x264   :  { %19857 = vst [vmem:[#allocation118_spill] sm:$0xff] %v13944_v9  ;;  %v13947_v16 = vsel %vm7195_vm7, %v9312_v10, %v10641_v45  ;;  %v13952_v1 = vsel %vm7193_vm5, %v5478_v37, %v7259_v44  ;;  %11617 = vpow2.f32 %v1975_v26  ;;  %v1459_v19 = vmul.f32 %v19744_v23, %v1224_v6  ;;  %v1168_v44 = vpop.permute.xlu0 %1167 }
 0x265   :  { %19858 = vst [vmem:[#allocation119_spill] sm:$0xff] %v13947_v16  ;;  %v3163_v0 = vcombine.high %v3155_v4, %v3155_v4  ;;  %v3164_v52 = vcombine.high %v3162_v53, %v3162_v53  ;;  %v11464_v7 = vrot.slane %v3155_v4, 9  ;;  %v11466_v8 = vrot.slane %v3162_v53, 9 }
 0x266   :  { %11619 = vpow2.f32 %v1977_v39  ;;  %v1460_v37 = vmul.f32 %v19745_v47, %v1224_v6  ;;  %v5714_v24 = vrot.slane %v13687_v48, %v19815_v33  ;;  %v13967_v18 = vadd.f32 %v1459_v19, %v13203_v60 }
 0x267   :  { %v11465_v42 = vrot.slane %v3163_v0, 9  ;;  %v11467_v29 = vrot.slane %v3164_v52, 9  ;;  %v4835_v10 = vmax.f32 %v3155_v4, %v11464_v7  ;;  %v4837_v26 = vmax.f32 %v3162_v53, %v11466_v8 }
 0x268   :  { %v13970_v57 = vadd.f32 %v1460_v37, %v13212_v59  ;;  %v1431_v6 = vmul.f32 %v19744_v23, %v1168_v44  ;;  %v1432_v11 = vmul.f32 %v19745_v47, %v1168_v44  ;;  %vm1699_vm0 = vcmp.gt.f32.partialorder %v13894_v62, 0.0 }
 0x269   :  { %v4836_v39 = vmax.f32 %v3163_v0, %v11465_v42  ;;  %v4838_v45 = vmax.f32 %v3164_v52, %v11467_v29  ;;  %v6202_v4 = vrot.slane %v4835_v10, %v19815_v33  ;;  %v6206_v53 = vrot.slane %v4835_v10, %v19816_v28 }
 0x26a   :  { %v6218_v7 = vrot.slane %v4837_v26, %v19815_v33  ;;  %v8101_v8 = vmul.f32 %v4835_v10, %v4835_v10  ;;  %v6222_v59 = vrot.slane %v4837_v26, %v19816_v28  ;;  %v8103_v19 = vmul.f32 %v4837_v26, %v4837_v26 }
 0x26b   :  { %v6210_v25 = vrot.slane %v4836_v39, %v19815_v33  ;;  %v6214_v60 = vrot.slane %v4836_v39, %v19816_v28  ;;  %v6226_v0 = vrot.slane %v4838_v45, %v19815_v33  ;;  %v6230_v52 = vrot.slane %v4838_v45, %v19816_v28 }
 0x26c   :  { %v8102_v37 = vmul.f32 %v4836_v39, %v4836_v39  ;;  %v8104_v44 = vmul.f32 %v4838_v45, %v4838_v45  ;;  %v9468_v30 = vrot.slane %v8101_v8, %v19815_v33  ;;  %v9472_v10 = vrot.slane %v8101_v8, %v19816_v28 }
 0x26d   :  { %v7414_v42 = vsel %vm7191_vm4, %v6210_v25, %v6202_v4  ;;  %v7421_v29 = vsel %vm7191_vm4, %v6214_v60, %v6206_v53  ;;  %v9484_v25 = vrot.slane %v8103_v19, %v19815_v33  ;;  %v9488_v45 = vrot.slane %v8103_v19, %v19816_v28 }
 0x26e   :  { %v7415_v40 = vsel %vm7193_vm5, %v6218_v7, %v7414_v42  ;;  %v7422_v46 = vsel %vm7193_vm5, %v6222_v59, %v7421_v29  ;;  %v9476_v26 = vrot.slane %v8102_v37, %v19815_v33  ;;  %v9480_v16 = vrot.slane %v8102_v37, %v19816_v28 }
 0x26f   :  { %v13991_v9 = vsel %vm7195_vm7, %v6226_v0, %v7415_v40  ;;  %v13994_v39 = vsel %vm7195_vm7, %v6230_v52, %v7422_v46  ;;  %v9492_v4 = vrot.slane %v8104_v44, %v19815_v33  ;;  %v9496_v53 = vrot.slane %v8104_v44, %v19816_v28 }
 0x270   :  { %19859 = vst [vmem:[#allocation31_spill] sm:$0xff] %v13991_v9  ;;  %19860 = vst [vmem:[#allocation122_spill] sm:$0xff] %v13994_v39  ;;  %v10673_v7 = vsel %vm7191_vm4, %v9476_v26, %v9468_v30  ;;  %v10680_v8 = vsel %vm7191_vm4, %v9480_v16, %v9472_v10  ;;  %v1843_v46 = vmin.f32 %v13967_v18, 0.0  ;;  %v1844_v0 = vmin.f32 %v13970_v57, 0.0  ;;  %v1160_v16 = vpop.permute.xlu1 %1159 }
 0x271   :  { %v11618_v60 = vpop.eup %11617  ;;  %v10674_v59 = vsel %vm7193_vm5, %v9484_v25, %v10673_v7  ;;  %v10681_v40 = vsel %vm7193_vm5, %v9488_v45, %v10680_v8  ;;  %v14013_v30 = vadd.f32 %v1431_v6, %v13043_v56  ;;  %v14017_v10 = vadd.f32 %v1432_v11, %v13046_v21 }
 0x272   :  { %v14007_v52 = vsel %vm7195_vm7, %v9492_v4, %v10674_v59  ;;  %v14010_v19 = vsel %vm7195_vm7, %v9496_v53, %v10681_v40  ;;  %v11232_v37 = vadd.f32 -1.0, %v11618_v60  ;;  %v2007_v42 = vmul.f32 1.442695, %v1843_v46 }
 0x273   :  { %19861 = vst [vmem:[#allocation125_spill] sm:$0xff] %v14007_v52  ;;  %19862 = vst [vmem:[#allocation33_spill] sm:$0xff] %v14010_v19  ;;  %v11620_v44 = vpop.eup %11619  ;;  %v2009_v29 = vmul.f32 1.442695, %v1844_v0  ;;  %v19863_v26 = vrot.slane %v13679_v38, %v19815_v33  ;;  %v1815_v56 = vmin.f32 %v14013_v30, 0.0  ;;  %vm1700_vm1 = vcmp.gt.f32.partialorder %v13898_v3, 0.0 }
 0x274   :  { %v11233_v45 = vadd.f32 -1.0, %v11620_v44  ;;  %v2339_v4 = vsel %vm1699_vm0, %v13894_v62, %v11232_v37  ;;  %11621 = vpow2.f32 %v2007_v42  ;;  %v1816_v6 = vmin.f32 %v14017_v10, 0.0 }
 0x275   :  { %v7306_v25 = vsel %vm7191_vm4, %v5714_v24, %v19863_v26  ;;  %v1427_v53 = vmul.f32 %v19744_v23, %v1160_v16  ;;  %11623 = vpow2.f32 %v2009_v29  ;;  %v1951_v11 = vmul.f32 1.442695, %v1815_v56  ;;  %v19869_v29 = vld [vmem:[#allocation133_spill] sm:$0xff] }
 0x276   :  { %v2340_v21 = vsel %vm1700_vm1, %v13898_v3, %v11233_v45  ;;  %v1428_v7 = vmul.f32 %v19745_v47, %v1160_v16  ;;  %v19864_v24 = vrot.slane %v13679_v38, %v19816_v28  ;;  %v19865_v62 = vrot.slane %v13687_v48, %v19816_v28 }
 0x277   :  { %v2754_v60 = vcombine.low %v2339_v4, %v2340_v21  ;;  %v2755_v59 = vcombine.high %v2339_v4, %v2340_v21  ;;  %v1953_v40 = vmul.f32 1.442695, %v1816_v6  ;;  %v19866_v46 = vrot.slane %v13627_v61, %v19815_v33 }
 0x278   :  { %v7313_v8 = vsel %vm7191_vm4, %v19865_v62, %v19864_v24  ;;  %v19867_v0 = vrot.slane %v13627_v61, %v19816_v28  ;;  %v5726_v48 = vrot.slane %v13681_v54, %v19816_v28  ;;  %11625 = vpow2.f32 %v1951_v11 }
 0x279   :  { %v14042_v3 = vsel %vm7195_vm7, %v19866_v46, %v13920_v20  ;;  %v19868_v37 = vrot.slane %v13681_v54, %v19815_v33  ;;  %v2762_v44 = vrot.slane %v2754_v60, %v19814_v51  ;;  %v2769_v20 = vrot.slane %v2755_v59, %v19814_v51 }
 0x27a   :  { %v14049_v38 = vsel %vm7195_vm7, %v19867_v0, %v13952_v1  ;;  %11627 = vpow2.f32 %v1953_v40  ;;  %v5730_v61 = vrot.slane %v13689_v32, %v19815_v33  ;;  %v7314_v1 = vsel %vm7193_vm5, %v5726_v48, %v7313_v8 }
 0x27b   :  { %v7307_v16 = vsel %vm7193_vm5, %v19868_v37, %v7306_v25  ;;  %v14063_v42 = vadd.f32 %v1427_v53, %v13019_v49  ;;  %v14066_v26 = vadd.f32 %v1428_v7, %v19869_v29  ;;  %v2770_v45 = vcombine.high %v2762_v44, %v2762_v44 }
 0x27c   :  { %v2771_v54 = vcombine.high %v2769_v20, %v2769_v20  ;;  %v11379_v4 = vrot.slane %v2762_v44, 9  ;;  %v11381_v25 = vrot.slane %v2769_v20, 9  ;;  %v5734_v56 = vrot.slane %v13689_v32, %v19816_v28 }
 0x27d   :  { %v14071_v6 = vsel %vm7195_vm7, %v5730_v61, %v7307_v16  ;;  %v5218_v21 = vrot.slane %v13749_v55, %v19815_v33  ;;  %v5222_v49 = vrot.slane %v13749_v55, %v19816_v28  ;;  %v11380_v53 = vrot.slane %v2770_v45, 9 }
 0x27e   :  { %19870 = vst [vmem:[#allocation127_spill] sm:$0xff] %v14071_v6  ;;  %v11382_v11 = vrot.slane %v2771_v54, 9  ;;  %v14077_v7 = vmax.f32 %v2762_v44, %v11379_v4  ;;  %v14079_v24 = vmax.f32 %v2769_v20, %v11381_v25  ;;  %v14082_v62 = vsel %vm7195_vm7, %v5734_v56, %v7314_v1 }
 0x27f   :  { %19871 = vst [vmem:[#allocation128_spill] sm:$0xff] %v14082_v62  ;;  %v5210_v32 = vrot.slane %v13747_v41, %v19815_v33  ;;  %v5214_v8 = vrot.slane %v13747_v41, %v19816_v28  ;;  %v5226_v60 = vrot.slane %v13751_v63, %v19815_v33  ;;  %v14090_v59 = vmax.f32 %v2770_v45, %v11380_v53 }
 0x280   :  { %v14092_v55 = vmax.f32 %v2771_v54, %v11382_v11  ;;  %v1811_v40 = vmin.f32 %v14063_v42, 0.0  ;;  %v1812_v46 = vmin.f32 %v14066_v26, 0.0  ;;  %v5230_v0 = vrot.slane %v13751_v63, %v19816_v28 }
 0x281   :  { %v5234_v48 = vrot.slane %v13753_v36, %v19815_v33  ;;  %v8016_v37 = vmul.f32 %v14077_v7, %v14077_v7  ;;  %v7192_v16 = vsel %vm7191_vm4, %v5218_v21, %v5210_v32  ;;  %v7205_v44 = vsel %vm7191_vm4, %v5222_v49, %v5214_v8  ;;  %v11622_v63 = vpop.eup %11621 }
 0x282   :  { %v5594_v20 = vrot.slane %v13811_v17, %v19815_v33  ;;  %v8018_v61 = vmul.f32 %v14079_v24, %v14079_v24  ;;  %v8017_v1 = vmul.f32 %v14090_v59, %v14090_v59  ;;  %v8019_v29 = vmul.f32 %v14092_v55, %v14092_v55  ;;  %v11624_v45 = vpop.eup %11623 }
 0x283   :  { %vm1715_vm2 = vcmp.gt.f32.partialorder %v13967_v18, 0.0  ;;  %vm1716_vm3 = vcmp.gt.f32.partialorder %v13970_v57, 0.0  ;;  %vm1687_vm6 = vcmp.gt.f32.partialorder %v14013_v30, 0.0  ;;  %vm1688_vm8 = vcmp.gt.f32.partialorder %v14017_v10, 0.0 }
 0x284   :  { %v1943_v54 = vmul.f32 1.442695, %v1811_v40  ;;  %v1945_v4 = vmul.f32 1.442695, %v1812_v46  ;;  %v8788_v25 = vrot.slane %v8016_v37, %v19815_v33  ;;  %v8792_v56 = vrot.slane %v8016_v37, %v19816_v28 }
 0x285   :  { %v8796_v21 = vrot.slane %v8017_v1, %v19815_v33  ;;  %v8800_v49 = vrot.slane %v8017_v1, %v19816_v28  ;;  %v11626_v53 = vpop.eup %11625  ;;  %v8804_v11 = vrot.slane %v8018_v61, %v19815_v33  ;;  %v8808_v32 = vrot.slane %v8018_v61, %v19816_v28 }
 0x286   :  { %v8812_v8 = vrot.slane %v8019_v29, %v19815_v33  ;;  %v8816_v41 = vrot.slane %v8019_v29, %v19816_v28  ;;  %v11248_v5 = vadd.f32 -1.0, %v11622_v63  ;;  %v11249_v37 = vadd.f32 -1.0, %v11624_v45 }
 0x287   :  { %v11628_v13 = vpop.eup %11627  ;;  %v10525_v40 = vsel %vm7191_vm4, %v8796_v21, %v8788_v25  ;;  %v10532_v46 = vsel %vm7191_vm4, %v8800_v49, %v8792_v56  ;;  %v11220_v52 = vadd.f32 -1.0, %v11626_v53  ;;  %11629 = vpow2.f32 %v1943_v54 }
 0x288   :  { %v10526_v19 = vsel %vm7193_vm5, %v8804_v11, %v10525_v40  ;;  %v10533_v1 = vsel %vm7193_vm5, %v8808_v32, %v10532_v46  ;;  %v11221_v39 = vadd.f32 -1.0, %v11628_v13  ;;  %v2355_v29 = vsel %vm1715_vm2, %v13967_v18, %v11248_v5 }
 0x289   :  { %v14131_v9 = vsel %vm7195_vm7, %v8812_v8, %v10526_v19  ;;  %v14134_v61 = vsel %vm7195_vm7, %v8816_v41, %v10533_v1  ;;  %v2356_v63 = vsel %vm1716_vm3, %v13970_v57, %v11249_v37  ;;  %v2327_v13 = vsel %vm1687_vm6, %v14013_v30, %v11220_v52 }
 0x28a   :  { %v2897_v45 = vcombine.low %v2355_v29, %v2356_v63  ;;  %v2898_v25 = vcombine.high %v2355_v29, %v2356_v63  ;;  %v2328_v19 = vsel %vm1688_vm8, %v14017_v10, %v11221_v39  ;;  %v5598_v41 = vrot.slane %v13811_v17, %v19816_v28 }
 0x28b   :  { %v2647_v56 = vcombine.low %v2327_v13, %v2328_v19  ;;  %v2648_v21 = vcombine.high %v2327_v13, %v2328_v19  ;;  %v7194_v5 = vsel %vm7193_vm5, %v5226_v60, %v7192_v16  ;;  %v5586_v18 = vrot.slane %v13805_v22, %v19815_v33  ;;  %v1196_v13 = vpop.permute.xlu0 %1195 }
 0x28c   :  { %v2905_v57 = vrot.slane %v2897_v45, %v19814_v51  ;;  %v2912_v49 = vrot.slane %v2898_v25, %v19814_v51  ;;  %v5590_v52 = vrot.slane %v13805_v22, %v19816_v28  ;;  %11631 = vpow2.f32 %v1945_v4 }
 0x28d   :  { %v2655_v39 = vrot.slane %v2647_v56, %v19814_v51  ;;  %v2662_v30 = vrot.slane %v2648_v21, %v19814_v51  ;;  %v14160_v60 = vsel %vm7195_vm7, %v5234_v48, %v7194_v5  ;;  %v14163_v16 = vsel %vm7193_vm5, %v5230_v0, %v7205_v44 }
 0x28e   :  { %v2913_v17 = vcombine.high %v2905_v57, %v2905_v57  ;;  %v2914_v10 = vcombine.high %v2912_v49, %v2912_v49  ;;  %v11410_v54 = vrot.slane %v2905_v57, 9  ;;  %v11412_v53 = vrot.slane %v2912_v49, 9  ;;  %19872 = vst [vmem:[#allocation129_spill] sm:$0xff] %v14160_v60 }
 0x28f   :  { %v7280_v11 = vsel %vm7191_vm4, %v5594_v20, %v5586_v18  ;;  %v7287_v32 = vsel %vm7191_vm4, %v5598_v41, %v5590_v52  ;;  %v5602_v4 = vrot.slane %v13807_v43, %v19815_v33  ;;  %v5606_v48 = vrot.slane %v13807_v43, %v19816_v28 }
 0x290   :  { %v11411_v22 = vrot.slane %v2913_v17, 9  ;;  %v11413_v8 = vrot.slane %v2914_v10, 9  ;;  %v14167_v40 = vmax.f32 %v2905_v57, %v11410_v54  ;;  %v14169_v46 = vmax.f32 %v2912_v49, %v11412_v53 }
 0x291   :  { %v2663_v44 = vcombine.high %v2655_v39, %v2655_v39  ;;  %v2664_v29 = vcombine.high %v2662_v30, %v2662_v30  ;;  %v14184_v63 = vsel %vm7193_vm5, %v5602_v4, %v7280_v11  ;;  %v14187_v45 = vsel %vm7193_vm5, %v5606_v48, %v7287_v32 }
 0x292   :  { %v14179_v37 = vmax.f32 %v2913_v17, %v11411_v22  ;;  %v14181_v1 = vmax.f32 %v2914_v10, %v11413_v8  ;;  %v6018_v43 = vrot.slane %v13882_v15, %v19815_v33  ;;  %v8047_v25 = vmul.f32 %v14167_v40, %v14167_v40 }
 0x293   :  { %v6022_v19 = vrot.slane %v13882_v15, %v19816_v28  ;;  %v6026_v41 = vrot.slane %v13889_v31, %v19815_v33  ;;  %v8049_v56 = vmul.f32 %v14169_v46, %v14169_v46  ;;  %v11356_v21 = vrot.slane %v2655_v39, 9 }
 0x294   :  { %v6030_v5 = vrot.slane %v13889_v31, %v19816_v28  ;;  %v8048_v18 = vmul.f32 %v14179_v37, %v14179_v37  ;;  %v8050_v57 = vmul.f32 %v14181_v1, %v14181_v1  ;;  %v11357_v49 = vrot.slane %v2663_v44, 9  ;;  %v11630_v32 = vpop.eup %11629 }
 0x295   :  { %v11358_v52 = vrot.slane %v2662_v30, 9  ;;  %v11359_v17 = vrot.slane %v2664_v29, 9  ;;  %v1445_v15 = vmul.f32 %v19744_v23, %v1196_v13  ;;  %v1446_v10 = vmul.f32 %v19745_v47, %v1196_v13 }
 0x296   :  { %v9036_v54 = vrot.slane %v8047_v25, %v19815_v33  ;;  %v9040_v53 = vrot.slane %v8047_v25, %v19816_v28  ;;  %v9044_v11 = vrot.slane %v8048_v18, %v19815_v33  ;;  %v9048_v31 = vrot.slane %v8048_v18, %v19816_v28 }
 0x297   :  { %v9052_v22 = vrot.slane %v8049_v56, %v19815_v33  ;;  %v9056_v8 = vrot.slane %v8049_v56, %v19816_v28  ;;  %v9060_v4 = vrot.slane %v8050_v57, %v19815_v33  ;;  %v14214_v48 = vmax.f32 %v2655_v39, %v11356_v21 }
 0x298   :  { %v9064_v20 = vrot.slane %v8050_v57, %v19816_v28  ;;  %v10579_v13 = vsel %vm7191_vm4, %v9044_v11, %v9036_v54  ;;  %v10586_v0 = vsel %vm7191_vm4, %v9048_v31, %v9040_v53  ;;  %v14219_v25 = vmax.f32 %v2663_v44, %v11357_v49  ;;  %v19873_v54 = vld [vmem:[#allocation62_spill] sm:$0xff]  ;;  %v1248_v44 = vpop.permute.xlu1 %1247 }
 0x299   :  { %v11632_v62 = vpop.eup %11631  ;;  %v10580_v18 = vsel %vm7193_vm5, %v9052_v22, %v10579_v13  ;;  %v10587_v6 = vsel %vm7193_vm5, %v9056_v8, %v10586_v0  ;;  %v14223_v12 = vmax.f32 %v2662_v30, %v11358_v52  ;;  %v14225_v56 = vmax.f32 %v2664_v29, %v11359_v17 }
 0x29a   :  { %v14228_v39 = vsel %vm7195_vm7, %v9060_v4, %v10580_v18  ;;  %v14231_v21 = vsel %vm7195_vm7, %v9064_v20, %v10587_v6  ;;  %v11216_v57 = vadd.f32 -1.0, %v11630_v32  ;;  %v14234_v53 = vadd.f32 %v1445_v15, %v19873_v54 }
 0x29b   :  { %v6034_v49 = vrot.slane %v13884_v27, %v19815_v33  ;;  %v6038_v30 = vrot.slane %v13884_v27, %v19816_v28  ;;  %v7374_v0 = vsel %vm7191_vm4, %v6026_v41, %v6018_v43  ;;  %v7381_v29 = vsel %vm7191_vm4, %v6030_v5, %v6022_v19  ;;  %v19874_v41 = vld [vmem:[#allocation63_spill] sm:$0xff] }
 0x29c   :  { %v7993_v52 = vmul.f32 %v14214_v48, %v14214_v48  ;;  %v7994_v6 = vmul.f32 %v14219_v25, %v14219_v25  ;;  %vm1683_vm9 = vcmp.gt.f32.partialorder %v14063_v42, 0.0  ;;  %v11217_v20 = vadd.f32 -1.0, %v11632_v62 }
 0x29d   :  { %v7995_v17 = vmul.f32 %v14223_v12, %v14223_v12  ;;  %v7996_v15 = vmul.f32 %v14225_v56, %v14225_v56  ;;  %vm1684_vm10 = vcmp.gt.f32.partialorder %v14066_v26, 0.0  ;;  %v1471_v27 = vmul.f32 %v19744_v23, %v1248_v44 }
 0x29e   :  { %v8604_v43 = vrot.slane %v7993_v52, %v19815_v33  ;;  %v2323_v19 = vsel %vm1683_vm9, %v14063_v42, %v11216_v57  ;;  %v14256_v5 = vadd.f32 %v1446_v10, %v19874_v41  ;;  %v1829_v11 = vmin.f32 %v14234_v53, 0.0 }
 0x29f   :  { %v8608_v62 = vrot.slane %v7993_v52, %v19816_v28  ;;  %v8612_v31 = vrot.slane %v7994_v6, %v19815_v33  ;;  %v8616_v32 = vrot.slane %v7994_v6, %v19816_v28  ;;  %v8620_v22 = vrot.slane %v7995_v17, %v19815_v33 }
 0x2a0   :  { %v8624_v8 = vrot.slane %v7995_v17, %v19816_v28  ;;  %v8628_v4 = vrot.slane %v7996_v15, %v19815_v33  ;;  %v8632_v13 = vrot.slane %v7996_v15, %v19816_v28  ;;  %v2324_v42 = vsel %vm1684_vm10, %v14066_v26, %v11217_v20 }
 0x2a1   :  { %v10485_v10 = vsel %vm7191_vm4, %v8612_v31, %v8604_v43  ;;  %v10492_v18 = vsel %vm7191_vm4, %v8616_v32, %v8608_v62  ;;  %v2611_v57 = vcombine.low %v2323_v19, %v2324_v42  ;;  %v2612_v54 = vcombine.high %v2323_v19, %v2324_v42  ;;  %v19877_v62 = vld [vmem:[#allocation68_spill] sm:$0xff] }
 0x2a2   :  { %v10486_v52 = vsel %vm7193_vm5, %v8620_v22, %v10485_v10  ;;  %v10493_v6 = vsel %vm7193_vm5, %v8624_v8, %v10492_v18  ;;  %v1830_v41 = vmin.f32 %v14256_v5, 0.0  ;;  %v1979_v35 = vmul.f32 1.442695, %v1829_v11 }
 0x2a3   :  { %v14273_v17 = vsel %vm7195_vm7, %v8628_v4, %v10486_v52  ;;  %v14276_v15 = vsel %vm7195_vm7, %v8632_v13, %v10493_v6  ;;  %v2619_v26 = vrot.slane %v2611_v57, %v19814_v51  ;;  %v2626_v20 = vrot.slane %v2612_v54, %v19814_v51 }
 0x2a4   :  { %19875 = vst [vmem:[#allocation39_spill] sm:$0xff] %v14273_v17  ;;  %19876 = vst [vmem:[#allocation133_spill] sm:$0xff] %v14276_v15  ;;  %v7375_v43 = vsel %vm7193_vm5, %v6034_v49, %v7374_v0  ;;  %11633 = vpow2.f32 %v1979_v35  ;;  %v1981_v19 = vmul.f32 1.442695, %v1830_v41  ;;  %v14282_v31 = vadd.f32 %v1471_v27, %v19877_v62  ;;  %v19888_v62 = vld [vmem:[#allocation69_spill] sm:$0xff] }
 0x2a5   :  { %v2627_v32 = vcombine.high %v2619_v26, %v2619_v26  ;;  %v2628_v22 = vcombine.high %v2626_v20, %v2626_v20  ;;  %v11348_v11 = vrot.slane %v2619_v26, 9  ;;  %v11350_v8 = vrot.slane %v2626_v20, 9 }
 0x2a6   :  { %v7382_v4 = vsel %vm7193_vm5, %v6038_v30, %v7381_v29  ;;  %v1005_v13 = vmul.f32 %v12284_v2, %v13937_v34  ;;  %11635 = vpow2.f32 %v1981_v19  ;;  %v1472_v42 = vmul.f32 %v19745_v47, %v1248_v44 }
 0x2a7   :  { %v11349_v10 = vrot.slane %v2627_v32, 9  ;;  %v11351_v18 = vrot.slane %v2628_v22, 9  ;;  %v14288_v49 = vmax.f32 %v2619_v26, %v11348_v11  ;;  %v14290_v35 = vmax.f32 %v2626_v20, %v11350_v8  ;;  %v1264_v26 = vpop.permute.xlu0 %1263  ;;  %v19886_v20 = vld [vmem:[#allocation123_spill] sm:$0xff] }
 0x2a8   :  { %v19878_v0 = vrot.slane %v13753_v36, %v19816_v28  ;;  %v6042_v30 = vrot.slane %v13891_v14, %v19815_v33  ;;  %v6046_v29 = vrot.slane %v13891_v14, %v19816_v28  ;;  %v1855_v44 = vmin.f32 %v14282_v31, 0.0 }
 0x2a9   :  { %v19880_v57 = vrot.slane %v13813_v50, %v19815_v33  ;;  %v19882_v36 = vrot.slane %v13813_v50, %v19816_v28  ;;  %v14318_v52 = vmax.f32 %v2627_v32, %v11349_v10  ;;  %v14320_v6 = vmax.f32 %v2628_v22, %v11351_v18 }
 0x2aa   :  { %v14297_v27 = vsel %vm7195_vm7, %v19878_v0, %v14163_v16  ;;  %v14323_v14 = vsel %vm7195_vm7, %v6042_v30, %v7375_v43  ;;  %v14326_v41 = vsel %vm7195_vm7, %v6046_v29, %v7382_v4  ;;  %v7985_v50 = vmul.f32 %v14288_v49, %v14288_v49 }
 0x2ab   :  { %19879 = vst [vmem:[#allocation62_spill] sm:$0xff] %v14297_v27  ;;  %v14309_v54 = vsel %vm7195_vm7, %v19880_v57, %v14184_v63  ;;  %v14316_v16 = vsel %vm7195_vm7, %v19882_v36, %v14187_v45  ;;  %19884 = vst [vmem:[#allocation141_spill] sm:$0xff] %v14323_v14  ;;  %v14330_v63 = vmul.f32 %v12298_v58, %v13937_v34  ;;  %v2031_v8 = vmul.f32 1.442695, %v1855_v44 }
 0x2ac   :  { %19881 = vst [vmem:[#allocation63_spill] sm:$0xff] %v14309_v54  ;;  %19883 = vst [vmem:[#allocation68_spill] sm:$0xff] %v14316_v16  ;;  %v5522_v45 = vrot.slane %v14077_v7, %v19815_v33  ;;  %v14337_v19 = vadd.f32 %v1005_v13, %v19886_v20  ;;  %v7987_v43 = vmul.f32 %v14290_v35, %v14290_v35  ;;  %vm1701_vm11 = vcmp.gt.f32.partialorder %v14234_v53, 0.0 }
 0x2ad   :  { %19885 = vst [vmem:[#allocation142_spill] sm:$0xff] %v14326_v41  ;;  %v14342_v32 = vadd.f32 %v1472_v42, %v19888_v62  ;;  %v5526_v34 = vrot.slane %v14077_v7, %v19816_v28  ;;  %v7986_v22 = vmul.f32 %v14318_v52, %v14318_v52  ;;  %v7988_v11 = vmul.f32 %v14320_v6, %v14320_v6 }
 0x2ae   :  { %19887 = vst [vmem:[#allocation123_spill] sm:$0xff] %v14337_v19  ;;  %v5530_v4 = vrot.slane %v14090_v59, %v19815_v33  ;;  %v5534_v13 = vrot.slane %v14090_v59, %v19816_v28  ;;  %v5538_v42 = vrot.slane %v14079_v24, %v19815_v33  ;;  %v1479_v10 = vmul.f32 %v19744_v23, %v1264_v26 }
 0x2af   :  { %v8540_v7 = vrot.slane %v7985_v50, %v19815_v33  ;;  %v8544_v18 = vrot.slane %v7985_v50, %v19816_v28  ;;  %v8548_v0 = vrot.slane %v7986_v22, %v19815_v33  ;;  %v8552_v30 = vrot.slane %v7986_v22, %v19816_v28  ;;  %v1232_v50 = vpop.permute.xlu1 %1231 }
 0x2b0   :  { %v8556_v29 = vrot.slane %v7987_v43, %v19815_v33  ;;  %v8560_v44 = vrot.slane %v7987_v43, %v19816_v28  ;;  %v8564_v57 = vrot.slane %v7988_v11, %v19815_v33  ;;  %v1856_v59 = vmin.f32 %v14342_v32, 0.0  ;;  %v19889_v43 = vld [vmem:[#allocation29_spill] sm:$0xff] }
 0x2b1   :  { %v8568_v36 = vrot.slane %v7988_v11, %v19816_v28  ;;  %v10471_v20 = vsel %vm7191_vm4, %v8548_v0, %v8540_v7  ;;  %v10478_v62 = vsel %vm7191_vm4, %v8552_v30, %v8544_v18  ;;  %11637 = vpow2.f32 %v2031_v8  ;;  %v11634_v15 = vpop.eup %11633  ;;  %v19892_v0 = vld [vmem:[#allocation73_spill] sm:$0xff] }
 0x2b2   :  { %v10472_v17 = vsel %vm7193_vm5, %v8556_v29, %v10471_v20  ;;  %v10479_v22 = vsel %vm7193_vm5, %v8560_v44, %v10478_v62  ;;  %v1480_v41 = vmul.f32 %v19745_v47, %v1264_v26  ;;  %v14372_v14 = vadd.f32 %v1479_v10, %v19889_v43 }
 0x2b3   :  { %v14375_v16 = vsel %vm7195_vm7, %v8564_v57, %v10472_v17  ;;  %v14378_v11 = vsel %vm7195_vm7, %v8568_v36, %v10479_v22  ;;  %v11234_v8 = vadd.f32 -1.0, %v11634_v15  ;;  %v11636_v7 = vpop.eup %11635  ;;  %v2033_v18 = vmul.f32 1.442695, %v1856_v59  ;;  %v1320_v59 = vpop.permute.xlu0 %1319  ;;  %v19893_v22 = vld [vmem:[#allocation60_spill] sm:$0xff] }
 0x2b4   :  { %19890 = vst [vmem:[#allocation69_spill] sm:$0xff] %v14375_v16  ;;  %19891 = vst [vmem:[#allocation29_spill] sm:$0xff] %v14378_v11  ;;  %v14382_v30 = vadd.f32 %v1480_v41, %v19892_v0  ;;  %v1863_v29 = vmin.f32 %v14372_v14, 0.0  ;;  %v1463_v26 = vmul.f32 %v19744_v23, %v1232_v50  ;;  %v5542_v10 = vrot.slane %v14079_v24, %v19816_v28  ;;  %v19894_v24 = vld [vmem:[#allocation61_spill] sm:$0xff] }
 0x2b5   :  { %v11235_v17 = vadd.f32 -1.0, %v11636_v7  ;;  %v2341_v44 = vsel %vm1701_vm11, %v14234_v53, %v11234_v8  ;;  %v1464_v57 = vmul.f32 %v19745_v47, %v1232_v50  ;;  %v7266_v36 = vsel %vm7191_vm4, %v5530_v4, %v5522_v45 }
 0x2b6   :  { %vm1702_vm12 = vcmp.gt.f32.partialorder %v14256_v5, 0.0  ;;  %v1864_v15 = vmin.f32 %v14382_v30, 0.0  ;;  %v2047_v41 = vmul.f32 1.442695, %v1863_v29  ;;  %v7273_v20 = vsel %vm7191_vm4, %v5534_v13, %v5526_v34 }
 0x2b7   :  { %v2342_v62 = vsel %vm1702_vm12, %v14256_v5, %v11235_v17  ;;  %v14396_v43 = vadd.f32 %v1463_v26, %v19893_v22  ;;  %v14399_v7 = vadd.f32 %v1464_v57, %v19894_v24  ;;  %11639 = vpow2.f32 %v2033_v18 }
 0x2b8   :  { %v2772_v53 = vcombine.low %v2341_v44, %v2342_v62  ;;  %v2773_v50 = vcombine.high %v2341_v44, %v2342_v62  ;;  %v2049_v45 = vmul.f32 1.442695, %v1864_v15  ;;  %v5546_v4 = vrot.slane %v14092_v55, %v19815_v33 }
 0x2b9   :  { %v7267_v8 = vsel %vm7193_vm5, %v5538_v42, %v7266_v36  ;;  %vm7199_vm14 = vcmask 1045509   ;;  %11641 = vpow2.f32 %v2047_v41  ;;  %v1507_v5 = vmul.f32 %v19744_v23, %v1320_v59 }
 0x2ba   :  { %v7274_v34 = vsel %vm7193_vm5, %v5542_v10, %v7273_v20  ;;  %vm7201_vm15 = vcmask 1046534   ;;  %v2780_v13 = vrot.slane %v2772_v53, %v19814_v51  ;;  %v2787_v0 = vrot.slane %v2773_v50, %v19814_v51  ;;  %v19895_v20 = vld [vmem:[#allocation93_spill] sm:$0xff] }
 0x2bb   :  { %11643 = vpow2.f32 %v2049_v45  ;;  %v5550_v18 = vrot.slane %v14092_v55, %v19816_v28  ;;  %vm7203_vm0 = vcmask 1047559   ;;  %v1847_v29 = vmin.f32 %v14396_v43, 0.0 }
 0x2bc   :  { %v1848_v42 = vmin.f32 %v14399_v7, 0.0  ;;  %v1508_v26 = vmul.f32 %v19745_v47, %v1320_v59  ;;  %v2788_v17 = vcombine.high %v2780_v13, %v2780_v13  ;;  %v2789_v44 = vcombine.high %v2787_v0, %v2787_v0 }
 0x2bd   :  { %v11383_v57 = vrot.slane %v2780_v13, 9  ;;  %v11385_v10 = vrot.slane %v2787_v0, 9  ;;  %v7268_v36 = vsel %vm7195_vm7, %v5546_v4, %v7267_v8  ;;  %v7275_v15 = vsel %vm7195_vm7, %v5550_v18, %v7274_v34  ;;  %v19896_v4 = vld [vmem:[#allocation94_spill] sm:$0xff] }
 0x2be   :  { %v14418_v55 = vadd.f32 %v1507_v5, %v19895_v20  ;;  %v11638_v62 = vpop.eup %11637  ;;  %v11384_v22 = vrot.slane %v2788_v17, 9  ;;  %v11386_v24 = vrot.slane %v2789_v44, 9  ;;  %vm1727_vm1 = vcmp.gt.f32.partialorder %v14282_v31, 0.0 }
 0x2bf   :  { %v4754_v53 = vmax.f32 %v2780_v13, %v11383_v57  ;;  %v4756_v50 = vmax.f32 %v2787_v0, %v11385_v10  ;;  %v11260_v59 = vadd.f32 -1.0, %v11638_v62  ;;  %v2015_v45 = vmul.f32 1.442695, %v1847_v29 }
 0x2c0   :  { %v14421_v54 = vmul.f32 1.442695, %v1848_v42  ;;  %v14424_v8 = vadd.f32 %v1508_v26, %v19896_v4  ;;  %v4755_v34 = vmax.f32 %v2788_v17, %v11384_v22  ;;  %v4757_v18 = vmax.f32 %v2789_v44, %v11386_v24 }
 0x2c1   :  { %v5554_v41 = vrot.slane %v4754_v53, %v19815_v33  ;;  %v5558_v5 = vrot.slane %v4754_v53, %v19816_v28  ;;  %v5570_v20 = vrot.slane %v4756_v50, %v19815_v33  ;;  %v5574_v13 = vrot.slane %v4756_v50, %v19816_v28 }
 0x2c2   :  { %v8020_v0 = vmul.f32 %v4754_v53, %v4754_v53  ;;  %v8022_v57 = vmul.f32 %v4756_v50, %v4756_v50  ;;  %vm1728_vm2 = vcmp.gt.f32.partialorder %v14342_v32, 0.0  ;;  %v5562_v29 = vrot.slane %v4755_v34, %v19815_v33 }
 0x2c3   :  { %v5566_v42 = vrot.slane %v4755_v34, %v19816_v28  ;;  %v5578_v26 = vrot.slane %v4757_v18, %v19815_v33  ;;  %v5582_v17 = vrot.slane %v4757_v18, %v19816_v28  ;;  %vm1735_vm3 = vcmp.gt.f32.partialorder %v14372_v14, 0.0 }
 0x2c4   :  { %vm1736_vm6 = vcmp.gt.f32.partialorder %v14382_v30, 0.0  ;;  %v7269_v44 = vsel %vm7197_vm13, %v5554_v41, %v7268_v36  ;;  %v7276_v10 = vsel %vm7197_vm13, %v5558_v5, %v7275_v15  ;;  %v8021_v62 = vmul.f32 %v4755_v34, %v4755_v34  ;;  %v11640_v11 = vpop.eup %11639 }
 0x2c5   :  { %v8023_v22 = vmul.f32 %v4757_v18, %v4757_v18  ;;  %v7270_v24 = vsel %vm7199_vm14, %v5562_v29, %v7269_v44  ;;  %v7277_v53 = vsel %vm7199_vm14, %v5566_v42, %v7276_v10  ;;  %v8820_v50 = vrot.slane %v8020_v0, %v19815_v33 }
 0x2c6   :  { %v8824_v4 = vrot.slane %v8020_v0, %v19816_v28  ;;  %v7271_v16 = vsel %vm7201_vm15, %v5570_v20, %v7270_v24  ;;  %v7278_v19 = vsel %vm7201_vm15, %v5574_v13, %v7277_v53  ;;  %v8828_v27 = vrot.slane %v8021_v62, %v19815_v33  ;;  %v11642_v15 = vpop.eup %11641 }
 0x2c7   :  { %v8832_v36 = vrot.slane %v8021_v62, %v19816_v28  ;;  %v7272_v41 = vsel %vm7203_vm0, %v5578_v26, %v7271_v16  ;;  %v7279_v34 = vsel %vm7203_vm0, %v5582_v17, %v7278_v19  ;;  %v8836_v18 = vrot.slane %v8022_v57, %v19815_v33 }
 0x2c8   :  { %v8840_v5 = vrot.slane %v8022_v57, %v19816_v28  ;;  %v11644_v29 = vpop.eup %11643  ;;  %7704 = vst [vmem:[%s19394_s3 + $0x50] sm:$0xff] %v7272_v41  ;;  %7705 = vst [vmem:[%s19394_s3 + $0x58] sm:$0xff] %v7279_v34  ;;  %v8844_v20 = vrot.slane %v8023_v22, %v19815_v33  ;;  %v8848_v13 = vrot.slane %v8023_v22, %v19816_v28  ;;  %v11261_v42 = vadd.f32 -1.0, %v11640_v11 }
 0x2c9   :  { %v10528_v16 = vsel %vm7197_vm13, %v8820_v50, %v14131_v9  ;;  %v10535_v19 = vsel %vm7197_vm13, %v8824_v4, %v14134_v61  ;;  %v2367_v26 = vsel %vm1727_vm1, %v14282_v31, %v11260_v59  ;;  %v11268_v10 = vadd.f32 -1.0, %v11642_v15 }
 0x2ca   :  { %v10529_v0 = vsel %vm7199_vm14, %v8828_v27, %v10528_v16  ;;  %v10536_v57 = vsel %vm7199_vm14, %v8832_v36, %v10535_v19  ;;  %v11269_v62 = vadd.f32 -1.0, %v11644_v29  ;;  %v2368_v27 = vsel %vm1728_vm2, %v14342_v32, %v11261_v42 }
 0x2cb   :  { %v10530_v17 = vsel %vm7201_vm15, %v8836_v18, %v10529_v0  ;;  %v10537_v44 = vsel %vm7201_vm15, %v8840_v5, %v10536_v57  ;;  %v1891_v11 = vmin.f32 %v14418_v55, 0.0  ;;  %v3004_v22 = vcombine.low %v2367_v26, %v2368_v27 }
 0x2cc   :  { %v14471_v9 = vsel %vm7203_vm0, %v8844_v20, %v10530_v17  ;;  %v14474_v61 = vsel %vm7203_vm0, %v8848_v13, %v10537_v44  ;;  %v3005_v31 = vcombine.high %v2367_v26, %v2368_v27  ;;  %v2375_v59 = vsel %vm1735_vm3, %v14372_v14, %v11268_v10 }
 0x2cd   :  { %v2376_v24 = vsel %vm1736_vm6, %v14382_v30, %v11269_v62  ;;  %11645 = vpow2.f32 %v2015_v45  ;;  %v1892_v4 = vmin.f32 %v14424_v8, 0.0  ;;  %v5770_v32 = vrot.slane %v14167_v40, %v19815_v33 }
 0x2ce   :  { %v3076_v53 = vcombine.low %v2375_v59, %v2376_v24  ;;  %v3077_v50 = vcombine.high %v2375_v59, %v2376_v24  ;;  %v5782_v36 = vrot.slane %v14179_v37, %v19816_v28  ;;  %v3012_v15 = vrot.slane %v3004_v22, %v19814_v51 }
 0x2cf   :  { %v3019_v41 = vrot.slane %v3005_v31, %v19814_v51  ;;  %11647 = vpow2.f32 %v14421_v54  ;;  %v2103_v30 = vmul.f32 1.442695, %v1891_v11  ;;  %v5774_v20 = vrot.slane %v14167_v40, %v19816_v28  ;;  %v19898_v11 = vld [vmem:[#allocation124_spill] sm:$0xff] }
 0x2d0   :  { %v3084_v14 = vrot.slane %v3076_v53, %v19814_v51  ;;  %v3091_v34 = vrot.slane %v3077_v50, %v19814_v51  ;;  %v3020_v45 = vcombine.high %v3012_v15, %v3012_v15  ;;  %v11433_v5 = vrot.slane %v3012_v15, 9 }
 0x2d1   :  { %v3021_v18 = vcombine.high %v3019_v41, %v3019_v41  ;;  %v11435_v29 = vrot.slane %v3019_v41, 9  ;;  %v5786_v13 = vrot.slane %v14169_v46, %v19815_v33  ;;  %v19897_v16 = vrot.slane %v14179_v37, %v19815_v33 }
 0x2d2   :  { %v2105_v0 = vmul.f32 1.442695, %v1892_v4  ;;  %v11434_v57 = vrot.slane %v3020_v45, 9  ;;  %v14504_v54 = vmax.f32 %v3012_v15, %v11433_v5  ;;  %v5790_v17 = vrot.slane %v14169_v46, %v19816_v28 }
 0x2d3   :  { %v7320_v19 = vsel %vm7191_vm4, %v19897_v16, %v5770_v32  ;;  %v11436_v42 = vrot.slane %v3021_v18, 9  ;;  %v14506_v26 = vmax.f32 %v3019_v41, %v11435_v29  ;;  %v7327_v40 = vsel %vm7191_vm4, %v5782_v36, %v5774_v20 }
 0x2d4   :  { %v3092_v44 = vcombine.high %v3084_v14, %v3084_v14  ;;  %11649 = vpow2.f32 %v2103_v30  ;;  %v7321_v10 = vsel %vm7193_vm5, %v5786_v13, %v7320_v19  ;;  %v14512_v62 = vmax.f32 %v3020_v45, %v11434_v57 }
 0x2d5   :  { %v14514_v37 = vmax.f32 %v3021_v18, %v11436_v42  ;;  %v3093_v27 = vcombine.high %v3091_v34, %v3091_v34  ;;  %v14518_v22 = vadd.f32 %v14330_v63, %v19898_v11  ;;  %v5794_v31 = vrot.slane %v14181_v1, %v19815_v33 }
 0x2d6   :  { %v8070_v46 = vmul.f32 %v14504_v54, %v14504_v54  ;;  %11651 = vpow2.f32 %v2105_v0  ;;  %v14527_v24 = vsel %vm7193_vm5, %v5790_v17, %v7327_v40  ;;  %v8072_v53 = vmul.f32 %v14506_v26, %v14506_v26 }
 0x2d7   :  { %19899 = vst [vmem:[#allocation73_spill] sm:$0xff] %v14518_v22  ;;  %v11449_v50 = vrot.slane %v3084_v14, 9  ;;  %v14532_v63 = vsel %vm7195_vm7, %v5794_v31, %v7321_v10  ;;  %v8071_v4 = vmul.f32 %v14512_v62, %v14512_v62  ;;  %v8073_v32 = vmul.f32 %v14514_v37, %v14514_v37 }
 0x2d8   :  { %v11450_v36 = vrot.slane %v3092_v44, 9  ;;  %v11451_v30 = vrot.slane %v3091_v34, 9  ;;  %v11452_v45 = vrot.slane %v3093_v27, 9  ;;  %v9220_v18 = vrot.slane %v8070_v46, %v19815_v33 }
 0x2d9   :  { %v9224_v5 = vrot.slane %v8070_v46, %v19816_v28  ;;  %v9228_v29 = vrot.slane %v8071_v4, %v19815_v33  ;;  %v9232_v20 = vrot.slane %v8071_v4, %v19816_v28  ;;  %v9236_v16 = vrot.slane %v8072_v53, %v19815_v33 }
 0x2da   :  { %v11646_v13 = vpop.eup %11645  ;;  %v9240_v19 = vrot.slane %v8072_v53, %v19816_v28  ;;  %v9244_v0 = vrot.slane %v8073_v32, %v19815_v33  ;;  %v14549_v57 = vmax.f32 %v3084_v14, %v11449_v50  ;;  %v9248_v42 = vrot.slane %v8073_v32, %v19816_v28 }
 0x2db   :  { %v10619_v17 = vsel %vm7191_vm4, %v9228_v29, %v9220_v18  ;;  %v10626_v40 = vsel %vm7191_vm4, %v9232_v20, %v9224_v5  ;;  %v14554_v10 = vmax.f32 %v3092_v44, %v11450_v36  ;;  %v14558_v4 = vmax.f32 %v3091_v34, %v11451_v30  ;;  %v1288_v36 = vpop.permute.xlu1 %1287 }
 0x2dc   :  { %v11648_v11 = vpop.eup %11647  ;;  %v10620_v31 = vsel %vm7193_vm5, %v9236_v16, %v10619_v17  ;;  %v10627_v46 = vsel %vm7193_vm5, %v9240_v19, %v10626_v40  ;;  %v14560_v53 = vmax.f32 %v3093_v27, %v11452_v45  ;;  %v5346_v14 = vrot.slane %v14219_v25, %v19815_v33 }
 0x2dd   :  { %v14565_v50 = vsel %vm7195_vm7, %v9244_v0, %v10620_v31  ;;  %v14568_v32 = vsel %vm7195_vm7, %v9248_v42, %v10627_v46  ;;  %v11252_v44 = vadd.f32 -1.0, %v11646_v13  ;;  %v5350_v18 = vrot.slane %v14219_v25, %v19816_v28 }
 0x2de   :  { %19900 = vst [vmem:[#allocation60_spill] sm:$0xff] %v14565_v50  ;;  %19901 = vst [vmem:[#allocation61_spill] sm:$0xff] %v14568_v32  ;;  %v5354_v34 = vrot.slane %v14223_v12, %v19815_v33  ;;  %v5358_v27 = vrot.slane %v14223_v12, %v19816_v28  ;;  %vm1719_vm8 = vcmp.gt.f32.partialorder %v14396_v43, 0.0  ;;  %v8086_v30 = vmul.f32 %v14549_v57, %v14549_v57  ;;  %v1228_v50 = vpop.permute.xlu0 %1227 }
 0x2df   :  { %v8087_v45 = vmul.f32 %v14554_v10, %v14554_v10  ;;  %vm1720_vm9 = vcmp.gt.f32.partialorder %v14399_v7, 0.0  ;;  %v11253_v5 = vadd.f32 -1.0, %v11648_v11  ;;  %v8088_v25 = vmul.f32 %v14558_v4, %v14558_v4 }
 0x2e0   :  { %v8089_v20 = vmul.f32 %v14560_v53, %v14560_v53  ;;  %vm1763_vm10 = vcmp.gt.f32.partialorder %v14418_v55, 0.0  ;;  %v1491_v12 = vmul.f32 %v19744_v23, %v1288_v36  ;;  %v9348_v13 = vrot.slane %v8086_v30, %v19815_v33 }
 0x2e1   :  { %v11650_v29 = vpop.eup %11649  ;;  %v9352_v16 = vrot.slane %v8086_v30, %v19816_v28  ;;  %v2359_v19 = vsel %vm1719_vm8, %v14396_v43, %v11252_v44  ;;  %v1492_v0 = vmul.f32 %v19745_v47, %v1288_v36  ;;  %v9356_v17 = vrot.slane %v8087_v45, %v19815_v33 }
 0x2e2   :  { %v9360_v40 = vrot.slane %v8087_v45, %v19816_v28  ;;  %v9364_v11 = vrot.slane %v8088_v25, %v19815_v33  ;;  %v9368_v31 = vrot.slane %v8088_v25, %v19816_v28  ;;  %v9372_v46 = vrot.slane %v8089_v20, %v19815_v33 }
 0x2e3   :  { %v11652_v42 = vpop.eup %11651  ;;  %v9376_v59 = vrot.slane %v8089_v20, %v19816_v28  ;;  %v2360_v30 = vsel %vm1720_vm9, %v14399_v7, %v11253_v5  ;;  %v11296_v43 = vadd.f32 -1.0, %v11650_v29  ;;  %v10647_v44 = vsel %vm7191_vm4, %v9356_v17, %v9348_v13 }
 0x2e4   :  { %v10654_v36 = vsel %vm7191_vm4, %v9360_v40, %v9352_v16  ;;  %v2933_v41 = vcombine.low %v2359_v19, %v2360_v30  ;;  %v2934_v15 = vcombine.high %v2359_v19, %v2360_v30  ;;  %v10648_v45 = vsel %vm7193_vm5, %v9364_v11, %v10647_v44  ;;  %v19904_v16 = vld [vmem:[#allocation79_spill] sm:$0xff] }
 0x2e5   :  { %v10655_v22 = vsel %vm7193_vm5, %v9368_v31, %v10654_v36  ;;  %vm1764_vm11 = vcmp.gt.f32.partialorder %v14424_v8, 0.0  ;;  %v11297_v25 = vadd.f32 -1.0, %v11652_v42  ;;  %v14607_v20 = vsel %vm7195_vm7, %v9372_v46, %v10648_v45  ;;  %v19905_v42 = vld [vmem:[#allocation80_spill] sm:$0xff] }
 0x2e6   :  { %19902 = vst [vmem:[#allocation93_spill] sm:$0xff] %v14607_v20  ;;  %v14610_v32 = vsel %vm7195_vm7, %v9376_v59, %v10655_v22  ;;  %v2941_v7 = vrot.slane %v2933_v41, %v19814_v51  ;;  %v2948_v5 = vrot.slane %v2934_v15, %v19814_v51  ;;  %v2403_v29 = vsel %vm1763_vm10, %v14418_v55, %v11296_v43 }
 0x2e7   :  { %19903 = vst [vmem:[#allocation94_spill] sm:$0xff] %v14610_v32  ;;  %v2404_v13 = vsel %vm1764_vm11, %v14424_v8, %v11297_v25  ;;  %v14619_v19 = vadd.f32 %v1491_v12, %v19904_v16  ;;  %v14622_v17 = vadd.f32 %v1492_v0, %v19905_v42  ;;  %v19906_v55 = vrot.slane %v14214_v48, %v19815_v33 }
 0x2e8   :  { %v2949_v40 = vcombine.high %v2941_v7, %v2941_v7  ;;  %v2950_v11 = vcombine.high %v2948_v5, %v2948_v5  ;;  %v11418_v22 = vrot.slane %v2941_v7, 9  ;;  %v11420_v59 = vrot.slane %v2948_v5, 9 }
 0x2e9   :  { %v7226_v8 = vsel %vm7191_vm4, %v5346_v14, %v19906_v55  ;;  %v19907_v12 = vrot.slane %v14214_v48, %v19816_v28  ;;  %v5282_v44 = vrot.slane %v14318_v52, %v19815_v33  ;;  %v5286_v36 = vrot.slane %v14318_v52, %v19816_v28 }
 0x2ea   :  { %v11419_v31 = vrot.slane %v2949_v40, 9  ;;  %v11421_v46 = vrot.slane %v2950_v11, 9  ;;  %v14636_v30 = vmax.f32 %v2941_v7, %v11418_v22  ;;  %v14638_v43 = vmax.f32 %v2948_v5, %v11420_v59 }
 0x2eb   :  { %v7233_v0 = vsel %vm7191_vm4, %v5350_v18, %v19907_v12  ;;  %v3326_v45 = vcombine.low %v2403_v29, %v2404_v13  ;;  %v3327_v25 = vcombine.high %v2403_v29, %v2404_v13  ;;  %v1875_v48 = vmin.f32 %v14619_v19, 0.0 }
 0x2ec   :  { %v14644_v14 = vmax.f32 %v2949_v40, %v11419_v31  ;;  %v14646_v16 = vmax.f32 %v2950_v11, %v11421_v46  ;;  %v1876_v18 = vmin.f32 %v14622_v17, 0.0  ;;  %v7227_v7 = vsel %vm7193_vm5, %v5354_v34, %v7226_v8 }
 0x2ed   :  { %v7234_v5 = vsel %vm7193_vm5, %v5358_v27, %v7233_v0  ;;  %v5274_v42 = vrot.slane %v14288_v49, %v19815_v33  ;;  %v8055_v52 = vmul.f32 %v14636_v30, %v14636_v30  ;;  %v5278_v29 = vrot.slane %v14288_v49, %v19816_v28 }
 0x2ee   :  { %v5290_v13 = vrot.slane %v14290_v35, %v19815_v33  ;;  %v5294_v40 = vrot.slane %v14290_v35, %v19816_v28  ;;  %v8057_v34 = vmul.f32 %v14638_v43, %v14638_v43  ;;  %v8056_v27 = vmul.f32 %v14644_v14, %v14644_v14 }
 0x2ef   :  { %v8058_v11 = vmul.f32 %v14646_v16, %v14646_v16  ;;  %v3334_v22 = vrot.slane %v3326_v45, %v19814_v51  ;;  %v3341_v59 = vrot.slane %v3327_v25, %v19814_v51  ;;  %v7212_v49 = vsel %vm7191_vm4, %v5282_v44, %v5274_v42 }
 0x2f0   :  { %v7219_v55 = vsel %vm7191_vm4, %v5286_v36, %v5278_v29  ;;  %v2071_v8 = vmul.f32 1.442695, %v1875_v48  ;;  %v2073_v12 = vmul.f32 1.442695, %v1876_v18  ;;  %v9100_v35 = vrot.slane %v8055_v52, %v19815_v33 }
 0x2f1   :  { %v9104_v0 = vrot.slane %v8055_v52, %v19816_v28  ;;  %v9108_v31 = vrot.slane %v8056_v27, %v19815_v33  ;;  %v9112_v46 = vrot.slane %v8056_v27, %v19816_v28  ;;  %v9116_v15 = vrot.slane %v8057_v34, %v19815_v33 }
 0x2f2   :  { %v9120_v45 = vrot.slane %v8057_v34, %v19816_v28  ;;  %v9124_v25 = vrot.slane %v8058_v11, %v19815_v33  ;;  %v9128_v44 = vrot.slane %v8058_v11, %v19816_v28  ;;  %v3342_v18 = vcombine.high %v3334_v22, %v3334_v22 }
 0x2f3   :  { %v10593_v36 = vsel %vm7191_vm4, %v9108_v31, %v9100_v35  ;;  %v10600_v48 = vsel %vm7191_vm4, %v9112_v46, %v9104_v0  ;;  %v3343_v42 = vcombine.high %v3341_v59, %v3341_v59  ;;  %v11503_v41 = vrot.slane %v3334_v22, 9 }
 0x2f4   :  { %v10594_v52 = vsel %vm7193_vm5, %v9116_v15, %v10593_v36  ;;  %v10601_v29 = vsel %vm7193_vm5, %v9120_v45, %v10600_v48  ;;  %v11505_v27 = vrot.slane %v3341_v59, 9  ;;  %v11504_v20 = vrot.slane %v3342_v18, 9 }
 0x2f5   :  { %v14685_v32 = vsel %vm7195_vm7, %v9124_v25, %v10594_v52  ;;  %v14688_v34 = vsel %vm7195_vm7, %v9128_v44, %v10601_v29  ;;  %v11506_v11 = vrot.slane %v3343_v42, 9  ;;  %v7213_v35 = vsel %vm7193_vm5, %v5290_v13, %v7212_v49  ;;  %v19916_v52 = vld [vmem:[#allocation74_spill] sm:$0xff] }
 0x2f6   :  { %19908 = vst [vmem:[#allocation124_spill] sm:$0xff] %v14685_v32  ;;  %19909 = vst [vmem:[#allocation79_spill] sm:$0xff] %v14688_v34  ;;  %v14691_v0 = vmax.f32 %v3334_v22, %v11503_v41  ;;  %v14693_v31 = vmax.f32 %v3341_v59, %v11505_v27  ;;  %11653 = vpow2.f32 %v2071_v8  ;;  %v5298_v15 = vrot.slane %v14320_v6, %v19815_v33  ;;  %v19917_v27 = vld [vmem:[#allocation24_spill] sm:$0xff] }
 0x2f7   :  { %v14697_v46 = vmax.f32 %v3342_v18, %v11504_v20  ;;  %v14699_v45 = vmax.f32 %v3343_v42, %v11506_v11  ;;  %11655 = vpow2.f32 %v2073_v12  ;;  %v19910_v25 = vrot.slane %v14181_v1, %v19816_v28  ;;  %v14738_v12 = vpop.permute.xlu1 %853  ;;  %v1296_v1 = vpop.permute.xlu0 %1295 }
 0x2f8   :  { %v19911_v41 = vrot.slane %v14225_v56, %v19815_v33  ;;  %v1461_v22 = vmul.f32 %v19744_v23, %v1228_v50  ;;  %v1462_v20 = vmul.f32 %v19745_v47, %v1228_v50  ;;  %v19913_v59 = vrot.slane %v14225_v56, %v19816_v28 }
 0x2f9   :  { %v14706_v44 = vsel %vm7195_vm7, %v19910_v25, %v14527_v24  ;;  %v14725_v24 = vsel %vm7195_vm7, %v5298_v15, %v7213_v35  ;;  %v14728_v8 = vsel %vm7193_vm5, %v5294_v40, %v7219_v55  ;;  %v8140_v50 = vmul.f32 %v14691_v0, %v14691_v0 }
 0x2fa   :  { %v14712_v13 = vsel %vm7195_vm7, %v19911_v41, %v7227_v7  ;;  %v14720_v49 = vsel %vm7195_vm7, %v19913_v59, %v7234_v5  ;;  %19915 = vst [vmem:[#allocation144_spill] sm:$0xff] %v14725_v24  ;;  %v5962_v7 = vrot.slane %v14512_v62, %v19815_v33  ;;  %v8141_v56 = vmul.f32 %v14697_v46, %v14697_v46 }
 0x2fb   :  { %19912 = vst [vmem:[#allocation80_spill] sm:$0xff] %v14712_v13  ;;  %19914 = vst [vmem:[#allocation143_spill] sm:$0xff] %v14720_v49  ;;  %v8142_v5 = vmul.f32 %v14693_v31, %v14693_v31  ;;  %v5954_v36 = vrot.slane %v14504_v54, %v19815_v33  ;;  %v5958_v40 = vrot.slane %v14504_v54, %v19816_v28  ;;  %vm1747_vm12 = vcmp.gt.f32.partialorder %v14619_v19, 0.0 }
 0x2fc   :  { %v5970_v55 = vrot.slane %v14506_v26, %v19815_v33  ;;  %v8143_v48 = vmul.f32 %v14699_v45, %v14699_v45  ;;  %v5966_v18 = vrot.slane %v14512_v62, %v19816_v28  ;;  %v14753_v29 = vadd.f32 %v1461_v22, %v19916_v52 }
 0x2fd   :  { %v14756_v11 = vadd.f32 %v1462_v20, %v19917_v27  ;;  %v9780_v54 = vrot.slane %v8140_v50, %v19815_v33  ;;  %v9784_v35 = vrot.slane %v8140_v50, %v19816_v28  ;;  %v9788_v15 = vrot.slane %v8141_v56, %v19815_v33 }
 0x2fe   :  { %v9792_v25 = vrot.slane %v8141_v56, %v19816_v28  ;;  %v7360_v41 = vsel %vm7191_vm4, %v5962_v7, %v5954_v36  ;;  %v9796_v59 = vrot.slane %v8142_v5, %v19815_v33  ;;  %v9800_v22 = vrot.slane %v8142_v5, %v19816_v28  ;;  %v1188_v36 = vpop.permute.xlu1 %1187 }
 0x2ff   :  { %v9804_v20 = vrot.slane %v8143_v48, %v19815_v33  ;;  %v9808_v52 = vrot.slane %v8143_v48, %v19816_v28  ;;  %v10741_v27 = vsel %vm7191_vm4, %v9788_v15, %v9780_v54  ;;  %v1845_v62 = vmin.f32 %v14753_v29, 0.0 }
 0x300   :  { %v10748_v50 = vsel %vm7191_vm4, %v9792_v25, %v9784_v35  ;;  %v10742_v56 = vsel %vm7193_vm5, %v9796_v59, %v10741_v27  ;;  %v1846_v7 = vmin.f32 %v14756_v11, 0.0  ;;  %v14776_v5 = vsel %vm7193_vm5, %v5970_v55, %v7360_v41  ;;  %v19920_v27 = vld [vmem:[#allocation83_spill] sm:$0xff] }
 0x301   :  { %v10749_v42 = vsel %vm7193_vm5, %v9800_v22, %v10748_v50  ;;  %v7367_v49 = vsel %vm7191_vm4, %v5966_v18, %v5958_v40  ;;  %v14780_v48 = vsel %vm7195_vm7, %v9804_v20, %v10742_v56  ;;  %v6082_v35 = vrot.slane %v14549_v57, %v19815_v33  ;;  %v19921_v50 = vld [vmem:[#allocation84_spill] sm:$0xff] }
 0x302   :  { %19918 = vst [vmem:[#allocation74_spill] sm:$0xff] %v14780_v48  ;;  %v14783_v54 = vsel %vm7195_vm7, %v9808_v52, %v10749_v42  ;;  %v2011_v15 = vmul.f32 1.442695, %v1845_v62  ;;  %v1495_v25 = vmul.f32 %v19744_v23, %v1296_v1  ;;  %v1496_v59 = vmul.f32 %v19745_v47, %v1296_v1  ;;  %v19923_v48 = vld [vmem:[#allocation59_spill] sm:$0xff] }
 0x303   :  { %19919 = vst [vmem:[#allocation24_spill] sm:$0xff] %v14783_v54  ;;  %v11654_v22 = vpop.eup %11653  ;;  %v6090_v55 = vrot.slane %v14554_v10, %v19815_v33  ;;  %v2013_v41 = vmul.f32 1.442695, %v1846_v7  ;;  %v1441_v40 = vmul.f32 %v19744_v23, %v1188_v36  ;;  %v1442_v18 = vmul.f32 %v19745_v47, %v1188_v36  ;;  %v19922_v54 = vld [vmem:[#allocation57_spill] sm:$0xff] }
 0x304   :  { %v11656_v20 = vpop.eup %11655  ;;  %v6094_v42 = vrot.slane %v14554_v10, %v19816_v28  ;;  %v11280_v52 = vadd.f32 -1.0, %v11654_v22  ;;  %v14796_v62 = vadd.f32 %v1495_v25, %v19920_v27  ;;  %v14799_v56 = vadd.f32 %v1496_v59, %v19921_v50  ;;  %v1352_v25 = vpop.permute.xlu0 %1351 }
 0x305   :  { %v11281_v1 = vadd.f32 -1.0, %v11656_v20  ;;  %v14803_v7 = vadd.f32 %v1441_v40, %v19922_v54  ;;  %v14806_v13 = vadd.f32 %v1442_v18, %v19923_v48  ;;  %vm1748_vm1 = vcmp.gt.f32.partialorder %v14622_v17, 0.0 }
 0x306   :  { %v2387_v10 = vsel %vm1747_vm12, %v14619_v19, %v11280_v52  ;;  %11657 = vpow2.f32 %v2011_v15  ;;  %v1879_v36 = vmin.f32 %v14796_v62, 0.0  ;;  %v7388_v59 = vsel %vm7191_vm4, %v6090_v55, %v6082_v35 }
 0x307   :  { %v2388_v22 = vsel %vm1748_vm1, %v14622_v17, %v11281_v1  ;;  %11659 = vpow2.f32 %v2013_v41  ;;  %v1880_v20 = vmin.f32 %v14799_v56, 0.0  ;;  %v1825_v48 = vmin.f32 %v14803_v7, 0.0  ;;  %v19924_v41 = vld [vmem:[#allocation104_spill] sm:$0xff] }
 0x308   :  { %v3183_v54 = vcombine.low %v2387_v10, %v2388_v22  ;;  %v3184_v40 = vcombine.high %v2387_v10, %v2388_v22  ;;  %v2079_v27 = vmul.f32 1.442695, %v1879_v36  ;;  %v1826_v50 = vmin.f32 %v14806_v13, 0.0  ;;  %v19925_v10 = vld [vmem:[#allocation19_spill] sm:$0xff] }
 0x309   :  { %v2081_v18 = vmul.f32 1.442695, %v1880_v20  ;;  %v1523_v19 = vmul.f32 %v19744_v23, %v1352_v25  ;;  %v1524_v15 = vmul.f32 %v19745_v47, %v1352_v25  ;;  %v1971_v17 = vmul.f32 1.442695, %v1825_v48 }
 0x30a   :  { %v3191_v52 = vrot.slane %v3183_v54, %v19814_v51  ;;  %v3198_v35 = vrot.slane %v3184_v40, %v19814_v51  ;;  %11661 = vpow2.f32 %v2079_v27  ;;  %v1973_v55 = vmul.f32 1.442695, %v1826_v50 }
 0x30b   :  { %11663 = vpow2.f32 %v2081_v18  ;;  %v14821_v1 = vadd.f32 %v1523_v19, %v19924_v41  ;;  %v14824_v36 = vadd.f32 %v1524_v15, %v19925_v10  ;;  %v19926_v25 = vrot.slane %v14506_v26, %v19816_v28 }
 0x30c   :  { %v3199_v22 = vcombine.high %v3191_v52, %v3191_v52  ;;  %v3200_v20 = vcombine.high %v3198_v35, %v3198_v35  ;;  %v11472_v34 = vrot.slane %v3191_v52, 9  ;;  %v11474_v32 = vrot.slane %v3198_v35, 9 }
 0x30d   :  { %v7368_v54 = vsel %vm7193_vm5, %v19926_v25, %v7367_v49  ;;  %v6086_v40 = vrot.slane %v14549_v57, %v19816_v28  ;;  %v6098_v27 = vrot.slane %v14558_v4, %v19815_v33  ;;  %11665 = vpow2.f32 %v1971_v17 }
 0x30e   :  { %v11473_v48 = vrot.slane %v3199_v22, 9  ;;  %v11475_v18 = vrot.slane %v3200_v20, 9  ;;  %v14834_v50 = vmax.f32 %v3191_v52, %v11472_v34  ;;  %v14836_v19 = vmax.f32 %v3198_v35, %v11474_v32 }
 0x30f   :  { %v5982_v15 = vrot.slane %v14514_v37, %v19816_v28  ;;  %v7389_v26 = vsel %vm7193_vm5, %v6098_v27, %v7388_v59  ;;  %v7395_v49 = vsel %vm7191_vm4, %v6094_v42, %v6086_v40  ;;  %11667 = vpow2.f32 %v1973_v55 }
 0x310   :  { %v6102_v57 = vrot.slane %v14558_v4, %v19816_v28  ;;  %v6106_v17 = vrot.slane %v14560_v53, %v19815_v33  ;;  %v14846_v41 = vmax.f32 %v3199_v22, %v11473_v48  ;;  %v14848_v34 = vmax.f32 %v3200_v20, %v11475_v18 }
 0x311   :  { %v19928_v32 = vrot.slane %v14320_v6, %v19816_v28  ;;  %v19930_v42 = vrot.slane %v14514_v37, %v19815_v33  ;;  %v14865_v59 = vsel %vm7195_vm7, %v5982_v15, %v7368_v54  ;;  %v8109_v35 = vmul.f32 %v14834_v50, %v14834_v50 }
 0x312   :  { %19927 = vst [vmem:[#allocation83_spill] sm:$0xff] %v14848_v34  ;;  %19932 = vst [vmem:[#allocation59_spill] sm:$0xff] %v14865_v59  ;;  %v14872_v6 = vsel %vm7195_vm7, %v6106_v17, %v7389_v26  ;;  %v8111_v37 = vmul.f32 %v14836_v19, %v14836_v19  ;;  %v8110_v22 = vmul.f32 %v14846_v41, %v14846_v41  ;;  %vm1717_vm2 = vcmp.gt.f32.partialorder %v14753_v29, 0.0 }
 0x313   :  { %v14855_v52 = vsel %vm7195_vm7, %v19928_v32, %v14728_v8  ;;  %v14862_v4 = vsel %vm7195_vm7, %v19930_v42, %v14776_v5  ;;  %19933 = vst [vmem:[#allocation104_spill] sm:$0xff] %v14872_v6  ;;  %v14875_v8 = vsel %vm7193_vm5, %v6102_v57, %v7395_v49  ;;  %v11658_v5 = vpop.eup %11657  ;;  %v8112_v20 = vmul.f32 %v14848_v34, %v14848_v34 }
 0x314   :  { %19929 = vst [vmem:[#allocation84_spill] sm:$0xff] %v14855_v52  ;;  %19931 = vst [vmem:[#allocation57_spill] sm:$0xff] %v14862_v4  ;;  %v11660_v25 = vpop.eup %11659  ;;  %vm1718_vm3 = vcmp.gt.f32.partialorder %v14756_v11, 0.0  ;;  %vm1751_vm6 = vcmp.gt.f32.partialorder %v14796_v62, 0.0  ;;  %v1907_v54 = vmin.f32 %v14821_v1, 0.0  ;;  %v1908_v40 = vmin.f32 %v14824_v36, 0.0 }
 0x315   :  { %v9532_v27 = vrot.slane %v8109_v35, %v19815_v33  ;;  %v9536_v48 = vrot.slane %v8109_v35, %v19816_v28  ;;  %v9540_v18 = vrot.slane %v8110_v22, %v19815_v33  ;;  %v9544_v15 = vrot.slane %v8110_v22, %v19816_v28 }
 0x316   :  { %v9548_v26 = vrot.slane %v8111_v37, %v19815_v33  ;;  %v9552_v49 = vrot.slane %v8111_v37, %v19816_v28  ;;  %v9556_v57 = vrot.slane %v8112_v20, %v19815_v33  ;;  %v9560_v17 = vrot.slane %v8112_v20, %v19816_v28 }
 0x317   :  { %v11662_v32 = vpop.eup %11661  ;;  %v10687_v42 = vsel %vm7191_vm4, %v9540_v18, %v9532_v27  ;;  %v10694_v10 = vsel %vm7191_vm4, %v9544_v15, %v9536_v48  ;;  %v11250_v55 = vadd.f32 -1.0, %v11658_v5  ;;  %v11251_v6 = vadd.f32 -1.0, %v11660_v25 }
 0x318   :  { %v11664_v35 = vpop.eup %11663  ;;  %v10688_v52 = vsel %vm7193_vm5, %v9548_v26, %v10687_v42  ;;  %v10695_v22 = vsel %vm7193_vm5, %v9552_v49, %v10694_v10  ;;  %v11284_v24 = vadd.f32 -1.0, %v11662_v32  ;;  %v2135_v59 = vmul.f32 1.442695, %v1907_v54 }
 0x319   :  { %v14903_v37 = vsel %vm7195_vm7, %v9556_v57, %v10688_v52  ;;  %v14906_v4 = vsel %vm7195_vm7, %v9560_v17, %v10695_v22  ;;  %v2357_v20 = vsel %vm1717_vm2, %v14753_v29, %v11250_v55  ;;  %v2358_v5 = vsel %vm1718_vm3, %v14756_v11, %v11251_v6 }
 0x31a   :  { %19934 = vst [vmem:[#allocation19_spill] sm:$0xff] %v14903_v37  ;;  %19935 = vst [vmem:[#allocation145_spill] sm:$0xff] %v14906_v4  ;;  %v11666_v25 = vpop.eup %11665  ;;  %v2915_v27 = vcombine.low %v2357_v20, %v2358_v5  ;;  %v2916_v48 = vcombine.high %v2357_v20, %v2358_v5  ;;  %v11285_v10 = vadd.f32 -1.0, %v11664_v35  ;;  %v2391_v52 = vsel %vm1751_vm6, %v14796_v62, %v11284_v24 }
 0x31b   :  { %vm1752_vm8 = vcmp.gt.f32.partialorder %v14799_v56, 0.0  ;;  %v2137_v29 = vmul.f32 1.442695, %v1908_v40  ;;  %v14927_v49 = vadd.f32 -1.0, %v11666_v25  ;;  %11669 = vpow2.f32 %v2135_v59 }
 0x31c   :  { %v11668_v55 = vpop.eup %11667  ;;  %v2923_v6 = vrot.slane %v2915_v27, %v19814_v51  ;;  %v2930_v15 = vrot.slane %v2916_v48, %v19814_v51  ;;  %v2392_v26 = vsel %vm1752_vm8, %v14799_v56, %v11285_v10  ;;  %vm1697_vm9 = vcmp.gt.f32.partialorder %v14803_v7, 0.0 }
 0x31d   :  { %v3219_v24 = vcombine.low %v2391_v52, %v2392_v26  ;;  %v3220_v62 = vcombine.high %v2391_v52, %v2392_v26  ;;  %v14931_v22 = vadd.f32 -1.0, %v11668_v55  ;;  %11671 = vpow2.f32 %v2137_v29 }
 0x31e   :  { %v2931_v57 = vcombine.high %v2923_v6, %v2923_v6  ;;  %v2932_v17 = vcombine.high %v2930_v15, %v2930_v15  ;;  %v11414_v32 = vrot.slane %v2923_v6, 9  ;;  %v11416_v42 = vrot.slane %v2930_v15, 9 }
 0x31f   :  { %v3227_v40 = vrot.slane %v3219_v24, %v19814_v51  ;;  %v3234_v35 = vrot.slane %v3220_v62, %v19814_v51  ;;  %vm1698_vm10 = vcmp.gt.f32.partialorder %v14806_v13, 0.0  ;;  %vm1779_vm11 = vcmp.gt.f32.partialorder %v14821_v1, 0.0 }
 0x320   :  { %v11415_v20 = vrot.slane %v2931_v57, 9  ;;  %v11417_v5 = vrot.slane %v2932_v17, 9  ;;  %v4785_v27 = vmax.f32 %v2923_v6, %v11414_v32  ;;  %v4787_v56 = vmax.f32 %v2930_v15, %v11416_v42 }
 0x321   :  { %v3235_v48 = vcombine.high %v3227_v40, %v3227_v40  ;;  %v3236_v10 = vcombine.high %v3234_v35, %v3234_v35  ;;  %v11480_v25 = vrot.slane %v3227_v40, 9  ;;  %v11482_v52 = vrot.slane %v3234_v35, 9 }
 0x322   :  { %v4786_v59 = vmax.f32 %v2931_v57, %v11415_v20  ;;  %v4788_v26 = vmax.f32 %v2932_v17, %v11417_v5  ;;  %v5802_v11 = vrot.slane %v4785_v27, %v19815_v33  ;;  %v5806_v54 = vrot.slane %v4785_v27, %v19816_v28 }
 0x323   :  { %v5818_v24 = vrot.slane %v4787_v56, %v19815_v33  ;;  %v5822_v55 = vrot.slane %v4787_v56, %v19816_v28  ;;  %v8051_v62 = vmul.f32 %v4785_v27, %v4785_v27  ;;  %v8053_v29 = vmul.f32 %v4787_v56, %v4787_v56 }
 0x324   :  { %v5810_v18 = vrot.slane %v4786_v59, %v19815_v33  ;;  %v5814_v6 = vrot.slane %v4786_v59, %v19816_v28  ;;  %v5826_v15 = vrot.slane %v4788_v26, %v19815_v33  ;;  %v5830_v32 = vrot.slane %v4788_v26, %v19816_v28 }
 0x325   :  { %v7323_v57 = vsel %vm7197_vm13, %v5802_v11, %v14532_v63  ;;  %v7330_v17 = vsel %vm7197_vm13, %v5806_v54, %v14706_v44  ;;  %v8052_v42 = vmul.f32 %v4786_v59, %v4786_v59  ;;  %v8054_v20 = vmul.f32 %v4788_v26, %v4788_v26 }
 0x326   :  { %v7324_v5 = vsel %vm7199_vm14, %v5810_v18, %v7323_v57  ;;  %v7331_v27 = vsel %vm7199_vm14, %v5814_v6, %v7330_v17  ;;  %v9068_v56 = vrot.slane %v8051_v62, %v19815_v33  ;;  %v9072_v4 = vrot.slane %v8051_v62, %v19816_v28 }
 0x327   :  { %v7325_v37 = vsel %vm7201_vm15, %v5818_v24, %v7324_v5  ;;  %v7332_v60 = vsel %vm7201_vm15, %v5822_v55, %v7331_v27  ;;  %v9076_v34 = vrot.slane %v8052_v42, %v19815_v33  ;;  %v9080_v63 = vrot.slane %v8052_v42, %v19816_v28 }
 0x328   :  { %v7326_v44 = vsel %vm7203_vm0, %v5826_v15, %v7325_v37  ;;  %v7333_v54 = vsel %vm7203_vm0, %v5830_v32, %v7332_v60  ;;  %v9084_v18 = vrot.slane %v8053_v29, %v19815_v33  ;;  %v9088_v11 = vrot.slane %v8053_v29, %v19816_v28  ;;  %v11670_v24 = vpop.eup %11669 }
 0x329   :  { %7712 = vst [vmem:[%s19394_s3 + $0x90] sm:$0xff] %v7326_v44  ;;  %7713 = vst [vmem:[%s19394_s3 + $0x98] sm:$0xff] %v7333_v54  ;;  %v9092_v59 = vrot.slane %v8054_v20, %v19815_v33  ;;  %v9096_v26 = vrot.slane %v8054_v20, %v19816_v28  ;;  %v10582_v37 = vsel %vm7197_vm13, %v9068_v56, %v14228_v39  ;;  %v11481_v29 = vrot.slane %v3235_v48, 9 }
 0x32a   :  { %v10589_v60 = vsel %vm7197_vm13, %v9072_v4, %v14231_v21  ;;  %v10583_v55 = vsel %vm7199_vm14, %v9076_v34, %v10582_v37  ;;  %v11483_v6 = vrot.slane %v3236_v10, 9  ;;  %v14975_v57 = vmax.f32 %v3227_v40, %v11480_v25  ;;  %v11672_v42 = vpop.eup %11671 }
 0x32b   :  { %v10590_v62 = vsel %vm7199_vm14, %v9080_v63, %v10589_v60  ;;  %v10584_v15 = vsel %vm7201_vm15, %v9084_v18, %v10583_v55  ;;  %v14977_v17 = vmax.f32 %v3234_v35, %v11482_v52  ;;  %v14985_v34 = vmax.f32 %v3235_v48, %v11481_v29 }
 0x32c   :  { %v10591_v32 = vsel %vm7201_vm15, %v9088_v11, %v10590_v62  ;;  %v14980_v39 = vsel %vm7203_vm0, %v9092_v59, %v10584_v15  ;;  %v14987_v4 = vmax.f32 %v3236_v10, %v11483_v6  ;;  %v19936_v20 = vrot.slane %v14560_v53, %v19816_v28 }
 0x32d   :  { %v14983_v21 = vsel %vm7203_vm0, %v9096_v26, %v10591_v32  ;;  %v19938_v35 = vrot.slane %v14636_v30, %v19815_v33  ;;  %v19939_v25 = vrot.slane %v14644_v14, %v19815_v33  ;;  %v2337_v48 = vsel %vm1697_vm9, %v14803_v7, %v14927_v49 }
 0x32e   :  { %v14994_v40 = vsel %vm7195_vm7, %v19936_v20, %v14875_v8  ;;  %v2338_v53 = vsel %vm1698_vm10, %v14806_v13, %v14931_v22  ;;  %v5850_v8 = vrot.slane %v14638_v43, %v19815_v33  ;;  %v5854_v10 = vrot.slane %v14638_v43, %v19816_v28 }
 0x32f   :  { %19937 = vst [vmem:[#allocation146_spill] sm:$0xff] %v14994_v40  ;;  %v7334_v52 = vsel %vm7191_vm4, %v19939_v25, %v19938_v35  ;;  %v5858_v5 = vrot.slane %v14646_v16, %v19815_v33  ;;  %v19940_v27 = vrot.slane %v14636_v30, %v19816_v28  ;;  %v19941_v7 = vrot.slane %v14644_v14, %v19816_v28 }
 0x330   :  { %v8117_v13 = vmul.f32 %v14975_v57, %v14975_v57  ;;  %v8118_v22 = vmul.f32 %v14985_v34, %v14985_v34  ;;  %v8119_v43 = vmul.f32 %v14977_v17, %v14977_v17  ;;  %v8120_v56 = vmul.f32 %v14987_v4, %v14987_v4 }
 0x331   :  { %v7341_v49 = vsel %vm7191_vm4, %v19941_v7, %v19940_v27  ;;  %v5862_v30 = vrot.slane %v14646_v16, %v19816_v28  ;;  %v15035_v63 = vsel %vm7193_vm5, %v5850_v8, %v7334_v52  ;;  %v2736_v14 = vcombine.low %v2337_v48, %v2338_v53  ;;  %v1208_v7 = vpop.permute.xlu1 %1207 }
 0x332   :  { %v2737_v44 = vcombine.high %v2337_v48, %v2338_v53  ;;  %v15038_v54 = vsel %vm7193_vm5, %v5854_v10, %v7341_v49  ;;  %v6522_v18 = vrot.slane %v14697_v46, %v19815_v33  ;;  %vm1780_vm12 = vcmp.gt.f32.partialorder %v14824_v36, 0.0 }
 0x333   :  { %v9596_v11 = vrot.slane %v8117_v13, %v19815_v33  ;;  %v9600_v59 = vrot.slane %v8117_v13, %v19816_v28  ;;  %v9604_v26 = vrot.slane %v8118_v22, %v19815_v33  ;;  %v9608_v37 = vrot.slane %v8118_v22, %v19816_v28 }
 0x334   :  { %v9612_v60 = vrot.slane %v8119_v43, %v19815_v33  ;;  %v9616_v55 = vrot.slane %v8119_v43, %v19816_v28  ;;  %v9620_v62 = vrot.slane %v8120_v56, %v19815_v33  ;;  %v9624_v29 = vrot.slane %v8120_v56, %v19816_v28 }
 0x335   :  { %v10701_v6 = vsel %vm7191_vm4, %v9604_v26, %v9596_v11  ;;  %v10708_v15 = vsel %vm7191_vm4, %v9608_v37, %v9600_v59  ;;  %v2744_v32 = vrot.slane %v2736_v14, %v19814_v51  ;;  %v2751_v20 = vrot.slane %v2737_v44, %v19814_v51 }
 0x336   :  { %v10702_v35 = vsel %vm7193_vm5, %v9612_v60, %v10701_v6  ;;  %v10709_v25 = vsel %vm7193_vm5, %v9616_v55, %v10708_v15  ;;  %v11312_v52 = vadd.f32 -1.0, %v11670_v24  ;;  %v11313_v48 = vadd.f32 -1.0, %v11672_v42 }
 0x337   :  { %v15059_v53 = vsel %vm7195_vm7, %v9620_v62, %v10702_v35  ;;  %v15062_v8 = vsel %vm7195_vm7, %v9624_v29, %v10709_v25  ;;  %v2752_v10 = vcombine.high %v2744_v32, %v2744_v32  ;;  %v2753_v27 = vcombine.high %v2751_v20, %v2751_v20 }
 0x338   :  { %19942 = vst [vmem:[#allocation147_spill] sm:$0xff] %v15059_v53  ;;  %19943 = vst [vmem:[#allocation148_spill] sm:$0xff] %v15062_v8  ;;  %v11375_v49 = vrot.slane %v2744_v32, 9  ;;  %v11377_v13 = vrot.slane %v2751_v20, 9  ;;  %v2419_v22 = vsel %vm1779_vm11, %v14821_v1, %v11312_v52  ;;  %v2420_v24 = vsel %vm1780_vm12, %v14824_v36, %v11313_v48 }
 0x339   :  { %v11376_v42 = vrot.slane %v2752_v10, 9  ;;  %v11378_v43 = vrot.slane %v2753_v27, 9  ;;  %v3469_v56 = vcombine.low %v2419_v22, %v2420_v24  ;;  %v3470_v14 = vcombine.high %v2419_v22, %v2420_v24  ;;  %v15088_v22 = vpop.permute.xlu0 %1155 }
 0x33a   :  { %v4746_v44 = vmax.f32 %v2744_v32, %v11375_v49  ;;  %v4748_v11 = vmax.f32 %v2751_v20, %v11377_v13  ;;  %v1451_v59 = vmul.f32 %v19744_v23, %v1208_v7  ;;  %v1452_v26 = vmul.f32 %v19745_v47, %v1208_v7 }
 0x33b   :  { %v4747_v37 = vmax.f32 %v2752_v10, %v11376_v42  ;;  %v4749_v60 = vmax.f32 %v2753_v27, %v11378_v43  ;;  %v3477_v55 = vrot.slane %v3469_v56, %v19814_v51  ;;  %v3484_v1 = vrot.slane %v3470_v14, %v19814_v51 }
 0x33c   :  { %v5490_v62 = vrot.slane %v4746_v44, %v19815_v33  ;;  %v5494_v36 = vrot.slane %v4746_v44, %v19816_v28  ;;  %v5506_v29 = vrot.slane %v4748_v11, %v19815_v33  ;;  %v5510_v6 = vrot.slane %v4748_v11, %v19816_v28 }
 0x33d   :  { %v5498_v15 = vrot.slane %v4747_v37, %v19815_v33  ;;  %v5502_v32 = vrot.slane %v4747_v37, %v19816_v28  ;;  %v5514_v20 = vrot.slane %v4749_v60, %v19815_v33  ;;  %v5518_v35 = vrot.slane %v4749_v60, %v19816_v28 }
 0x33e   :  { %v7255_v25 = vsel %vm7197_vm13, %v5490_v62, %v14042_v3  ;;  %v7262_v52 = vsel %vm7197_vm13, %v5494_v36, %v14049_v38  ;;  %v8012_v48 = vmul.f32 %v4746_v44, %v4746_v44  ;;  %v8013_v10 = vmul.f32 %v4747_v37, %v4747_v37 }
 0x33f   :  { %v7256_v27 = vsel %vm7199_vm14, %v5498_v15, %v7255_v25  ;;  %v7263_v7 = vsel %vm7199_vm14, %v5502_v32, %v7262_v52  ;;  %v8014_v49 = vmul.f32 %v4748_v11, %v4748_v11  ;;  %v8015_v13 = vmul.f32 %v4749_v60, %v4749_v60  ;;  %v19944_v60 = vld [vmem:[#allocation54_spill] sm:$0xff]  ;;  %v19945_v15 = vld [vmem:[#allocation105_spill] sm:$0xff] }
 0x340   :  { %v7257_v24 = vsel %vm7201_vm15, %v5506_v29, %v7256_v27  ;;  %v7264_v42 = vsel %vm7201_vm15, %v5510_v6, %v7263_v7  ;;  %v8756_v43 = vrot.slane %v8012_v48, %v19815_v33  ;;  %v8760_v3 = vrot.slane %v8012_v48, %v19816_v28 }
 0x341   :  { %v7258_v38 = vsel %vm7203_vm0, %v5514_v20, %v7257_v24  ;;  %v7265_v56 = vsel %vm7203_vm0, %v5518_v35, %v7264_v42  ;;  %v8764_v14 = vrot.slane %v8013_v10, %v19815_v33  ;;  %v8768_v44 = vrot.slane %v8013_v10, %v19816_v28  ;;  %v19946_v20 = vld [vmem:[#allocation18_spill] sm:$0xff] }
 0x342   :  { %7702 = vst [vmem:[%s19394_s3 + $0x40] sm:$0xff] %v7258_v38  ;;  %7703 = vst [vmem:[%s19394_s3 + $0x48] sm:$0xff] %v7265_v56  ;;  %v8772_v11 = vrot.slane %v8014_v49, %v19815_v33  ;;  %v8776_v37 = vrot.slane %v8014_v49, %v19816_v28  ;;  %v15107_v62 = vadd.f32 %v1451_v59, %v19944_v60  ;;  %v11534_v7 = vrot.slane %v3477_v55, 9  ;;  %v19949_v60 = vld [vmem:[#allocation55_spill] sm:$0xff] }
 0x343   :  { %v1425_v36 = vmul.f32 %v19744_v23, %v15088_v22  ;;  %v8780_v29 = vrot.slane %v8015_v13, %v19815_v33  ;;  %v8784_v6 = vrot.slane %v8015_v13, %v19816_v28  ;;  %v10514_v32 = vsel %vm7197_vm13, %v8756_v43, %v19945_v15 }
 0x344   :  { %v10521_v35 = vsel %vm7197_vm13, %v8760_v3, %v19946_v20  ;;  %v10515_v25 = vsel %vm7199_vm14, %v8764_v14, %v10514_v32  ;;  %v3485_v48 = vcombine.high %v3477_v55, %v3477_v55  ;;  %v3486_v59 = vcombine.high %v3484_v1, %v3484_v1 }
 0x345   :  { %v10522_v52 = vsel %vm7199_vm14, %v8768_v44, %v10521_v35  ;;  %v10516_v10 = vsel %vm7201_vm15, %v8772_v11, %v10515_v25  ;;  %v11536_v49 = vrot.slane %v3484_v1, 9  ;;  %v4905_v56 = vmax.f32 %v3477_v55, %v11534_v7 }
 0x346   :  { %v10523_v27 = vsel %vm7201_vm15, %v8776_v37, %v10522_v52  ;;  %v10517_v13 = vsel %vm7203_vm0, %v8780_v29, %v10516_v10  ;;  %v11535_v42 = vrot.slane %v3485_v48, 9  ;;  %v11537_v43 = vrot.slane %v3486_v59, 9 }
 0x347   :  { %v10524_v24 = vsel %vm7203_vm0, %v8784_v6, %v10523_v27  ;;  %v15124_v3 = vadd.f32 %v14471_v9, %v10517_v13  ;;  %v4907_v14 = vmax.f32 %v3484_v1, %v11536_v49  ;;  %v15130_v37 = vadd.f32 %v1452_v26, %v19949_v60 }
 0x348   :  { %v15127_v38 = vadd.f32 %v14474_v61, %v10524_v24  ;;  %v4906_v44 = vmax.f32 %v3485_v48, %v11535_v42  ;;  %v4908_v11 = vmax.f32 %v3486_v59, %v11537_v43  ;;  %v1835_v15 = vmin.f32 %v15107_v62, 0.0 }
 0x349   :  { %19947 = vst [vmem:[#allocation54_spill] sm:$0xff] %v15124_v3  ;;  %v6762_v29 = vrot.slane %v4905_v56, %v19815_v33  ;;  %v6766_v6 = vrot.slane %v4905_v56, %v19816_v28  ;;  %v6778_v32 = vrot.slane %v4907_v14, %v19815_v33  ;;  %v6782_v9 = vrot.slane %v4907_v14, %v19816_v28 }
 0x34a   :  { %19948 = vst [vmem:[#allocation105_spill] sm:$0xff] %v15127_v38  ;;  %v6770_v61 = vrot.slane %v4906_v44, %v19815_v33  ;;  %v6774_v55 = vrot.slane %v4906_v44, %v19816_v28  ;;  %v6786_v1 = vrot.slane %v4908_v11, %v19815_v33  ;;  %v6790_v20 = vrot.slane %v4908_v11, %v19816_v28 }
 0x34b   :  { %v8171_v26 = vmul.f32 %v4905_v56, %v4905_v56  ;;  %v8172_v35 = vmul.f32 %v4906_v44, %v4906_v44  ;;  %v8173_v25 = vmul.f32 %v4907_v14, %v4907_v14  ;;  %v8174_v52 = vmul.f32 %v4908_v11, %v4908_v11 }
 0x34c   :  { %v7536_v48 = vsel %vm7191_vm4, %v6770_v61, %v6762_v29  ;;  %v7543_v59 = vsel %vm7191_vm4, %v6774_v55, %v6766_v6  ;;  %v1836_v10 = vmin.f32 %v15130_v37, 0.0  ;;  %v1991_v27 = vmul.f32 1.442695, %v1835_v15  ;;  %v1312_v29 = vpop.permute.xlu1 %1311 }
 0x34d   :  { %v7537_v7 = vsel %vm7193_vm5, %v6778_v32, %v7536_v48  ;;  %v7544_v49 = vsel %vm7193_vm5, %v6782_v9, %v7543_v59  ;;  %v10028_v13 = vrot.slane %v8171_v26, %v19815_v33  ;;  %v10032_v24 = vrot.slane %v8171_v26, %v19816_v28 }
 0x34e   :  { %v15149_v42 = vsel %vm7195_vm7, %v6786_v1, %v7537_v7  ;;  %v15152_v43 = vsel %vm7195_vm7, %v6790_v20, %v7544_v49  ;;  %v10036_v56 = vrot.slane %v8172_v35, %v19815_v33  ;;  %v10040_v14 = vrot.slane %v8172_v35, %v19816_v28  ;;  %v19952_v20 = vld [vmem:[#allocation51_spill] sm:$0xff]  ;;  %v1176_v35 = vpop.permute.xlu0 %1175  ;;  %v19957_v49 = vld [vmem:[#allocation90_spill] sm:$0xff] }
 0x34f   :  { %19950 = vst [vmem:[#allocation18_spill] sm:$0xff] %v15149_v42  ;;  %19951 = vst [vmem:[#allocation55_spill] sm:$0xff] %v15152_v43  ;;  %v10044_v44 = vrot.slane %v8173_v25, %v19815_v33  ;;  %v10048_v11 = vrot.slane %v8173_v25, %v19816_v28  ;;  %v10052_v60 = vrot.slane %v8174_v52, %v19815_v33  ;;  %11673 = vpow2.f32 %v1991_v27  ;;  %v19972_v42 = vld [vmem:[#allocation64_spill] sm:$0xff] }
 0x350   :  { %v10056_v15 = vrot.slane %v8174_v52, %v19816_v28  ;;  %v10795_v6 = vsel %vm7191_vm4, %v10036_v56, %v10028_v13  ;;  %v10802_v32 = vsel %vm7191_vm4, %v10040_v14, %v10032_v24  ;;  %v1993_v9 = vmul.f32 1.442695, %v1836_v10 }
 0x351   :  { %v10796_v61 = vsel %vm7193_vm5, %v10044_v44, %v10795_v6  ;;  %v10803_v55 = vsel %vm7193_vm5, %v10048_v11, %v10802_v32  ;;  %v1426_v1 = vmul.f32 %v19745_v47, %v15088_v22  ;;  %v15167_v26 = vadd.f32 %v1425_v36, %v19952_v20  ;;  %v19956_v22 = vld [vmem:[#allocation52_spill] sm:$0xff]  ;;  %v19958_v44 = vld [vmem:[#allocation91_spill] sm:$0xff]  ;;  %v19959_v6 = vld [vmem:[#allocation137_spill] sm:$0xff] }
 0x352   :  { %v15170_v25 = vsel %vm7195_vm7, %v10052_v60, %v10796_v61  ;;  %v15173_v52 = vsel %vm7195_vm7, %v10056_v15, %v10803_v55  ;;  %11675 = vpow2.f32 %v1993_v9  ;;  %v1503_v48 = vmul.f32 %v19744_v23, %v1312_v29 }
 0x353   :  { %19953 = vst [vmem:[#allocation51_spill] sm:$0xff] %v15170_v25  ;;  %19954 = vst [vmem:[#allocation149_spill] sm:$0xff] %v15173_v52  ;;  %v15181_v59 = vsel %vm7195_vm7, %v5858_v5, %v15035_v63  ;;  %v15184_v36 = vadd.f32 %v1426_v1, %v19956_v22  ;;  %v1809_v10 = vmin.f32 %v15167_v26, 0.0  ;;  %v1504_v27 = vmul.f32 %v19745_v47, %v1312_v29  ;;  %v19960_v1 = vld [vmem:[#allocation138_spill] sm:$0xff] }
 0x354   :  { %19955 = vst [vmem:[#allocation150_spill] sm:$0xff] %v15181_v59  ;;  %v6514_v7 = vrot.slane %v14691_v0, %v19815_v33  ;;  %v15191_v13 = vadd.f32 %v1503_v48, %v19957_v49  ;;  %v1435_v24 = vmul.f32 %v19744_v23, %v1176_v35  ;;  %v1436_v56 = vmul.f32 %v19745_v47, %v1176_v35 }
 0x355   :  { %v6526_v5 = vrot.slane %v14697_v46, %v19816_v28  ;;  %v1810_v63 = vmin.f32 %v15184_v36, 0.0  ;;  %v1939_v14 = vmul.f32 1.442695, %v1809_v10  ;;  %v15199_v11 = vadd.f32 %v1504_v27, %v19958_v44 }
 0x356   :  { %v6518_v60 = vrot.slane %v14691_v0, %v19816_v28  ;;  %v7482_v15 = vsel %vm7191_vm4, %v6522_v18, %v6514_v7  ;;  %v1887_v29 = vmin.f32 %v15191_v13, 0.0  ;;  %v15209_v32 = vadd.f32 %v1435_v24, %v19959_v6  ;;  %v1220_v0 = vpop.permute.xlu1 %1219  ;;  %v1252_v7 = vpop.permute.xlu0 %1251 }
 0x357   :  { %v6530_v9 = vrot.slane %v14693_v31, %v19815_v33  ;;  %v1941_v61 = vmul.f32 1.442695, %v1810_v63  ;;  %v1888_v55 = vmin.f32 %v15199_v11, 0.0  ;;  %v15215_v20 = vadd.f32 %v1436_v56, %v19960_v1 }
 0x358   :  { %v15222_v46 = vsel %vm7195_vm7, %v5862_v30, %v15038_v54  ;;  %v6534_v18 = vrot.slane %v14693_v31, %v19816_v28  ;;  %v2095_v35 = vmul.f32 1.442695, %v1887_v29  ;;  %v1819_v48 = vmin.f32 %v15209_v32, 0.0 }
 0x359   :  { %19961 = vst [vmem:[#allocation52_spill] sm:$0xff] %v15222_v46  ;;  %v6538_v22 = vrot.slane %v14699_v45, %v19815_v33  ;;  %v7483_v10 = vsel %vm7193_vm5, %v6530_v9, %v7482_v15  ;;  %v7489_v27 = vsel %vm7191_vm4, %v6526_v5, %v6518_v60  ;;  %11677 = vpow2.f32 %v1939_v14 }
 0x35a   :  { %11679 = vpow2.f32 %v1941_v61  ;;  %v2097_v30 = vmul.f32 1.442695, %v1888_v55  ;;  %v1457_v54 = vmul.f32 %v19744_v23, %v1220_v0  ;;  %v1820_v31 = vmin.f32 %v15215_v20, 0.0  ;;  %v19963_v55 = vld [vmem:[#allocation72_spill] sm:$0xff] }
 0x35b   :  { %11681 = vpow2.f32 %v2095_v35  ;;  %v1959_v49 = vmul.f32 1.442695, %v1819_v48  ;;  %v1458_v24 = vmul.f32 %v19745_v47, %v1220_v0  ;;  %v15237_v56 = vsel %vm7195_vm7, %v6538_v22, %v7483_v10  ;;  %v1272_v48 = vpop.permute.xlu0 %1271 }
 0x35c   :  { %19962 = vst [vmem:[#allocation90_spill] sm:$0xff] %v15237_v56  ;;  %v15240_v5 = vsel %vm7193_vm5, %v6534_v18, %v7489_v27  ;;  %v15244_v63 = vmul.f32 %v12284_v2, %v14738_v12  ;;  %v1473_v14 = vmul.f32 %v19744_v23, %v1252_v7  ;;  %v11674_v44 = vpop.eup %11673  ;;  %v6266_v60 = vrot.slane %v14834_v50, %v19815_v33  ;;  %v19964_v18 = vld [vmem:[#allocation21_spill] sm:$0xff] }
 0x35d   :  { %v6270_v15 = vrot.slane %v14834_v50, %v19816_v28  ;;  %v6274_v29 = vrot.slane %v14846_v41, %v19815_v33  ;;  %v15255_v6 = vmul.f32 %v12298_v58, %v14738_v12  ;;  %v6282_v9 = vrot.slane %v14836_v19, %v19815_v33  ;;  %v19965_v27 = vld [vmem:[#allocation81_spill] sm:$0xff] }
 0x35e   :  { %v11240_v61 = vadd.f32 -1.0, %v11674_v44  ;;  %11683 = vpow2.f32 %v2097_v30  ;;  %v15260_v1 = vadd.f32 %v1457_v54, %v19963_v55  ;;  %vm1707_vm1 = vcmp.gt.f32.partialorder %v15107_v62, 0.0  ;;  %v15282_v55 = vpop.permute.xlu1 %1239 }
 0x35f   :  { %v11676_v0 = vpop.eup %11675  ;;  %11685 = vpow2.f32 %v1959_v49  ;;  %v1961_v50 = vmul.f32 1.442695, %v1820_v31  ;;  %v15264_v35 = vadd.f32 %v1458_v24, %v19964_v18  ;;  %v1474_v10 = vmul.f32 %v19745_v47, %v1252_v7 }
 0x360   :  { %v11241_v22 = vadd.f32 -1.0, %v11676_v0  ;;  %v2347_v12 = vsel %vm1707_vm1, %v15107_v62, %v11240_v61  ;;  %v15269_v44 = vadd.f32 %v1473_v14, %v19965_v27  ;;  %v6278_v30 = vrot.slane %v14846_v41, %v19816_v28  ;;  %v19966_v0 = vld [vmem:[#allocation82_spill] sm:$0xff] }
 0x361   :  { %v7428_v31 = vsel %vm7191_vm4, %v6274_v29, %v6266_v60  ;;  %vm1708_vm2 = vcmp.gt.f32.partialorder %v15130_v37, 0.0  ;;  %v1841_v24 = vmin.f32 %v15260_v1, 0.0  ;;  %v1483_v62 = vmul.f32 %v19744_v23, %v1272_v48  ;;  %v19967_v29 = vld [vmem:[#allocation75_spill] sm:$0xff] }
 0x362   :  { %v2348_v49 = vsel %vm1708_vm2, %v15130_v37, %v11241_v22  ;;  %v1484_v7 = vmul.f32 %v19745_v47, %v1272_v48  ;;  %11687 = vpow2.f32 %v1961_v50  ;;  %v1842_v41 = vmin.f32 %v15264_v35, 0.0  ;;  %v19968_v22 = vld [vmem:[#allocation76_spill] sm:$0xff]  ;;  %v19969_v48 = vld [vmem:[#allocation83_spill] sm:$0xff] }
 0x363   :  { %v2826_v14 = vcombine.low %v2347_v12, %v2348_v49  ;;  %v2827_v61 = vcombine.high %v2347_v12, %v2348_v49  ;;  %v15285_v18 = vadd.f32 %v1474_v10, %v19966_v0  ;;  %v1857_v60 = vmin.f32 %v15269_v44, 0.0 }
 0x364   :  { %v15289_v37 = vadd.f32 %v1483_v62, %v19967_v29  ;;  %v15292_v27 = vadd.f32 %v1484_v7, %v19968_v22  ;;  %v15297_v50 = vsel %vm7191_vm4, %v6278_v30, %v6270_v15  ;;  %v15302_v0 = vsel %vm7193_vm5, %v6282_v9, %v7428_v31 }
 0x365   :  { %v2834_v12 = vrot.slane %v2826_v14, %v19814_v51  ;;  %v2841_v49 = vrot.slane %v2827_v61, %v19814_v51  ;;  %vm1681_vm3 = vcmp.gt.f32.partialorder %v15167_v26, 0.0  ;;  %v2003_v62 = vmul.f32 1.442695, %v1841_v24 }
 0x366   :  { %v11678_v10 = vpop.eup %11677  ;;  %v1467_v7 = vmul.f32 %v19744_v23, %v15282_v55  ;;  %vm1682_vm6 = vcmp.gt.f32.partialorder %v15184_v36, 0.0  ;;  %v2005_v14 = vmul.f32 1.442695, %v1842_v41  ;;  %v1858_v61 = vmin.f32 %v15285_v18, 0.0 }
 0x367   :  { %v11680_v29 = vpop.eup %11679  ;;  %v2842_v22 = vcombine.high %v2834_v12, %v2834_v12  ;;  %v2843_v54 = vcombine.high %v2841_v49, %v2841_v49  ;;  %v11395_v16 = vrot.slane %v2834_v12, 9  ;;  %v11397_v15 = vrot.slane %v2841_v49, 9 }
 0x368   :  { %v11682_v30 = vpop.eup %11681  ;;  %v2035_v52 = vmul.f32 1.442695, %v1857_v60  ;;  %v11214_v43 = vadd.f32 -1.0, %v11678_v10  ;;  %vm1759_vm8 = vcmp.gt.f32.partialorder %v15191_v13, 0.0  ;;  %11689 = vpow2.f32 %v2003_v62 }
 0x369   :  { %v11396_v9 = vrot.slane %v2842_v22, 9  ;;  %v11398_v31 = vrot.slane %v2843_v54, 9  ;;  %v15309_v25 = vmax.f32 %v2834_v12, %v11395_v16  ;;  %v15311_v24 = vmax.f32 %v2841_v49, %v11397_v15 }
 0x36a   :  { %v15315_v8 = vadd.f32 %v1467_v7, %v19972_v42  ;;  %v11215_v40 = vadd.f32 -1.0, %v11680_v29  ;;  %v11292_v60 = vadd.f32 -1.0, %v11682_v30  ;;  %vm1760_vm9 = vcmp.gt.f32.partialorder %v15199_v11, 0.0 }
 0x36b   :  { %19970 = vst [vmem:[#allocation91_spill] sm:$0xff] %v15309_v25  ;;  %19971 = vst [vmem:[#allocation137_spill] sm:$0xff] %v15311_v24  ;;  %v11684_v53 = vpop.eup %11683  ;;  %v15317_v56 = vmax.f32 %v2842_v22, %v11396_v9  ;;  %v15319_v41 = vmax.f32 %v2843_v54, %v11398_v31  ;;  %v8032_v16 = vmul.f32 %v15309_v25, %v15309_v25  ;;  %vm1691_vm10 = vcmp.gt.f32.partialorder %v15209_v32, 0.0 }
 0x36c   :  { %v11686_v46 = vpop.eup %11685  ;;  %11691 = vpow2.f32 %v2005_v14  ;;  %v8034_v42 = vmul.f32 %v15311_v24, %v15311_v24  ;;  %vm1692_vm11 = vcmp.gt.f32.partialorder %v15215_v20, 0.0  ;;  %v15328_v12 = vmul.f32 1.442695, %v1858_v61 }
 0x36d   :  { %19973 = vst [vmem:[#allocation138_spill] sm:$0xff] %v15319_v41  ;;  %11693 = vpow2.f32 %v2035_v52  ;;  %v8033_v54 = vmul.f32 %v15317_v56, %v15317_v56  ;;  %v8035_v49 = vmul.f32 %v15319_v41, %v15319_v41  ;;  %v2321_v10 = vsel %vm1681_vm3, %v15167_v26, %v11214_v43 }
 0x36e   :  { %v2322_v7 = vsel %vm1682_vm6, %v15184_v36, %v11215_v40  ;;  %v11293_v29 = vadd.f32 -1.0, %v11684_v53  ;;  %v2399_v52 = vsel %vm1759_vm8, %v15191_v13, %v11292_v60  ;;  %v11224_v22 = vadd.f32 -1.0, %v11686_v46 }
 0x36f   :  { %v11688_v15 = vpop.eup %11687  ;;  %v8916_v30 = vrot.slane %v8032_v16, %v19815_v33  ;;  %v8920_v14 = vrot.slane %v8032_v16, %v19816_v28  ;;  %v8924_v61 = vrot.slane %v8033_v54, %v19815_v33  ;;  %v8928_v43 = vrot.slane %v8033_v54, %v19816_v28 }
 0x370   :  { %v8932_v26 = vrot.slane %v8034_v42, %v19815_v33  ;;  %v8936_v9 = vrot.slane %v8034_v42, %v19816_v28  ;;  %v8940_v40 = vrot.slane %v8035_v49, %v19815_v33  ;;  %v8944_v53 = vrot.slane %v8035_v49, %v19816_v28 }
 0x371   :  { %v10553_v36 = vsel %vm7191_vm4, %v8924_v61, %v8916_v30  ;;  %v10559_v13 = vsel %vm7191_vm4, %v8928_v43, %v8920_v14  ;;  %v2593_v46 = vcombine.low %v2321_v10, %v2322_v7  ;;  %v2594_v31 = vcombine.high %v2321_v10, %v2322_v7 }
 0x372   :  { %v10554_v60 = vsel %vm7193_vm5, %v8932_v26, %v10553_v36  ;;  %v10560_v16 = vsel %vm7193_vm5, %v8936_v9, %v10559_v13  ;;  %v2400_v54 = vsel %vm1760_vm9, %v15199_v11, %v11293_v29  ;;  %v11225_v62 = vadd.f32 -1.0, %v11688_v15 }
 0x373   :  { %v15360_v42 = vsel %vm7195_vm7, %v8940_v40, %v10554_v60  ;;  %v15363_v49 = vsel %vm7195_vm7, %v8944_v53, %v10560_v16  ;;  %v2601_v30 = vrot.slane %v2593_v46, %v19814_v51  ;;  %v2608_v14 = vrot.slane %v2594_v31, %v19814_v51 }
 0x374   :  { %19974 = vst [vmem:[#allocation72_spill] sm:$0xff] %v15360_v42  ;;  %19975 = vst [vmem:[#allocation21_spill] sm:$0xff] %v15363_v49  ;;  %v3290_v10 = vcombine.low %v2399_v52, %v2400_v54  ;;  %v3291_v7 = vcombine.high %v2399_v52, %v2400_v54  ;;  %v15370_v61 = vsel %vm1691_vm10, %v15209_v32, %v11224_v22  ;;  %11695 = vpow2.f32 %v15328_v12 }
 0x375   :  { %v15375_v11 = vsel %vm1692_vm11, %v15215_v20, %v11225_v62  ;;  %v2609_v29 = vcombine.high %v2601_v30, %v2601_v30  ;;  %v2610_v15 = vcombine.high %v2608_v14, %v2608_v14  ;;  %v11344_v43 = vrot.slane %v2601_v30, 9  ;;  %v15377_v9 = vpop.eup %11689 }
 0x376   :  { %v11346_v26 = vrot.slane %v2608_v14, 9  ;;  %v3298_v40 = vrot.slane %v3290_v10, %v19814_v51  ;;  %v3305_v52 = vrot.slane %v3291_v7, %v19814_v51  ;;  %vm1713_vm12 = vcmp.gt.f32.partialorder %v15260_v1, 0.0 }
 0x377   :  { %v11345_v22 = vrot.slane %v2609_v29, 9  ;;  %v11347_v36 = vrot.slane %v2610_v15, 9  ;;  %v4715_v20 = vmax.f32 %v2601_v30, %v11344_v43  ;;  %vm1714_vm1 = vcmp.gt.f32.partialorder %v15264_v35, 0.0 }
 0x378   :  { %v4717_v62 = vmax.f32 %v2608_v14, %v11346_v26  ;;  %v3306_v46 = vcombine.high %v3298_v40, %v3298_v40  ;;  %v3307_v31 = vcombine.high %v3305_v52, %v3305_v52  ;;  %v11495_v60 = vrot.slane %v3298_v40, 9 }
 0x379   :  { %v15385_v13 = vpop.eup %11691  ;;  %v11497_v16 = vrot.slane %v3305_v52, 9  ;;  %v4716_v10 = vmax.f32 %v2609_v29, %v11345_v22  ;;  %v4718_v7 = vmax.f32 %v2610_v15, %v11347_v36  ;;  %v5242_v59 = vrot.slane %v4715_v20, %v19815_v33  ;;  %v19976_v29 = vld [vmem:[#allocation129_spill] sm:$0xff]  ;;  %v19977_v22 = vld [vmem:[#allocation62_spill] sm:$0xff] }
 0x37a   :  { %v15387_v54 = vpop.eup %11693  ;;  %v5246_v53 = vrot.slane %v4715_v20, %v19816_v28  ;;  %v5258_v32 = vrot.slane %v4717_v62, %v19815_v33  ;;  %v5262_v49 = vrot.slane %v4717_v62, %v19816_v28  ;;  %v7981_v30 = vmul.f32 %v4715_v20, %v4715_v20 }
 0x37b   :  { %v7983_v14 = vmul.f32 %v4717_v62, %v4717_v62  ;;  %v5250_v43 = vrot.slane %v4716_v10, %v19815_v33  ;;  %v5254_v26 = vrot.slane %v4716_v10, %v19816_v28  ;;  %v5266_v42 = vrot.slane %v4718_v7, %v19815_v33 }
 0x37c   :  { %v5270_v38 = vrot.slane %v4718_v7, %v19816_v28  ;;  %v7198_v15 = vsel %vm7197_vm13, %v5242_v59, %v19976_v29  ;;  %v7208_v36 = vsel %vm7197_vm13, %v5246_v53, %v19977_v22  ;;  %v7982_v3 = vmul.f32 %v4716_v10, %v4716_v10 }
 0x37d   :  { %v7984_v58 = vmul.f32 %v4718_v7, %v4718_v7  ;;  %v7200_v2 = vsel %vm7199_vm14, %v5250_v43, %v7198_v15  ;;  %v7209_v20 = vsel %vm7199_vm14, %v5254_v26, %v7208_v36  ;;  %v8508_v62 = vrot.slane %v7981_v30, %v19815_v33 }
 0x37e   :  { %v8512_v41 = vrot.slane %v7981_v30, %v19816_v28  ;;  %v7202_v24 = vsel %vm7201_vm15, %v5258_v32, %v7200_v2  ;;  %v7210_v25 = vsel %vm7201_vm15, %v5262_v49, %v7209_v20  ;;  %v8516_v23 = vrot.slane %v7982_v3, %v19815_v33  ;;  %v19978_v49 = vld [vmem:[#allocation23_spill] sm:$0xff] }
 0x37f   :  { %v8520_v59 = vrot.slane %v7982_v3, %v19816_v28  ;;  %v7204_v53 = vsel %vm7203_vm0, %v5266_v42, %v7202_v24  ;;  %v7211_v10 = vsel %vm7203_vm0, %v5270_v38, %v7210_v25  ;;  %v8524_v7 = vrot.slane %v7983_v14, %v19815_v33  ;;  %v19979_v38 = vld [vmem:[#allocation112_spill] sm:$0xff] }
 0x380   :  { %v8528_v43 = vrot.slane %v7983_v14, %v19816_v28  ;;  %7694 = vst [vmem:[%s19394_s3] sm:$0xff] %v7204_v53  ;;  %7695 = vst [vmem:[%s19394_s3 + $0x8] sm:$0xff] %v7211_v10  ;;  %v8532_v2 = vrot.slane %v7984_v58, %v19815_v33  ;;  %v8536_v3 = vrot.slane %v7984_v58, %v19816_v28  ;;  %v11496_v30 = vrot.slane %v3306_v46, 9 }
 0x381   :  { %v10460_v24 = vsel %vm7197_vm13, %v8508_v62, %v19978_v49  ;;  %v10467_v25 = vsel %vm7197_vm13, %v8512_v41, %v19979_v38  ;;  %v11498_v14 = vrot.slane %v3307_v31, 9  ;;  %v15429_v15 = vmax.f32 %v3298_v40, %v11495_v60 }
 0x382   :  { %v10461_v42 = vsel %vm7199_vm14, %v8516_v23, %v10460_v24  ;;  %v10468_v32 = vsel %vm7199_vm14, %v8520_v59, %v10467_v25  ;;  %v15431_v22 = vmax.f32 %v3305_v52, %v11497_v16  ;;  %v15439_v41 = vmax.f32 %v3306_v46, %v11496_v30  ;;  %v19986_v16 = vld [vmem:[#allocation34_spill] sm:$0xff] }
 0x383   :  { %v10462_v26 = vsel %vm7201_vm15, %v8524_v7, %v10461_v42  ;;  %v10469_v29 = vsel %vm7201_vm15, %v8528_v43, %v10468_v32  ;;  %v15441_v23 = vmax.f32 %v3307_v31, %v11498_v14  ;;  %v19980_v20 = vrot.slane %v14699_v45, %v19816_v28 }
 0x384   :  { %v15434_v58 = vsel %vm7203_vm0, %v8532_v2, %v10462_v26  ;;  %v15437_v36 = vsel %vm7203_vm0, %v8536_v3, %v10469_v29  ;;  %v19982_v40 = vrot.slane %v14836_v19, %v19816_v28  ;;  %v19983_v46 = vmin.f32 %v15315_v8, 0.0 }
 0x385   :  { %v15448_v62 = vsel %vm7195_vm7, %v19980_v20, %v15240_v5  ;;  %v6294_v31 = vrot.slane %v19969_v48, %v19816_v28  ;;  %v19984_v45 = vrot.slane %v19969_v48, %v19815_v33  ;;  %v15469_v19 = vadd.f32 %v15244_v63, %v19986_v16 }
 0x386   :  { %19981 = vst [vmem:[#allocation81_spill] sm:$0xff] %v15448_v62  ;;  %v7436_v52 = vsel %vm7193_vm5, %v19982_v40, %v15297_v50  ;;  %v2023_v60 = vmul.f32 1.442695, %v19983_v46  ;;  %v19987_v50 = vld [vmem:[#allocation126_spill] sm:$0xff]  ;;  %v8132_v59 = vmul.f32 %v15429_v15, %v15429_v15  ;;  %v8133_v53 = vmul.f32 %v15439_v41, %v15439_v41 }
 0x387   :  { %v15465_v5 = vsel %vm7195_vm7, %v19984_v45, %v15302_v0  ;;  %v15473_v12 = vadd.f32 %v15255_v6, %v19987_v50  ;;  %v8134_v48 = vmul.f32 %v15431_v22, %v15431_v22  ;;  %v8135_v0 = vmul.f32 %v15441_v23, %v15441_v23 }
 0x388   :  { %19985 = vst [vmem:[#allocation82_spill] sm:$0xff] %v15465_v5  ;;  %v15484_v10 = vsel %vm7195_vm7, %v6294_v31, %v7436_v52  ;;  %v6330_v63 = vrot.slane %v14975_v57, %v19815_v33  ;;  %v19989_v6 = vcombine.low %v15370_v61, %v15375_v11  ;;  %v19990_v43 = vcombine.high %v15370_v61, %v15375_v11 }
 0x389   :  { %19988 = vst [vmem:[#allocation75_spill] sm:$0xff] %v15484_v10  ;;  %v6338_v3 = vrot.slane %v14985_v34, %v19815_v33  ;;  %v6342_v49 = vrot.slane %v14985_v34, %v19816_v28  ;;  %v1468_v24 = vmul.f32 %v19745_v47, %v15282_v55  ;;  %11697 = vpow2.f32 %v2023_v60 }
 0x38a   :  { %v2691_v7 = vrot.slane %v19989_v6, %v19814_v51  ;;  %v2698_v2 = vrot.slane %v19990_v43, %v19814_v51  ;;  %v9716_v38 = vrot.slane %v8132_v59, %v19815_v33  ;;  %v9720_v25 = vrot.slane %v8132_v59, %v19816_v28 }
 0x38b   :  { %v9724_v42 = vrot.slane %v8133_v53, %v19815_v33  ;;  %v9728_v32 = vrot.slane %v8133_v53, %v19816_v28  ;;  %v9732_v61 = vrot.slane %v8134_v48, %v19815_v33  ;;  %v9736_v11 = vrot.slane %v8134_v48, %v19816_v28 }
 0x38c   :  { %v9740_v30 = vrot.slane %v8135_v0, %v19815_v33  ;;  %v9744_v34 = vrot.slane %v8135_v0, %v19816_v28  ;;  %v2699_v26 = vcombine.high %v2691_v7, %v2691_v7  ;;  %v2700_v29 = vcombine.high %v2698_v2, %v2698_v2 }
 0x38d   :  { %v10727_v14 = vsel %vm7191_vm4, %v9724_v42, %v9716_v38  ;;  %v10734_v55 = vsel %vm7191_vm4, %v9728_v32, %v9720_v25  ;;  %v11364_v52 = vrot.slane %v2691_v7, 9  ;;  %v11366_v46 = vrot.slane %v2698_v2, 9  ;;  %v19993_v38 = vld [vmem:[#allocation65_spill] sm:$0xff] }
 0x38e   :  { %v10728_v20 = vsel %vm7193_vm5, %v9732_v61, %v10727_v14  ;;  %v10735_v40 = vsel %vm7193_vm5, %v9736_v11, %v10734_v55  ;;  %v11365_v45 = vrot.slane %v2699_v26, 9  ;;  %v11367_v16 = vrot.slane %v2700_v29, 9 }
 0x38f   :  { %v15515_v60 = vsel %vm7195_vm7, %v9740_v30, %v10728_v20  ;;  %v15518_v31 = vsel %vm7195_vm7, %v9744_v34, %v10735_v40  ;;  %v6334_v50 = vrot.slane %v14975_v57, %v19816_v28  ;;  %v7442_v59 = vsel %vm7191_vm4, %v6338_v3, %v6330_v63 }
 0x390   :  { %19991 = vst [vmem:[#allocation76_spill] sm:$0xff] %v15515_v60  ;;  %19992 = vst [vmem:[#allocation83_spill] sm:$0xff] %v15518_v31  ;;  %v15523_v53 = vmax.f32 %v2691_v7, %v11364_v52  ;;  %v15525_v48 = vmax.f32 %v2698_v2, %v11366_v46  ;;  %v6346_v0 = vrot.slane %v14977_v17, %v19815_v33  ;;  %v11246_v63 = vadd.f32 -1.0, %v15377_v9  ;;  %v11696_v2 = vpop.eup %11695 }
 0x391   :  { %v15529_v6 = vmax.f32 %v2699_v26, %v11365_v45  ;;  %v15531_v43 = vmax.f32 %v2700_v29, %v11367_v16  ;;  %v15534_v25 = vadd.f32 %v1468_v24, %v19993_v38  ;;  %v6350_v42 = vrot.slane %v14977_v17, %v19816_v28 }
 0x392   :  { %v11247_v7 = vadd.f32 -1.0, %v15385_v13  ;;  %v15545_v32 = vsel %vm7193_vm5, %v6346_v0, %v7442_v59  ;;  %v7449_v24 = vsel %vm7191_vm4, %v6342_v49, %v6334_v50  ;;  %v8001_v17 = vmul.f32 %v15523_v53, %v15523_v53 }
 0x393   :  { %v8002_v61 = vmul.f32 %v15529_v6, %v15529_v6  ;;  %v8003_v9 = vmul.f32 %v15525_v48, %v15525_v48  ;;  %v8004_v13 = vmul.f32 %v15531_v43, %v15531_v43  ;;  %vm1729_vm2 = vcmp.gt.f32.partialorder %v15269_v44, 0.0 }
 0x394   :  { %vm1730_vm3 = vcmp.gt.f32.partialorder %v15285_v18, 0.0  ;;  %v1852_v49 = vmin.f32 %v15534_v25, 0.0  ;;  %v2353_v11 = vsel %vm1713_vm12, %v15260_v1, %v11246_v63  ;;  %v2354_v30 = vsel %vm1714_vm1, %v15264_v35, %v11247_v7 }
 0x395   :  { %v11262_v34 = vadd.f32 -1.0, %v15387_v54  ;;  %v11263_v14 = vadd.f32 -1.0, %v11696_v2  ;;  %v8668_v26 = vrot.slane %v8001_v17, %v19815_v33  ;;  %v8672_v29 = vrot.slane %v8001_v17, %v19816_v28 }
 0x396   :  { %v11698_v55 = vpop.eup %11697  ;;  %v8676_v20 = vrot.slane %v8002_v61, %v19815_v33  ;;  %v8680_v40 = vrot.slane %v8002_v61, %v19816_v28  ;;  %v8684_v52 = vrot.slane %v8003_v9, %v19815_v33  ;;  %v8688_v46 = vrot.slane %v8003_v9, %v19816_v28 }
 0x397   :  { %v8692_v1 = vrot.slane %v8004_v13, %v19815_v33  ;;  %v8696_v35 = vrot.slane %v8004_v13, %v19816_v28  ;;  %v2879_v16 = vcombine.low %v2353_v11, %v2354_v30  ;;  %v2880_v50 = vcombine.high %v2353_v11, %v2354_v30 }
 0x398   :  { %v10499_v54 = vsel %vm7191_vm4, %v8676_v20, %v8668_v26  ;;  %v10505_v45 = vsel %vm7191_vm4, %v8680_v40, %v8672_v29  ;;  %v2369_v38 = vsel %vm1729_vm2, %v15269_v44, %v11262_v34  ;;  %v2370_v63 = vsel %vm1730_vm3, %v15285_v18, %v11263_v14 }
 0x399   :  { %v10500_v59 = vsel %vm7193_vm5, %v8684_v52, %v10499_v54  ;;  %v10506_v0 = vsel %vm7193_vm5, %v8688_v46, %v10505_v45  ;;  %v2887_v17 = vrot.slane %v2879_v16, %v19814_v51  ;;  %v2894_v61 = vrot.slane %v2880_v50, %v19814_v51 }
 0x39a   :  { %v15583_v7 = vsel %vm7195_vm7, %v8692_v1, %v10500_v59  ;;  %v15586_v2 = vsel %vm7195_vm7, %v8696_v35, %v10506_v0  ;;  %v15591_v9 = vsel %vm7193_vm5, %v6350_v42, %v7449_v24  ;;  %v3022_v13 = vcombine.low %v2369_v38, %v2370_v63 }
 0x39b   :  { %19994 = vst [vmem:[#allocation64_spill] sm:$0xff] %v15583_v7  ;;  %19995 = vst [vmem:[#allocation129_spill] sm:$0xff] %v15586_v2  ;;  %v3023_v11 = vcombine.high %v2369_v38, %v2370_v63  ;;  %v2025_v44 = vmul.f32 1.442695, %v1852_v49  ;;  %v2895_v30 = vcombine.high %v2887_v17, %v2887_v17  ;;  %v2896_v34 = vcombine.high %v2894_v61, %v2894_v61 }
 0x39c   :  { %v11406_v26 = vrot.slane %v2887_v17, 9  ;;  %v11408_v18 = vrot.slane %v2894_v61, 9  ;;  %v3030_v14 = vrot.slane %v3022_v13, %v19814_v51  ;;  %vm1723_vm6 = vcmp.gt.f32.partialorder %v15315_v8, 0.0 }
 0x39d   :  { %v3037_v29 = vrot.slane %v3023_v11, %v19814_v51  ;;  %11699 = vpow2.f32 %v2025_v44  ;;  %v11256_v20 = vadd.f32 -1.0, %v11698_v55  ;;  %v11407_v40 = vrot.slane %v2895_v30, 9  ;;  %v19996_v11 = vld [vmem:[#allocation127_spill] sm:$0xff] }
 0x39e   :  { %v11409_v52 = vrot.slane %v2896_v34, 9  ;;  %v4777_v46 = vmax.f32 %v2887_v17, %v11406_v26  ;;  %v4779_v42 = vmax.f32 %v2894_v61, %v11408_v18  ;;  %v3038_v24 = vcombine.high %v3030_v14, %v3030_v14 }
 0x39f   :  { %v3039_v1 = vcombine.high %v3037_v29, %v3037_v29  ;;  %v11437_v35 = vrot.slane %v3030_v14, 9  ;;  %v11439_v49 = vrot.slane %v3037_v29, 9  ;;  %v4778_v54 = vmax.f32 %v2895_v30, %v11407_v40  ;;  %v19997_v30 = vld [vmem:[#allocation128_spill] sm:$0xff] }
 0x3a0   :  { %v4780_v45 = vmax.f32 %v2896_v34, %v11409_v52  ;;  %v5738_v16 = vrot.slane %v4777_v46, %v19815_v33  ;;  %v5742_v50 = vrot.slane %v4777_v46, %v19816_v28  ;;  %v5754_v59 = vrot.slane %v4779_v42, %v19815_v33 }
 0x3a1   :  { %v5758_v0 = vrot.slane %v4779_v42, %v19816_v28  ;;  %v8043_v38 = vmul.f32 %v4777_v46, %v4777_v46  ;;  %v8045_v55 = vmul.f32 %v4779_v42, %v4779_v42  ;;  %v5746_v63 = vrot.slane %v4778_v54, %v19815_v33 }
 0x3a2   :  { %v5750_v17 = vrot.slane %v4778_v54, %v19816_v28  ;;  %v5762_v61 = vrot.slane %v4780_v45, %v19815_v33  ;;  %v5766_v13 = vrot.slane %v4780_v45, %v19816_v28  ;;  %v7309_v44 = vsel %vm7197_vm13, %v5738_v16, %v19996_v11 }
 0x3a3   :  { %v7316_v34 = vsel %vm7197_vm13, %v5742_v50, %v19997_v30  ;;  %v8044_v26 = vmul.f32 %v4778_v54, %v4778_v54  ;;  %v8046_v18 = vmul.f32 %v4780_v45, %v4780_v45  ;;  %v7310_v40 = vsel %vm7199_vm14, %v5746_v63, %v7309_v44  ;;  %v19999_v63 = vld [vmem:[#allocation111_spill] sm:$0xff] }
 0x3a4   :  { %v7317_v52 = vsel %vm7199_vm14, %v5750_v17, %v7316_v34  ;;  %v9004_v46 = vrot.slane %v8043_v38, %v19815_v33  ;;  %v9008_v42 = vrot.slane %v8043_v38, %v19816_v28  ;;  %v7311_v3 = vsel %vm7201_vm15, %v5754_v59, %v7310_v40 }
 0x3a5   :  { %v7318_v57 = vsel %vm7201_vm15, %v5758_v0, %v7317_v52  ;;  %v9012_v62 = vrot.slane %v8044_v26, %v19815_v33  ;;  %v9016_v16 = vrot.slane %v8044_v26, %v19816_v28  ;;  %v5658_v54 = vrot.slane %v15317_v56, %v19815_v33 }
 0x3a6   :  { %v15619_v45 = vsel %vm7203_vm0, %v5762_v61, %v7311_v3  ;;  %v15622_v50 = vsel %vm7203_vm0, %v5766_v13, %v7318_v57  ;;  %v15627_v38 = vsel %vm1723_vm6, %v15315_v8, %v11256_v20  ;;  %v9020_v3 = vrot.slane %v8045_v55, %v19815_v33  ;;  %v19998_v8 = vld [vmem:[#allocation110_spill] sm:$0xff] }
 0x3a7   :  { %7710 = vst [vmem:[%s19394_s3 + $0x80] sm:$0xff] %v15619_v45  ;;  %7711 = vst [vmem:[%s19394_s3 + $0x88] sm:$0xff] %v15622_v50  ;;  %v9024_v57 = vrot.slane %v8045_v55, %v19816_v28  ;;  %v9028_v59 = vrot.slane %v8046_v18, %v19815_v33  ;;  %v9032_v0 = vrot.slane %v8046_v18, %v19816_v28  ;;  %v11438_v61 = vrot.slane %v3038_v24, 9 }
 0x3a8   :  { %v10568_v20 = vsel %vm7197_vm13, %v9004_v46, %v19998_v8  ;;  %v10575_v17 = vsel %vm7197_vm13, %v9008_v42, %v19999_v63  ;;  %v11440_v13 = vrot.slane %v3039_v1, 9  ;;  %v4808_v30 = vmax.f32 %v3030_v14, %v11437_v35 }
 0x3a9   :  { %v10569_v11 = vsel %vm7199_vm14, %v9012_v62, %v10568_v20  ;;  %v10576_v44 = vsel %vm7199_vm14, %v9016_v16, %v10575_v17  ;;  %v4810_v34 = vmax.f32 %v3037_v29, %v11439_v49  ;;  %v4809_v18 = vmax.f32 %v3038_v24, %v11438_v61 }
 0x3aa   :  { %v11700_v26 = vpop.eup %11699  ;;  %v10570_v55 = vsel %vm7201_vm15, %v9020_v3, %v10569_v11  ;;  %v10577_v40 = vsel %vm7201_vm15, %v9024_v57, %v10576_v44  ;;  %v4811_v52 = vmax.f32 %v3039_v1, %v11440_v13  ;;  %v5986_v42 = vrot.slane %v4808_v30, %v19815_v33  ;;  %v20002_v3 = vld [vmem:[#allocation57_spill] sm:$0xff]  ;;  %v20003_v57 = vld [vmem:[#allocation59_spill] sm:$0xff] }
 0x3ab   :  { %v10571_v46 = vsel %vm7203_vm0, %v9028_v59, %v10570_v55  ;;  %v10578_v8 = vsel %vm7203_vm0, %v9032_v0, %v10577_v40  ;;  %v5990_v63 = vrot.slane %v4808_v30, %v19816_v28  ;;  %v5994_v29 = vrot.slane %v4809_v18, %v19815_v33 }
 0x3ac   :  { %v15654_v62 = vadd.f32 %v14980_v39, %v10571_v46  ;;  %v15657_v14 = vadd.f32 %v14983_v21, %v10578_v8  ;;  %v5998_v35 = vrot.slane %v4809_v18, %v19816_v28  ;;  %vm1724_vm8 = vcmp.gt.f32.partialorder %v15534_v25, 0.0 }
 0x3ad   :  { %v6002_v24 = vrot.slane %v4810_v34, %v19815_v33  ;;  %v6006_v1 = vrot.slane %v4810_v34, %v19816_v28  ;;  %v6010_v49 = vrot.slane %v4811_v52, %v19815_v33  ;;  %v6014_v16 = vrot.slane %v4811_v52, %v19816_v28 }
 0x3ae   :  { %20000 = vst [vmem:[#allocation62_spill] sm:$0xff] %v15654_v62  ;;  %20001 = vst [vmem:[#allocation23_spill] sm:$0xff] %v15657_v14  ;;  %v7363_v39 = vsel %vm7197_vm13, %v5986_v42, %v20002_v3  ;;  %v7370_v21 = vsel %vm7197_vm13, %v5990_v63, %v20003_v57  ;;  %v8074_v59 = vmul.f32 %v4808_v30, %v4808_v30  ;;  %v1344_v42 = vpop.permute.xlu1 %1343  ;;  %v1867_v3 = vmin.f32 %v15289_v37, 0.0 }
 0x3af   :  { %v8075_v0 = vmul.f32 %v4809_v18, %v4809_v18  ;;  %v7364_v20 = vsel %vm7199_vm14, %v5994_v29, %v7363_v39  ;;  %v7371_v17 = vsel %vm7199_vm14, %v5998_v35, %v7370_v21  ;;  %v8076_v61 = vmul.f32 %v4810_v34, %v4810_v34  ;;  %v20004_v35 = vld [vmem:[#allocation60_spill] sm:$0xff] }
 0x3b0   :  { %v8077_v13 = vmul.f32 %v4811_v52, %v4811_v52  ;;  %v7365_v11 = vsel %vm7201_vm15, %v6002_v24, %v7364_v20  ;;  %v7372_v44 = vsel %vm7201_vm15, %v6006_v1, %v7371_v17  ;;  %v9252_v55 = vrot.slane %v8074_v59, %v19815_v33  ;;  %v20005_v1 = vld [vmem:[#allocation61_spill] sm:$0xff] }
 0x3b1   :  { %v9256_v40 = vrot.slane %v8074_v59, %v19816_v28  ;;  %v7366_v46 = vsel %vm7203_vm0, %v6010_v49, %v7365_v11  ;;  %v7373_v8 = vsel %vm7203_vm0, %v6014_v16, %v7372_v44  ;;  %v9260_v30 = vrot.slane %v8075_v0, %v19815_v33  ;;  %v20006_v59 = vld [vmem:[#allocation43_spill] sm:$0xff] }
 0x3b2   :  { %v9264_v18 = vrot.slane %v8075_v0, %v19816_v28  ;;  %7718 = vst [vmem:[%s19394_s3 + $0xc0] sm:$0xff] %v7366_v46  ;;  %7719 = vst [vmem:[%s19394_s3 + $0xc8] sm:$0xff] %v7373_v8  ;;  %v9268_v34 = vrot.slane %v8076_v61, %v19815_v33  ;;  %v9272_v52 = vrot.slane %v8076_v61, %v19816_v28  ;;  %v11257_v16 = vadd.f32 -1.0, %v11700_v26  ;;  %v20007_v8 = vld [vmem:[#allocation102_spill] sm:$0xff] }
 0x3b3   :  { %v9276_v63 = vrot.slane %v8077_v13, %v19815_v33  ;;  %v9280_v29 = vrot.slane %v8077_v13, %v19816_v28  ;;  %v10622_v24 = vsel %vm7197_vm13, %v9252_v55, %v20004_v35  ;;  %v10629_v49 = vsel %vm7197_vm13, %v9256_v40, %v20005_v1  ;;  %v20013_v35 = vld [vmem:[#allocation16_spill] sm:$0xff] }
 0x3b4   :  { %v10623_v39 = vsel %vm7199_vm14, %v9260_v30, %v10622_v24  ;;  %v10630_v57 = vsel %vm7199_vm14, %v9264_v18, %v10629_v49  ;;  %v1868_v21 = vmin.f32 %v15292_v27, 0.0  ;;  %v1519_v0 = vmul.f32 %v20006_v59, %v1344_v42 }
 0x3b5   :  { %v10624_v20 = vsel %vm7201_vm15, %v9268_v34, %v10623_v39  ;;  %v10631_v17 = vsel %vm7201_vm15, %v9272_v52, %v10630_v57  ;;  %v2364_v61 = vsel %vm1724_vm8, %v15534_v25, %v11257_v16  ;;  %v2055_v13 = vmul.f32 1.442695, %v1867_v3  ;;  %v11850_v3 = vld [vmem:[%s19394_s3 + $0x40] sm:$0xff] }
 0x3b6   :  { %v15705_v26 = vsel %vm7203_vm0, %v9276_v63, %v10624_v20  ;;  %v15708_v11 = vsel %vm7203_vm0, %v9280_v29, %v10631_v17  ;;  %v2969_v44 = vcombine.low %v15627_v38, %v2364_v61  ;;  %v2970_v55 = vcombine.high %v15627_v38, %v2364_v61  ;;  %v20012_v63 = vld [vmem:[#allocation91_spill] sm:$0xff]  ;;  %v1376_v20 = vpop.permute.xlu0 %1375 }
 0x3b7   :  { %11701 = vpow2.f32 %v2055_v13  ;;  %v2057_v40 = vmul.f32 1.442695, %v1868_v21  ;;  %v1520_v46 = vmul.f32 %v19745_v47, %v1344_v42  ;;  %v15714_v30 = vadd.f32 %v1519_v0, %v20007_v8 }
 0x3b8   :  { %v20008_v25 = vrot.slane %v14987_v4, %v19815_v33  ;;  %v20010_v34 = vrot.slane %v14987_v4, %v19816_v28  ;;  %v2977_v52 = vrot.slane %v2969_v44, %v19814_v51  ;;  %v2984_v42 = vrot.slane %v2970_v55, %v19814_v51  ;;  %v11851_v55 = vld [vmem:[%s19394_s3 + $0x58] sm:$0xff] }
 0x3b9   :  { %v5650_v29 = vrot.slane %v20012_v63, %v19815_v33  ;;  %11703 = vpow2.f32 %v2057_v40  ;;  %v15735_v24 = vadd.f32 %v1520_v46, %v20013_v35  ;;  %v5662_v57 = vrot.slane %v15317_v56, %v19816_v28  ;;  %v11852_v40 = vld [vmem:[%s19394_s3 + $0x48] sm:$0xff] }
 0x3ba   :  { %v15721_v18 = vsel %vm7195_vm7, %v20008_v25, %v15545_v32  ;;  %v15728_v38 = vsel %vm7195_vm7, %v20010_v34, %v15591_v9  ;;  %v1903_v32 = vmin.f32 %v15714_v30, 0.0  ;;  %v2985_v1 = vcombine.high %v2977_v52, %v2977_v52  ;;  %v11849_v9 = vld [vmem:[%s19394_s3 + $0x50] sm:$0xff] }
 0x3bb   :  { %20009 = vst [vmem:[#allocation112_spill] sm:$0xff] %v15721_v18  ;;  %20011 = vst [vmem:[#allocation34_spill] sm:$0xff] %v15728_v38  ;;  %v2986_v49 = vcombine.high %v2984_v42, %v2984_v42  ;;  %v11426_v16 = vrot.slane %v2977_v52, 9  ;;  %v11428_v4 = vrot.slane %v2984_v42, 9  ;;  %v15744_v39 = vadd.f32 %v11850_v3, %v11849_v9  ;;  %v15786_v9 = vpop.permute.xlu1 %861 }
 0x3bc   :  { %v7294_v21 = vsel %vm7191_vm4, %v5658_v54, %v5650_v29  ;;  %v2127_v0 = vmul.f32 1.442695, %v1903_v32  ;;  %v11427_v17 = vrot.slane %v2985_v1, 9  ;;  %v15762_v46 = vadd.f32 %v11852_v40, %v11851_v55  ;;  %v20014_v54 = vld [vmem:[#allocation137_spill] sm:$0xff] }
 0x3bd   :  { %v11429_v61 = vrot.slane %v2986_v49, 9  ;;  %v15752_v13 = vmax.f32 %v2977_v52, %v11426_v16  ;;  %v15754_v44 = vmax.f32 %v2984_v42, %v11428_v4  ;;  %v5654_v56 = vrot.slane %v20012_v63, %v19816_v28 }
 0x3be   :  { %v5666_v8 = vrot.slane %v20014_v54, %v19815_v33  ;;  %11705 = vpow2.f32 %v2127_v0  ;;  %v15768_v25 = vmax.f32 %v2985_v1, %v11427_v17  ;;  %v1904_v52 = vmin.f32 %v15735_v24, 0.0  ;;  %v20015_v1 = vld [vmem:[#allocation138_spill] sm:$0xff] }
 0x3bf   :  { %v15770_v34 = vmax.f32 %v2986_v49, %v11429_v61  ;;  %v1535_v42 = vmul.f32 %v20006_v59, %v1376_v20  ;;  %v7300_v35 = vsel %vm7191_vm4, %v5662_v57, %v5654_v56  ;;  %v8063_v32 = vmul.f32 %v15752_v13, %v15752_v13  ;;  %v20016_v61 = vld [vmem:[#allocation123_spill] sm:$0xff]  ;;  %v1164_v14 = vpop.permute.xlu1 %1163 }
 0x3c0   :  { %v7295_v29 = vsel %vm7193_vm5, %v5666_v8, %v7294_v21  ;;  %vm1739_vm9 = vcmp.gt.f32.partialorder %v15289_v37, 0.0  ;;  %v5670_v63 = vrot.slane %v20014_v54, %v19816_v28  ;;  %v5674_v49 = vrot.slane %v20015_v1, %v19815_v33 }
 0x3c1   :  { %v8065_v16 = vmul.f32 %v15754_v44, %v15754_v44  ;;  %v1536_v4 = vmul.f32 %v19745_v47, %v1376_v20  ;;  %v8064_v57 = vmul.f32 %v15768_v25, %v15768_v25  ;;  %v8066_v21 = vmul.f32 %v15770_v34, %v15770_v34 }
 0x3c2   :  { %vm1740_vm10 = vcmp.gt.f32.partialorder %v15292_v27, 0.0  ;;  %v15796_v0 = vsel %vm7195_vm7, %v5674_v49, %v7295_v29  ;;  %v15799_v17 = vsel %vm7193_vm5, %v5670_v63, %v7300_v35  ;;  %v2129_v20 = vmul.f32 1.442695, %v1904_v52  ;;  %v20017_v63 = vld [vmem:[#allocation73_spill] sm:$0xff] }
 0x3c3   :  { %v15802_v55 = vadd.f32 %v1535_v42, %v20016_v61  ;;  %v9164_v40 = vrot.slane %v8063_v32, %v19815_v33  ;;  %v9168_v56 = vrot.slane %v8063_v32, %v19816_v28  ;;  %v9172_v54 = vrot.slane %v8064_v57, %v19815_v33 }
 0x3c4   :  { %v9176_v8 = vrot.slane %v8064_v57, %v19816_v28  ;;  %v11702_v3 = vpop.eup %11701  ;;  %v9180_v38 = vrot.slane %v8065_v16, %v19815_v33  ;;  %v9184_v29 = vrot.slane %v8065_v16, %v19816_v28  ;;  %v9188_v35 = vrot.slane %v8066_v21, %v19815_v33 }
 0x3c5   :  { %v15812_v52 = vadd.f32 %v1536_v4, %v20017_v63  ;;  %v9192_v42 = vrot.slane %v8066_v21, %v19816_v28  ;;  %v10607_v49 = vsel %vm7191_vm4, %v9172_v54, %v9164_v40  ;;  %v11272_v61 = vadd.f32 -1.0, %v11702_v3 }
 0x3c6   :  { %v10613_v32 = vsel %vm7191_vm4, %v9176_v8, %v9168_v56  ;;  %v11704_v18 = vpop.eup %11703  ;;  %v6458_v57 = vrot.slane %v15439_v41, %v19815_v33  ;;  %v10608_v2 = vsel %vm7193_vm5, %v9180_v38, %v10607_v49  ;;  %v1919_v7 = vmin.f32 %v15802_v55, 0.0 }
 0x3c7   :  { %v10614_v16 = vsel %vm7193_vm5, %v9184_v29, %v10613_v32  ;;  %v15823_v4 = vsel %vm7195_vm7, %v9188_v35, %v10608_v2  ;;  %v11273_v40 = vadd.f32 -1.0, %v11704_v18  ;;  %v2379_v3 = vsel %vm1739_vm9, %v15289_v37, %v11272_v61 }
 0x3c8   :  { %20018 = vst [vmem:[#allocation126_spill] sm:$0xff] %v15823_v4  ;;  %v15826_v21 = vsel %vm7195_vm7, %v9192_v42, %v10614_v16  ;;  %v6450_v56 = vrot.slane %v15429_v15, %v19815_v33  ;;  %v6462_v38 = vrot.slane %v15439_v41, %v19816_v28  ;;  %v1920_v54 = vmin.f32 %v15812_v52, 0.0 }
 0x3c9   :  { %20019 = vst [vmem:[#allocation65_spill] sm:$0xff] %v15826_v21  ;;  %v2159_v8 = vmul.f32 1.442695, %v1919_v7  ;;  %v6454_v2 = vrot.slane %v15429_v15, %v19816_v28  ;;  %v2380_v18 = vsel %vm1740_vm10, %v15292_v27, %v11273_v40  ;;  %11707 = vpow2.f32 %v2129_v20 }
 0x3ca   :  { %v1429_v29 = vmul.f32 %v20006_v59, %v1164_v14  ;;  %v3112_v35 = vcombine.low %v2379_v3, %v2380_v18  ;;  %v3113_v63 = vcombine.high %v2379_v3, %v2380_v18  ;;  %v2161_v42 = vmul.f32 1.442695, %v1920_v54  ;;  %v20020_v3 = vld [vmem:[#allocation45_spill] sm:$0xff] }
 0x3cb   :  { %v11706_v37 = vpop.eup %11705  ;;  %11709 = vpow2.f32 %v2159_v8  ;;  %v6466_v41 = vrot.slane %v15431_v22, %v19815_v33  ;;  %v6470_v7 = vrot.slane %v15431_v22, %v19816_v28  ;;  %v7468_v49 = vsel %vm7191_vm4, %v6458_v57, %v6450_v56 }
 0x3cc   :  { %v7475_v27 = vsel %vm7191_vm4, %v6462_v38, %v6454_v2  ;;  %v3120_v20 = vrot.slane %v3112_v35, %v19814_v51  ;;  %v3127_v32 = vrot.slane %v3113_v63, %v19814_v51  ;;  %11711 = vpow2.f32 %v2161_v42 }
 0x3cd   :  { %v11308_v16 = vadd.f32 -1.0, %v11706_v37  ;;  %v1430_v40 = vmul.f32 %v19745_v47, %v1164_v14  ;;  %v15856_v22 = vadd.f32 %v1429_v29, %v20020_v3  ;;  %v15859_v56 = vsel %vm7193_vm5, %v6466_v41, %v7468_v49  ;;  %v20021_v3 = vld [vmem:[#allocation46_spill] sm:$0xff] }
 0x3ce   :  { %v3128_v54 = vcombine.high %v3120_v20, %v3120_v20  ;;  %v3129_v8 = vcombine.high %v3127_v32, %v3127_v32  ;;  %v11457_v18 = vrot.slane %v3120_v20, 9  ;;  %v11459_v57 = vrot.slane %v3127_v32, 9 }
 0x3cf   :  { %v15862_v38 = vsel %vm7193_vm5, %v6470_v7, %v7475_v27  ;;  %vm1775_vm11 = vcmp.gt.f32.partialorder %v15714_v30, 0.0  ;;  %v15871_v41 = vadd.f32 %v1430_v40, %v20021_v3  ;;  %v1813_v7 = vmin.f32 %v15856_v22, 0.0 }
 0x3d0   :  { %v11458_v37 = vrot.slane %v3128_v54, 9  ;;  %v11460_v14 = vrot.slane %v3129_v8, 9  ;;  %v4828_v35 = vmax.f32 %v3120_v20, %v11457_v18  ;;  %v4830_v29 = vmax.f32 %v3127_v32, %v11459_v57 }
 0x3d1   :  { %v2415_v42 = vsel %vm1775_vm11, %v15714_v30, %v11308_v16  ;;  %vm1776_vm12 = vcmp.gt.f32.partialorder %v15735_v24, 0.0  ;;  %vm1791_vm1 = vcmp.gt.f32.partialorder %v15802_v55, 0.0  ;;  %vm1792_vm2 = vcmp.gt.f32.partialorder %v15812_v52, 0.0 }
 0x3d2   :  { %v4829_v49 = vmax.f32 %v3128_v54, %v11458_v37  ;;  %v4831_v27 = vmax.f32 %v3129_v8, %v11460_v14  ;;  %v6146_v61 = vrot.slane %v4828_v35, %v19815_v33  ;;  %v6150_v15 = vrot.slane %v4828_v35, %v19816_v28 }
 0x3d3   :  { %v6162_v20 = vrot.slane %v4830_v29, %v19815_v33  ;;  %v6166_v32 = vrot.slane %v4830_v29, %v19816_v28  ;;  %v8094_v30 = vmul.f32 %v4828_v35, %v4828_v35  ;;  %v8096_v16 = vmul.f32 %v4830_v29, %v4830_v29 }
 0x3d4   :  { %v6154_v40 = vrot.slane %v4829_v49, %v19815_v33  ;;  %v6158_v54 = vrot.slane %v4829_v49, %v19816_v28  ;;  %v6170_v8 = vrot.slane %v4831_v27, %v19815_v33  ;;  %v6174_v18 = vrot.slane %v4831_v27, %v19816_v28 }
 0x3d5   :  { %v8095_v57 = vmul.f32 %v4829_v49, %v4829_v49  ;;  %v8097_v37 = vmul.f32 %v4831_v27, %v4831_v27  ;;  %v9412_v14 = vrot.slane %v8094_v30, %v19815_v33  ;;  %v9416_v3 = vrot.slane %v8094_v30, %v19816_v28 }
 0x3d6   :  { %v11708_v63 = vpop.eup %11707  ;;  %v7402_v35 = vsel %vm7191_vm4, %v6154_v40, %v6146_v61  ;;  %v7408_v29 = vsel %vm7191_vm4, %v6158_v54, %v6150_v15  ;;  %v9428_v2 = vrot.slane %v8096_v16, %v19815_v33  ;;  %v9432_v21 = vrot.slane %v8096_v16, %v19816_v28 }
 0x3d7   :  { %v7403_v62 = vsel %vm7193_vm5, %v6162_v20, %v7402_v35  ;;  %v7409_v10 = vsel %vm7193_vm5, %v6166_v32, %v7408_v29  ;;  %v9420_v49 = vrot.slane %v8095_v57, %v19815_v33  ;;  %v9424_v27 = vrot.slane %v8095_v57, %v19816_v28 }
 0x3d8   :  { %v11710_v4 = vpop.eup %11709  ;;  %v15896_v30 = vsel %vm7195_vm7, %v6170_v8, %v7403_v62  ;;  %v15899_v61 = vsel %vm7195_vm7, %v6174_v18, %v7409_v10  ;;  %v9436_v15 = vrot.slane %v8097_v37, %v19815_v33  ;;  %v9440_v40 = vrot.slane %v8097_v37, %v19816_v28  ;;  %v15907_v8 = vpop.permute.xlu0 %837 }
 0x3d9   :  { %20022 = vst [vmem:[#allocation127_spill] sm:$0xff] %v15896_v30  ;;  %20023 = vst [vmem:[#allocation128_spill] sm:$0xff] %v15899_v61  ;;  %v11712_v16 = vpop.eup %11711  ;;  %v10661_v54 = vsel %vm7191_vm4, %v9420_v49, %v9412_v14  ;;  %v10667_v20 = vsel %vm7191_vm4, %v9424_v27, %v9416_v3  ;;  %v11309_v32 = vadd.f32 -1.0, %v11708_v63  ;;  %v11324_v35 = vadd.f32 -1.0, %v11710_v4 }
 0x3da   :  { %v10662_v29 = vsel %vm7193_vm5, %v9428_v2, %v10661_v54  ;;  %v10668_v57 = vsel %vm7193_vm5, %v9432_v21, %v10667_v20  ;;  %v11325_v62 = vadd.f32 -1.0, %v11712_v16  ;;  %v1814_v10 = vmin.f32 %v15871_v41, 0.0 }
 0x3db   :  { %v15911_v18 = vsel %vm7195_vm7, %v9436_v15, %v10662_v29  ;;  %v15914_v37 = vsel %vm7195_vm7, %v9440_v40, %v10668_v57  ;;  %v2416_v63 = vsel %vm1776_vm12, %v15735_v24, %v11309_v32  ;;  %v2431_v4 = vsel %vm1791_vm1, %v15802_v55, %v11324_v35 }
 0x3dc   :  { %20024 = vst [vmem:[#allocation110_spill] sm:$0xff] %v15911_v18  ;;  %20025 = vst [vmem:[#allocation111_spill] sm:$0xff] %v15914_v37  ;;  %v5402_v21 = vrot.slane %v15523_v53, %v19815_v33  ;;  %v3433_v2 = vcombine.low %v2415_v42, %v2416_v63  ;;  %v3434_v14 = vcombine.high %v2415_v42, %v2416_v63  ;;  %v1947_v40 = vmul.f32 1.442695, %v1813_v7  ;;  %v1284_v63 = vpop.permute.xlu0 %1283 }
 0x3dd   :  { %v2432_v3 = vsel %vm1792_vm2, %v15812_v52, %v11325_v62  ;;  %v5406_v49 = vrot.slane %v15523_v53, %v19816_v28  ;;  %v5418_v24 = vrot.slane %v15525_v48, %v19815_v33  ;;  %v20026_v55 = vrot.slane %v15529_v6, %v19815_v33 }
 0x3de   :  { %v3576_v27 = vcombine.low %v2431_v4, %v2432_v3  ;;  %v3577_v15 = vcombine.high %v2431_v4, %v2432_v3  ;;  %v3441_v42 = vrot.slane %v3433_v2, %v19814_v51  ;;  %v3448_v54 = vrot.slane %v3434_v14, %v19814_v51 }
 0x3df   :  { %v7240_v16 = vsel %vm7191_vm4, %v20026_v55, %v5402_v21  ;;  %v20027_v52 = vrot.slane %v15529_v6, %v19816_v28  ;;  %v1949_v32 = vmul.f32 1.442695, %v1814_v10  ;;  %v5422_v4 = vrot.slane %v15525_v48, %v19816_v28 }
 0x3e0   :  { %v3584_v20 = vrot.slane %v3576_v27, %v19814_v51  ;;  %v3591_v7 = vrot.slane %v3577_v15, %v19814_v51  ;;  %v3449_v35 = vcombine.high %v3441_v42, %v3441_v42  ;;  %v3450_v29 = vcombine.high %v3448_v54, %v3448_v54 }
 0x3e1   :  { %v7246_v53 = vsel %vm7191_vm4, %v20027_v52, %v5406_v49  ;;  %v11526_v57 = vrot.slane %v3441_v42, 9  ;;  %v11528_v62 = vrot.slane %v3448_v54, 9  ;;  %v5426_v21 = vrot.slane %v15531_v43, %v19815_v33 }
 0x3e2   :  { %v7241_v6 = vsel %vm7193_vm5, %v5418_v24, %v7240_v16  ;;  %11713 = vpow2.f32 %v1947_v40  ;;  %v11527_v2 = vrot.slane %v3449_v35, 9  ;;  %v11529_v14 = vrot.slane %v3450_v29, 9 }
 0x3e3   :  { %v15948_v3 = vmax.f32 %v3441_v42, %v11526_v57  ;;  %v15950_v49 = vmax.f32 %v3448_v54, %v11528_v62  ;;  %v7247_v10 = vsel %vm7193_vm5, %v5422_v4, %v7246_v53  ;;  %v3592_v27 = vcombine.high %v3584_v20, %v3584_v20  ;;  %v20036_v4 = vld [vmem:[#allocation95_spill] sm:$0xff] }
 0x3e4   :  { %11715 = vpow2.f32 %v1949_v32  ;;  %v1489_v15 = vmul.f32 %v20006_v59, %v1284_v63  ;;  %v15954_v55 = vmax.f32 %v3449_v35, %v11527_v2  ;;  %v15956_v48 = vmax.f32 %v3450_v29, %v11529_v14 }
 0x3e5   :  { %v3593_v52 = vcombine.high %v3591_v7, %v3591_v7  ;;  %v1490_v24 = vmul.f32 %v19745_v47, %v1284_v63  ;;  %v20028_v40 = vrot.slane %v20015_v1, %v19816_v28  ;;  %v20030_v42 = vrot.slane %v15441_v23, %v19815_v33 }
 0x3e6   :  { %v5430_v53 = vrot.slane %v15531_v43, %v19816_v28  ;;  %v8163_v32 = vmul.f32 %v15948_v3, %v15948_v3  ;;  %v20032_v1 = vrot.slane %v15441_v23, %v19816_v28  ;;  %v15985_v35 = vsel %vm7195_vm7, %v5426_v21, %v7241_v6  ;;  %v20037_v21 = vld [vmem:[#allocation96_spill] sm:$0xff] }
 0x3e7   :  { %v15964_v16 = vsel %vm7195_vm7, %v20028_v40, %v15799_v17  ;;  %v15971_v54 = vsel %vm7195_vm7, %v20030_v42, %v15859_v56  ;;  %20034 = vst [vmem:[#allocation61_spill] sm:$0xff] %v15985_v35  ;;  %v8165_v56 = vmul.f32 %v15950_v49, %v15950_v49  ;;  %v11557_v29 = vrot.slane %v3584_v20, 9 }
 0x3e8   :  { %20029 = vst [vmem:[#allocation57_spill] sm:$0xff] %v15964_v16  ;;  %20031 = vst [vmem:[#allocation59_spill] sm:$0xff] %v15971_v54  ;;  %v15982_v17 = vsel %vm7195_vm7, %v20032_v1, %v15862_v38  ;;  %v15990_v57 = vsel %vm7195_vm7, %v5430_v53, %v7247_v10  ;;  %v8164_v43 = vmul.f32 %v15954_v55, %v15954_v55  ;;  %v11558_v23 = vrot.slane %v3592_v27, 9 }
 0x3e9   :  { %20033 = vst [vmem:[#allocation60_spill] sm:$0xff] %v15982_v17  ;;  %20035 = vst [vmem:[#allocation43_spill] sm:$0xff] %v15990_v57  ;;  %v8166_v62 = vmul.f32 %v15956_v48, %v15956_v48  ;;  %v11559_v63 = vrot.slane %v3591_v7, 9  ;;  %v11560_v38 = vrot.slane %v3593_v52, 9  ;;  %v15997_v2 = vadd.f32 %v1489_v15, %v20036_v4 }
 0x3ea   :  { %v16000_v6 = vadd.f32 %v1490_v24, %v20037_v21  ;;  %v9964_v14 = vrot.slane %v8163_v32, %v19815_v33  ;;  %v9968_v10 = vrot.slane %v8163_v32, %v19816_v28  ;;  %v9972_v40 = vrot.slane %v8164_v43, %v19815_v33 }
 0x3eb   :  { %v9976_v42 = vrot.slane %v8164_v43, %v19816_v28  ;;  %v9980_v53 = vrot.slane %v8165_v56, %v19815_v33  ;;  %v9984_v1 = vrot.slane %v8165_v56, %v19816_v28  ;;  %v9988_v37 = vrot.slane %v8166_v62, %v19815_v33 }
 0x3ec   :  { %v16009_v18 = vmax.f32 %v3584_v20, %v11557_v29  ;;  %v9992_v15 = vrot.slane %v8166_v62, %v19816_v28  ;;  %v10781_v24 = vsel %vm7191_vm4, %v9972_v40, %v9964_v14  ;;  %v16014_v21 = vmax.f32 %v3592_v27, %v11558_v23  ;;  %v11853_v20 = vld [vmem:[%s19394_s3 + $0x90] sm:$0xff]  ;;  %v11854_v27 = vld [vmem:[%s19394_s3 + $0x98] sm:$0xff] }
 0x3ed   :  { %v10788_v4 = vsel %vm7191_vm4, %v9976_v42, %v9968_v10  ;;  %v10782_v32 = vsel %vm7193_vm5, %v9980_v53, %v10781_v24  ;;  %v16018_v61 = vmax.f32 %v3591_v7, %v11559_v63  ;;  %v16020_v30 = vmax.f32 %v3593_v52, %v11560_v38 }
 0x3ee   :  { %v10789_v43 = vsel %vm7193_vm5, %v9984_v1, %v10788_v4  ;;  %v16026_v56 = vadd.f32 %v11853_v20, %v15619_v45  ;;  %v16032_v29 = vadd.f32 %v11854_v27, %v15622_v50  ;;  %v16035_v62 = vsel %vm7195_vm7, %v9988_v37, %v10782_v32 }
 0x3ef   :  { %20040 = vst [vmem:[#allocation16_spill] sm:$0xff] %v16035_v62  ;;  %v16038_v7 = vsel %vm7195_vm7, %v9992_v15, %v10789_v43  ;;  %v11714_v52 = vpop.eup %11713  ;;  %v5898_v23 = vrot.slane %v15752_v13, %v19815_v33  ;;  %v5902_v45 = vrot.slane %v15752_v13, %v19816_v28  ;;  %v5914_v63 = vrot.slane %v15754_v44, %v19815_v33 }
 0x3f0   :  { %20038 = vst [vmem:[#allocation102_spill] sm:$0xff] %v16026_v56  ;;  %20039 = vst [vmem:[#allocation91_spill] sm:$0xff] %v16032_v29  ;;  %v5918_v50 = vrot.slane %v15754_v44, %v19816_v28  ;;  %v5906_v37 = vrot.slane %v15768_v25, %v19815_v33  ;;  %v5910_v38 = vrot.slane %v15768_v25, %v19816_v28  ;;  %v1873_v44 = vmin.f32 %v15997_v2, 0.0  ;;  %v1204_v29 = vpop.permute.xlu1 %1203 }
 0x3f1   :  { %20041 = vst [vmem:[#allocation137_spill] sm:$0xff] %v16038_v7  ;;  %v8194_v14 = vmul.f32 %v16009_v18, %v16009_v18  ;;  %v8195_v10 = vmul.f32 %v16014_v21, %v16014_v21  ;;  %v11716_v40 = vpop.eup %11715  ;;  %v8196_v13 = vmul.f32 %v16018_v61, %v16018_v61  ;;  %v8197_v42 = vmul.f32 %v16020_v30, %v16020_v30 }
 0x3f2   :  { %v1874_v53 = vmin.f32 %v16000_v6, 0.0  ;;  %vm1685_vm3 = vcmp.gt.f32.partialorder %v15856_v22, 0.0  ;;  %vm1686_vm6 = vcmp.gt.f32.partialorder %v15871_v41, 0.0  ;;  %v11218_v27 = vadd.f32 -1.0, %v11714_v52 }
 0x3f3   :  { %v10212_v1 = vrot.slane %v8194_v14, %v19815_v33  ;;  %v10216_v25 = vrot.slane %v8194_v14, %v19816_v28  ;;  %v10220_v15 = vrot.slane %v8195_v10, %v19815_v33  ;;  %v10224_v24 = vrot.slane %v8195_v10, %v19816_v28 }
 0x3f4   :  { %v10228_v4 = vrot.slane %v8196_v13, %v19815_v33  ;;  %v10232_v32 = vrot.slane %v8196_v13, %v19816_v28  ;;  %v10236_v43 = vrot.slane %v8197_v42, %v19815_v33  ;;  %v10240_v20 = vrot.slane %v8197_v42, %v19816_v28 }
 0x3f5   :  { %v11219_v57 = vadd.f32 -1.0, %v11716_v40  ;;  %v10835_v14 = vsel %vm7191_vm4, %v10220_v15, %v10212_v1  ;;  %v10842_v35 = vsel %vm7191_vm4, %v10224_v24, %v10216_v25  ;;  %v2067_v7 = vmul.f32 1.442695, %v1873_v44  ;;  %v1304_v1 = vpop.permute.xlu0 %1303  ;;  %v20044_v24 = vld [vmem:[#allocation66_spill] sm:$0xff] }
 0x3f6   :  { %v2069_v62 = vmul.f32 1.442695, %v1874_v53  ;;  %v10836_v56 = vsel %vm7193_vm5, %v10228_v4, %v10835_v14  ;;  %v10843_v10 = vsel %vm7193_vm5, %v10232_v32, %v10842_v35  ;;  %v2325_v13 = vsel %vm1685_vm3, %v15856_v22, %v11218_v27  ;;  %v20045_v32 = vld [vmem:[#allocation67_spill] sm:$0xff] }
 0x3f7   :  { %v2326_v52 = vsel %vm1686_vm6, %v15871_v41, %v11219_v57  ;;  %v16083_v40 = vsel %vm7195_vm7, %v10236_v43, %v10836_v56  ;;  %v16086_v42 = vsel %vm7195_vm7, %v10240_v20, %v10843_v10  ;;  %v7348_v25 = vsel %vm7191_vm4, %v5906_v37, %v5898_v23 }
 0x3f8   :  { %20042 = vst [vmem:[#allocation138_spill] sm:$0xff] %v16083_v40  ;;  %20043 = vst [vmem:[#allocation123_spill] sm:$0xff] %v16086_v42  ;;  %v2629_v44 = vcombine.low %v2325_v13, %v2326_v52  ;;  %v2630_v53 = vcombine.high %v2325_v13, %v2326_v52  ;;  %11717 = vpow2.f32 %v2067_v7  ;;  %v1449_v35 = vmul.f32 %v20006_v59, %v1204_v29 }
 0x3f9   :  { %v1450_v22 = vmul.f32 %v19745_v47, %v1204_v29  ;;  %v7354_v15 = vsel %vm7191_vm4, %v5910_v38, %v5902_v45  ;;  %11719 = vpow2.f32 %v2069_v62  ;;  %v1499_v7 = vmul.f32 %v20006_v59, %v1304_v1 }
 0x3fa   :  { %v2637_v41 = vrot.slane %v2629_v44, %v19814_v51  ;;  %v2644_v57 = vrot.slane %v2630_v53, %v19814_v51  ;;  %v16097_v4 = vadd.f32 %v1449_v35, %v20044_v24  ;;  %v16106_v62 = vsel %vm7193_vm5, %v5914_v63, %v7348_v25 }
 0x3fb   :  { %v16100_v23 = vadd.f32 %v1450_v22, %v20045_v32  ;;  %v16109_v20 = vsel %vm7193_vm5, %v5918_v50, %v7354_v15  ;;  %v1500_v35 = vmul.f32 %v19745_v47, %v1304_v1  ;;  %v20046_v22 = vld [vmem:[#allocation86_spill] sm:$0xff]  ;;  %vm1745_vm8 = vcmp.gt.f32.partialorder %v15997_v2, 0.0 }
 0x3fc   :  { %v2645_v37 = vcombine.high %v2637_v41, %v2637_v41  ;;  %v2646_v29 = vcombine.high %v2644_v57, %v2644_v57  ;;  %v11352_v43 = vrot.slane %v2637_v41, 9  ;;  %v11354_v45 = vrot.slane %v2644_v57, 9 }
 0x3fd   :  { %v1833_v27 = vmin.f32 %v16097_v4, 0.0  ;;  %v1834_v44 = vmin.f32 %v16100_v23, 0.0  ;;  %v16115_v24 = vadd.f32 %v1499_v7, %v20046_v22  ;;  %vm1746_vm9 = vcmp.gt.f32.partialorder %v16000_v6, 0.0 }
 0x3fe   :  { %v11353_v14 = vrot.slane %v2645_v37, 9  ;;  %v11355_v10 = vrot.slane %v2646_v29, 9  ;;  %v4723_v13 = vmax.f32 %v2637_v41, %v11352_v43  ;;  %v4725_v52 = vmax.f32 %v2644_v57, %v11354_v45  ;;  %v20047_v43 = vld [vmem:[#allocation144_spill] sm:$0xff] }
 0x3ff   :  { %v1987_v53 = vmul.f32 1.442695, %v1833_v27  ;;  %v20048_v27 = vld [vmem:[#allocation84_spill] sm:$0xff]  ;;  %vm1705_vm10 = vcmp.gt.f32.partialorder %v16097_v4, 0.0  ;;  %vm1706_vm11 = vcmp.gt.f32.partialorder %v16100_v23, 0.0  ;;  %vm1755_vm12 = vcmp.gt.f32.partialorder %v16115_v24, 0.0 }
 0x400   :  { %v4724_v32 = vmax.f32 %v2645_v37, %v11353_v14  ;;  %v4726_v63 = vmax.f32 %v2646_v29, %v11355_v10  ;;  %v5306_v25 = vrot.slane %v4723_v13, %v19815_v33  ;;  %v5310_v50 = vrot.slane %v4723_v13, %v19816_v28 }
 0x401   :  { %v5322_v15 = vrot.slane %v4725_v52, %v19815_v33  ;;  %v5326_v38 = vrot.slane %v4725_v52, %v19816_v28  ;;  %v7989_v41 = vmul.f32 %v4723_v13, %v4723_v13  ;;  %v7991_v57 = vmul.f32 %v4725_v52, %v4725_v52  ;;  %v1260_v52 = vpop.permute.xlu1 %1259 }
 0x402   :  { %v5314_v1 = vrot.slane %v4724_v32, %v19815_v33  ;;  %v5318_v7 = vrot.slane %v4724_v32, %v19816_v28  ;;  %v5330_v37 = vrot.slane %v4726_v63, %v19815_v33  ;;  %v5334_v29 = vrot.slane %v4726_v63, %v19816_v28 }
 0x403   :  { %v7215_v45 = vsel %vm7197_vm13, %v5306_v25, %v20047_v43  ;;  %v7222_v14 = vsel %vm7197_vm13, %v5310_v50, %v20048_v27  ;;  %v7990_v10 = vmul.f32 %v4724_v32, %v4724_v32  ;;  %v7992_v13 = vmul.f32 %v4726_v63, %v4726_v63 }
 0x404   :  { %v7216_v22 = vsel %vm7199_vm14, %v5314_v1, %v7215_v45  ;;  %v7223_v56 = vsel %vm7199_vm14, %v5318_v7, %v7222_v14  ;;  %v8572_v42 = vrot.slane %v7989_v41, %v19815_v33  ;;  %v8576_v40 = vrot.slane %v7989_v41, %v19816_v28 }
 0x405   :  { %v7217_v5 = vsel %vm7201_vm15, %v5322_v15, %v7216_v22  ;;  %v7224_v31 = vsel %vm7201_vm15, %v5326_v38, %v7223_v56  ;;  %v8580_v25 = vrot.slane %v7990_v10, %v19815_v33  ;;  %v8584_v43 = vrot.slane %v7990_v10, %v19816_v28  ;;  %v11718_v50 = vpop.eup %11717  ;;  %v20049_v38 = vld [vmem:[#allocation87_spill] sm:$0xff]  ;;  %v20050_v15 = vld [vmem:[#allocation69_spill] sm:$0xff] }
 0x406   :  { %v16140_v32 = vsel %vm7203_vm0, %v5330_v37, %v7217_v5  ;;  %v16143_v63 = vsel %vm7203_vm0, %v5334_v29, %v7224_v31  ;;  %v1989_v1 = vmul.f32 1.442695, %v1834_v44  ;;  %v1477_v7 = vmul.f32 %v20006_v59, %v1260_v52  ;;  %v11720_v45 = vpop.eup %11719  ;;  %v20051_v37 = vld [vmem:[#allocation29_spill] sm:$0xff] }
 0x407   :  { %7696 = vst [vmem:[%s19394_s3 + $0x10] sm:$0xff] %v16140_v32  ;;  %7697 = vst [vmem:[%s19394_s3 + $0x18] sm:$0xff] %v16143_v63  ;;  %v8588_v5 = vrot.slane %v7991_v57, %v19815_v33  ;;  %v8592_v56 = vrot.slane %v7991_v57, %v19816_v28  ;;  %v8596_v31 = vrot.slane %v7992_v13, %v19815_v33  ;;  %v11278_v27 = vadd.f32 -1.0, %v11718_v50 }
 0x408   :  { %v16158_v44 = vadd.f32 %v1500_v35, %v20049_v38  ;;  %v10474_v41 = vsel %vm7197_vm13, %v8572_v42, %v20050_v15  ;;  %v10481_v29 = vsel %vm7197_vm13, %v8576_v40, %v20051_v37  ;;  %v11279_v14 = vadd.f32 -1.0, %v11720_v45  ;;  %v20057_v15 = vld [vmem:[#allocation32_spill] sm:$0xff] }
 0x409   :  { %v8600_v10 = vrot.slane %v7992_v13, %v19816_v28  ;;  %v10475_v22 = vsel %vm7199_vm14, %v8580_v25, %v10474_v41  ;;  %v10482_v60 = vsel %vm7199_vm14, %v8584_v43, %v10481_v29  ;;  %11721 = vpow2.f32 %v1987_v53 }
 0x40a   :  { %v10476_v57 = vsel %vm7201_vm15, %v8588_v5, %v10475_v22  ;;  %v10483_v35 = vsel %vm7201_vm15, %v8592_v56, %v10482_v60  ;;  %v2385_v42 = vsel %vm1745_vm8, %v15997_v2, %v11278_v27  ;;  %v2386_v40 = vsel %vm1746_vm9, %v16000_v6, %v11279_v14 }
 0x40b   :  { %v10477_v50 = vsel %vm7203_vm0, %v8596_v31, %v10476_v57  ;;  %v10484_v13 = vsel %vm7203_vm0, %v8600_v10, %v10483_v35  ;;  %v3165_v25 = vcombine.low %v2385_v42, %v2386_v40  ;;  %v3166_v45 = vcombine.high %v2385_v42, %v2386_v40 }
 0x40c   :  { %v16178_v53 = vadd.f32 %v10477_v50, %v15434_v58  ;;  %v16181_v43 = vadd.f32 %v10484_v13, %v15437_v36  ;;  %11723 = vpow2.f32 %v1989_v1  ;;  %v1883_v60 = vmin.f32 %v16115_v24, 0.0  ;;  %v20056_v36 = vld [vmem:[#allocation40_spill] sm:$0xff] }
 0x40d   :  { %v3173_v2 = vrot.slane %v3165_v25, %v19814_v51  ;;  %v3180_v5 = vrot.slane %v3166_v45, %v19814_v51  ;;  %v1884_v6 = vmin.f32 %v16158_v44, 0.0  ;;  %v1478_v56 = vmul.f32 %v19745_v47, %v1260_v52  ;;  %v20058_v52 = vld [vmem:[#allocation42_spill] sm:$0xff] }
 0x40e   :  { %20052 = vst [vmem:[#allocation73_spill] sm:$0xff] %v16178_v53  ;;  %20053 = vst [vmem:[#allocation45_spill] sm:$0xff] %v16181_v43  ;;  %v20054_v31 = vrot.slane %v15770_v34, %v19815_v33  ;;  %v16197_v1 = vmul.f32 %v20056_v36, %v15786_v9  ;;  %v2087_v38 = vmul.f32 1.442695, %v1883_v60  ;;  %v16200_v41 = vadd.f32 %v1477_v7, %v20057_v15 }
 0x40f   :  { %v3181_v37 = vcombine.high %v3173_v2, %v3173_v2  ;;  %v3182_v29 = vcombine.high %v3180_v5, %v3180_v5  ;;  %v11468_v27 = vrot.slane %v3173_v2, 9  ;;  %v11470_v14 = vrot.slane %v3180_v5, 9 }
 0x410   :  { %v16193_v58 = vsel %vm7195_vm7, %v20054_v31, %v16106_v62  ;;  %v16204_v10 = vmul.f32 %v20058_v52, %v15786_v9  ;;  %11725 = vpow2.f32 %v2087_v38  ;;  %v2089_v22 = vmul.f32 1.442695, %v1884_v6  ;;  %v20059_v62 = vld [vmem:[#allocation85_spill] sm:$0xff] }
 0x411   :  { %20055 = vst [vmem:[#allocation46_spill] sm:$0xff] %v16193_v58  ;;  %v16207_v57 = vadd.f32 %v1478_v56, %v20059_v62  ;;  %v11469_v35 = vrot.slane %v3181_v37, 9  ;;  %v11471_v42 = vrot.slane %v3182_v29, 9  ;;  %v4839_v40 = vmax.f32 %v3173_v2, %v11468_v27  ;;  %v20061_v62 = vld [vmem:[#allocation122_spill] sm:$0xff] }
 0x412   :  { %v4841_v50 = vmax.f32 %v3180_v5, %v11470_v14  ;;  %v16211_v7 = vmul.f32 %v20056_v36, %v15907_v8  ;;  %11727 = vpow2.f32 %v2089_v22  ;;  %v1861_v13 = vmin.f32 %v16200_v41, 0.0  ;;  %v20060_v14 = vld [vmem:[#allocation31_spill] sm:$0xff] }
 0x413   :  { %v1862_v25 = vmin.f32 %v16207_v57, 0.0  ;;  %v4840_v9 = vmax.f32 %v3181_v37, %v11469_v35  ;;  %v4842_v45 = vmax.f32 %v3182_v29, %v11471_v42  ;;  %v6234_v60 = vrot.slane %v4839_v40, %v19815_v33 }
 0x414   :  { %v6238_v6 = vrot.slane %v4839_v40, %v19816_v28  ;;  %v6250_v56 = vrot.slane %v4841_v50, %v19815_v33  ;;  %v6254_v2 = vrot.slane %v4841_v50, %v19816_v28  ;;  %v8105_v5 = vmul.f32 %v4839_v40, %v4839_v40 }
 0x415   :  { %v8107_v31 = vmul.f32 %v4841_v50, %v4841_v50  ;;  %v6242_v38 = vrot.slane %v4840_v9, %v19815_v33  ;;  %v6246_v15 = vrot.slane %v4840_v9, %v19816_v28  ;;  %v6258_v37 = vrot.slane %v4842_v45, %v19815_v33 }
 0x416   :  { %v6262_v29 = vrot.slane %v4842_v45, %v19816_v28  ;;  %v11722_v27 = vpop.eup %11721  ;;  %v7417_v22 = vsel %vm7197_vm13, %v6234_v60, %v20060_v14  ;;  %v7424_v35 = vsel %vm7197_vm13, %v6238_v6, %v20061_v62  ;;  %v8106_v42 = vmul.f32 %v4840_v9, %v4840_v9 }
 0x417   :  { %v8108_v40 = vmul.f32 %v4842_v45, %v4842_v45  ;;  %v7418_v50 = vsel %vm7199_vm14, %v6242_v38, %v7417_v22  ;;  %v7425_v43 = vsel %vm7199_vm14, %v6246_v15, %v7424_v35  ;;  %v9500_v53 = vrot.slane %v8105_v5, %v19815_v33 }
 0x418   :  { %v9504_v58 = vrot.slane %v8105_v5, %v19816_v28  ;;  %v7419_v17 = vsel %vm7201_vm15, %v6250_v56, %v7418_v50  ;;  %v7426_v54 = vsel %vm7201_vm15, %v6254_v2, %v7425_v43  ;;  %v9508_v16 = vrot.slane %v8106_v42, %v19815_v33  ;;  %v20062_v2 = vld [vmem:[#allocation125_spill] sm:$0xff] }
 0x419   :  { %v9512_v60 = vrot.slane %v8106_v42, %v19816_v28  ;;  %v11724_v14 = vpop.eup %11723  ;;  %v7420_v9 = vsel %vm7203_vm0, %v6258_v37, %v7419_v17  ;;  %v7427_v45 = vsel %vm7203_vm0, %v6262_v29, %v7426_v54  ;;  %v9516_v6 = vrot.slane %v8107_v31, %v19815_v33  ;;  %v20063_v54 = vld [vmem:[#allocation33_spill] sm:$0xff] }
 0x41a   :  { %v9520_v38 = vrot.slane %v8107_v31, %v19816_v28  ;;  %7726 = vst [vmem:[%s19394_s3 + $0x100] sm:$0xff] %v7420_v9  ;;  %7727 = vst [vmem:[%s19394_s3 + $0x108] sm:$0xff] %v7427_v45  ;;  %v9524_v43 = vrot.slane %v8108_v40, %v19815_v33  ;;  %v9528_v56 = vrot.slane %v8108_v40, %v19816_v28  ;;  %v11238_v37 = vadd.f32 -1.0, %v11722_v27  ;;  %v20066_v9 = vld [vmem:[#allocation36_spill] sm:$0xff] }
 0x41b   :  { %v10676_v17 = vsel %vm7197_vm13, %v9500_v53, %v20062_v2  ;;  %v10683_v5 = vsel %vm7197_vm13, %v9504_v58, %v20063_v54  ;;  %v11239_v29 = vadd.f32 -1.0, %v11724_v14  ;;  %v2043_v35 = vmul.f32 1.442695, %v1861_v13 }
 0x41c   :  { %v10677_v31 = vsel %vm7199_vm14, %v9508_v16, %v10676_v17  ;;  %v10684_v15 = vsel %vm7199_vm14, %v9512_v60, %v10683_v5  ;;  %v2045_v42 = vmul.f32 1.442695, %v1862_v25  ;;  %v2345_v16 = vsel %vm1705_vm10, %v16097_v4, %v11238_v37  ;;  %v20068_v4 = vld [vmem:[#allocation37_spill] sm:$0xff] }
 0x41d   :  { %v10678_v22 = vsel %vm7201_vm15, %v9516_v6, %v10677_v31  ;;  %v10685_v62 = vsel %vm7201_vm15, %v9520_v38, %v10684_v15  ;;  %v11726_v50 = vpop.eup %11725  ;;  %v2346_v58 = vsel %vm1706_vm11, %v16100_v23, %v11239_v29  ;;  %v20064_v13 = vrot.slane %v15770_v34, %v19816_v28  ;;  %v16304_v31 = vpop.permute.xlu1 %1327 }
 0x41e   :  { %v16258_v40 = vsel %vm7203_vm0, %v9524_v43, %v10678_v22  ;;  %v16261_v53 = vsel %vm7203_vm0, %v9528_v56, %v10685_v62  ;;  %v2808_v27 = vcombine.low %v2345_v16, %v2346_v58  ;;  %v2809_v60 = vcombine.high %v2345_v16, %v2346_v58 }
 0x41f   :  { %v16274_v25 = vsel %vm7195_vm7, %v20064_v13, %v16109_v20  ;;  %11729 = vpow2.f32 %v2043_v35  ;;  %v11728_v14 = vpop.eup %11727  ;;  %v16278_v45 = vadd.f32 %v16197_v1, %v20066_v9  ;;  %v16282_v6 = vadd.f32 %v16204_v10, %v20068_v4  ;;  %v20070_v20 = vld [vmem:[#allocation120_spill] sm:$0xff] }
 0x420   :  { %20065 = vst [vmem:[#allocation95_spill] sm:$0xff] %v16274_v25  ;;  %v16286_v23 = vmul.f32 %v20058_v52, %v15907_v8  ;;  %11731 = vpow2.f32 %v2045_v42  ;;  %v16292_v38 = vadd.f32 %v16211_v7, %v20070_v20  ;;  %v2816_v43 = vrot.slane %v2808_v27, %v19814_v51 }
 0x421   :  { %20067 = vst [vmem:[#allocation96_spill] sm:$0xff] %v16278_v45  ;;  %20069 = vst [vmem:[#allocation66_spill] sm:$0xff] %v16282_v6  ;;  %v2823_v1 = vrot.slane %v2809_v60, %v19814_v51  ;;  %vm1756_vm1 = vcmp.gt.f32.partialorder %v16158_v44, 0.0  ;;  %v11288_v16 = vadd.f32 -1.0, %v11726_v50  ;;  %v11289_v58 = vadd.f32 -1.0, %v11728_v14 }
 0x422   :  { %v2824_v17 = vcombine.high %v2816_v43, %v2816_v43  ;;  %v11391_v7 = vrot.slane %v2816_v43, 9  ;;  %v1511_v13 = vmul.f32 %v20006_v59, %v16304_v31  ;;  %vm1733_vm2 = vcmp.gt.f32.partialorder %v16200_v41, 0.0 }
 0x423   :  { %v2825_v54 = vcombine.high %v2823_v1, %v2823_v1  ;;  %v11393_v5 = vrot.slane %v2823_v1, 9  ;;  %vm1734_vm3 = vcmp.gt.f32.partialorder %v16207_v57, 0.0 }
 0x424   :  { %v11392_v22 = vrot.slane %v2824_v17, 9  ;;  %v4762_v35 = vmax.f32 %v2816_v43, %v11391_v7 }
 0x425   :  { %v11394_v62 = vrot.slane %v2825_v54, 9  ;;  %v4764_v42 = vmax.f32 %v2823_v1, %v11393_v5  ;;  %v20072_v5 = vld [vmem:[#allocation68_spill] sm:$0xff] }
 0x426   :  { %v4763_v27 = vmax.f32 %v2824_v17, %v11392_v22  ;;  %v5618_v9 = vrot.slane %v4762_v35, %v19815_v33  ;;  %v5622_v4 = vrot.slane %v4762_v35, %v19816_v28  ;;  %v8028_v8 = vmul.f32 %v4762_v35, %v4762_v35  ;;  %v20071_v17 = vld [vmem:[#allocation63_spill] sm:$0xff] }
 0x427   :  { %v4765_v60 = vmax.f32 %v2825_v54, %v11394_v62  ;;  %v5634_v20 = vrot.slane %v4764_v42, %v19815_v33  ;;  %v5638_v2 = vrot.slane %v4764_v42, %v19816_v28  ;;  %v8030_v43 = vmul.f32 %v4764_v42, %v4764_v42 }
 0x428   :  { %v5626_v1 = vrot.slane %v4763_v27, %v19815_v33  ;;  %v5630_v50 = vrot.slane %v4763_v27, %v19816_v28  ;;  %v7283_v54 = vsel %vm7197_vm13, %v5618_v9, %v20071_v17  ;;  %v7290_v22 = vsel %vm7197_vm13, %v5622_v4, %v20072_v5 }
 0x429   :  { %v5642_v14 = vrot.slane %v4765_v60, %v19815_v33  ;;  %v5646_v7 = vrot.slane %v4765_v60, %v19816_v28  ;;  %v8029_v62 = vmul.f32 %v4763_v27, %v4763_v27  ;;  %v8031_v29 = vmul.f32 %v4765_v60, %v4765_v60 }
 0x42a   :  { %v7284_v37 = vsel %vm7199_vm14, %v5626_v1, %v7283_v54  ;;  %v7291_v35 = vsel %vm7199_vm14, %v5630_v50, %v7290_v22  ;;  %v8884_v42 = vrot.slane %v8028_v8, %v19815_v33  ;;  %v8888_v15 = vrot.slane %v8028_v8, %v19816_v28 }
 0x42b   :  { %v7285_v56 = vsel %vm7201_vm15, %v5634_v20, %v7284_v37  ;;  %v7292_v34 = vsel %vm7201_vm15, %v5638_v2, %v7291_v35  ;;  %v8892_v9 = vrot.slane %v8029_v62, %v19815_v33  ;;  %v8896_v17 = vrot.slane %v8029_v62, %v19816_v28  ;;  %v20073_v2 = vld [vmem:[#allocation117_spill] sm:$0xff] }
 0x42c   :  { %v11730_v10 = vpop.eup %11729  ;;  %v16337_v27 = vsel %vm7203_vm0, %v5642_v14, %v7285_v56  ;;  %v16340_v60 = vsel %vm7203_vm0, %v5646_v7, %v7292_v34  ;;  %v2395_v8 = vsel %vm1755_vm12, %v16115_v24, %v11288_v16  ;;  %v2396_v37 = vsel %vm1756_vm1, %v16158_v44, %v11289_v58  ;;  %v20074_v16 = vld [vmem:[#allocation30_spill] sm:$0xff] }
 0x42d   :  { %v11732_v4 = vpop.eup %11731  ;;  %7706 = vst [vmem:[%s19394_s3 + $0x60] sm:$0xff] %v16337_v27  ;;  %7707 = vst [vmem:[%s19394_s3 + $0x68] sm:$0xff] %v16340_v60  ;;  %v8900_v34 = vrot.slane %v8030_v43, %v19815_v33  ;;  %v8904_v56 = vrot.slane %v8030_v43, %v19816_v28  ;;  %v10542_v24 = vsel %vm7197_vm13, %v8884_v42, %v20073_v2  ;;  %v11266_v54 = vadd.f32 -1.0, %v11730_v10 }
 0x42e   :  { %v10549_v44 = vsel %vm7197_vm13, %v8888_v15, %v20074_v16  ;;  %v8908_v58 = vrot.slane %v8031_v29, %v19815_v33  ;;  %v8912_v20 = vrot.slane %v8031_v29, %v19816_v28  ;;  %v10543_v1 = vsel %vm7199_vm14, %v8892_v9, %v10542_v24  ;;  %v20079_v24 = vld [vmem:[#allocation97_spill] sm:$0xff] }
 0x42f   :  { %v10550_v50 = vsel %vm7199_vm14, %v8896_v17, %v10549_v44  ;;  %v10544_v14 = vsel %vm7201_vm15, %v8900_v34, %v10543_v1  ;;  %v11267_v43 = vadd.f32 -1.0, %v11732_v4  ;;  %v6722_v15 = vrot.slane %v15956_v48, %v19815_v33 }
 0x430   :  { %v10551_v7 = vsel %vm7201_vm15, %v8904_v56, %v10550_v50  ;;  %v16369_v5 = vsel %vm7203_vm0, %v8908_v58, %v10544_v14  ;;  %v6946_v29 = vrot.slane %v16009_v18, %v19815_v33  ;;  %v2373_v62 = vsel %vm1733_vm2, %v16200_v41, %v11266_v54  ;;  %v850_v50 = vpop.permute.xlu0 %849 }
 0x431   :  { %v16372_v22 = vsel %vm7203_vm0, %v8912_v20, %v10551_v7  ;;  %v2374_v10 = vsel %vm1734_vm3, %v16207_v57, %v11267_v43  ;;  %v6950_v35 = vrot.slane %v16009_v18, %v19816_v28  ;;  %v3255_v42 = vcombine.low %v2395_v8, %v2396_v37 }
 0x432   :  { %v3058_v9 = vcombine.low %v2373_v62, %v2374_v10  ;;  %v3059_v17 = vcombine.high %v2373_v62, %v2374_v10  ;;  %v20075_v4 = vrot.slane %v15948_v3, %v19815_v33  ;;  %v20076_v34 = vrot.slane %v15954_v55, %v19815_v33 }
 0x433   :  { %v20077_v2 = vrot.slane %v15948_v3, %v19816_v28  ;;  %v20078_v41 = vrot.slane %v15954_v55, %v19816_v28  ;;  %v1512_v18 = vmul.f32 %v19745_v47, %v16304_v31  ;;  %v16401_v16 = vadd.f32 %v1511_v13, %v20079_v24 }
 0x434   :  { %v7522_v56 = vsel %vm7191_vm4, %v20076_v34, %v20075_v4  ;;  %v6726_v44 = vrot.slane %v15956_v48, %v19816_v28  ;;  %v20080_v58 = vrot.slane %v16014_v21, %v19815_v33  ;;  %v20081_v3 = vrot.slane %v16014_v21, %v19816_v28  ;;  %v20086_v34 = vld [vmem:[#allocation121_spill] sm:$0xff]  ;;  %v16463_v24 = vpop.permute.xlu0 %869 }
 0x435   :  { %v7529_v57 = vsel %vm7191_vm4, %v20078_v41, %v20077_v2  ;;  %v3066_v1 = vrot.slane %v3058_v9, %v19814_v51  ;;  %v6962_v31 = vrot.slane %v16018_v61, %v19815_v33  ;;  %v6966_v13 = vrot.slane %v16018_v61, %v19816_v28 }
 0x436   :  { %v7576_v20 = vsel %vm7191_vm4, %v20080_v58, %v6946_v29  ;;  %v7583_v55 = vsel %vm7191_vm4, %v20081_v3, %v6950_v35  ;;  %v3256_v48 = vcombine.high %v2395_v8, %v2396_v37  ;;  %v3073_v14 = vrot.slane %v3059_v17, %v19814_v51  ;;  %v20084_v37 = vld [vmem:[#allocation98_spill] sm:$0xff] }
 0x437   :  { %v20082_v7 = vrot.slane %v15950_v49, %v19815_v33  ;;  %v20083_v21 = vrot.slane %v15950_v49, %v19816_v28  ;;  %v6970_v29 = vrot.slane %v16020_v30, %v19815_v33  ;;  %v16430_v62 = vrot.slane %v3255_v42, %v19814_v51 }
 0x438   :  { %v7577_v61 = vsel %vm7193_vm5, %v6962_v31, %v7576_v20  ;;  %v7584_v8 = vsel %vm7193_vm5, %v6966_v13, %v7583_v55  ;;  %v16435_v10 = vadd.f32 %v1512_v18, %v20084_v37  ;;  %v1895_v35 = vmin.f32 %v16401_v16, 0.0  ;;  %v20092_v13 = vld [vmem:[#allocation134_spill] sm:$0xff] }
 0x439   :  { %v7523_v54 = vsel %vm7193_vm5, %v20082_v7, %v7522_v56  ;;  %v7530_v43 = vsel %vm7193_vm5, %v20083_v21, %v7529_v57  ;;  %v6974_v49 = vrot.slane %v16020_v30, %v19816_v28  ;;  %v3074_v9 = vcombine.high %v3066_v1, %v3066_v1  ;;  %v20094_v7 = vld [vmem:[#allocation135_spill] sm:$0xff] }
 0x43a   :  { %v1007_v17 = vmul.f32 %v20056_v36, %v850_v50  ;;  %v1008_v4 = vmul.f32 %v20058_v52, %v850_v50  ;;  %v16443_v42 = vsel %vm7195_vm7, %v6722_v15, %v7523_v54  ;;  %v16447_v56 = vadd.f32 %v16286_v23, %v20086_v34  ;;  %v11855_v23 = vld [vmem:[%s19394_s3] sm:$0xff] }
 0x43b   :  { %20085 = vst [vmem:[#allocation67_spill] sm:$0xff] %v16443_v42  ;;  %v16450_v2 = vrot.slane %v3256_v48, %v19814_v51  ;;  %v3075_v41 = vcombine.high %v3073_v14, %v3073_v14  ;;  %v16453_v57 = vsel %vm7195_vm7, %v6726_v44, %v7530_v43  ;;  %v16456_v30 = vsel %vm7195_vm7, %v6970_v29, %v7577_v61  ;;  %v11856_v44 = vld [vmem:[%s19394_s3 + $0x8] sm:$0xff] }
 0x43c   :  { %20087 = vst [vmem:[#allocation86_spill] sm:$0xff] %v16453_v57  ;;  %20088 = vst [vmem:[#allocation144_spill] sm:$0xff] %v16456_v30  ;;  %v16459_v18 = vsel %vm7195_vm7, %v6974_v49, %v7584_v8  ;;  %v3271_v15 = vcombine.high %v16430_v62, %v16430_v62  ;;  %v16469_v58 = vadd.f32 %v11855_v23, %v16140_v32  ;;  %v1896_v3 = vmin.f32 %v16435_v10, 0.0 }
 0x43d   :  { %20089 = vst [vmem:[#allocation84_spill] sm:$0xff] %v16459_v18  ;;  %v16475_v20 = vadd.f32 %v11856_v44, %v16143_v63  ;;  %v2111_v55 = vmul.f32 1.442695, %v1895_v35  ;;  %v11445_v50 = vrot.slane %v3066_v1, 9  ;;  %v11446_v31 = vrot.slane %v3074_v9, 9 }
 0x43e   :  { %20090 = vst [vmem:[#allocation87_spill] sm:$0xff] %v16469_v58  ;;  %v16479_v48 = vadd.f32 %v1007_v17, %v20092_v13  ;;  %v16482_v54 = vadd.f32 %v1008_v4, %v20094_v7  ;;  %v16486_v32 = vcombine.high %v16450_v2, %v16450_v2  ;;  %v11447_v21 = vrot.slane %v3073_v14, 9 }
 0x43f   :  { %20091 = vst [vmem:[#allocation69_spill] sm:$0xff] %v16475_v20  ;;  %v11448_v43 = vrot.slane %v3075_v41, 9  ;;  %v16490_v63 = vmul.f32 %v20056_v36, %v16463_v24  ;;  %v11488_v29 = vrot.slane %v16430_v62, 9  ;;  %v11489_v61 = vrot.slane %v3271_v15, 9 }
 0x440   :  { %20093 = vst [vmem:[#allocation29_spill] sm:$0xff] %v16479_v48  ;;  %20095 = vst [vmem:[#allocation32_spill] sm:$0xff] %v16482_v54  ;;  %v4816_v8 = vmax.f32 %v3066_v1, %v11445_v50  ;;  %v4817_v37 = vmax.f32 %v3074_v9, %v11446_v31  ;;  %v4818_v35 = vmax.f32 %v3073_v14, %v11447_v21  ;;  %11733 = vpow2.f32 %v2111_v55  ;;  %v20096_v14 = vld [vmem:[#allocation141_spill] sm:$0xff] }
 0x441   :  { %v4819_v49 = vmax.f32 %v3075_v41, %v11448_v43  ;;  %v2113_v17 = vmul.f32 1.442695, %v1896_v3  ;;  %v20097_v41 = vld [vmem:[#allocation142_spill] sm:$0xff]  ;;  %vm1767_vm6 = vcmp.gt.f32.partialorder %v16401_v16, 0.0  ;;  %vm1768_vm8 = vcmp.gt.f32.partialorder %v16435_v10, 0.0 }
 0x442   :  { %v6050_v4 = vrot.slane %v4816_v8, %v19815_v33  ;;  %v6054_v34 = vrot.slane %v4816_v8, %v19816_v28  ;;  %v6058_v23 = vrot.slane %v4817_v37, %v19815_v33  ;;  %v6062_v44 = vrot.slane %v4817_v37, %v19816_v28 }
 0x443   :  { %v6066_v13 = vrot.slane %v4818_v35, %v19815_v33  ;;  %v6070_v7 = vrot.slane %v4818_v35, %v19816_v28  ;;  %v6074_v18 = vrot.slane %v4819_v49, %v19815_v33  ;;  %v6078_v1 = vrot.slane %v4819_v49, %v19816_v28 }
 0x444   :  { %v7377_v9 = vsel %vm7197_vm13, %v6050_v4, %v20096_v14  ;;  %v7384_v3 = vsel %vm7197_vm13, %v6054_v34, %v20097_v41  ;;  %v8082_v55 = vmul.f32 %v4816_v8, %v4816_v8  ;;  %v8083_v50 = vmul.f32 %v4817_v37, %v4817_v37 }
 0x445   :  { %v7378_v31 = vsel %vm7199_vm14, %v6058_v23, %v7377_v9  ;;  %v7385_v21 = vsel %vm7199_vm14, %v6062_v44, %v7384_v3  ;;  %v8084_v43 = vmul.f32 %v4818_v35, %v4818_v35  ;;  %v8085_v30 = vmul.f32 %v4819_v49, %v4819_v49  ;;  %v1384_v35 = vpop.permute.xlu1 %1383 }
 0x446   :  { %v7379_v54 = vsel %vm7201_vm15, %v6066_v13, %v7378_v31  ;;  %v7386_v48 = vsel %vm7201_vm15, %v6070_v7, %v7385_v21  ;;  %v9316_v6 = vrot.slane %v8082_v55, %v19815_v33  ;;  %v9320_v45 = vrot.slane %v8082_v55, %v19816_v28  ;;  %v20098_v13 = vld [vmem:[#allocation118_spill] sm:$0xff]  ;;  %v1212_v31 = vpop.permute.xlu0 %1211 }
 0x447   :  { %v16512_v4 = vsel %vm7203_vm0, %v6074_v18, %v7379_v54  ;;  %v16515_v8 = vsel %vm7203_vm0, %v6078_v1, %v7386_v48  ;;  %v9324_v37 = vrot.slane %v8083_v50, %v19815_v33  ;;  %v9328_v34 = vrot.slane %v8083_v50, %v19816_v28 }
 0x448   :  { %v11490_v49 = vrot.slane %v16450_v2, 9  ;;  %v11491_v23 = vrot.slane %v16486_v32, 9  ;;  %v16521_v44 = vmax.f32 %v3271_v15, %v11489_v61  ;;  %7720 = vst [vmem:[%s19394_s3 + $0xd0] sm:$0xff] %v16512_v4  ;;  %7721 = vst [vmem:[%s19394_s3 + $0xd8] sm:$0xff] %v16515_v8  ;;  %v9332_v18 = vrot.slane %v8084_v43, %v19815_v33  ;;  %v20099_v61 = vld [vmem:[#allocation119_spill] sm:$0xff] }
 0x449   :  { %v9336_v48 = vrot.slane %v8084_v43, %v19816_v28  ;;  %v9340_v54 = vrot.slane %v8085_v30, %v19815_v33  ;;  %v10636_v15 = vsel %vm7197_vm13, %v9316_v6, %v20098_v13  ;;  %v10643_v7 = vsel %vm7197_vm13, %v9320_v45, %v20099_v61 }
 0x44a   :  { %v9344_v1 = vrot.slane %v8085_v30, %v19816_v28  ;;  %v10637_v14 = vsel %vm7199_vm14, %v9324_v37, %v10636_v15  ;;  %v10644_v9 = vsel %vm7199_vm14, %v9328_v34, %v10643_v7  ;;  %11735 = vpow2.f32 %v2113_v17 }
 0x44b   :  { %v10638_v41 = vsel %vm7201_vm15, %v9332_v18, %v10637_v14  ;;  %v10645_v3 = vsel %vm7201_vm15, %v9336_v48, %v10644_v9  ;;  %v1539_v55 = vmul.f32 %v20006_v59, %v1384_v35  ;;  %v1540_v50 = vmul.f32 %v19745_v47, %v1384_v35  ;;  %v20104_v48 = vld [vmem:[#allocation70_spill] sm:$0xff] }
 0x44c   :  { %v4859_v6 = vmax.f32 %v16430_v62, %v11488_v29  ;;  %v10639_v45 = vsel %vm7203_vm0, %v9340_v54, %v10638_v41  ;;  %v10646_v30 = vsel %vm7203_vm0, %v9344_v1, %v10645_v3  ;;  %v16550_v21 = vadd.f32 %v15744_v39, %v16337_v27  ;;  %v1236_v62 = vpop.permute.xlu1 %1235  ;;  %v20102_v39 = vld [vmem:[#allocation54_spill] sm:$0xff]  ;;  %v20105_v41 = vld [vmem:[#allocation71_spill] sm:$0xff] }
 0x44d   :  { %v16553_v17 = vadd.f32 %v10639_v45, %v15705_v26  ;;  %v16556_v43 = vadd.f32 %v10646_v30, %v15708_v11  ;;  %v16559_v37 = vadd.f32 %v1539_v55, %v15469_v19  ;;  %v16562_v34 = vadd.f32 %v1540_v50, %v15473_v12  ;;  %v11734_v29 = vpop.eup %11733  ;;  %v20103_v26 = vld [vmem:[#allocation105_spill] sm:$0xff] }
 0x44e   :  { %v16566_v35 = vadd.f32 %v15762_v46, %v16340_v60  ;;  %v16570_v27 = vadd.f32 %v20102_v39, %v16369_v5  ;;  %v16574_v11 = vadd.f32 %v20103_v26, %v16372_v22  ;;  %v1453_v19 = vmul.f32 %v20006_v59, %v1212_v31  ;;  %v20107_v45 = vld [vmem:[#allocation77_spill] sm:$0xff] }
 0x44f   :  { %20100 = vst [vmem:[#allocation85_spill] sm:$0xff] %v16553_v17  ;;  %20101 = vst [vmem:[#allocation31_spill] sm:$0xff] %v16556_v43  ;;  %v6402_v12 = vrot.slane %v16521_v44, %v19815_v33  ;;  %v16582_v18 = vmul.f32 %v20058_v52, %v16463_v24  ;;  %v1923_v46 = vmin.f32 %v16559_v37, 0.0  ;;  %v1924_v60 = vmin.f32 %v16562_v34, 0.0  ;;  %v1316_v24 = vpop.permute.xlu0 %1315  ;;  %v20113_v43 = vld [vmem:[#allocation106_spill] sm:$0xff] }
 0x450   :  { %v1454_v5 = vmul.f32 %v19745_v47, %v1212_v31  ;;  %v16588_v22 = vadd.f32 %v1453_v19, %v20104_v48  ;;  %v1465_v54 = vmul.f32 %v20006_v59, %v1236_v62  ;;  %v4861_v13 = vmax.f32 %v16450_v2, %v11490_v49 }
 0x451   :  { %v4862_v15 = vmax.f32 %v16486_v32, %v11491_v23  ;;  %v2167_v61 = vmul.f32 1.442695, %v1923_v46  ;;  %v1466_v7 = vmul.f32 %v19745_v47, %v1236_v62  ;;  %v6394_v1 = vrot.slane %v4859_v6, %v19815_v33  ;;  %v20106_v32 = vld [vmem:[#allocation35_spill] sm:$0xff] }
 0x452   :  { %v6406_v14 = vrot.slane %v16521_v44, %v19816_v28  ;;  %v2169_v9 = vmul.f32 1.442695, %v1924_v60  ;;  %v16598_v3 = vadd.f32 %v1454_v5, %v20105_v41  ;;  %v6398_v55 = vrot.slane %v4859_v6, %v19816_v28 }
 0x453   :  { %v1837_v2 = vmin.f32 %v16588_v22, 0.0  ;;  %v16604_v49 = vadd.f32 %v1465_v54, %v20106_v32  ;;  %v7456_v23 = vsel %vm7191_vm4, %v6402_v12, %v6394_v1  ;;  %v11300_v50 = vadd.f32 -1.0, %v11734_v29 }
 0x454   :  { %v1838_v31 = vmin.f32 %v16598_v3, 0.0  ;;  %v16609_v30 = vadd.f32 %v1466_v7, %v20107_v45  ;;  %v6410_v62 = vrot.slane %v4861_v13, %v19815_v33  ;;  %v6414_v39 = vrot.slane %v4861_v13, %v19816_v28  ;;  %v1336_v7 = vpop.permute.xlu0 %1335 }
 0x455   :  { %v16613_v26 = vmul.f32 %v4859_v6, %v4859_v6  ;;  %11737 = vpow2.f32 %v2167_v61  ;;  %v6418_v19 = vrot.slane %v4862_v15, %v19815_v33  ;;  %v7462_v46 = vsel %vm7191_vm4, %v6406_v14, %v6398_v55 }
 0x456   :  { %11739 = vpow2.f32 %v2169_v9  ;;  %v1849_v12 = vmin.f32 %v16604_v49, 0.0  ;;  %v6422_v60 = vrot.slane %v4862_v15, %v19816_v28  ;;  %v7457_v5 = vsel %vm7193_vm5, %v6410_v62, %v7456_v23 }
 0x457   :  { %v11736_v29 = vpop.eup %11735  ;;  %v8126_v48 = vmul.f32 %v16521_v44, %v16521_v44  ;;  %v1995_v54 = vmul.f32 1.442695, %v1837_v2  ;;  %v2407_v61 = vsel %vm1767_vm6, %v16401_v16, %v11300_v50  ;;  %v1997_v1 = vmul.f32 1.442695, %v1838_v31 }
 0x458   :  { %v11301_v6 = vadd.f32 -1.0, %v11736_v29  ;;  %v1850_v14 = vmin.f32 %v16609_v30, 0.0  ;;  %v7463_v9 = vsel %vm7193_vm5, %v6414_v39, %v7462_v46  ;;  %v16627_v41 = vmul.f32 %v4861_v13, %v4861_v13 }
 0x459   :  { %v16629_v55 = vmul.f32 %v4862_v15, %v4862_v15  ;;  %v9660_v32 = vrot.slane %v16613_v26, %v19815_v33  ;;  %v9664_v44 = vrot.slane %v16613_v26, %v19816_v28  ;;  %v2019_v16 = vmul.f32 1.442695, %v1849_v12  ;;  %v1292_v15 = vpop.permute.xlu1 %1291 }
 0x45a   :  { %v2408_v2 = vsel %vm1768_vm8, %v16435_v10, %v11301_v6  ;;  %v1515_v23 = vmul.f32 %v20006_v59, %v1336_v7  ;;  %v16640_v50 = vsel %vm7195_vm7, %v6418_v19, %v7457_v5  ;;  %11741 = vpow2.f32 %v1995_v54  ;;  %v20110_v5 = vld [vmem:[#allocation14_spill] sm:$0xff] }
 0x45b   :  { %20108 = vst [vmem:[#allocation122_spill] sm:$0xff] %v16640_v50  ;;  %v3362_v13 = vcombine.low %v2407_v61, %v2408_v2  ;;  %v3363_v31 = vcombine.high %v2407_v61, %v2408_v2  ;;  %v16643_v45 = vsel %vm7195_vm7, %v6422_v60, %v7463_v9  ;;  %v9668_v62 = vrot.slane %v8126_v48, %v19815_v33  ;;  %v20111_v2 = vld [vmem:[#allocation15_spill] sm:$0xff] }
 0x45c   :  { %20109 = vst [vmem:[#allocation125_spill] sm:$0xff] %v16643_v45  ;;  %11743 = vpow2.f32 %v1997_v1  ;;  %v2021_v39 = vmul.f32 1.442695, %v1850_v14  ;;  %v1505_v46 = vmul.f32 %v20006_v59, %v1316_v24  ;;  %v1516_v19 = vmul.f32 %v19745_v47, %v1336_v7 }
 0x45d   :  { %v3370_v26 = vrot.slane %v3362_v13, %v19814_v51  ;;  %v3377_v10 = vrot.slane %v3363_v31, %v19814_v51  ;;  %11745 = vpow2.f32 %v2019_v16  ;;  %v1506_v12 = vmul.f32 %v19745_v47, %v1316_v24 }
 0x45e   :  { %v1493_v29 = vmul.f32 %v20006_v59, %v1292_v15  ;;  %v16653_v60 = vadd.f32 %v1515_v23, %v20110_v5  ;;  %v9672_v14 = vrot.slane %v8126_v48, %v19816_v28  ;;  %v9676_v9 = vrot.slane %v16627_v41, %v19815_v33  ;;  %v20112_v48 = vld [vmem:[#allocation20_spill] sm:$0xff] }
 0x45f   :  { %v3378_v54 = vcombine.high %v3370_v26, %v3370_v26  ;;  %v3379_v6 = vcombine.high %v3377_v10, %v3377_v10  ;;  %v11511_v61 = vrot.slane %v3370_v26, 9  ;;  %v11513_v1 = vrot.slane %v3377_v10, 9 }
 0x460   :  { %11747 = vpow2.f32 %v2021_v39  ;;  %v16659_v7 = vadd.f32 %v1516_v19, %v20111_v2  ;;  %v10715_v45 = vsel %vm7191_vm4, %v9668_v62, %v9660_v32  ;;  %v16669_v50 = vadd.f32 %v1505_v46, %v20112_v48 }
 0x461   :  { %v11512_v16 = vrot.slane %v3378_v54, 9  ;;  %v11514_v24 = vrot.slane %v3379_v6, 9  ;;  %v16661_v13 = vmax.f32 %v3370_v26, %v11511_v61  ;;  %v16663_v31 = vmax.f32 %v3377_v10, %v11513_v1  ;;  %v20114_v10 = vld [vmem:[#allocation99_spill] sm:$0xff] }
 0x462   :  { %v11738_v23 = vpop.eup %11737  ;;  %v16672_v39 = vadd.f32 %v1506_v12, %v20113_v43  ;;  %v1494_v26 = vmul.f32 %v19745_v47, %v1292_v15  ;;  %v16680_v61 = vadd.f32 %v1493_v29, %v20114_v10  ;;  %v10721_v62 = vsel %vm7191_vm4, %v9672_v14, %v9664_v44  ;;  %v20115_v14 = vld [vmem:[#allocation13_spill] sm:$0xff] }
 0x463   :  { %v11740_v19 = vpop.eup %11739  ;;  %v16674_v2 = vmax.f32 %v3378_v54, %v11512_v16  ;;  %v16676_v17 = vmax.f32 %v3379_v6, %v11514_v24  ;;  %v8148_v43 = vmul.f32 %v16661_v13, %v16661_v13  ;;  %v16690_v46 = vsel %vm7193_vm5, %v9676_v9, %v10715_v45 }
 0x464   :  { %v8150_v15 = vmul.f32 %v16663_v31, %v16663_v31  ;;  %vm1795_vm9 = vcmp.gt.f32.partialorder %v16559_v37, 0.0  ;;  %vm1796_vm10 = vcmp.gt.f32.partialorder %v16562_v34, 0.0  ;;  %v11328_v44 = vadd.f32 -1.0, %v11738_v23 }
 0x465   :  { %v8149_v12 = vmul.f32 %v16674_v2, %v16674_v2  ;;  %v8151_v29 = vmul.f32 %v16676_v17, %v16676_v17  ;;  %v11329_v54 = vadd.f32 -1.0, %v11740_v19  ;;  %v1889_v6 = vmin.f32 %v16669_v50, 0.0 }
 0x466   :  { %v1890_v45 = vmin.f32 %v16672_v39, 0.0  ;;  %v16703_v9 = vadd.f32 %v1494_v26, %v20115_v14  ;;  %v1877_v16 = vmin.f32 %v16680_v61, 0.0  ;;  %v9844_v48 = vrot.slane %v8148_v43, %v19815_v33 }
 0x467   :  { %v11742_v24 = vpop.eup %11741  ;;  %v9848_v10 = vrot.slane %v8148_v43, %v19816_v28  ;;  %v9852_v32 = vrot.slane %v8149_v12, %v19815_v33  ;;  %v9856_v1 = vrot.slane %v8149_v12, %v19816_v28  ;;  %v9860_v19 = vrot.slane %v8150_v15, %v19815_v33 }
 0x468   :  { %v9864_v5 = vrot.slane %v8150_v15, %v19816_v28  ;;  %v9868_v20 = vrot.slane %v8151_v29, %v19815_v33  ;;  %v9872_v26 = vrot.slane %v8151_v29, %v19816_v28  ;;  %v2435_v43 = vsel %vm1795_vm9, %v16559_v37, %v11328_v44 }
 0x469   :  { %v11744_v23 = vpop.eup %11743  ;;  %v10755_v14 = vsel %vm7191_vm4, %v9852_v32, %v9844_v48  ;;  %v10762_v58 = vsel %vm7191_vm4, %v9856_v1, %v9848_v10  ;;  %v2436_v12 = vsel %vm1796_vm10, %v16562_v34, %v11329_v54  ;;  %v11242_v32 = vadd.f32 -1.0, %v11742_v24 }
 0x46a   :  { %v11746_v57 = vpop.eup %11745  ;;  %v10756_v42 = vsel %vm7193_vm5, %v9860_v19, %v10755_v14  ;;  %v10763_v15 = vsel %vm7193_vm5, %v9864_v5, %v10762_v58  ;;  %v3612_v25 = vcombine.low %v2435_v43, %v2436_v12  ;;  %v3613_v52 = vcombine.high %v2435_v43, %v2436_v12 }
 0x46b   :  { %v16725_v29 = vsel %vm7195_vm7, %v9868_v20, %v10756_v42  ;;  %v16728_v1 = vsel %vm7195_vm7, %v9872_v26, %v10763_v15  ;;  %v11243_v48 = vadd.f32 -1.0, %v11744_v23  ;;  %vm1709_vm11 = vcmp.gt.f32.partialorder %v16588_v22, 0.0 }
 0x46c   :  { %20116 = vst [vmem:[#allocation33_spill] sm:$0xff] %v16728_v1  ;;  %v3620_v44 = vrot.slane %v3612_v25, %v19814_v51  ;;  %v3627_v34 = vrot.slane %v3613_v52, %v19814_v51  ;;  %vm1710_vm12 = vcmp.gt.f32.partialorder %v16598_v3, 0.0  ;;  %v2349_v58 = vsel %vm1709_vm11, %v16588_v22, %v11242_v32 }
 0x46d   :  { %v11748_v37 = vpop.eup %11747  ;;  %v2350_v5 = vsel %vm1710_vm12, %v16598_v3, %v11243_v48  ;;  %v2099_v42 = vmul.f32 1.442695, %v1889_v6  ;;  %v2101_v20 = vmul.f32 1.442695, %v1890_v45  ;;  %v11254_v23 = vadd.f32 -1.0, %v11746_v57 }
 0x46e   :  { %v3628_v54 = vcombine.high %v3620_v44, %v3620_v44  ;;  %v3629_v10 = vcombine.high %v3627_v34, %v3627_v34  ;;  %v11565_v19 = vrot.slane %v3620_v44, 9  ;;  %v11567_v24 = vrot.slane %v3627_v34, 9 }
 0x46f   :  { %v11255_v26 = vadd.f32 -1.0, %v11748_v37  ;;  %v1878_v25 = vmin.f32 %v16703_v9, 0.0  ;;  %v2075_v14 = vmul.f32 1.442695, %v1877_v16  ;;  %v20117_v22 = vrot.slane %v16627_v41, %v19816_v28 }
 0x470   :  { %v11566_v52 = vrot.slane %v3628_v54, 9  ;;  %v11568_v43 = vrot.slane %v3629_v10, 9  ;;  %v16737_v12 = vmax.f32 %v3620_v44, %v11565_v19  ;;  %v16739_v15 = vmax.f32 %v3627_v34, %v11567_v24 }
 0x471   :  { %v16745_v3 = vsel %vm7193_vm5, %v20117_v22, %v10721_v62  ;;  %v2844_v6 = vcombine.low %v2349_v58, %v2350_v5  ;;  %vm1721_vm1 = vcmp.gt.f32.partialorder %v16604_v49, 0.0  ;;  %vm1722_vm2 = vcmp.gt.f32.partialorder %v16609_v30, 0.0 }
 0x472   :  { %v16749_v57 = vmax.f32 %v3628_v54, %v11566_v52  ;;  %v16751_v45 = vmax.f32 %v3629_v10, %v11568_v43  ;;  %v2845_v16 = vcombine.high %v2349_v58, %v2350_v5  ;;  %11749 = vpow2.f32 %v2099_v42 }
 0x473   :  { %v8202_v32 = vmul.f32 %v16737_v12, %v16737_v12  ;;  %v2361_v48 = vsel %vm1721_vm1, %v16604_v49, %v11254_v23  ;;  %v2362_v41 = vsel %vm1722_vm2, %v16609_v30, %v11255_v26  ;;  %11751 = vpow2.f32 %v2101_v20 }
 0x474   :  { %v20118_v62 = vrot.slane %v16629_v55, %v19815_v33  ;;  %v8204_v44 = vmul.f32 %v16739_v15, %v16739_v15  ;;  %11753 = vpow2.f32 %v2075_v14  ;;  %v16766_v34 = vmul.f32 1.442695, %v1878_v25 }
 0x475   :  { %v8203_v49 = vmul.f32 %v16749_v57, %v16749_v57  ;;  %v8205_v30 = vmul.f32 %v16751_v45, %v16751_v45  ;;  %v2852_v5 = vrot.slane %v2844_v6, %v19814_v51  ;;  %v2859_v42 = vrot.slane %v2845_v16, %v19814_v51 }
 0x476   :  { %v16762_v37 = vsel %vm7195_vm7, %v20118_v62, %v16690_v46  ;;  %v2951_v20 = vcombine.low %v2361_v48, %v2362_v41  ;;  %v2952_v54 = vcombine.high %v2361_v48, %v2362_v41  ;;  %v10276_v10 = vrot.slane %v8202_v32, %v19815_v33 }
 0x477   :  { %20119 = vst [vmem:[#allocation36_spill] sm:$0xff] %v16762_v37  ;;  %v10280_v19 = vrot.slane %v8202_v32, %v19816_v28  ;;  %v10284_v24 = vrot.slane %v8203_v49, %v19815_v33  ;;  %v10288_v23 = vrot.slane %v8203_v49, %v19816_v28  ;;  %v10292_v26 = vrot.slane %v8204_v44, %v19815_v33 }
 0x478   :  { %v10296_v25 = vrot.slane %v8204_v44, %v19816_v28  ;;  %v10300_v14 = vrot.slane %v8205_v30, %v19815_v33  ;;  %v10304_v52 = vrot.slane %v8205_v30, %v19816_v28  ;;  %vm7760_vm3 = vcmask 1046528  }
 0x479   :  { %v10849_v43 = vsel %vm7191_vm4, %v10284_v24, %v10276_v10  ;;  %v10856_v22 = vsel %vm7191_vm4, %v10288_v23, %v10280_v19  ;;  %v2860_v6 = vcombine.high %v2852_v5, %v2852_v5  ;;  %v11399_v16 = vrot.slane %v2852_v5, 9 }
 0x47a   :  { %v10850_v32 = vsel %vm7193_vm5, %v10292_v26, %v10849_v43  ;;  %v10857_v48 = vsel %vm7193_vm5, %v10296_v25, %v10856_v22  ;;  %v11401_v41 = vrot.slane %v2859_v42, 9  ;;  %v2959_v62 = vrot.slane %v2951_v20, %v19814_v51 }
 0x47b   :  { %v16792_v44 = vsel %vm7195_vm7, %v10300_v14, %v10850_v32  ;;  %v16795_v49 = vsel %vm7195_vm7, %v10304_v52, %v10857_v48  ;;  %v11400_v30 = vrot.slane %v2860_v6, 9  ;;  %v4770_v46 = vmax.f32 %v2852_v5, %v11399_v16 }
 0x47c   :  { %20120 = vst [vmem:[#allocation37_spill] sm:$0xff] %v16792_v44  ;;  %20121 = vst [vmem:[#allocation120_spill] sm:$0xff] %v16795_v49  ;;  %v4772_v10 = vmax.f32 %v2859_v42, %v11401_v41  ;;  %v2966_v19 = vrot.slane %v2952_v54, %v19814_v51  ;;  %v2967_v24 = vcombine.high %v2959_v62, %v2959_v62  ;;  %v11422_v23 = vrot.slane %v2959_v62, 9 }
 0x47d   :  { %v4771_v58 = vmax.f32 %v2860_v6, %v11400_v30  ;;  %v5682_v26 = vrot.slane %v4770_v46, %v19815_v33  ;;  %v5686_v25 = vrot.slane %v4770_v46, %v19816_v28  ;;  %v8036_v43 = vmul.f32 %v4770_v46, %v4770_v46  ;;  %v20122_v6 = vld [vmem:[#allocation57_spill] sm:$0xff] }
 0x47e   :  { %v5698_v20 = vrot.slane %v4772_v10, %v19815_v33  ;;  %v5702_v14 = vrot.slane %v4772_v10, %v19816_v28  ;;  %v8038_v22 = vmul.f32 %v4772_v10, %v4772_v10  ;;  %v2968_v52 = vcombine.high %v2966_v19, %v2966_v19 }
 0x47f   :  { %v16802_v32 = vpop.eup %11749  ;;  %v5690_v5 = vrot.slane %v4771_v58, %v19815_v33  ;;  %v5694_v42 = vrot.slane %v4771_v58, %v19816_v28  ;;  %v7297_v54 = vsel %vm7197_vm13, %v5682_v26, %v15796_v0  ;;  %v7303_v16 = vsel %vm7197_vm13, %v5686_v25, %v20122_v6 }
 0x480   :  { %v16810_v48 = vpop.eup %11751  ;;  %v8037_v46 = vmul.f32 %v4771_v58, %v4771_v58  ;;  %v8948_v41 = vrot.slane %v8036_v43, %v19815_v33  ;;  %v8952_v30 = vrot.slane %v8036_v43, %v19816_v28  ;;  %v8964_v10 = vrot.slane %v8038_v22, %v19815_v33 }
 0x481   :  { %v16815_v37 = vpop.eup %11753  ;;  %v7298_v49 = vsel %vm7199_vm14, %v5690_v5, %v7297_v54  ;;  %v7304_v44 = vsel %vm7199_vm14, %v5694_v42, %v7303_v16  ;;  %v8968_v0 = vrot.slane %v8038_v22, %v19816_v28  ;;  %v11423_v26 = vrot.slane %v2967_v24, 9  ;;  %v20123_v5 = vld [vmem:[#allocation72_spill] sm:$0xff] }
 0x482   :  { %v7299_v25 = vsel %vm7201_vm15, %v5698_v20, %v7298_v49  ;;  %v7305_v6 = vsel %vm7201_vm15, %v5702_v14, %v7304_v44  ;;  %v8956_v58 = vrot.slane %v8037_v46, %v19815_v33  ;;  %v8960_v1 = vrot.slane %v8037_v46, %v19816_v28  ;;  %v20124_v44 = vld [vmem:[#allocation21_spill] sm:$0xff] }
 0x483   :  { %7708 = vst [vmem:[%s19394_s3 + $0x70] sm:$0x7f] %v7299_v25  ;;  %7709 = vst [vmem:[%s19394_s3 + $0x78] sm:$0x7f] %v7305_v6  ;;  %v7781_v43 = vsel %vm7760_vm3, %v7299_v25, 0.0  ;;  %v7791_v22 = vsel %vm7760_vm3, %v7305_v6, 0.0  ;;  %v10556_v49 = vsel %vm7197_vm13, %v8948_v41, %v20123_v5  ;;  %v10562_v20 = vsel %vm7197_vm13, %v8952_v30, %v20124_v44 }
 0x484   :  { %v16837_v14 = vadd.f32 %v7781_v43, %v16550_v21  ;;  %v16840_v42 = vadd.f32 %v7791_v22, %v16566_v35  ;;  %v10557_v54 = vsel %vm7199_vm14, %v8956_v58, %v10556_v49  ;;  %v10563_v16 = vsel %vm7199_vm14, %v8960_v1, %v10562_v20 }
 0x485   :  { %v6590_v46 = vrot.slane %v16674_v2, %v19816_v28  ;;  %v10558_v25 = vsel %vm7201_vm15, %v8964_v10, %v10557_v54  ;;  %v10564_v41 = vsel %vm7201_vm15, %v8968_v0, %v10563_v16  ;;  %v11424_v6 = vrot.slane %v2966_v19, 9  ;;  %v20133_v16 = vld [vmem:[#allocation38_spill] sm:$0xff] }
 0x486   :  { %v6582_v30 = vrot.slane %v16661_v13, %v19816_v28  ;;  %v10975_v21 = vsel %vm7760_vm3, %v10558_v25, 0.0  ;;  %v10985_v35 = vsel %vm7760_vm3, %v10564_v41, 0.0  ;;  %v11425_v43 = vrot.slane %v2968_v52, 9 }
 0x487   :  { %v16853_v58 = vadd.f32 %v10975_v21, %v16570_v27  ;;  %v16856_v1 = vadd.f32 %v10985_v35, %v16574_v11  ;;  %v4793_v22 = vmax.f32 %v2959_v62, %v11422_v23  ;;  %v4794_v5 = vmax.f32 %v2967_v24, %v11423_v26  ;;  %v20136_v35 = vld [vmem:[#allocation52_spill] sm:$0xff] }
 0x488   :  { %v20125_v10 = vrot.slane %v16629_v55, %v19816_v28  ;;  %v6594_v49 = vrot.slane %v16663_v31, %v19815_v33  ;;  %v20127_v44 = vrot.slane %v16661_v13, %v19815_v33  ;;  %v20128_v27 = vrot.slane %v16674_v2, %v19815_v33  ;;  %v11857_v2 = vld [vmem:[%s19394_s3 + $0xc0] sm:$0xff] }
 0x489   :  { %11755 = vpow2.f32 %v16766_v34  ;;  %v7503_v62 = vsel %vm7191_vm4, %v6590_v46, %v6582_v30  ;;  %v4795_v24 = vmax.f32 %v2966_v19, %v11424_v6  ;;  %v5866_v55 = vrot.slane %v4793_v22, %v19815_v33  ;;  %v11858_v19 = vld [vmem:[%s19394_s3 + $0xc8] sm:$0xff] }
 0x48a   :  { %v16863_v0 = vsel %vm7195_vm7, %v20125_v10, %v16745_v3  ;;  %v7496_v11 = vsel %vm7191_vm4, %v20128_v27, %v20127_v44  ;;  %v5870_v3 = vrot.slane %v4793_v22, %v19816_v28  ;;  %v6598_v23 = vrot.slane %v16663_v31, %v19816_v28  ;;  %v20131_v31 = vld [vmem:[#allocation130_spill] sm:$0xff] }
 0x48b   :  { %20126 = vst [vmem:[#allocation63_spill] sm:$0xff] %v16863_v0  ;;  %v4796_v26 = vmax.f32 %v2968_v52, %v11425_v43  ;;  %v5874_v13 = vrot.slane %v4794_v5, %v19815_v33  ;;  %v5878_v20 = vrot.slane %v4794_v5, %v19816_v28  ;;  %v16886_v34 = vadd.f32 %v11857_v2, %v16512_v4 }
 0x48c   :  { %v16892_v54 = vadd.f32 %v11858_v19, %v16515_v8  ;;  %v16896_v52 = vadd.f32 %v16490_v63, %v20131_v31  ;;  %v16900_v46 = vadd.f32 %v16582_v18, %v20133_v16  ;;  %v6602_v25 = vrot.slane %v16676_v17, %v19815_v33  ;;  %v20135_v63 = vld [vmem:[#allocation150_spill] sm:$0xff] }
 0x48d   :  { %20129 = vst [vmem:[#allocation68_spill] sm:$0xff] %v16886_v34  ;;  %v6606_v4 = vrot.slane %v16676_v17, %v19816_v28  ;;  %v7497_v41 = vsel %vm7193_vm5, %v6594_v49, %v7496_v11  ;;  %v7504_v6 = vsel %vm7193_vm5, %v6598_v23, %v7503_v62  ;;  %v5882_v8 = vrot.slane %v4795_v24, %v19815_v33 }
 0x48e   :  { %20130 = vst [vmem:[#allocation117_spill] sm:$0xff] %v16892_v54  ;;  %20132 = vst [vmem:[#allocation30_spill] sm:$0xff] %v16896_v52  ;;  %v5886_v30 = vrot.slane %v4795_v24, %v19816_v28  ;;  %v7337_v21 = vsel %vm7197_vm13, %v5866_v55, %v20135_v63  ;;  %v7344_v18 = vsel %vm7197_vm13, %v5870_v3, %v20136_v35  ;;  %vm1761_vm6 = vcmp.gt.f32.partialorder %v16669_v50, 0.0  ;;  %v20137_v35 = vld [vmem:[#allocation124_spill] sm:$0xff] }
 0x48f   :  { %20134 = vst [vmem:[#allocation97_spill] sm:$0xff] %v16900_v46  ;;  %vm1762_vm8 = vcmp.gt.f32.partialorder %v16672_v39, 0.0  ;;  %v5890_v17 = vrot.slane %v4796_v26, %v19815_v33  ;;  %v5894_v43 = vrot.slane %v4796_v26, %v19816_v28  ;;  %v7338_v10 = vsel %vm7199_vm14, %v5874_v13, %v7337_v21 }
 0x490   :  { %v7345_v49 = vsel %vm7199_vm14, %v5878_v20, %v7344_v18  ;;  %v16921_v44 = vsel %vm7195_vm7, %v6602_v25, %v7497_v41  ;;  %v7339_v27 = vsel %vm7201_vm15, %v5882_v8, %v7338_v10  ;;  %v1899_v62 = vmin.f32 %v16653_v60, 0.0 }
 0x491   :  { %v7346_v11 = vsel %vm7201_vm15, %v5886_v30, %v7345_v49  ;;  %v16927_v55 = vsel %vm7195_vm7, %v6606_v4, %v7504_v6  ;;  %v16930_v3 = vsel %vm7203_vm0, %v5890_v17, %v7339_v27  ;;  %v11294_v13 = vadd.f32 -1.0, %v16802_v32  ;;  %v20138_v17 = vld [vmem:[#allocation79_spill] sm:$0xff] }
 0x492   :  { %v16933_v23 = vsel %vm7203_vm0, %v5894_v43, %v7346_v11  ;;  %7714 = vst [vmem:[%s19394_s3 + $0xa0] sm:$0xff] %v16930_v3  ;;  %v8059_v2 = vmul.f32 %v4793_v22, %v4793_v22  ;;  %v8060_v19 = vmul.f32 %v4794_v5, %v4794_v5  ;;  %v11295_v31 = vadd.f32 -1.0, %v16810_v48 }
 0x493   :  { %7715 = vst [vmem:[%s19394_s3 + $0xa8] sm:$0xff] %v16933_v23  ;;  %vm1749_vm9 = vcmp.gt.f32.partialorder %v16680_v61, 0.0  ;;  %vm1750_vm10 = vcmp.gt.f32.partialorder %v16703_v9, 0.0  ;;  %v8061_v25 = vmul.f32 %v4795_v24, %v4795_v24  ;;  %v8062_v4 = vmul.f32 %v4796_v26, %v4796_v26 }
 0x494   :  { %v9132_v48 = vrot.slane %v8059_v2, %v19815_v33  ;;  %v9136_v5 = vrot.slane %v8059_v2, %v19816_v28  ;;  %v9140_v6 = vrot.slane %v8060_v19, %v19815_v33  ;;  %v9144_v8 = vrot.slane %v8060_v19, %v19816_v28 }
 0x495   :  { %v9148_v30 = vrot.slane %v8061_v25, %v19815_v33  ;;  %v9152_v63 = vrot.slane %v8061_v25, %v19816_v28  ;;  %v9156_v26 = vrot.slane %v8062_v4, %v19815_v33  ;;  %v9160_v21 = vrot.slane %v8062_v4, %v19816_v28 }
 0x496   :  { %v11756_v24 = vpop.eup %11755  ;;  %v10596_v18 = vsel %vm7197_vm13, %v9132_v48, %v20137_v35  ;;  %v10603_v43 = vsel %vm7197_vm13, %v9136_v5, %v20138_v17  ;;  %v2401_v27 = vsel %vm1761_vm6, %v16669_v50, %v11294_v13  ;;  %v2402_v11 = vsel %vm1762_vm8, %v16672_v39, %v11295_v31  ;;  %v1360_v48 = vpop.permute.xlu1 %1359 }
 0x497   :  { %v10597_v10 = vsel %vm7199_vm14, %v9140_v6, %v10596_v18  ;;  %v10604_v49 = vsel %vm7199_vm14, %v9144_v8, %v10603_v43  ;;  %v3308_v25 = vcombine.low %v2401_v27, %v2402_v11  ;;  %v3309_v4 = vcombine.high %v2401_v27, %v2402_v11 }
 0x498   :  { %v10598_v2 = vsel %vm7201_vm15, %v9148_v30, %v10597_v10  ;;  %v10605_v19 = vsel %vm7201_vm15, %v9152_v63, %v10604_v49  ;;  %v11282_v8 = vadd.f32 -1.0, %v16815_v37  ;;  %v11283_v50 = vadd.f32 -1.0, %v11756_v24 }
 0x499   :  { %v16980_v5 = vsel %vm7203_vm0, %v9156_v26, %v10598_v2  ;;  %v16983_v6 = vsel %vm7203_vm0, %v9160_v21, %v10605_v19  ;;  %v3316_v13 = vrot.slane %v3308_v25, %v19814_v51  ;;  %v3323_v39 = vrot.slane %v3309_v4, %v19814_v51 }
 0x49a   :  { %v1900_v31 = vmin.f32 %v16659_v7, 0.0  ;;  %v2119_v30 = vmul.f32 1.442695, %v1899_v62  ;;  %v2389_v26 = vsel %vm1749_vm9, %v16680_v61, %v11282_v8  ;;  %v2390_v21 = vsel %vm1750_vm10, %v16703_v9, %v11283_v50 }
 0x49b   :  { %v16997_v37 = vmul.f32 %v20006_v59, %v1360_v48  ;;  %v3324_v24 = vcombine.high %v3316_v13, %v3316_v13  ;;  %v3325_v35 = vcombine.high %v3323_v39, %v3323_v39  ;;  %v11499_v18 = vrot.slane %v3316_v13, 9 }
 0x49c   :  { %v11501_v17 = vrot.slane %v3323_v39, 9  ;;  %v3201_v43 = vcombine.low %v2389_v26, %v2390_v21  ;;  %v3202_v10 = vcombine.high %v2389_v26, %v2390_v21  ;;  %11757 = vpow2.f32 %v2119_v30 }
 0x49d   :  { %v2121_v62 = vmul.f32 1.442695, %v1900_v31  ;;  %v11500_v49 = vrot.slane %v3324_v24, 9  ;;  %v11502_v27 = vrot.slane %v3325_v35, 9  ;;  %v4870_v11 = vmax.f32 %v3316_v13, %v11499_v18 }
 0x49e   :  { %v4872_v2 = vmax.f32 %v3323_v39, %v11501_v17  ;;  %v3209_v61 = vrot.slane %v3201_v43, %v19814_v51  ;;  %v3216_v19 = vrot.slane %v3202_v10, %v19814_v51  ;;  %v1528_v9 = vmul.f32 %v19745_v47, %v1360_v48  ;;  %v20140_v17 = vld [vmem:[#allocation60_spill] sm:$0xff] }
 0x49f   :  { %11759 = vpow2.f32 %v2121_v62  ;;  %v4871_v25 = vmax.f32 %v3324_v24, %v11500_v49  ;;  %v4873_v4 = vmax.f32 %v3325_v35, %v11502_v27  ;;  %v6482_v8 = vrot.slane %v4870_v11, %v19815_v33  ;;  %v20139_v24 = vld [vmem:[#allocation59_spill] sm:$0xff] }
 0x4a0   :  { %v6486_v50 = vrot.slane %v4870_v11, %v19816_v28  ;;  %v6498_v30 = vrot.slane %v4872_v2, %v19815_v33  ;;  %v6502_v31 = vrot.slane %v4872_v2, %v19816_v28  ;;  %v8136_v26 = vmul.f32 %v4870_v11, %v4870_v11 }
 0x4a1   :  { %v8138_v13 = vmul.f32 %v4872_v2, %v4872_v2  ;;  %v6490_v39 = vrot.slane %v4871_v25, %v19815_v33  ;;  %v6494_v21 = vrot.slane %v4871_v25, %v19816_v28  ;;  %v6506_v18 = vrot.slane %v4873_v4, %v19815_v33 }
 0x4a2   :  { %v6510_v48 = vrot.slane %v4873_v4, %v19816_v28  ;;  %v7471_v35 = vsel %vm7197_vm13, %v6482_v8, %v20139_v24  ;;  %v7478_v43 = vsel %vm7197_vm13, %v6486_v50, %v20140_v17  ;;  %v8137_v10 = vmul.f32 %v4871_v25, %v4871_v25 }
 0x4a3   :  { %v8139_v62 = vmul.f32 %v4873_v4, %v4873_v4  ;;  %v7472_v49 = vsel %vm7199_vm14, %v6490_v39, %v7471_v35  ;;  %v7479_v27 = vsel %vm7199_vm14, %v6494_v21, %v7478_v43  ;;  %v9748_v11 = vrot.slane %v8136_v26, %v19815_v33 }
 0x4a4   :  { %v9752_v2 = vrot.slane %v8136_v26, %v19816_v28  ;;  %v7473_v22 = vsel %vm7201_vm15, %v6498_v30, %v7472_v49  ;;  %v7480_v16 = vsel %vm7201_vm15, %v6502_v31, %v7479_v27  ;;  %v9756_v32 = vrot.slane %v8137_v10, %v19815_v33  ;;  %v20141_v26 = vld [vmem:[#allocation76_spill] sm:$0xff] }
 0x4a5   :  { %v9760_v8 = vrot.slane %v8137_v10, %v19816_v28  ;;  %v7474_v50 = vsel %vm7203_vm0, %v6506_v18, %v7473_v22  ;;  %v7481_v25 = vsel %vm7203_vm0, %v6510_v48, %v7480_v16  ;;  %v9764_v4 = vrot.slane %v8138_v13, %v19815_v33  ;;  %v20142_v16 = vld [vmem:[#allocation83_spill] sm:$0xff] }
 0x4a6   :  { %v9768_v39 = vrot.slane %v8138_v13, %v19816_v28  ;;  %7734 = vst [vmem:[%s19394_s3 + $0x140] sm:$0xff] %v7474_v50  ;;  %7735 = vst [vmem:[%s19394_s3 + $0x148] sm:$0xff] %v7481_v25  ;;  %v9772_v30 = vrot.slane %v8139_v62, %v19815_v33  ;;  %v9776_v31 = vrot.slane %v8139_v62, %v19816_v28  ;;  %v11476_v43 = vrot.slane %v3209_v61, 9  ;;  %v20143_v25 = vld [vmem:[#allocation107_spill] sm:$0xff] }
 0x4a7   :  { %v10730_v22 = vsel %vm7197_vm13, %v9748_v11, %v20141_v26  ;;  %v10737_v21 = vsel %vm7197_vm13, %v9752_v2, %v20142_v16  ;;  %v3217_v48 = vcombine.high %v3209_v61, %v3209_v61  ;;  %v3218_v24 = vcombine.high %v3216_v19, %v3216_v19  ;;  %v20144_v16 = vld [vmem:[#allocation22_spill] sm:$0xff] }
 0x4a8   :  { %v10731_v13 = vsel %vm7199_vm14, %v9756_v32, %v10730_v22  ;;  %v10738_v18 = vsel %vm7199_vm14, %v9760_v8, %v10737_v21  ;;  %v11478_v10 = vrot.slane %v3216_v19, 9  ;;  %v7793_v32 = vrot.slane %v16840_v42, 4 }
 0x4a9   :  { %v10732_v35 = vsel %vm7201_vm15, %v9764_v4, %v10731_v13  ;;  %v10739_v17 = vsel %vm7201_vm15, %v9768_v39, %v10738_v18  ;;  %v11758_v49 = vpop.eup %11757  ;;  %v11477_v11 = vrot.slane %v3217_v48, 9  ;;  %v11479_v2 = vrot.slane %v3218_v24, 9 }
 0x4aa   :  { %v17043_v62 = vsel %vm7203_vm0, %v9772_v30, %v10732_v35  ;;  %v17046_v27 = vsel %vm7203_vm0, %v9776_v31, %v10739_v17  ;;  %v4847_v8 = vmax.f32 %v3209_v61, %v11476_v43  ;;  %v4849_v50 = vmax.f32 %v3216_v19, %v11478_v10  ;;  %v20146_v17 = vld [vmem:[#allocation75_spill] sm:$0xff] }
 0x4ab   :  { %v17051_v4 = vadd.f32 %v16997_v37, %v20143_v25  ;;  %v4848_v26 = vmax.f32 %v3217_v48, %v11477_v11  ;;  %v4850_v22 = vmax.f32 %v3218_v24, %v11479_v2  ;;  %vm1771_vm11 = vcmp.gt.f32.partialorder %v16653_v60, 0.0 }
 0x4ac   :  { %v11760_v39 = vpop.eup %11759  ;;  %v11304_v30 = vadd.f32 -1.0, %v11758_v49  ;;  %v17055_v21 = vadd.f32 %v1528_v9, %v20144_v16  ;;  %v6298_v31 = vrot.slane %v4847_v8, %v19815_v33  ;;  %v6302_v13 = vrot.slane %v4847_v8, %v19816_v28  ;;  %v20145_v9 = vld [vmem:[#allocation82_spill] sm:$0xff] }
 0x4ad   :  { %v6314_v61 = vrot.slane %v4849_v50, %v19815_v33  ;;  %v6318_v19 = vrot.slane %v4849_v50, %v19816_v28  ;;  %v6306_v37 = vrot.slane %v4848_v26, %v19815_v33  ;;  %v6310_v18 = vrot.slane %v4848_v26, %v19816_v28 }
 0x4ae   :  { %v6322_v48 = vrot.slane %v4850_v22, %v19815_v33  ;;  %v6326_v24 = vrot.slane %v4850_v22, %v19816_v28  ;;  %vm1772_vm12 = vcmp.gt.f32.partialorder %v16659_v7, 0.0  ;;  %v7431_v35 = vsel %vm7197_vm13, %v6298_v31, %v20145_v9 }
 0x4af   :  { %v7438_v43 = vsel %vm7197_vm13, %v6302_v13, %v20146_v17  ;;  %v8113_v10 = vmul.f32 %v4847_v8, %v4847_v8  ;;  %v8114_v49 = vmul.f32 %v4848_v26, %v4848_v26  ;;  %v7432_v11 = vsel %vm7199_vm14, %v6306_v37, %v7431_v35  ;;  %v20148_v37 = vld [vmem:[#allocation19_spill] sm:$0xff] }
 0x4b0   :  { %v7439_v2 = vsel %vm7199_vm14, %v6310_v18, %v7438_v43  ;;  %v8115_v25 = vmul.f32 %v4849_v50, %v4849_v50  ;;  %v8116_v16 = vmul.f32 %v4850_v22, %v4850_v22  ;;  %v7433_v41 = vsel %vm7201_vm15, %v6314_v61, %v7432_v11 }
 0x4b1   :  { %v7440_v20 = vsel %vm7201_vm15, %v6318_v19, %v7439_v2  ;;  %v9564_v63 = vrot.slane %v8113_v10, %v19815_v33  ;;  %v9568_v0 = vrot.slane %v8113_v10, %v19816_v28  ;;  %v17077_v31 = vsel %vm7203_vm0, %v6322_v48, %v7433_v41  ;;  %v20149_v48 = vld [vmem:[#allocation145_spill] sm:$0xff] }
 0x4b2   :  { %v17080_v8 = vsel %vm7203_vm0, %v6326_v24, %v7440_v20  ;;  %v9572_v26 = vrot.slane %v8114_v49, %v19815_v33  ;;  %v9576_v13 = vrot.slane %v8114_v49, %v19816_v28  ;;  %v20147_v50 = vrot.slane %v16837_v14, 4  ;;  %7728 = vst [vmem:[%s19394_s3 + $0x110] sm:$0xff] %v17077_v31 }
 0x4b3   :  { %7729 = vst [vmem:[%s19394_s3 + $0x118] sm:$0xff] %v17080_v8  ;;  %v9580_v20 = vrot.slane %v8115_v25, %v19815_v33  ;;  %v9584_v41 = vrot.slane %v8115_v25, %v19816_v28  ;;  %v1911_v61 = vmin.f32 %v17051_v4, 0.0  ;;  %v9588_v19 = vrot.slane %v8116_v16, %v19815_v33 }
 0x4b4   :  { %v17087_v22 = vadd.f32 %v20147_v50, %v16837_v14  ;;  %v9592_v14 = vrot.slane %v8116_v16, %v19816_v28  ;;  %v10690_v18 = vsel %vm7197_vm13, %v9564_v63, %v20148_v37  ;;  %v10697_v24 = vsel %vm7197_vm13, %v9568_v0, %v20149_v48  ;;  %v1244_v16 = vpop.permute.xlu0 %1243 }
 0x4b5   :  { %v10691_v9 = vsel %vm7199_vm14, %v9572_v26, %v10690_v18  ;;  %v10698_v35 = vsel %vm7199_vm14, %v9576_v13, %v10697_v24  ;;  %v11305_v17 = vadd.f32 -1.0, %v11760_v39  ;;  %v2411_v43 = vsel %vm1771_vm11, %v16653_v60, %v11304_v30  ;;  %v20152_v13 = vld [vmem:[#allocation102_spill] sm:$0xff] }
 0x4b6   :  { %v17112_v10 = vadd.f32 %v7793_v32, %v16840_v42  ;;  %v10692_v49 = vsel %vm7201_vm15, %v9580_v20, %v10691_v9  ;;  %v10699_v11 = vsel %vm7201_vm15, %v9584_v41, %v10698_v35  ;;  %v1912_v63 = vmin.f32 %v17055_v21, 0.0  ;;  %v20153_v20 = vld [vmem:[#allocation91_spill] sm:$0xff] }
 0x4b7   :  { %v10693_v0 = vsel %vm7203_vm0, %v9588_v19, %v10692_v49  ;;  %v10700_v2 = vsel %vm7203_vm0, %v9592_v14, %v10699_v11  ;;  %v2412_v39 = vsel %vm1772_vm12, %v16659_v7, %v11305_v17  ;;  %v2143_v25 = vmul.f32 1.442695, %v1911_v61  ;;  %v20155_v19 = vld [vmem:[#allocation23_spill] sm:$0xff]  ;;  %v20156_v17 = vld [vmem:[#allocation28_spill] sm:$0xff] }
 0x4b8   :  { %v17123_v60 = vadd.f32 %v10693_v0, %v16258_v40  ;;  %v17126_v42 = vadd.f32 %v10700_v2, %v16261_v53  ;;  %v3398_v32 = vcombine.low %v2411_v43, %v2412_v39  ;;  %v3399_v30 = vcombine.high %v2411_v43, %v2412_v39  ;;  %v20154_v53 = vld [vmem:[#allocation62_spill] sm:$0xff] }
 0x4b9   :  { %11761 = vpow2.f32 %v2143_v25  ;;  %v2145_v26 = vmul.f32 1.442695, %v1912_v63  ;;  %v17130_v50 = vadd.f32 %v20152_v13, %v16930_v3  ;;  %v17134_v41 = vadd.f32 %v20153_v20, %v16933_v23 }
 0x4ba   :  { %20150 = vst [vmem:[#allocation98_spill] sm:$0xff] %v17123_v60  ;;  %20151 = vst [vmem:[#allocation121_spill] sm:$0xff] %v17126_v42  ;;  %v3406_v7 = vrot.slane %v3398_v32, %v19814_v51  ;;  %v3413_v40 = vrot.slane %v3399_v30, %v19814_v51  ;;  %v17140_v61 = vadd.f32 %v20154_v53, %v16980_v5  ;;  %v10977_v37 = vrot.slane %v16853_v58, 4 }
 0x4bb   :  { %v17144_v14 = vadd.f32 %v20155_v19, %v16983_v6  ;;  %11763 = vpow2.f32 %v2145_v26  ;;  %v1469_v3 = vmul.f32 %v20006_v59, %v1244_v16  ;;  %v1470_v23 = vmul.f32 %v19745_v47, %v1244_v16  ;;  %v20157_v6 = vld [vmem:[#allocation78_spill] sm:$0xff] }
 0x4bc   :  { %v3414_v18 = vcombine.high %v3406_v7, %v3406_v7  ;;  %v3415_v48 = vcombine.high %v3413_v40, %v3413_v40  ;;  %v11519_v24 = vrot.slane %v3406_v7, 9  ;;  %v11521_v9 = vrot.slane %v3413_v40, 9 }
 0x4bd   :  { %v10987_v5 = vrot.slane %v16856_v1, 4  ;;  %v17152_v43 = vadd.f32 %v1469_v3, %v20156_v17  ;;  %v17155_v49 = vadd.f32 %v1470_v23, %v20157_v6  ;;  %v17159_v25 = vadd.f32 %v10977_v37, %v16853_v58 }
 0x4be   :  { %v11520_v11 = vrot.slane %v3414_v18, 9  ;;  %v11522_v63 = vrot.slane %v3415_v48, 9  ;;  %v4890_v0 = vmax.f32 %v3406_v7, %v11519_v24  ;;  %v4892_v2 = vmax.f32 %v3413_v40, %v11521_v9 }
 0x4bf   :  { %v1853_v32 = vmin.f32 %v17152_v43, 0.0  ;;  %v1854_v30 = vmin.f32 %v17155_v49, 0.0  ;;  %vm1783_vm1 = vcmp.gt.f32.partialorder %v17051_v4, 0.0  ;;  %vm1784_vm2 = vcmp.gt.f32.partialorder %v17055_v21, 0.0 }
 0x4c0   :  { %v4891_v16 = vmax.f32 %v3414_v18, %v11520_v11  ;;  %v4893_v26 = vmax.f32 %v3415_v48, %v11522_v63  ;;  %v6642_v13 = vrot.slane %v4890_v0, %v19815_v33  ;;  %v6646_v20 = vrot.slane %v4890_v0, %v19816_v28 }
 0x4c1   :  { %v6658_v53 = vrot.slane %v4892_v2, %v19815_v33  ;;  %v6662_v7 = vrot.slane %v4892_v2, %v19816_v28  ;;  %v8156_v40 = vmul.f32 %v4890_v0, %v4890_v0  ;;  %v8158_v19 = vmul.f32 %v4892_v2, %v4892_v2 }
 0x4c2   :  { %v6650_v3 = vrot.slane %v4891_v16, %v19815_v33  ;;  %v6654_v58 = vrot.slane %v4891_v16, %v19816_v28  ;;  %v6666_v37 = vrot.slane %v4893_v26, %v19815_v33  ;;  %v6670_v23 = vrot.slane %v4893_v26, %v19816_v28 }
 0x4c3   :  { %v8157_v18 = vmul.f32 %v4891_v16, %v4891_v16  ;;  %v8159_v48 = vmul.f32 %v4893_v26, %v4893_v26  ;;  %v9908_v24 = vrot.slane %v8156_v40, %v19815_v33  ;;  %v9912_v9 = vrot.slane %v8156_v40, %v19816_v28 }
 0x4c4   :  { %v7510_v17 = vsel %vm7191_vm4, %v6650_v3, %v6642_v13  ;;  %v7516_v6 = vsel %vm7191_vm4, %v6654_v58, %v6646_v20  ;;  %v9924_v11 = vrot.slane %v8158_v19, %v19815_v33  ;;  %v9928_v63 = vrot.slane %v8158_v19, %v19816_v28  ;;  %v17189_v19 = vpop.permute.xlu1 %857 }
 0x4c5   :  { %v7511_v0 = vsel %vm7193_vm5, %v6658_v53, %v7510_v17  ;;  %v7517_v2 = vsel %vm7193_vm5, %v6662_v7, %v7516_v6  ;;  %v9916_v39 = vrot.slane %v8157_v18, %v19815_v33  ;;  %v9920_v16 = vrot.slane %v8157_v18, %v19816_v28  ;;  %v1348_v18 = vpop.permute.xlu0 %1347 }
 0x4c6   :  { %v11762_v26 = vpop.eup %11761  ;;  %v17182_v35 = vsel %vm7195_vm7, %v6666_v37, %v7511_v0  ;;  %v17185_v13 = vsel %vm7195_vm7, %v6670_v23, %v7517_v2  ;;  %v9932_v20 = vrot.slane %v8159_v48, %v19815_v33  ;;  %v9936_v40 = vrot.slane %v8159_v48, %v19816_v28 }
 0x4c7   :  { %20158 = vst [vmem:[#allocation134_spill] sm:$0xff] %v17182_v35  ;;  %20159 = vst [vmem:[#allocation135_spill] sm:$0xff] %v17185_v13  ;;  %v10769_v53 = vsel %vm7191_vm4, %v9916_v39, %v9908_v24  ;;  %v10775_v7 = vsel %vm7191_vm4, %v9920_v16, %v9912_v9  ;;  %v11316_v3 = vadd.f32 -1.0, %v11762_v26  ;;  %v2027_v58 = vmul.f32 1.442695, %v1853_v32  ;;  %v20162_v26 = vld [vmem:[#allocation41_spill] sm:$0xff] }
 0x4c8   :  { %v11764_v17 = vpop.eup %11763  ;;  %v10770_v37 = vsel %vm7193_vm5, %v9924_v11, %v10769_v53  ;;  %v10776_v6 = vsel %vm7193_vm5, %v9928_v63, %v10775_v7  ;;  %v2029_v23 = vmul.f32 1.442695, %v1854_v30  ;;  %v7022_v32 = vrot.slane %v16749_v57, %v19816_v28 }
 0x4c9   :  { %v17197_v0 = vsel %vm7195_vm7, %v9932_v20, %v10770_v37  ;;  %v17200_v48 = vsel %vm7195_vm7, %v9936_v40, %v10776_v6  ;;  %v11317_v39 = vadd.f32 -1.0, %v11764_v17  ;;  %v2423_v24 = vsel %vm1783_vm1, %v17051_v4, %v11316_v3  ;;  %v1172_v40 = vpop.permute.xlu1 %1171 }
 0x4ca   :  { %20160 = vst [vmem:[#allocation141_spill] sm:$0xff] %v17197_v0  ;;  %20161 = vst [vmem:[#allocation142_spill] sm:$0xff] %v17200_v48  ;;  %11765 = vpow2.f32 %v2027_v58  ;;  %v1521_v9 = vmul.f32 %v20006_v59, %v1348_v18  ;;  %v10988_v11 = vadd.f32 %v10987_v5, %v16856_v1  ;;  %v1522_v63 = vmul.f32 %v19745_v47, %v1348_v18 }
 0x4cb   :  { %v2424_v30 = vsel %vm1784_vm2, %v17055_v21, %v11317_v39  ;;  %11767 = vpow2.f32 %v2029_v23  ;;  %v20163_v1 = vrot.slane %v17087_v22, 2  ;;  %v20164_v21 = vrot.slane %v17112_v10, 2  ;;  %v20168_v39 = vld [vmem:[#allocation11_spill] sm:$0xff] }
 0x4cc   :  { %v3505_v16 = vcombine.low %v2423_v24, %v2424_v30  ;;  %v3506_v4 = vcombine.high %v2423_v24, %v2424_v30  ;;  %v17213_v20 = vadd.f32 %v1521_v9, %v20162_v26  ;;  %v10979_v3 = vrot.slane %v17159_v25, 2 }
 0x4cd   :  { %v7786_v5 = vadd.f32 %v20163_v1, %v17087_v22  ;;  %v7796_v7 = vadd.f32 %v20164_v21, %v17112_v10  ;;  %v20165_v58 = vrot.slane %v16737_v12, %v19815_v33  ;;  %v20166_v18 = vrot.slane %v16749_v57, %v19815_v33 }
 0x4ce   :  { %v20167_v37 = vrot.slane %v16737_v12, %v19816_v28  ;;  %v3513_v22 = vrot.slane %v3505_v16, %v19814_v51  ;;  %v3520_v23 = vrot.slane %v3506_v4, %v19814_v51  ;;  %v10989_v10 = vrot.slane %v10988_v11, 2 }
 0x4cf   :  { %v7590_v17 = vsel %vm7191_vm4, %v20166_v18, %v20165_v58  ;;  %v17238_v24 = vadd.f32 %v1522_v63, %v20168_v39  ;;  %v1905_v9 = vmin.f32 %v17213_v20, 0.0  ;;  %v1433_v30 = vmul.f32 %v20006_v59, %v1172_v40  ;;  %v1368_v58 = vpop.permute.xlu0 %1367 }
 0x4d0   :  { %v7597_v6 = vsel %vm7191_vm4, %v7022_v32, %v20167_v37  ;;  %v3521_v57 = vcombine.high %v3513_v22, %v3513_v22  ;;  %v3522_v26 = vcombine.high %v3520_v23, %v3520_v23  ;;  %v11542_v1 = vrot.slane %v3513_v22, 9 }
 0x4d1   :  { %v11544_v21 = vrot.slane %v3520_v23, 9  ;;  %v7787_v12 = vrot.slane %v7786_v5, 1  ;;  %v7797_v18 = vrot.slane %v7796_v7, 1  ;;  %v10980_v32 = vadd.f32 %v10979_v3, %v17159_v25 }
 0x4d2   :  { %v2131_v16 = vmul.f32 1.442695, %v1905_v9  ;;  %v11543_v37 = vrot.slane %v3521_v57, 9  ;;  %v11545_v4 = vrot.slane %v3522_v26, 9  ;;  %v17243_v53 = vmax.f32 %v3513_v22, %v11542_v1  ;;  %v20170_v22 = vld [vmem:[#allocation49_spill] sm:$0xff] }
 0x4d3   :  { %v17245_v63 = vmax.f32 %v3520_v23, %v11544_v21  ;;  %v20169_v39 = vrot.slane %v16739_v15, %v19815_v33  ;;  %v1434_v42 = vmul.f32 %v19745_v47, %v1172_v40  ;;  %v1531_v60 = vmul.f32 %v20006_v59, %v1368_v58 }
 0x4d4   :  { %11769 = vpow2.f32 %v2131_v16  ;;  %v17253_v46 = vmax.f32 %v3521_v57, %v11543_v37  ;;  %v17255_v25 = vmax.f32 %v3522_v26, %v11545_v4  ;;  %v1906_v3 = vmin.f32 %v17238_v24, 0.0 }
 0x4d5   :  { %v7591_v2 = vsel %vm7193_vm5, %v20169_v39, %v7590_v17  ;;  %v17259_v9 = vadd.f32 %v1433_v30, %v20170_v22  ;;  %v20171_v23 = vrot.slane %v16739_v15, %v19816_v28  ;;  %v17265_v17 = vadd.f32 %v7787_v12, %v7786_v5 }
 0x4d6   :  { %v10990_v21 = vadd.f32 %v10989_v10, %v10988_v11  ;;  %v8179_v40 = vmul.f32 %v17243_v53, %v17243_v53  ;;  %v17269_v57 = vadd.f32 %v7797_v18, %v7796_v7  ;;  %v10981_v26 = vrot.slane %v10980_v32, 1  ;;  %v20174_v11 = vld [vmem:[#allocation50_spill] sm:$0xff] }
 0x4d7   :  { %v7598_v1 = vsel %vm7193_vm5, %v20171_v23, %v7597_v6  ;;  %20172 = vst [vmem:[#allocation118_spill] sm:$0xff] %v17265_v17  ;;  %v8181_v16 = vmul.f32 %v17245_v63, %v17245_v63  ;;  %vm1725_vm6 = vcmp.gt.f32.partialorder %v17152_v43, 0.0  ;;  %v11766_v30 = vpop.eup %11765  ;;  %v8180_v15 = vmul.f32 %v17253_v46, %v17253_v46 }
 0x4d8   :  { %20173 = vst [vmem:[#allocation119_spill] sm:$0xff] %v17269_v57  ;;  %v8182_v5 = vmul.f32 %v17255_v25, %v17255_v25  ;;  %vm1726_vm8 = vcmp.gt.f32.partialorder %v17155_v49, 0.0  ;;  %v17280_v6 = vadd.f32 %v1434_v42, %v20174_v11  ;;  %v11768_v7 = vpop.eup %11767  ;;  %v2133_v10 = vmul.f32 1.442695, %v1906_v3 }
 0x4d9   :  { %v1817_v12 = vmin.f32 %v17259_v9, 0.0  ;;  %v1532_v18 = vmul.f32 %v19745_v47, %v1368_v58  ;;  %v17285_v37 = vadd.f32 %v1531_v60, %v16292_v38  ;;  %v10092_v4 = vrot.slane %v8179_v40, %v19815_v33 }
 0x4da   :  { %v10096_v39 = vrot.slane %v8179_v40, %v19816_v28  ;;  %v10100_v22 = vrot.slane %v8180_v15, %v19815_v33  ;;  %v10104_v23 = vrot.slane %v8180_v15, %v19816_v28  ;;  %v10108_v42 = vrot.slane %v8181_v16, %v19815_v33 }
 0x4db   :  { %v10112_v11 = vrot.slane %v8181_v16, %v19816_v28  ;;  %v10116_v3 = vrot.slane %v8182_v5, %v19815_v33  ;;  %v10120_v52 = vrot.slane %v8182_v5, %v19816_v28  ;;  %v11258_v60 = vadd.f32 -1.0, %v11766_v30 }
 0x4dc   :  { %v10809_v58 = vsel %vm7191_vm4, %v10100_v22, %v10092_v4  ;;  %v10816_v38 = vsel %vm7191_vm4, %v10104_v23, %v10096_v39  ;;  %v11259_v54 = vadd.f32 -1.0, %v11768_v7  ;;  %11771 = vpow2.f32 %v2133_v10  ;;  %v17324_v22 = vpop.permute.xlu1 %1267 }
 0x4dd   :  { %v10810_v40 = vsel %vm7193_vm5, %v10108_v42, %v10809_v58  ;;  %v10817_v34 = vsel %vm7193_vm5, %v10112_v11, %v10816_v38  ;;  %v1818_v15 = vmin.f32 %v17280_v6, 0.0  ;;  %v2365_v5 = vsel %vm1725_vm6, %v17152_v43, %v11258_v60 }
 0x4de   :  { %v17301_v48 = vsel %vm7195_vm7, %v10116_v3, %v10810_v40  ;;  %v17304_v16 = vsel %vm7195_vm7, %v10120_v52, %v10817_v34  ;;  %v2366_v30 = vsel %vm1726_vm8, %v17155_v49, %v11259_v54  ;;  %v20177_v7 = vrot.slane %v16751_v45, %v19815_v33 }
 0x4df   :  { %20175 = vst [vmem:[#allocation54_spill] sm:$0xff] %v17301_v48  ;;  %20176 = vst [vmem:[#allocation105_spill] sm:$0xff] %v17304_v16  ;;  %v20178_v4 = vrot.slane %v16751_v45, %v19816_v28  ;;  %v2987_v52 = vcombine.low %v2365_v5, %v2366_v30  ;;  %v2988_v39 = vcombine.high %v2365_v5, %v2366_v30  ;;  %v10991_v49 = vrot.slane %v10990_v21, 1 }
 0x4e0   :  { %v17316_v10 = vsel %vm7195_vm7, %v20177_v7, %v7591_v2  ;;  %v1915_v23 = vmin.f32 %v17285_v37, 0.0  ;;  %v17329_v2 = vadd.f32 %v10981_v26, %v10980_v32  ;;  %v1957_v58 = vmul.f32 1.442695, %v1818_v15  ;;  %v20181_v26 = vld [vmem:[#allocation42_spill] sm:$0xff] }
 0x4e1   :  { %v17322_v34 = vsel %vm7195_vm7, %v20178_v4, %v7598_v1  ;;  %v11770_v42 = vpop.eup %11769  ;;  %v2995_v11 = vrot.slane %v2987_v52, %v19814_v51  ;;  %v3002_v45 = vrot.slane %v2988_v39, %v19814_v51  ;;  %v1955_v1 = vmul.f32 1.442695, %v1817_v12  ;;  %v20182_v39 = vld [vmem:[#allocation88_spill] sm:$0xff] }
 0x4e2   :  { %20179 = vst [vmem:[#allocation70_spill] sm:$0xff] %v17329_v2  ;;  %v11310_v3 = vadd.f32 -1.0, %v11770_v42  ;;  %v17334_v38 = vadd.f32 %v1532_v18, %v16447_v56  ;;  %v1481_v60 = vmul.f32 %v20006_v59, %v17324_v22  ;;  %v2151_v7 = vmul.f32 1.442695, %v1915_v23 }
 0x4e3   :  { %v3003_v40 = vcombine.high %v2995_v11, %v2995_v11  ;;  %v11430_v5 = vrot.slane %v2995_v11, 9  ;;  %v11432_v30 = vrot.slane %v3002_v45, 9  ;;  %v17338_v4 = vadd.f32 %v10991_v49, %v10990_v21 }
 0x4e4   :  { %v17342_v32 = vmul.f32 %v20056_v36, %v17189_v19  ;;  %v17346_v12 = vmul.f32 %v20181_v26, %v17189_v19  ;;  %vm1777_vm9 = vcmp.gt.f32.partialorder %v17213_v20, 0.0  ;;  %11773 = vpow2.f32 %v1955_v1 }
 0x4e5   :  { %20180 = vst [vmem:[#allocation71_spill] sm:$0xff] %v17338_v4  ;;  %v11431_v56 = vrot.slane %v3003_v40, 9  ;;  %v4801_v18 = vmax.f32 %v2995_v11, %v11430_v5  ;;  %v4803_v15 = vmax.f32 %v3002_v45, %v11432_v30  ;;  %vm1778_vm10 = vcmp.gt.f32.partialorder %v17238_v24, 0.0  ;;  %v20184_v30 = vld [vmem:[#allocation95_spill] sm:$0xff] }
 0x4e6   :  { %v2417_v52 = vsel %vm1777_vm9, %v17213_v20, %v11310_v3  ;;  %11775 = vpow2.f32 %v1957_v58  ;;  %v1916_v21 = vmin.f32 %v17334_v38, 0.0  ;;  %v17353_v49 = vadd.f32 %v1481_v60, %v20182_v39  ;;  %v20183_v58 = vld [vmem:[#allocation46_spill] sm:$0xff] }
 0x4e7   :  { %v4802_v23 = vmax.f32 %v3003_v40, %v11431_v56  ;;  %v5930_v19 = vrot.slane %v4801_v18, %v19815_v33  ;;  %v5934_v42 = vrot.slane %v4801_v18, %v19816_v28  ;;  %11777 = vpow2.f32 %v2151_v7 }
 0x4e8   :  { %v5946_v11 = vrot.slane %v4803_v15, %v19815_v33  ;;  %v5950_v45 = vrot.slane %v4803_v15, %v19816_v28  ;;  %v8067_v1 = vmul.f32 %v4801_v18, %v4801_v18  ;;  %v8069_v5 = vmul.f32 %v4803_v15, %v4803_v15 }
 0x4e9   :  { %v5938_v20 = vrot.slane %v4802_v23, %v19815_v33  ;;  %v5942_v3 = vrot.slane %v4802_v23, %v19816_v28  ;;  %v7351_v60 = vsel %vm7197_vm13, %v5930_v19, %v20183_v58  ;;  %v7357_v40 = vsel %vm7197_vm13, %v5934_v42, %v20184_v30  ;;  %v11772_v56 = vpop.eup %11771 }
 0x4ea   :  { %v8068_v39 = vmul.f32 %v4802_v23, %v4802_v23  ;;  %v9196_v7 = vrot.slane %v8067_v1, %v19815_v33  ;;  %v9200_v54 = vrot.slane %v8067_v1, %v19816_v28  ;;  %v9212_v43 = vrot.slane %v8069_v5, %v19815_v33 }
 0x4eb   :  { %v7352_v18 = vsel %vm7199_vm14, %v5938_v20, %v7351_v60  ;;  %v7358_v15 = vsel %vm7199_vm14, %v5942_v3, %v7357_v40  ;;  %v9216_v4 = vrot.slane %v8069_v5, %v19816_v28  ;;  %v11311_v2 = vadd.f32 -1.0, %v11772_v56  ;;  %v20185_v20 = vld [vmem:[#allocation126_spill] sm:$0xff] }
 0x4ec   :  { %v7353_v19 = vsel %vm7201_vm15, %v5946_v11, %v7352_v18  ;;  %v7359_v58 = vsel %vm7201_vm15, %v5950_v45, %v7358_v15  ;;  %v9204_v42 = vrot.slane %v8068_v39, %v19815_v33  ;;  %v9208_v23 = vrot.slane %v8068_v39, %v19816_v28  ;;  %v20186_v45 = vld [vmem:[#allocation65_spill] sm:$0xff] }
 0x4ed   :  { %7716 = vst [vmem:[%s19394_s3 + $0xb0] sm:$0x7f] %v7353_v19  ;;  %7717 = vst [vmem:[%s19394_s3 + $0xb8] sm:$0x7f] %v7359_v58  ;;  %v7801_v1 = vsel %vm7760_vm3, %v7353_v19, 0.0  ;;  %v7811_v5 = vsel %vm7760_vm3, %v7359_v58, 0.0  ;;  %v10610_v11 = vsel %vm7197_vm13, %v9196_v7, %v20185_v20  ;;  %v10616_v3 = vsel %vm7197_vm13, %v9200_v54, %v20186_v45 }
 0x4ee   :  { %v17388_v60 = vadd.f32 %v7801_v1, %v17130_v50  ;;  %v17391_v30 = vadd.f32 %v7811_v5, %v17134_v41  ;;  %v10611_v40 = vsel %vm7199_vm14, %v9204_v42, %v10610_v11  ;;  %v10617_v56 = vsel %vm7199_vm14, %v9208_v23, %v10616_v3  ;;  %v11859_v50 = vld [vmem:[%s19394_s3 + $0x100] sm:$0xff] }
 0x4ef   :  { %v10612_v39 = vsel %vm7201_vm15, %v9212_v43, %v10611_v40  ;;  %v10618_v18 = vsel %vm7201_vm15, %v9216_v4, %v10617_v56  ;;  %v2418_v7 = vsel %vm1778_vm10, %v17238_v24, %v11311_v2  ;;  %v2153_v15 = vmul.f32 1.442695, %v1916_v21  ;;  %v20189_v23 = vld [vmem:[#allocation53_spill] sm:$0xff] }
 0x4f0   :  { %v17404_v41 = vadd.f32 %v11859_v50, %v17077_v31  ;;  %v10995_v54 = vsel %vm7760_vm3, %v10612_v39, 0.0  ;;  %v11005_v19 = vsel %vm7760_vm3, %v10618_v18, 0.0  ;;  %v1482_v43 = vmul.f32 %v19745_v47, %v17324_v22  ;;  %v11860_v31 = vld [vmem:[%s19394_s3 + $0x108] sm:$0xff]  ;;  %v20190_v22 = vld [vmem:[#allocation136_spill] sm:$0xff] }
 0x4f1   :  { %v17411_v4 = vadd.f32 %v10995_v54, %v17140_v61  ;;  %v17414_v24 = vadd.f32 %v11005_v19, %v17144_v14  ;;  %v3451_v2 = vcombine.low %v2417_v52, %v2418_v7  ;;  %v3452_v21 = vcombine.high %v2417_v52, %v2418_v7  ;;  %v11774_v58 = vpop.eup %11773  ;;  %v20191_v56 = vld [vmem:[#allocation89_spill] sm:$0xff] }
 0x4f2   :  { %20187 = vst [vmem:[#allocation35_spill] sm:$0xff] %v17404_v41  ;;  %v17420_v42 = vadd.f32 %v11860_v31, %v17080_v8  ;;  %v17424_v1 = vadd.f32 %v17342_v32, %v20189_v23  ;;  %v17428_v61 = vadd.f32 %v17346_v12, %v20190_v22  ;;  %v1865_v14 = vmin.f32 %v17353_v49, 0.0 }
 0x4f3   :  { %v11776_v5 = vpop.eup %11775  ;;  %v3459_v52 = vrot.slane %v3451_v2, %v19814_v51  ;;  %v3466_v20 = vrot.slane %v3452_v21, %v19814_v51  ;;  %vm1689_vm11 = vcmp.gt.f32.partialorder %v17259_v9, 0.0  ;;  %11779 = vpow2.f32 %v2153_v15 }
 0x4f4   :  { %20188 = vst [vmem:[#allocation77_spill] sm:$0xff] %v17420_v42  ;;  %v11778_v8 = vpop.eup %11777  ;;  %vm1690_vm12 = vcmp.gt.f32.partialorder %v17280_v6, 0.0  ;;  %v17444_v39 = vadd.f32 %v1482_v43, %v20191_v56  ;;  %v11222_v15 = vadd.f32 -1.0, %v11774_v58  ;;  %v2051_v50 = vmul.f32 1.442695, %v1865_v14 }
 0x4f5   :  { %v3467_v3 = vcombine.high %v3459_v52, %v3459_v52  ;;  %v3468_v40 = vcombine.high %v3466_v20, %v3466_v20  ;;  %v11530_v18 = vrot.slane %v3459_v52, 9  ;;  %v11532_v7 = vrot.slane %v3466_v20, 9 }
 0x4f6   :  { %v11223_v21 = vadd.f32 -1.0, %v11776_v5  ;;  %v1866_v14 = vmin.f32 %v17444_v39, 0.0  ;;  %v2329_v5 = vsel %vm1689_vm11, %v17259_v9, %v11222_v15  ;;  %vm1787_vm1 = vcmp.gt.f32.partialorder %v17285_v37, 0.0  ;;  %v20192_v15 = vld [vmem:[#allocation67_spill] sm:$0xff] }
 0x4f7   :  { %v11531_v19 = vrot.slane %v3467_v3, 9  ;;  %v11533_v2 = vrot.slane %v3468_v40, 9  ;;  %v4901_v22 = vmax.f32 %v3459_v52, %v11530_v18  ;;  %v4903_v45 = vmax.f32 %v3466_v20, %v11532_v7 }
 0x4f8   :  { %11781 = vpow2.f32 %v2051_v50  ;;  %vm1788_vm2 = vcmp.gt.f32.partialorder %v17334_v38, 0.0  ;;  %vm1737_vm6 = vcmp.gt.f32.partialorder %v17353_v49, 0.0  ;;  %vm1738_vm8 = vcmp.gt.f32.partialorder %v17444_v39, 0.0 }
 0x4f9   :  { %v4902_v56 = vmax.f32 %v3467_v3, %v11531_v19  ;;  %v4904_v58 = vmax.f32 %v3468_v40, %v11533_v2  ;;  %v6730_v32 = vrot.slane %v4901_v22, %v19815_v33  ;;  %v6734_v12 = vrot.slane %v4901_v22, %v19816_v28  ;;  %v20193_v2 = vld [vmem:[#allocation86_spill] sm:$0xff] }
 0x4fa   :  { %v2330_v3 = vsel %vm1690_vm12, %v17280_v6, %v11223_v21  ;;  %v11320_v40 = vadd.f32 -1.0, %v11778_v8  ;;  %v6746_v18 = vrot.slane %v4903_v45, %v19815_v33  ;;  %v6750_v7 = vrot.slane %v4903_v45, %v19816_v28 }
 0x4fb   :  { %v6738_v52 = vrot.slane %v4902_v56, %v19815_v33  ;;  %v6742_v20 = vrot.slane %v4902_v56, %v19816_v28  ;;  %v6754_v19 = vrot.slane %v4904_v58, %v19815_v33  ;;  %v6758_v9 = vrot.slane %v4904_v58, %v19816_v28 }
 0x4fc   :  { %v7525_v50 = vsel %vm7197_vm13, %v6730_v32, %v20192_v15  ;;  %v7532_v43 = vsel %vm7197_vm13, %v6734_v12, %v20193_v2  ;;  %v8167_v23 = vmul.f32 %v4901_v22, %v4901_v22  ;;  %v8168_v31 = vmul.f32 %v4902_v56, %v4902_v56 }
 0x4fd   :  { %v7526_v6 = vsel %vm7199_vm14, %v6738_v52, %v7525_v50  ;;  %v7533_v8 = vsel %vm7199_vm14, %v6742_v20, %v7532_v43  ;;  %v8169_v21 = vmul.f32 %v4903_v45, %v4903_v45  ;;  %v8170_v54 = vmul.f32 %v4904_v58, %v4904_v58  ;;  %v20194_v43 = vld [vmem:[#allocation16_spill] sm:$0xff] }
 0x4fe   :  { %v7527_v11 = vsel %vm7201_vm15, %v6746_v18, %v7526_v6  ;;  %v7534_v57 = vsel %vm7201_vm15, %v6750_v7, %v7533_v8  ;;  %v9996_v17 = vrot.slane %v8167_v23, %v19815_v33  ;;  %v10000_v42 = vrot.slane %v8167_v23, %v19816_v28 }
 0x4ff   :  { %v7528_v15 = vsel %vm7203_vm0, %v6754_v19, %v7527_v11  ;;  %v7535_v12 = vsel %vm7203_vm0, %v6758_v9, %v7534_v57  ;;  %v10004_v22 = vrot.slane %v8168_v31, %v19815_v33  ;;  %v10008_v56 = vrot.slane %v8168_v31, %v19816_v28  ;;  %v20195_v31 = vld [vmem:[#allocation137_spill] sm:$0xff] }
 0x500   :  { %v11780_v32 = vpop.eup %11779  ;;  %7742 = vst [vmem:[%s19394_s3 + $0x180] sm:$0xff] %v7528_v15  ;;  %7743 = vst [vmem:[%s19394_s3 + $0x188] sm:$0xff] %v7535_v12  ;;  %v10012_v45 = vrot.slane %v8169_v21, %v19815_v33  ;;  %v10016_v23 = vrot.slane %v8169_v21, %v19816_v28  ;;  %v10020_v11 = vrot.slane %v8170_v54, %v19815_v33  ;;  %v2053_v8 = vmul.f32 1.442695, %v1866_v14 }
 0x501   :  { %v10024_v57 = vrot.slane %v8170_v54, %v19816_v28  ;;  %v10784_v58 = vsel %vm7197_vm13, %v9996_v17, %v20194_v43  ;;  %v10791_v52 = vsel %vm7197_vm13, %v10000_v42, %v20195_v31  ;;  %v2665_v20 = vcombine.low %v2329_v5, %v2330_v3 }
 0x502   :  { %v2666_v18 = vcombine.high %v2329_v5, %v2330_v3  ;;  %v10785_v7 = vsel %vm7199_vm14, %v10004_v22, %v10784_v58  ;;  %v10792_v19 = vsel %vm7199_vm14, %v10008_v56, %v10791_v52  ;;  %v11321_v9 = vadd.f32 -1.0, %v11780_v32 }
 0x503   :  { %v2427_v50 = vsel %vm1787_vm1, %v17285_v37, %v11320_v40  ;;  %v10786_v2 = vsel %vm7201_vm15, %v10012_v45, %v10785_v7  ;;  %v10793_v54 = vsel %vm7201_vm15, %v10016_v23, %v10792_v19  ;;  %v2673_v17 = vrot.slane %v2665_v20, %v19814_v51 }
 0x504   :  { %v2680_v6 = vrot.slane %v2666_v18, %v19814_v51  ;;  %v17509_v42 = vsel %vm7203_vm0, %v10020_v11, %v10786_v2  ;;  %v17512_v5 = vsel %vm7203_vm0, %v10024_v57, %v10793_v54  ;;  %v2428_v3 = vsel %vm1788_vm2, %v17334_v38, %v11321_v9 }
 0x505   :  { %20196 = vst [vmem:[#allocation14_spill] sm:$0xff] %v17509_v42  ;;  %20197 = vst [vmem:[#allocation15_spill] sm:$0xff] %v17512_v5  ;;  %v2681_v37 = vcombine.high %v2673_v17, %v2673_v17  ;;  %v11360_v21 = vrot.slane %v2673_v17, 9  ;;  %v17517_v15 = vpop.eup %11781  ;;  %v20198_v12 = vrot.slane %v17243_v53, %v19815_v33  ;;  %v20199_v22 = vrot.slane %v17253_v46, %v19815_v33 }
 0x506   :  { %v2682_v40 = vcombine.high %v2680_v6, %v2680_v6  ;;  %v11362_v32 = vrot.slane %v2680_v6, 9  ;;  %v3541_v45 = vcombine.low %v2427_v50, %v2428_v3  ;;  %v3542_v23 = vcombine.high %v2427_v50, %v2428_v3 }
 0x507   :  { %v17526_v56 = vsel %vm7191_vm4, %v20199_v22, %v20198_v12  ;;  %11783 = vpow2.f32 %v2053_v8  ;;  %v11361_v38 = vrot.slane %v2681_v37, 9  ;;  %v4731_v11 = vmax.f32 %v2673_v17, %v11360_v21  ;;  %v20201_v21 = vld [vmem:[#allocation143_spill] sm:$0xff] }
 0x508   :  { %v11363_v14 = vrot.slane %v2682_v40, 9  ;;  %v4733_v57 = vmax.f32 %v2680_v6, %v11362_v32  ;;  %v7803_v43 = vrot.slane %v17388_v60, 4  ;;  %v7813_v58 = vrot.slane %v17391_v30, 4 }
 0x509   :  { %v3549_v31 = vrot.slane %v3541_v45, %v19814_v51  ;;  %v17532_v52 = vrot.slane %v3542_v23, %v19814_v51  ;;  %v4732_v20 = vmax.f32 %v2681_v37, %v11361_v38  ;;  %v5370_v7 = vrot.slane %v4731_v11, %v19815_v33  ;;  %v20200_v37 = vld [vmem:[#allocation80_spill] sm:$0xff] }
 0x50a   :  { %v4734_v18 = vmax.f32 %v2682_v40, %v11363_v14  ;;  %v5374_v19 = vrot.slane %v4731_v11, %v19816_v28  ;;  %v5386_v9 = vrot.slane %v4733_v57, %v19815_v33  ;;  %v5390_v50 = vrot.slane %v4733_v57, %v19816_v28 }
 0x50b   :  { %v7997_v2 = vmul.f32 %v4731_v11, %v4731_v11  ;;  %v7999_v54 = vmul.f32 %v4733_v57, %v4733_v57  ;;  %v5378_v17 = vrot.slane %v4732_v20, %v19815_v33  ;;  %v5382_v6 = vrot.slane %v4732_v20, %v19816_v28 }
 0x50c   :  { %v5394_v3 = vrot.slane %v4734_v18, %v19815_v33  ;;  %v5398_v8 = vrot.slane %v4734_v18, %v19816_v28  ;;  %v7229_v40 = vsel %vm7197_vm13, %v5370_v7, %v20200_v37  ;;  %v7236_v32 = vsel %vm7197_vm13, %v5374_v19, %v20201_v21 }
 0x50d   :  { %v7998_v12 = vmul.f32 %v4732_v20, %v4732_v20  ;;  %v8000_v22 = vmul.f32 %v4734_v18, %v4734_v18  ;;  %v7230_v45 = vsel %vm7199_vm14, %v5378_v17, %v7229_v40  ;;  %v7237_v23 = vsel %vm7199_vm14, %v5382_v6, %v7236_v32 }
 0x50e   :  { %v8636_v38 = vrot.slane %v7997_v2, %v19815_v33  ;;  %v8640_v14 = vrot.slane %v7997_v2, %v19816_v28  ;;  %v7231_v11 = vsel %vm7201_vm15, %v5386_v9, %v7230_v45  ;;  %v7238_v57 = vsel %vm7201_vm15, %v5390_v50, %v7237_v23  ;;  %v20202_v2 = vld [vmem:[#allocation39_spill] sm:$0xff] }
 0x50f   :  { %v8644_v41 = vrot.slane %v7998_v12, %v19815_v33  ;;  %v8648_v7 = vrot.slane %v7998_v12, %v19816_v28  ;;  %v7804_v19 = vadd.f32 %v7803_v43, %v17388_v60  ;;  %v7232_v20 = vsel %vm7203_vm0, %v5394_v3, %v7231_v11  ;;  %v20203_v43 = vld [vmem:[#allocation133_spill] sm:$0xff]  ;;  %v1180_v11 = vpop.permute.xlu0 %1179 }
 0x510   :  { %v7239_v18 = vsel %vm7203_vm0, %v5398_v8, %v7238_v57  ;;  %v8652_v17 = vrot.slane %v7999_v54, %v19815_v33  ;;  %7698 = vst [vmem:[%s19394_s3 + $0x20] sm:$0xff] %v7232_v20  ;;  %v8656_v9 = vrot.slane %v7999_v54, %v19816_v28  ;;  %v8660_v50 = vrot.slane %v8000_v22, %v19815_v33 }
 0x511   :  { %7699 = vst [vmem:[%s19394_s3 + $0x28] sm:$0xff] %v7239_v18  ;;  %v10488_v60 = vsel %vm7197_vm13, %v8636_v38, %v20202_v2  ;;  %v10495_v6 = vsel %vm7197_vm13, %v8640_v14, %v20203_v43  ;;  %v8664_v3 = vrot.slane %v8000_v22, %v19816_v28  ;;  %v3557_v40 = vcombine.high %v3549_v31, %v3549_v31 }
 0x512   :  { %v10489_v8 = vsel %vm7199_vm14, %v8644_v41, %v10488_v60  ;;  %v10496_v37 = vsel %vm7199_vm14, %v8648_v7, %v10495_v6  ;;  %v11550_v54 = vrot.slane %v3549_v31, 9  ;;  %v11552_v12 = vrot.slane %v17532_v52, 9 }
 0x513   :  { %v10490_v21 = vsel %vm7201_vm15, %v8652_v17, %v10489_v8  ;;  %v10497_v32 = vsel %vm7201_vm15, %v8656_v9, %v10496_v37  ;;  %v7814_v23 = vadd.f32 %v7813_v58, %v17391_v30  ;;  %v11551_v22 = vrot.slane %v3557_v40, 9  ;;  %v20204_v17 = vld [vmem:[#allocation87_spill] sm:$0xff]  ;;  %v20205_v30 = vld [vmem:[#allocation69_spill] sm:$0xff] }
 0x514   :  { %v11784_v45 = vpop.eup %11783  ;;  %v10491_v38 = vsel %vm7203_vm0, %v8660_v50, %v10490_v21  ;;  %v10498_v14 = vsel %vm7203_vm0, %v8664_v3, %v10497_v32  ;;  %v17579_v41 = vmax.f32 %v3549_v31, %v11550_v54  ;;  %v17582_v57 = vmax.f32 %v17532_v52, %v11552_v12  ;;  %v20206_v50 = vld [vmem:[#allocation73_spill] sm:$0xff] }
 0x515   :  { %v11270_v7 = vadd.f32 -1.0, %v17517_v15  ;;  %v17586_v9 = vadd.f32 %v20204_v17, %v7232_v20  ;;  %v17588_v2 = vmax.f32 %v3557_v40, %v11551_v22  ;;  %v11271_v60 = vadd.f32 -1.0, %v11784_v45  ;;  %v20210_v45 = vld [vmem:[#allocation45_spill] sm:$0xff] }
 0x516   :  { %v17591_v58 = vadd.f32 %v20205_v30, %v7239_v18  ;;  %v17594_v43 = vadd.f32 %v20206_v50, %v10491_v38  ;;  %v7805_v6 = vrot.slane %v7804_v19, 2  ;;  %v10997_v31 = vrot.slane %v17411_v4, 4  ;;  %v20211_v50 = vld [vmem:[#allocation58_spill] sm:$0xff] }
 0x517   :  { %v11007_v3 = vrot.slane %v17414_v24, 4  ;;  %v1437_v8 = vmul.f32 %v20006_v59, %v1180_v11  ;;  %v20207_v15 = vrot.slane %v17245_v63, %v19815_v33  ;;  %v20208_v18 = vrot.slane %v17243_v53, %v19816_v28 }
 0x518   :  { %v20209_v37 = vrot.slane %v17253_v46, %v19816_v28  ;;  %v8187_v21 = vmul.f32 %v17579_v41, %v17579_v41  ;;  %v8189_v32 = vmul.f32 %v17582_v57, %v17582_v57  ;;  %v1438_v53 = vmul.f32 %v19745_v47, %v1180_v11 }
 0x519   :  { %v17604_v20 = vsel %vm7193_vm5, %v20207_v15, %v17526_v56  ;;  %v8188_v56 = vmul.f32 %v17588_v2, %v17588_v2  ;;  %v7815_v54 = vrot.slane %v7814_v23, 2  ;;  %v2377_v46 = vsel %vm1737_vm6, %v17353_v49, %v11270_v7 }
 0x51a   :  { %v17613_v40 = vsel %vm7191_vm4, %v20209_v37, %v20208_v18  ;;  %v2378_v12 = vsel %vm1738_vm8, %v17444_v39, %v11271_v60  ;;  %v17627_v38 = vadd.f32 %v20210_v45, %v10498_v14  ;;  %v17629_v22 = vadd.f32 %v7805_v6, %v7804_v19  ;;  %v1324_v6 = vpop.permute.xlu1 %1323 }
 0x51b   :  { %v17632_v17 = vadd.f32 %v10997_v31, %v17411_v4  ;;  %v17635_v30 = vadd.f32 %v11007_v3, %v17414_v24  ;;  %v17638_v15 = vadd.f32 %v1437_v8, %v20211_v50  ;;  %v10156_v11 = vrot.slane %v8187_v21, %v19815_v33  ;;  %v20212_v8 = vld [vmem:[#allocation56_spill] sm:$0xff] }
 0x51c   :  { %v10160_v49 = vrot.slane %v8187_v21, %v19816_v28  ;;  %v10164_v39 = vrot.slane %v8188_v56, %v19815_v33  ;;  %v10168_v14 = vrot.slane %v8188_v56, %v19816_v28  ;;  %v10172_v19 = vrot.slane %v8189_v32, %v19815_v33 }
 0x51d   :  { %v10176_v7 = vrot.slane %v8189_v32, %v19816_v28  ;;  %v3094_v4 = vcombine.low %v2377_v46, %v2378_v12  ;;  %v3095_v60 = vcombine.high %v2377_v46, %v2378_v12  ;;  %v17646_v24 = vadd.f32 %v7815_v54, %v7814_v23  ;;  %v20215_v23 = vld [vmem:[#allocation109_spill] sm:$0xff] }
 0x51e   :  { %v10823_v31 = vsel %vm7191_vm4, %v10164_v39, %v10156_v11  ;;  %v10829_v3 = vsel %vm7191_vm4, %v10168_v14, %v10160_v49  ;;  %v17651_v18 = vadd.f32 %v1438_v53, %v20212_v8  ;;  %v1821_v54 = vmin.f32 %v17638_v15, 0.0 }
 0x51f   :  { %v17654_v37 = vsel %vm7193_vm5, %v10172_v19, %v10823_v31  ;;  %v17657_v21 = vsel %vm7193_vm5, %v10176_v7, %v10829_v3  ;;  %v3102_v56 = vrot.slane %v3094_v4, %v19814_v51  ;;  %v3109_v32 = vrot.slane %v3095_v60, %v19814_v51  ;;  %v20214_v19 = vld [vmem:[#allocation108_spill] sm:$0xff] }
 0x520   :  { %20213 = vst [vmem:[#allocation20_spill] sm:$0xff] %v17657_v21  ;;  %v1822_v46 = vmin.f32 %v17651_v18, 0.0  ;;  %v1509_v12 = vmul.f32 %v20006_v59, %v1324_v6  ;;  %v1963_v39 = vmul.f32 1.442695, %v1821_v54  ;;  %v1510_v14 = vmul.f32 %v19745_v47, %v1324_v6 }
 0x521   :  { %v3110_v53 = vcombine.high %v3102_v56, %v3102_v56  ;;  %v3111_v45 = vcombine.high %v3109_v32, %v3109_v32  ;;  %v11453_v50 = vrot.slane %v3102_v56, 9  ;;  %v11455_v11 = vrot.slane %v3109_v32, 9 }
 0x522   :  { %v17668_v7 = vadd.f32 %v1509_v12, %v20214_v19  ;;  %11785 = vpow2.f32 %v1963_v39  ;;  %v1965_v8 = vmul.f32 1.442695, %v1822_v46  ;;  %v17671_v0 = vadd.f32 %v1510_v14, %v20215_v23 }
 0x523   :  { %v11454_v4 = vrot.slane %v3110_v53, 9  ;;  %v11456_v60 = vrot.slane %v3111_v45, 9  ;;  %v4824_v31 = vmax.f32 %v3102_v56, %v11453_v50  ;;  %v4826_v3 = vmax.f32 %v3109_v32, %v11455_v11  ;;  %v20217_v11 = vld [vmem:[#allocation146_spill] sm:$0xff] }
 0x524   :  { %v1893_v13 = vmin.f32 %v17668_v7, 0.0  ;;  %11787 = vpow2.f32 %v1965_v8  ;;  %vm1693_vm9 = vcmp.gt.f32.partialorder %v17638_v15, 0.0  ;;  %vm1694_vm10 = vcmp.gt.f32.partialorder %v17651_v18, 0.0 }
 0x525   :  { %v4825_v35 = vmax.f32 %v3110_v53, %v11454_v4  ;;  %v4827_v16 = vmax.f32 %v3111_v45, %v11456_v60  ;;  %v6114_v54 = vrot.slane %v4824_v31, %v19815_v33  ;;  %v6118_v6 = vrot.slane %v4824_v31, %v19816_v28  ;;  %v20216_v53 = vld [vmem:[#allocation104_spill] sm:$0xff] }
 0x526   :  { %v6130_v12 = vrot.slane %v4826_v3, %v19815_v33  ;;  %v6134_v19 = vrot.slane %v4826_v3, %v19816_v28  ;;  %v8090_v49 = vmul.f32 %v4824_v31, %v4824_v31  ;;  %v8092_v56 = vmul.f32 %v4826_v3, %v4826_v3 }
 0x527   :  { %v6122_v32 = vrot.slane %v4825_v35, %v19815_v33  ;;  %v6126_v46 = vrot.slane %v4825_v35, %v19816_v28  ;;  %v6138_v23 = vrot.slane %v4827_v16, %v19815_v33  ;;  %v6142_v50 = vrot.slane %v4827_v16, %v19816_v28 }
 0x528   :  { %v7391_v45 = vsel %vm7197_vm13, %v6114_v54, %v20216_v53  ;;  %v7398_v39 = vsel %vm7197_vm13, %v6118_v6, %v20217_v11  ;;  %v8091_v14 = vmul.f32 %v4825_v35, %v4825_v35  ;;  %v8093_v4 = vmul.f32 %v4827_v16, %v4827_v16 }
 0x529   :  { %v7392_v60 = vsel %vm7199_vm14, %v6122_v32, %v7391_v45  ;;  %v7399_v31 = vsel %vm7199_vm14, %v6126_v46, %v7398_v39  ;;  %v9380_v3 = vrot.slane %v8090_v49, %v19815_v33  ;;  %v9384_v48 = vrot.slane %v8090_v49, %v19816_v28  ;;  %v1332_v46 = vpop.permute.xlu0 %1331  ;;  %v1392_v45 = vpop.permute.xlu1 %1391 }
 0x52a   :  { %v7393_v5 = vsel %vm7201_vm15, %v6130_v12, %v7392_v60  ;;  %v7400_v42 = vsel %vm7201_vm15, %v6134_v19, %v7399_v31  ;;  %v9388_v21 = vrot.slane %v8091_v14, %v19815_v33  ;;  %v9392_v54 = vrot.slane %v8091_v14, %v19816_v28  ;;  %v20218_v19 = vld [vmem:[#allocation93_spill] sm:$0xff] }
 0x52b   :  { %v3558_v35 = vcombine.high %v17532_v52, %v17532_v52  ;;  %v7394_v16 = vsel %vm7203_vm0, %v6138_v23, %v7393_v5  ;;  %v7401_v6 = vsel %vm7203_vm0, %v6142_v50, %v7400_v42  ;;  %v9396_v32 = vrot.slane %v8092_v56, %v19815_v33  ;;  %v20219_v5 = vld [vmem:[#allocation94_spill] sm:$0xff] }
 0x52c   :  { %7722 = vst [vmem:[%s19394_s3 + $0xe0] sm:$0xff] %v7394_v16  ;;  %7723 = vst [vmem:[%s19394_s3 + $0xe8] sm:$0xff] %v7401_v6  ;;  %v9400_v49 = vrot.slane %v8092_v56, %v19816_v28  ;;  %v9404_v12 = vrot.slane %v8093_v4, %v19815_v33  ;;  %v10650_v52 = vsel %vm7197_vm13, %v9380_v3, %v20218_v19  ;;  %v1894_v39 = vmin.f32 %v17671_v0, 0.0 }
 0x52d   :  { %v10657_v42 = vsel %vm7197_vm13, %v9384_v48, %v20219_v5  ;;  %v9408_v23 = vrot.slane %v8093_v4, %v19816_v28  ;;  %v10651_v50 = vsel %vm7199_vm14, %v9388_v21, %v10650_v52  ;;  %v2107_v14 = vmul.f32 1.442695, %v1893_v13 }
 0x52e   :  { %v10658_v53 = vsel %vm7199_vm14, %v9392_v54, %v10657_v42  ;;  %v10652_v11 = vsel %vm7201_vm15, %v9396_v32, %v10651_v50  ;;  %v1513_v4 = vmul.f32 %v20006_v59, %v1332_v46  ;;  %v1514_v21 = vmul.f32 %v19745_v47, %v1332_v46  ;;  %v1388_v42 = vpop.permute.xlu0 %1387 }
 0x52f   :  { %v10659_v56 = vsel %vm7201_vm15, %v9400_v49, %v10658_v53  ;;  %v17718_v60 = vsel %vm7203_vm0, %v9404_v12, %v10652_v11  ;;  %v11553_v31 = vrot.slane %v3558_v35, 9  ;;  %11789 = vpow2.f32 %v2107_v14  ;;  %v11786_v54 = vpop.eup %11785  ;;  %v20230_v14 = vld [vmem:[#allocation96_spill] sm:$0xff] }
 0x530   :  { %v17721_v48 = vsel %vm7203_vm0, %v9408_v23, %v10659_v56  ;;  %v2109_v8 = vmul.f32 1.442695, %v1894_v39  ;;  %v1543_v3 = vmul.f32 %v20006_v59, %v1392_v45  ;;  %v20220_v13 = vrot.slane %v17245_v63, %v19816_v28  ;;  %v20225_v63 = vld [vmem:[#allocation113_spill] sm:$0xff] }
 0x531   :  { %v7807_v6 = vrot.slane %v17629_v22, 1  ;;  %v7817_v32 = vrot.slane %v17646_v24, 1  ;;  %v20221_v49 = vrot.slane %v17632_v17, 2  ;;  %v20223_v19 = vrot.slane %v17635_v30, 2 }
 0x532   :  { %v7558_v16 = vsel %vm7193_vm5, %v20220_v13, %v17613_v40  ;;  %v6898_v5 = vrot.slane %v17588_v2, %v19815_v33  ;;  %11791 = vpow2.f32 %v2109_v8  ;;  %v17746_v40 = vadd.f32 %v1513_v4, %v20225_v63 }
 0x533   :  { %v17736_v12 = vadd.f32 %v20221_v49, %v17632_v17  ;;  %v17741_v52 = vadd.f32 %v20223_v19, %v17635_v30  ;;  %v20226_v46 = vrot.slane %v17255_v25, %v19815_v33  ;;  %v6902_v23 = vrot.slane %v17588_v2, %v19816_v28  ;;  %v20227_v30 = vld [vmem:[#allocation114_spill] sm:$0xff] }
 0x534   :  { %v17758_v50 = vadd.f32 %v1514_v21, %v20227_v30  ;;  %v1544_v53 = vmul.f32 %v19745_v47, %v1392_v45  ;;  %v20228_v11 = vrot.slane %v17255_v25, %v19816_v28  ;;  %v17767_v39 = vmax.f32 %v3558_v35, %v11553_v31  ;;  %v17835_v31 = vpop.permute.xlu0 %841 }
 0x535   :  { %20222 = vst [vmem:[#allocation106_spill] sm:$0xff] %v17736_v12  ;;  %20224 = vst [vmem:[#allocation99_spill] sm:$0xff] %v17741_v52  ;;  %v17753_v17 = vsel %vm7195_vm7, %v20226_v46, %v17604_v20  ;;  %v6890_v20 = vrot.slane %v17579_v41, %v19815_v33  ;;  %v17772_v4 = vadd.f32 %v1543_v3, %v20230_v14  ;;  %v1897_v3 = vmin.f32 %v17746_v40, 0.0 }
 0x536   :  { %v17765_v56 = vsel %vm7195_vm7, %v20228_v11, %v7558_v16  ;;  %20229 = vst [vmem:[#allocation13_spill] sm:$0xff] %v17767_v39  ;;  %v17775_v2 = vadd.f32 %v7807_v6, %v17629_v22  ;;  %v17778_v21 = vadd.f32 %v7817_v32, %v17646_v24  ;;  %v6894_v25 = vrot.slane %v17579_v41, %v19816_v28  ;;  %v20233_v24 = vld [vmem:[#allocation66_spill] sm:$0xff]  ;;  %v1300_v11 = vpop.permute.xlu1 %1299 }
 0x537   :  { %v1541_v45 = vmul.f32 %v20006_v59, %v1388_v42  ;;  %v7564_v8 = vsel %vm7191_vm4, %v6898_v5, %v6890_v20  ;;  %v11226_v22 = vadd.f32 -1.0, %v11786_v54  ;;  %v1898_v16 = vmin.f32 %v17758_v50, 0.0 }
 0x538   :  { %20231 = vst [vmem:[#allocation57_spill] sm:$0xff] %v17775_v2  ;;  %20232 = vst [vmem:[#allocation72_spill] sm:$0xff] %v17778_v21  ;;  %v7570_v13 = vsel %vm7191_vm4, %v6902_v23, %v6894_v25  ;;  %v17790_v6 = vadd.f32 %v1544_v53, %v20233_v24  ;;  %v6906_v41 = vrot.slane %v17582_v57, %v19815_v33  ;;  %v1927_v19 = vmin.f32 %v17772_v4, 0.0  ;;  %v11788_v23 = vpop.eup %11787 }
 0x539   :  { %v6910_v32 = vrot.slane %v17582_v57, %v19816_v28  ;;  %v17798_v49 = vmul.f32 %v17767_v39, %v17767_v39  ;;  %v1542_v63 = vmul.f32 %v19745_v47, %v1388_v42  ;;  %v17807_v46 = vadd.f32 %v1541_v45, %v17424_v1 }
 0x53a   :  { %v17810_v57 = vsel %vm7193_vm5, %v6906_v41, %v7564_v8  ;;  %v2115_v53 = vmul.f32 1.442695, %v1897_v3  ;;  %v11227_v20 = vadd.f32 -1.0, %v11788_v23  ;;  %v2333_v14 = vsel %vm1693_vm9, %v17638_v15, %v11226_v22 }
 0x53b   :  { %20234 = vst [vmem:[#allocation21_spill] sm:$0xff] %v17810_v57  ;;  %v17813_v30 = vsel %vm7193_vm5, %v6910_v32, %v7570_v13  ;;  %v2117_v25 = vmul.f32 1.442695, %v1898_v16  ;;  %v1928_v42 = vmin.f32 %v17790_v6, 0.0  ;;  %vm1765_vm11 = vcmp.gt.f32.partialorder %v17668_v7, 0.0 }
 0x53c   :  { %20235 = vst [vmem:[#allocation130_spill] sm:$0xff] %v17813_v30  ;;  %v2175_v45 = vmul.f32 1.442695, %v1927_v19  ;;  %v11790_v8 = vpop.eup %11789  ;;  %v2334_v13 = vsel %vm1694_vm10, %v17651_v18, %v11227_v20  ;;  %v17824_v3 = vadd.f32 %v1542_v63, %v17428_v61  ;;  %v1925_v24 = vmin.f32 %v17807_v46, 0.0 }
 0x53d   :  { %v1497_v15 = vmul.f32 %v20006_v59, %v1300_v11  ;;  %v2701_v22 = vcombine.low %v2333_v14, %v2334_v13  ;;  %v2702_v16 = vcombine.high %v2333_v14, %v2334_v13  ;;  %v11298_v41 = vadd.f32 -1.0, %v11790_v8  ;;  %v20236_v8 = vld [vmem:[#allocation100_spill] sm:$0xff] }
 0x53e   :  { %11793 = vpow2.f32 %v2115_v53  ;;  %vm1766_vm12 = vcmp.gt.f32.partialorder %v17671_v0, 0.0  ;;  %v2177_v23 = vmul.f32 1.442695, %v1928_v42  ;;  %v1498_v19 = vmul.f32 %v19745_v47, %v1300_v11 }
 0x53f   :  { %v11792_v32 = vpop.eup %11791  ;;  %11795 = vpow2.f32 %v2117_v25  ;;  %v2709_v18 = vrot.slane %v2701_v22, %v19814_v51  ;;  %v2716_v61 = vrot.slane %v2702_v16, %v19814_v51  ;;  %v2405_v20 = vsel %vm1765_vm11, %v17668_v7, %v11298_v41  ;;  %v17844_v16 = vpop.permute.xlu1 %1355  ;;  %v20237_v41 = vld [vmem:[#allocation101_spill] sm:$0xff] }
 0x540   :  { %v11299_v63 = vadd.f32 -1.0, %v11792_v32  ;;  %11797 = vpow2.f32 %v2175_v45  ;;  %v1926_v53 = vmin.f32 %v17824_v3, 0.0  ;;  %v2171_v14 = vmul.f32 1.442695, %v1925_v24 }
 0x541   :  { %v17839_v25 = vadd.f32 %v1497_v15, %v20236_v8  ;;  %v2717_v42 = vcombine.high %v2709_v18, %v2709_v18  ;;  %v11368_v11 = vrot.slane %v2709_v18, 9  ;;  %v11370_v13 = vrot.slane %v2716_v61, 9 }
 0x542   :  { %v2406_v22 = vsel %vm1766_vm12, %v17671_v0, %v11299_v63  ;;  %v17847_v35 = vadd.f32 %v1498_v19, %v20237_v41  ;;  %v17851_v45 = vmul.f32 %v20056_v36, %v17835_v31  ;;  %11799 = vpow2.f32 %v2177_v23 }
 0x543   :  { %v3344_v32 = vcombine.low %v2405_v20, %v2406_v22  ;;  %v3345_v7 = vcombine.high %v2405_v20, %v2406_v22  ;;  %v11369_v24 = vrot.slane %v2717_v42, 9  ;;  %v4739_v15 = vmax.f32 %v2709_v18, %v11368_v11 }
 0x544   :  { %v4741_v8 = vmax.f32 %v2716_v61, %v11370_v13  ;;  %v2173_v0 = vmul.f32 1.442695, %v1926_v53  ;;  %v1525_v63 = vmul.f32 %v20006_v59, %v17844_v16  ;;  %v20238_v53 = vld [vmem:[#allocation61_spill] sm:$0xff]  ;;  %11801 = vpow2.f32 %v2171_v14 }
 0x545   :  { %v3352_v5 = vrot.slane %v3344_v32, %v19814_v51  ;;  %v3359_v54 = vrot.slane %v3345_v7, %v19814_v51  ;;  %v4740_v20 = vmax.f32 %v2717_v42, %v11369_v24  ;;  %v5434_v19 = vrot.slane %v4739_v15, %v19815_v33  ;;  %v20239_v7 = vld [vmem:[#allocation43_spill] sm:$0xff] }
 0x546   :  { %v5438_v22 = vrot.slane %v4739_v15, %v19816_v28  ;;  %v5450_v41 = vrot.slane %v4741_v8, %v19815_v33  ;;  %v5454_v1 = vrot.slane %v4741_v8, %v19816_v28  ;;  %v8005_v18 = vmul.f32 %v4739_v15, %v4739_v15 }
 0x547   :  { %v8007_v61 = vmul.f32 %v4741_v8, %v4741_v8  ;;  %v3360_v23 = vcombine.high %v3352_v5, %v3352_v5  ;;  %v5442_v11 = vrot.slane %v4740_v20, %v19815_v33  ;;  %v5446_v13 = vrot.slane %v4740_v20, %v19816_v28 }
 0x548   :  { %v7243_v32 = vsel %vm7197_vm13, %v5434_v19, %v20238_v53  ;;  %v7249_v42 = vsel %vm7197_vm13, %v5438_v22, %v20239_v7  ;;  %v8006_v24 = vmul.f32 %v4740_v20, %v4740_v20  ;;  %v8700_v52 = vrot.slane %v8005_v18, %v19815_v33 }
 0x549   :  { %v8704_v12 = vrot.slane %v8005_v18, %v19816_v28  ;;  %v8716_v21 = vrot.slane %v8007_v61, %v19815_v33  ;;  %v7244_v15 = vsel %vm7199_vm14, %v5442_v11, %v7243_v32  ;;  %v7250_v8 = vsel %vm7199_vm14, %v5446_v13, %v7249_v42  ;;  %v20240_v11 = vld [vmem:[#allocation64_spill] sm:$0xff]  ;;  %v20241_v13 = vld [vmem:[#allocation129_spill] sm:$0xff] }
 0x54a   :  { %v8720_v2 = vrot.slane %v8007_v61, %v19816_v28  ;;  %v3361_v30 = vcombine.high %v3359_v54, %v3359_v54  ;;  %v7245_v19 = vsel %vm7201_vm15, %v5450_v41, %v7244_v15  ;;  %v7251_v22 = vsel %vm7201_vm15, %v5454_v1, %v7250_v8 }
 0x54b   :  { %v17873_v39 = vpop.eup %11793  ;;  %v8708_v20 = vrot.slane %v8006_v24, %v19815_v33  ;;  %v8712_v53 = vrot.slane %v8006_v24, %v19816_v28  ;;  %7700 = vst [vmem:[%s19394_s3 + $0x30] sm:$0x7f] %v7245_v19  ;;  %7701 = vst [vmem:[%s19394_s3 + $0x38] sm:$0x7f] %v7251_v22  ;;  %v7761_v61 = vsel %vm7760_vm3, %v7245_v19, 0.0  ;;  %v7771_v41 = vsel %vm7760_vm3, %v7251_v22, 0.0 }
 0x54c   :  { %v17879_v18 = vpop.eup %11795  ;;  %v10502_v1 = vsel %vm7197_vm13, %v8700_v52, %v20240_v11  ;;  %v10508_v32 = vsel %vm7197_vm13, %v8704_v12, %v20241_v13  ;;  %v7762_v7 = vadd.f32 %v7761_v61, %v17586_v9  ;;  %v7772_v42 = vadd.f32 %v7771_v41, %v17591_v58 }
 0x54d   :  { %v10503_v24 = vsel %vm7199_vm14, %v8708_v20, %v10502_v1  ;;  %v10509_v15 = vsel %vm7199_vm14, %v8712_v53, %v10508_v32  ;;  %v17897_v8 = vpop.eup %11797  ;;  %v11507_v57 = vrot.slane %v3352_v5, 9  ;;  %v11508_v36 = vrot.slane %v3360_v23, 9  ;;  %v20242_v1 = vld [vmem:[#allocation12_spill] sm:$0xff] }
 0x54e   :  { %v10504_v19 = vsel %vm7201_vm15, %v8716_v21, %v10503_v24  ;;  %v10510_v22 = vsel %vm7201_vm15, %v8720_v2, %v10509_v15  ;;  %v1881_v9 = vmin.f32 %v17839_v25, 0.0  ;;  %v11509_v53 = vrot.slane %v3359_v54, 9 }
 0x54f   :  { %v10955_v52 = vsel %vm7760_vm3, %v10504_v19, 0.0  ;;  %v10965_v12 = vsel %vm7760_vm3, %v10510_v22, 0.0  ;;  %v11510_v61 = vrot.slane %v3361_v30, 9  ;;  %v17906_v41 = vpop.eup %11799  ;;  %v4878_v21 = vmax.f32 %v3352_v5, %v11507_v57 }
 0x550   :  { %v10956_v58 = vadd.f32 %v10955_v52, %v17594_v43  ;;  %v10966_v20 = vadd.f32 %v10965_v12, %v17627_v38  ;;  %v4879_v11 = vmax.f32 %v3360_v23, %v11508_v36  ;;  %v1882_v2 = vmin.f32 %v17847_v35, 0.0  ;;  %v20243_v23 = vld [vmem:[#allocation131_spill] sm:$0xff] }
 0x551   :  { %v17910_v13 = vadd.f32 %v1525_v63, %v20242_v1  ;;  %v7763_v32 = vrot.slane %v7762_v7, 4  ;;  %v7773_v24 = vrot.slane %v7772_v42, 4  ;;  %11803 = vpow2.f32 %v2173_v0  ;;  %v20246_v1 = vld [vmem:[#allocation81_spill] sm:$0xff] }
 0x552   :  { %v4880_v43 = vmax.f32 %v3359_v54, %v11509_v53  ;;  %v6546_v38 = vrot.slane %v4878_v21, %v19815_v33  ;;  %v6550_v15 = vrot.slane %v4878_v21, %v19816_v28  ;;  %v2083_v19 = vmul.f32 1.442695, %v1881_v9 }
 0x553   :  { %v4881_v22 = vmax.f32 %v3361_v30, %v11510_v61  ;;  %v6554_v36 = vrot.slane %v4879_v11, %v19815_v33  ;;  %v6558_v5 = vrot.slane %v4879_v11, %v19816_v28  ;;  %v17920_v57 = vmul.f32 %v20181_v26, %v17835_v31  ;;  %v20247_v26 = vld [vmem:[#allocation26_spill] sm:$0xff] }
 0x554   :  { %v17922_v63 = vmul.f32 1.442695, %v1882_v2  ;;  %v17926_v0 = vadd.f32 %v17851_v45, %v20243_v23  ;;  %v1526_v54 = vmul.f32 %v19745_v47, %v17844_v16  ;;  %v1909_v52 = vmin.f32 %v17910_v13, 0.0  ;;  %v20245_v2 = vld [vmem:[#allocation90_spill] sm:$0xff] }
 0x555   :  { %v17931_v30 = vadd.f32 %v7763_v32, %v7762_v7  ;;  %v17933_v12 = vadd.f32 %v7773_v24, %v7772_v42  ;;  %v10957_v9 = vrot.slane %v10956_v58, 4  ;;  %v10967_v53 = vrot.slane %v10966_v20, 4 }
 0x556   :  { %20244 = vst [vmem:[#allocation38_spill] sm:$0xff] %v17926_v0  ;;  %vm1769_vm1 = vcmp.gt.f32.partialorder %v17746_v40, 0.0  ;;  %v6562_v31 = vrot.slane %v4880_v43, %v19815_v33  ;;  %v6566_v61 = vrot.slane %v4880_v43, %v19816_v28  ;;  %v7485_v45 = vsel %vm7197_vm13, %v6546_v38, %v20245_v2 }
 0x557   :  { %v7492_v16 = vsel %vm7197_vm13, %v6550_v15, %v20246_v1  ;;  %v6570_v23 = vrot.slane %v4881_v22, %v19815_v33  ;;  %v6574_v7 = vrot.slane %v4881_v22, %v19816_v28  ;;  %v7486_v42 = vsel %vm7199_vm14, %v6554_v36, %v7485_v45 }
 0x558   :  { %v7493_v32 = vsel %vm7199_vm14, %v6558_v5, %v7492_v16  ;;  %vm1770_vm2 = vcmp.gt.f32.partialorder %v17758_v50, 0.0  ;;  %v7487_v24 = vsel %vm7201_vm15, %v6562_v31, %v7486_v42  ;;  %11805 = vpow2.f32 %v2083_v19 }
 0x559   :  { %v7494_v14 = vsel %vm7201_vm15, %v6566_v61, %v7493_v32  ;;  %v17950_v38 = vadd.f32 %v1526_v54, %v20247_v26  ;;  %v17953_v15 = vsel %vm7203_vm0, %v6570_v23, %v7487_v24  ;;  %v11302_v36 = vadd.f32 -1.0, %v17873_v39 }
 0x55a   :  { %v17956_v2 = vsel %vm7203_vm0, %v6574_v7, %v7494_v14  ;;  %vm1799_vm6 = vcmp.gt.f32.partialorder %v17772_v4, 0.0  ;;  %vm1800_vm8 = vcmp.gt.f32.partialorder %v17790_v6, 0.0  ;;  %v2139_v5 = vmul.f32 1.442695, %v1909_v52  ;;  %7736 = vst [vmem:[%s19394_s3 + $0x150] sm:$0xff] %v17953_v15  ;;  %v11802_v14 = vpop.eup %11801 }
 0x55b   :  { %v7765_v31 = vrot.slane %v17931_v30, 2  ;;  %v7775_v19 = vrot.slane %v17933_v12, 2  ;;  %7737 = vst [vmem:[%s19394_s3 + $0x158] sm:$0xff] %v17956_v2  ;;  %v8144_v26 = vmul.f32 %v4878_v21, %v4878_v21  ;;  %v8145_v39 = vmul.f32 %v4879_v11, %v4879_v11  ;;  %v20248_v11 = vld [vmem:[#allocation74_spill] sm:$0xff] }
 0x55c   :  { %v10958_v54 = vadd.f32 %v10957_v9, %v10956_v58  ;;  %v17971_v61 = vadd.f32 %v10967_v53, %v10966_v20  ;;  %v8146_v52 = vmul.f32 %v4880_v43, %v4880_v43  ;;  %v8147_v45 = vmul.f32 %v4881_v22, %v4881_v22  ;;  %v20249_v22 = vld [vmem:[#allocation24_spill] sm:$0xff] }
 0x55d   :  { %v9812_v1 = vrot.slane %v8144_v26, %v19815_v33  ;;  %v9816_v16 = vrot.slane %v8144_v26, %v19816_v28  ;;  %v9820_v23 = vrot.slane %v8145_v39, %v19815_v33  ;;  %v9824_v7 = vrot.slane %v8145_v39, %v19816_v28 }
 0x55e   :  { %v9828_v42 = vrot.slane %v8146_v52, %v19815_v33  ;;  %v9832_v32 = vrot.slane %v8146_v52, %v19816_v28  ;;  %v9836_v21 = vrot.slane %v8147_v45, %v19815_v33  ;;  %v9840_v58 = vrot.slane %v8147_v45, %v19816_v28  ;;  %v11804_v20 = vpop.eup %11803 }
 0x55f   :  { %v10744_v43 = vsel %vm7197_vm13, %v9812_v1, %v20248_v11  ;;  %v10751_v9 = vsel %vm7197_vm13, %v9816_v16, %v20249_v22  ;;  %v11303_v53 = vadd.f32 -1.0, %v17879_v18  ;;  %v2409_v24 = vsel %vm1769_vm1, %v17746_v40, %v11302_v36 }
 0x560   :  { %v10745_v26 = vsel %vm7199_vm14, %v9820_v23, %v10744_v43  ;;  %v10752_v39 = vsel %vm7199_vm14, %v9824_v7, %v10751_v9  ;;  %v11332_v52 = vadd.f32 -1.0, %v17897_v8  ;;  %v11333_v45 = vadd.f32 -1.0, %v17906_v41 }
 0x561   :  { %v10959_v0 = vrot.slane %v10958_v54, 2  ;;  %v10746_v1 = vsel %vm7201_vm15, %v9828_v42, %v10745_v26  ;;  %v10753_v11 = vsel %vm7201_vm15, %v9832_v32, %v10752_v39  ;;  %v2410_v18 = vsel %vm1770_vm2, %v17758_v50, %v11303_v53 }
 0x562   :  { %v10747_v16 = vsel %vm7203_vm0, %v9836_v21, %v10746_v1  ;;  %v10754_v40 = vsel %vm7203_vm0, %v9840_v58, %v10753_v11  ;;  %v3380_v36 = vcombine.low %v2409_v24, %v2410_v18  ;;  %v3381_v23 = vcombine.high %v2409_v24, %v2410_v18 }
 0x563   :  { %v18001_v7 = vadd.f32 %v10747_v16, %v17043_v62  ;;  %v18004_v8 = vadd.f32 %v10754_v40, %v17046_v27  ;;  %v2439_v41 = vsel %vm1799_vm6, %v17772_v4, %v11332_v52  ;;  %v2440_v50 = vsel %vm1800_vm8, %v17790_v6, %v11333_v45 }
 0x564   :  { %v3388_v42 = vrot.slane %v3380_v36, %v19814_v51  ;;  %v3395_v32 = vrot.slane %v3381_v23, %v19814_v51  ;;  %v3648_v21 = vcombine.low %v2439_v41, %v2440_v50  ;;  %11807 = vpow2.f32 %v17922_v63 }
 0x565   :  { %v18016_v62 = vadd.f32 %v7765_v31, %v17931_v30  ;;  %v3649_v27 = vcombine.high %v2439_v41, %v2440_v50  ;;  %v1910_v58 = vmin.f32 %v17950_v38, 0.0  ;;  %11809 = vpow2.f32 %v2139_v5  ;;  %v18019_v43 = vpop.eup %11805 }
 0x566   :  { %v3396_v4 = vcombine.high %v3388_v42, %v3388_v42  ;;  %v3397_v22 = vcombine.high %v3395_v32, %v3395_v32  ;;  %v11515_v9 = vrot.slane %v3388_v42, 9  ;;  %v11517_v6 = vrot.slane %v3395_v32, 9 }
 0x567   :  { %v18022_v53 = vadd.f32 %v7775_v19, %v17933_v12  ;;  %v18024_v24 = vadd.f32 %v10959_v0, %v10958_v54  ;;  %v10969_v63 = vrot.slane %v17971_v61, 2  ;;  %v18028_v30 = vrot.slane %v3648_v21, %v19814_v51 }
 0x568   :  { %v11516_v31 = vrot.slane %v3396_v4, 9  ;;  %v11518_v26 = vrot.slane %v3397_v22, 9  ;;  %v4886_v39 = vmax.f32 %v3388_v42, %v11515_v9  ;;  %v4888_v5 = vmax.f32 %v3395_v32, %v11517_v6 }
 0x569   :  { %v18031_v52 = vrot.slane %v3649_v27, %v19814_v51  ;;  %v18035_v45 = vcombine.high %v18028_v30, %v18028_v30  ;;  %v11330_v12 = vadd.f32 -1.0, %v11802_v14  ;;  %v11331_v19 = vadd.f32 -1.0, %v11804_v20 }
 0x56a   :  { %v4887_v0 = vmax.f32 %v3396_v4, %v11516_v31  ;;  %v4889_v54 = vmax.f32 %v3397_v22, %v11518_v26  ;;  %v6610_v1 = vrot.slane %v4886_v39, %v19815_v33  ;;  %v6614_v11 = vrot.slane %v4886_v39, %v19816_v28 }
 0x56b   :  { %v6626_v18 = vrot.slane %v4888_v5, %v19815_v33  ;;  %v6630_v16 = vrot.slane %v4888_v5, %v19816_v28  ;;  %v8152_v40 = vmul.f32 %v4886_v39, %v4886_v39  ;;  %v8154_v36 = vmul.f32 %v4888_v5, %v4888_v5 }
 0x56c   :  { %v6618_v23 = vrot.slane %v4887_v0, %v19815_v33  ;;  %v6622_v41 = vrot.slane %v4887_v0, %v19816_v28  ;;  %v6634_v50 = vrot.slane %v4889_v54, %v19815_v33  ;;  %v6638_v14 = vrot.slane %v4889_v54, %v19816_v28 }
 0x56d   :  { %vm1797_vm9 = vcmp.gt.f32.partialorder %v17807_v46, 0.0  ;;  %vm1798_vm10 = vcmp.gt.f32.partialorder %v17824_v3, 0.0  ;;  %v7499_v20 = vsel %vm7197_vm13, %v6610_v1, %v16921_v44  ;;  %v7506_v42 = vsel %vm7197_vm13, %v6614_v11, %v16927_v55 }
 0x56e   :  { %v8153_v32 = vmul.f32 %v4887_v0, %v4887_v0  ;;  %v8155_v21 = vmul.f32 %v4889_v54, %v4889_v54  ;;  %v7500_v27 = vsel %vm7199_vm14, %v6618_v23, %v7499_v20  ;;  %v7507_v4 = vsel %vm7199_vm14, %v6622_v41, %v7506_v42 }
 0x56f   :  { %v9876_v22 = vrot.slane %v8152_v40, %v19815_v33  ;;  %v9880_v9 = vrot.slane %v8152_v40, %v19816_v28  ;;  %v7501_v6 = vsel %vm7201_vm15, %v6626_v18, %v7500_v27  ;;  %v7508_v31 = vsel %vm7201_vm15, %v6630_v16, %v7507_v4  ;;  %v20250_v16 = vld [vmem:[#allocation33_spill] sm:$0xff] }
 0x570   :  { %v9884_v26 = vrot.slane %v8153_v32, %v19815_v33  ;;  %v9888_v44 = vrot.slane %v8153_v32, %v19816_v28  ;;  %v18060_v55 = vsel %vm7203_vm0, %v6634_v50, %v7501_v6  ;;  %v18063_v39 = vsel %vm7203_vm0, %v6638_v14, %v7508_v31 }
 0x571   :  { %v3665_v5 = vcombine.high %v18031_v52, %v18031_v52  ;;  %v11573_v0 = vrot.slane %v18028_v30, 9  ;;  %v11808_v54 = vpop.eup %11807  ;;  %7738 = vst [vmem:[%s19394_s3 + $0x160] sm:$0xff] %v18060_v55  ;;  %7739 = vst [vmem:[%s19394_s3 + $0x168] sm:$0xff] %v18063_v39  ;;  %v9892_v1 = vrot.slane %v8154_v36, %v19815_v33  ;;  %v9896_v11 = vrot.slane %v8154_v36, %v19816_v28 }
 0x572   :  { %v10758_v18 = vsel %vm7197_vm13, %v9876_v22, %v16725_v29  ;;  %v10765_v40 = vsel %vm7197_vm13, %v9880_v9, %v20250_v16  ;;  %vm1753_vm11 = vcmp.gt.f32.partialorder %v17839_v25, 0.0  ;;  %v18083_v23 = vpop.eup %11809  ;;  %v9900_v41 = vrot.slane %v8155_v21, %v19815_v33  ;;  %v1364_v9 = vpop.permute.xlu0 %1363  ;;  %v20252_v16 = vld [vmem:[#allocation132_spill] sm:$0xff] }
 0x573   :  { %v9904_v50 = vrot.slane %v8155_v21, %v19816_v28  ;;  %v10759_v14 = vsel %vm7199_vm14, %v9884_v26, %v10758_v18  ;;  %v10766_v20 = vsel %vm7199_vm14, %v9888_v44, %v10765_v40  ;;  %v11574_v29 = vrot.slane %v18035_v45, 9 }
 0x574   :  { %v10760_v36 = vsel %vm7201_vm15, %v9892_v1, %v10759_v14  ;;  %v10767_v42 = vsel %vm7201_vm15, %v9896_v11, %v10766_v20  ;;  %v11575_v32 = vrot.slane %v18031_v52, 9  ;;  %v7767_v27 = vrot.slane %v18016_v62, 1 }
 0x575   :  { %v18095_v4 = vsel %vm7203_vm0, %v9900_v41, %v10760_v36  ;;  %v18098_v22 = vsel %vm7203_vm0, %v9904_v50, %v10767_v42  ;;  %v11576_v21 = vrot.slane %v3665_v5, 9  ;;  %vm1754_vm12 = vcmp.gt.f32.partialorder %v17847_v35, 0.0 }
 0x576   :  { %v7777_v6 = vrot.slane %v18022_v53, 1  ;;  %v18105_v31 = vadd.f32 %v10969_v63, %v17971_v61  ;;  %v2437_v26 = vsel %vm1797_vm9, %v17807_v46, %v11330_v12  ;;  %v2438_v44 = vsel %vm1798_vm10, %v17824_v3, %v11331_v19 }
 0x577   :  { %v10961_v1 = vrot.slane %v18024_v24, 1  ;;  %v18115_v11 = vmax.f32 %v18028_v30, %v11573_v0  ;;  %v11286_v18 = vadd.f32 -1.0, %v18019_v43  ;;  %v18120_v40 = vadd.f32 %v17920_v57, %v20252_v16 }
 0x578   :  { %20251 = vst [vmem:[#allocation150_spill] sm:$0xff] %v18105_v31  ;;  %v18123_v61 = vmax.f32 %v18035_v45, %v11574_v29  ;;  %v18126_v46 = vmax.f32 %v18031_v52, %v11575_v32  ;;  %v2141_v3 = vmul.f32 1.442695, %v1910_v58  ;;  %v18131_v63 = vmul.f32 %v20006_v59, %v1364_v9  ;;  %v11861_v52 = vld [vmem:[%s19394_s3 + $0x140] sm:$0xff] }
 0x579   :  { %v18134_v30 = vadd.f32 %v7767_v27, %v18016_v62  ;;  %v18136_v43 = vmax.f32 %v3665_v5, %v11576_v21  ;;  %v3630_v12 = vcombine.low %v2437_v26, %v2438_v44  ;;  %v3631_v57 = vcombine.high %v2437_v26, %v2438_v44 }
 0x57a   :  { %v18139_v19 = vadd.f32 %v7777_v6, %v18022_v53  ;;  %v18146_v58 = vadd.f32 %v11861_v52, %v17953_v15  ;;  %v11287_v0 = vadd.f32 -1.0, %v11808_v54  ;;  %vm1781_vm1 = vcmp.gt.f32.partialorder %v17910_v13, 0.0  ;;  %v11862_v53 = vld [vmem:[%s19394_s3 + $0x148] sm:$0xff] }
 0x57b   :  { %20253 = vst [vmem:[#allocation52_spill] sm:$0xff] %v18134_v30  ;;  %v18150_v62 = vadd.f32 %v10961_v1, %v18024_v24  ;;  %v18156_v5 = vadd.f32 %v11862_v53, %v17956_v2  ;;  %v7074_v41 = vrot.slane %v18115_v11, %v19815_v33  ;;  %v2393_v15 = vsel %vm1753_vm11, %v17839_v25, %v11286_v18 }
 0x57c   :  { %20254 = vst [vmem:[#allocation124_spill] sm:$0xff] %v18139_v19  ;;  %v7082_v24 = vrot.slane %v18123_v61, %v19815_v33  ;;  %v3638_v25 = vrot.slane %v3630_v12, %v19814_v51  ;;  %v3645_v36 = vrot.slane %v3631_v57, %v19814_v51  ;;  %v18181_v29 = vmul.f32 %v18115_v11, %v18115_v11 }
 0x57d   :  { %20255 = vst [vmem:[#allocation79_spill] sm:$0xff] %v18150_v62  ;;  %v18185_v32 = vmul.f32 %v18123_v61, %v18123_v61  ;;  %v2394_v27 = vsel %vm1754_vm12, %v17847_v35, %v11287_v0  ;;  %v18192_v21 = vmul.f32 %v18126_v46, %v18126_v46  ;;  %11811 = vpow2.f32 %v2141_v3 }
 0x57e   :  { %v3646_v6 = vcombine.high %v3638_v25, %v3638_v25  ;;  %v3647_v26 = vcombine.high %v3645_v36, %v3645_v36  ;;  %v11569_v44 = vrot.slane %v3638_v25, 9  ;;  %v11571_v1 = vrot.slane %v3645_v36, 9 }
 0x57f   :  { %v3237_v18 = vcombine.low %v2393_v15, %v2394_v27  ;;  %v3238_v16 = vcombine.high %v2393_v15, %v2394_v27  ;;  %v18195_v12 = vsel %vm7191_vm4, %v7082_v24, %v7074_v41  ;;  %v11314_v53 = vadd.f32 -1.0, %v18083_v23 }
 0x580   :  { %v11570_v57 = vrot.slane %v3646_v6, 9  ;;  %v11572_v52 = vrot.slane %v3647_v26, 9  ;;  %v4940_v45 = vmax.f32 %v3638_v25, %v11569_v44  ;;  %v4942_v35 = vmax.f32 %v3645_v36, %v11571_v1 }
 0x581   :  { %v3245_v0 = vrot.slane %v3237_v18, %v19814_v51  ;;  %v18200_v42 = vmul.f32 %v19745_v47, %v1364_v9  ;;  %v3252_v2 = vrot.slane %v3238_v16, %v19814_v51  ;;  %v18206_v41 = vsel %vm1781_vm1, %v17910_v13, %v11314_v53 }
 0x582   :  { %v4941_v20 = vmax.f32 %v3646_v6, %v11570_v57  ;;  %v4943_v3 = vmax.f32 %v3647_v26, %v11572_v52  ;;  %v7042_v15 = vrot.slane %v4940_v45, %v19815_v33  ;;  %v7046_v23 = vrot.slane %v4940_v45, %v19816_v28 }
 0x583   :  { %v7058_v24 = vrot.slane %v4942_v35, %v19815_v33  ;;  %v7062_v25 = vrot.slane %v4942_v35, %v19816_v28  ;;  %v8206_v44 = vmul.f32 %v4940_v45, %v4940_v45  ;;  %v8208_v57 = vmul.f32 %v4942_v35, %v4942_v35 }
 0x584   :  { %v7050_v9 = vrot.slane %v4941_v20, %v19815_v33  ;;  %v7054_v36 = vrot.slane %v4941_v20, %v19816_v28  ;;  %v7066_v27 = vrot.slane %v4943_v3, %v19815_v33  ;;  %v7070_v6 = vrot.slane %v4943_v3, %v19816_v28 }
 0x585   :  { %v7593_v13 = vsel %vm7197_vm13, %v7042_v15, %v17316_v10  ;;  %v7600_v26 = vsel %vm7197_vm13, %v7046_v23, %v17322_v34  ;;  %v8207_v1 = vmul.f32 %v4941_v20, %v4941_v20  ;;  %v8209_v52 = vmul.f32 %v4943_v3, %v4943_v3  ;;  %v20256_v23 = vld [vmem:[#allocation37_spill] sm:$0xff] }
 0x586   :  { %v7594_v18 = vsel %vm7199_vm14, %v7050_v9, %v7593_v13  ;;  %v7601_v16 = vsel %vm7199_vm14, %v7054_v36, %v7600_v26  ;;  %v10308_v14 = vrot.slane %v8206_v44, %v19815_v33  ;;  %v10312_v54 = vrot.slane %v8206_v44, %v19816_v28 }
 0x587   :  { %v7595_v53 = vsel %vm7201_vm15, %v7058_v24, %v7594_v18  ;;  %v7602_v50 = vsel %vm7201_vm15, %v7062_v25, %v7601_v16  ;;  %v10316_v45 = vrot.slane %v8207_v1, %v19815_v33  ;;  %v10320_v20 = vrot.slane %v8207_v1, %v19816_v28  ;;  %v20257_v25 = vld [vmem:[#allocation120_spill] sm:$0xff] }
 0x588   :  { %v7596_v10 = vsel %vm7203_vm0, %v7066_v27, %v7595_v53  ;;  %v7603_v34 = vsel %vm7203_vm0, %v7070_v6, %v7602_v50  ;;  %v10324_v35 = vrot.slane %v8208_v57, %v19815_v33  ;;  %v10328_v3 = vrot.slane %v8208_v57, %v19816_v28 }
 0x589   :  { %7752 = vst [vmem:[%s19394_s3 + $0x1d0] sm:$0xff] %v7596_v10  ;;  %7753 = vst [vmem:[%s19394_s3 + $0x1d8] sm:$0xff] %v7603_v34  ;;  %v10332_v15 = vrot.slane %v8209_v52, %v19815_v33  ;;  %v10336_v50 = vrot.slane %v8209_v52, %v19816_v28  ;;  %v10852_v24 = vsel %vm7197_vm13, %v10308_v14, %v20256_v23  ;;  %v11484_v44 = vrot.slane %v3245_v0, 9  ;;  %v20258_v23 = vld [vmem:[#allocation27_spill] sm:$0xff] }
 0x58a   :  { %v10859_v9 = vsel %vm7197_vm13, %v10312_v54, %v20257_v25  ;;  %v3253_v36 = vcombine.high %v3245_v0, %v3245_v0  ;;  %v3254_v27 = vcombine.high %v3252_v2, %v3252_v2  ;;  %v11812_v6 = vpop.eup %11811  ;;  %v10853_v13 = vsel %vm7199_vm14, %v10316_v45, %v10852_v24 }
 0x58b   :  { %v10860_v26 = vsel %vm7199_vm14, %v10320_v20, %v10859_v9  ;;  %v11486_v1 = vrot.slane %v3252_v2, 9  ;;  %v10854_v18 = vsel %vm7201_vm15, %v10324_v35, %v10853_v13  ;;  %v4855_v53 = vmax.f32 %v3245_v0, %v11484_v44 }
 0x58c   :  { %v10861_v16 = vsel %vm7201_vm15, %v10328_v3, %v10860_v26  ;;  %v11485_v57 = vrot.slane %v3253_v36, 9  ;;  %v11487_v52 = vrot.slane %v3254_v27, 9  ;;  %v18249_v14 = vsel %vm7203_vm0, %v10332_v15, %v10854_v18 }
 0x58d   :  { %v18252_v54 = vsel %vm7203_vm0, %v10336_v50, %v10861_v16  ;;  %v4857_v10 = vmax.f32 %v3252_v2, %v11486_v1  ;;  %vm1782_vm2 = vcmp.gt.f32.partialorder %v17950_v38, 0.0  ;;  %v11315_v20 = vadd.f32 -1.0, %v11812_v6 }
 0x58e   :  { %v4856_v34 = vmax.f32 %v3253_v36, %v11485_v57  ;;  %v4858_v45 = vmax.f32 %v3254_v27, %v11487_v52  ;;  %v18257_v35 = vadd.f32 %v18131_v63, %v20258_v23  ;;  %v6362_v3 = vrot.slane %v4855_v53, %v19815_v33  ;;  %v20259_v36 = vld [vmem:[#allocation112_spill] sm:$0xff]  ;;  %v20260_v27 = vld [vmem:[#allocation34_spill] sm:$0xff] }
 0x58f   :  { %v6366_v24 = vrot.slane %v4855_v53, %v19816_v28  ;;  %v6378_v15 = vrot.slane %v4857_v10, %v19815_v33  ;;  %v6382_v50 = vrot.slane %v4857_v10, %v19816_v28  ;;  %v8121_v13 = vmul.f32 %v4855_v53, %v4855_v53 }
 0x590   :  { %v6370_v0 = vrot.slane %v4856_v34, %v19815_v33  ;;  %v6374_v2 = vrot.slane %v4856_v34, %v19816_v28  ;;  %v6386_v25 = vrot.slane %v4858_v45, %v19815_v33  ;;  %v6390_v9 = vrot.slane %v4858_v45, %v19816_v28 }
 0x591   :  { %v7445_v63 = vsel %vm7197_vm13, %v6362_v3, %v20259_v36  ;;  %v7452_v6 = vsel %vm7197_vm13, %v6366_v24, %v20260_v27  ;;  %v8122_v26 = vmul.f32 %v4856_v34, %v4856_v34  ;;  %v8123_v18 = vmul.f32 %v4857_v10, %v4857_v10  ;;  %v20263_v36 = vld [vmem:[#allocation148_spill] sm:$0xff] }
 0x592   :  { %v7446_v44 = vsel %vm7199_vm14, %v6370_v0, %v7445_v63  ;;  %v7453_v1 = vsel %vm7199_vm14, %v6374_v2, %v7452_v6  ;;  %v8124_v16 = vmul.f32 %v4858_v45, %v4858_v45  ;;  %v9628_v23 = vrot.slane %v8121_v13, %v19815_v33 }
 0x593   :  { %v7447_v57 = vsel %vm7201_vm15, %v6378_v15, %v7446_v44  ;;  %v7454_v52 = vsel %vm7201_vm15, %v6382_v50, %v7453_v1  ;;  %v9632_v62 = vrot.slane %v8121_v13, %v19816_v28  ;;  %v9636_v34 = vrot.slane %v8122_v26, %v19815_v33  ;;  %v20261_v50 = vld [vmem:[#allocation116_spill] sm:$0xff] }
 0x594   :  { %v18278_v3 = vsel %vm7203_vm0, %v6386_v25, %v7447_v57  ;;  %v18281_v53 = vsel %vm7203_vm0, %v6390_v9, %v7454_v52  ;;  %v9640_v24 = vrot.slane %v8122_v26, %v19816_v28  ;;  %v9644_v10 = vrot.slane %v8123_v18, %v19815_v33  ;;  %v20262_v25 = vld [vmem:[#allocation147_spill] sm:$0xff] }
 0x595   :  { %7730 = vst [vmem:[%s19394_s3 + $0x120] sm:$0xff] %v18278_v3  ;;  %7731 = vst [vmem:[%s19394_s3 + $0x128] sm:$0xff] %v18281_v53  ;;  %v9648_v45 = vrot.slane %v8123_v18, %v19816_v28  ;;  %v9652_v15 = vrot.slane %v8124_v16, %v19815_v33  ;;  %v18298_v0 = vadd.f32 %v18200_v42, %v20261_v50  ;;  %vm1785_vm6 = vcmp.gt.f32.partialorder %v18257_v35, 0.0 }
 0x596   :  { %v9656_v2 = vrot.slane %v8124_v16, %v19816_v28  ;;  %v10704_v9 = vsel %vm7197_vm13, %v9628_v23, %v20262_v25  ;;  %v10711_v63 = vsel %vm7197_vm13, %v9632_v62, %v20263_v36  ;;  %v2422_v27 = vsel %vm1782_vm2, %v17950_v38, %v11315_v20 }
 0x597   :  { %v10705_v6 = vsel %vm7199_vm14, %v9636_v34, %v10704_v9  ;;  %v10712_v13 = vsel %vm7199_vm14, %v9640_v24, %v10711_v63  ;;  %v3487_v26 = vcombine.low %v18206_v41, %v2422_v27  ;;  %v3488_v42 = vcombine.high %v18206_v41, %v2422_v27 }
 0x598   :  { %v20264_v44 = vrot.slane %v18115_v11, %v19816_v28  ;;  %v20265_v1 = vrot.slane %v18123_v61, %v19816_v28  ;;  %v10706_v18 = vsel %vm7201_vm15, %v9644_v10, %v10705_v6  ;;  %v10713_v38 = vsel %vm7201_vm15, %v9648_v45, %v10712_v13 }
 0x599   :  { %v1913_v20 = vmin.f32 %v18257_v35, 0.0  ;;  %v18323_v16 = vsel %vm7203_vm0, %v9652_v15, %v10706_v18  ;;  %v18326_v57 = vsel %vm7203_vm0, %v9656_v2, %v10713_v38  ;;  %v3495_v41 = vrot.slane %v3487_v26, %v19814_v51  ;;  %v18364_v18 = vpop.permute.xlu1 %865 }
 0x59a   :  { %v7611_v62 = vsel %vm7191_vm4, %v20265_v1, %v20264_v44  ;;  %v3502_v11 = vrot.slane %v3488_v42, %v19814_v51  ;;  %v20266_v61 = vrot.slane %v18126_v46, %v19815_v33  ;;  %v18339_v23 = vmul.f32 %v18136_v43, %v18136_v43 }
 0x59b   :  { %v1914_v34 = vmin.f32 %v18298_v0, 0.0  ;;  %v2147_v24 = vmul.f32 1.442695, %v1913_v20  ;;  %v3503_v10 = vcombine.high %v3495_v41, %v3495_v41  ;;  %v11538_v15 = vrot.slane %v3495_v41, 9 }
 0x59c   :  { %v18335_v52 = vsel %vm7193_vm5, %v20266_v61, %v18195_v12  ;;  %v3504_v45 = vcombine.high %v3502_v11, %v3502_v11  ;;  %v11540_v50 = vrot.slane %v3502_v11, 9  ;;  %v20267_v2 = vrot.slane %v18126_v46, %v19816_v28  ;;  %v20269_v61 = vld [vmem:[#allocation55_spill] sm:$0xff] }
 0x59d   :  { %v10340_v12 = vrot.slane %v18181_v29, %v19815_v33  ;;  %11813 = vpow2.f32 %v2147_v24  ;;  %v2149_v9 = vmul.f32 1.442695, %v1914_v34  ;;  %v11539_v36 = vrot.slane %v3503_v10, 9 }
 0x59e   :  { %v18346_v25 = vsel %vm7193_vm5, %v20267_v2, %v7611_v62  ;;  %v11541_v63 = vrot.slane %v3504_v45, 9  ;;  %v4909_v27 = vmax.f32 %v3495_v41, %v11538_v15  ;;  %v4911_v6 = vmax.f32 %v3502_v11, %v11540_v50  ;;  %v20268_v41 = vld [vmem:[#allocation18_spill] sm:$0xff] }
 0x59f   :  { %11815 = vpow2.f32 %v2149_v9  ;;  %v18352_v13 = vadd.f32 %v18146_v58, %v18060_v55  ;;  %v18356_v46 = vadd.f32 %v18156_v5, %v18063_v39  ;;  %v18360_v26 = vadd.f32 %v18001_v7, %v18095_v4 }
 0x5a0   :  { %v4910_v42 = vmax.f32 %v3503_v10, %v11539_v36  ;;  %v4912_v44 = vmax.f32 %v3504_v45, %v11541_v63  ;;  %v6794_v1 = vrot.slane %v4909_v27, %v19815_v33  ;;  %v6798_v62 = vrot.slane %v4909_v27, %v19816_v28 }
 0x5a1   :  { %v6810_v38 = vrot.slane %v4911_v6, %v19815_v33  ;;  %v6814_v55 = vrot.slane %v4911_v6, %v19816_v28  ;;  %v8175_v58 = vmul.f32 %v4909_v27, %v4909_v27  ;;  %v8177_v20 = vmul.f32 %v4911_v6, %v4911_v6  ;;  %v1340_v6 = vpop.permute.xlu0 %1339 }
 0x5a2   :  { %v6802_v39 = vrot.slane %v4910_v42, %v19815_v33  ;;  %v6806_v5 = vrot.slane %v4910_v42, %v19816_v28  ;;  %v6818_v7 = vrot.slane %v4912_v44, %v19815_v33  ;;  %v6822_v4 = vrot.slane %v4912_v44, %v19816_v28 }
 0x5a3   :  { %v7539_v11 = vsel %vm7197_vm13, %v6794_v1, %v20268_v41  ;;  %v7546_v34 = vsel %vm7197_vm13, %v6798_v62, %v20269_v61  ;;  %v8176_v24 = vmul.f32 %v4910_v42, %v4910_v42  ;;  %v8178_v10 = vmul.f32 %v4912_v44, %v4912_v44 }
 0x5a4   :  { %v7540_v45 = vsel %vm7199_vm14, %v6802_v39, %v7539_v11  ;;  %v7547_v15 = vsel %vm7199_vm14, %v6806_v5, %v7546_v34  ;;  %v10060_v50 = vrot.slane %v8175_v58, %v19815_v33  ;;  %v10064_v2 = vrot.slane %v8175_v58, %v19816_v28  ;;  %v1276_v58 = vpop.permute.xlu1 %1275  ;;  %v20270_v39 = vld [vmem:[#allocation51_spill] sm:$0xff] }
 0x5a5   :  { %v7541_v9 = vsel %vm7201_vm15, %v6810_v38, %v7540_v45  ;;  %v7548_v36 = vsel %vm7201_vm15, %v6814_v55, %v7547_v15  ;;  %v10068_v63 = vrot.slane %v8176_v24, %v19815_v33  ;;  %v10072_v27 = vrot.slane %v8176_v24, %v19816_v28 }
 0x5a6   :  { %v18385_v42 = vsel %vm7203_vm0, %v6818_v7, %v7541_v9  ;;  %v18388_v44 = vsel %vm7203_vm0, %v6822_v4, %v7548_v36  ;;  %v10076_v1 = vrot.slane %v8177_v20, %v19815_v33  ;;  %v10080_v62 = vrot.slane %v8177_v20, %v19816_v28  ;;  %v20271_v7 = vld [vmem:[#allocation149_spill] sm:$0xff]  ;;  %v20272_v9 = vld [vmem:[#allocation115_spill] sm:$0xff] }
 0x5a7   :  { %7744 = vst [vmem:[%s19394_s3 + $0x190] sm:$0xff] %v18385_v42  ;;  %7745 = vst [vmem:[%s19394_s3 + $0x198] sm:$0xff] %v18388_v44  ;;  %v10084_v38 = vrot.slane %v8178_v10, %v19815_v33  ;;  %v10088_v55 = vrot.slane %v8178_v10, %v19816_v28  ;;  %v10798_v5 = vsel %vm7197_vm13, %v10060_v50, %v20270_v39  ;;  %vm1786_vm8 = vcmp.gt.f32.partialorder %v18298_v0, 0.0 }
 0x5a8   :  { %v10805_v20 = vsel %vm7197_vm13, %v10064_v2, %v20271_v7  ;;  %v10799_v4 = vsel %vm7199_vm14, %v10068_v63, %v10798_v5  ;;  %v18410_v11 = vadd.f32 %v18004_v8, %v18098_v22  ;;  %v1517_v61 = vmul.f32 %v20006_v59, %v1340_v6  ;;  %v20277_v5 = vld [vmem:[#allocation44_spill] sm:$0xff] }
 0x5a9   :  { %v10806_v41 = vsel %vm7199_vm14, %v10072_v27, %v10805_v20  ;;  %v10800_v34 = vsel %vm7201_vm15, %v10076_v1, %v10799_v4  ;;  %v1518_v10 = vmul.f32 %v19745_v47, %v1340_v6  ;;  %v1485_v45 = vmul.f32 %v20006_v59, %v1276_v58  ;;  %v20273_v27 = vld [vmem:[#allocation25_spill] sm:$0xff]  ;;  %v20274_v6 = vld [vmem:[#allocation92_spill] sm:$0xff] }
 0x5aa   :  { %v10807_v24 = vsel %vm7201_vm15, %v10080_v62, %v10806_v41  ;;  %v11814_v15 = vpop.eup %11813  ;;  %v10801_v50 = vsel %vm7203_vm0, %v10084_v38, %v10800_v34  ;;  %v18420_v36 = vadd.f32 %v1517_v61, %v20272_v9  ;;  %v1486_v8 = vmul.f32 %v19745_v47, %v1276_v58 }
 0x5ab   :  { %v10808_v2 = vsel %vm7203_vm0, %v10088_v55, %v10807_v24  ;;  %v11318_v63 = vadd.f32 -1.0, %v11814_v15  ;;  %v18426_v1 = vadd.f32 %v1518_v10, %v20273_v27  ;;  %v18429_v62 = vadd.f32 %v1485_v45, %v20274_v6 }
 0x5ac   :  { %v11816_v39 = vpop.eup %11815  ;;  %v20275_v38 = vrot.slane %v18136_v43, %v19815_v33  ;;  %v1901_v58 = vmin.f32 %v18420_v36, 0.0  ;;  %v18441_v7 = vadd.f32 %v1486_v8, %v20277_v5  ;;  %v20278_v20 = vrot.slane %v18136_v43, %v19816_v28 }
 0x5ad   :  { %v11319_v41 = vadd.f32 -1.0, %v11816_v39  ;;  %v2425_v61 = vsel %vm1785_vm6, %v18257_v35, %v11318_v63  ;;  %v10348_v34 = vrot.slane %v18185_v32, %v19815_v33  ;;  %v1869_v10 = vmin.f32 %v18429_v62, 0.0  ;;  %v20281_v39 = vld [vmem:[#allocation31_spill] sm:$0xff] }
 0x5ae   :  { %v18436_v55 = vsel %vm7195_vm7, %v20275_v38, %v18335_v52  ;;  %v18448_v4 = vsel %vm7195_vm7, %v20278_v20, %v18346_v25  ;;  %v1902_v52 = vmin.f32 %v18426_v1, 0.0  ;;  %v2123_v24 = vmul.f32 1.442695, %v1901_v58  ;;  %v20280_v25 = vld [vmem:[#allocation85_spill] sm:$0xff] }
 0x5af   :  { %20276 = vst [vmem:[#allocation59_spill] sm:$0xff] %v18436_v55  ;;  %20279 = vst [vmem:[#allocation60_spill] sm:$0xff] %v18448_v4  ;;  %v2426_v45 = vsel %vm1786_vm8, %v18298_v0, %v11319_v41  ;;  %v1870_v43 = vmin.f32 %v18441_v7, 0.0  ;;  %v18460_v9 = vadd.f32 %v20280_v25, %v17718_v60  ;;  %v2059_v63 = vmul.f32 1.442695, %v1869_v10 }
 0x5b0   :  { %v2125_v15 = vmul.f32 1.442695, %v1902_v52  ;;  %v3523_v35 = vcombine.low %v2425_v61, %v2426_v45  ;;  %v3524_v8 = vcombine.high %v2425_v61, %v2426_v45  ;;  %11817 = vpow2.f32 %v2123_v24  ;;  %v1372_v45 = vpop.permute.xlu0 %1371 }
 0x5b1   :  { %v2061_v6 = vmul.f32 1.442695, %v1870_v43  ;;  %v18466_v38 = vadd.f32 %v20281_v39, %v17721_v48  ;;  %v20282_v48 = vrot.slane %v17798_v49, %v19815_v33  ;;  %v20283_v43 = vld [vmem:[#allocation20_spill] sm:$0xff]  ;;  %v20284_v25 = vrot.slane %v17798_v49, %v19816_v28  ;;  %v11864_v49 = vld [vmem:[%s19394_s3 + $0x188] sm:$0xff] }
 0x5b2   :  { %11819 = vpow2.f32 %v2125_v15  ;;  %v3531_v58 = vrot.slane %v3523_v35, %v19814_v51  ;;  %v3538_v60 = vrot.slane %v3524_v8, %v19814_v51  ;;  %v18487_v15 = vsel %vm7191_vm4, %v10348_v34, %v10340_v12  ;;  %v11863_v12 = vld [vmem:[%s19394_s3 + $0x180] sm:$0xff] }
 0x5b3   :  { %11821 = vpow2.f32 %v2059_v63  ;;  %v18481_v41 = vsel %vm7195_vm7, %v20282_v48, %v17654_v37  ;;  %v18494_v35 = vsel %vm7195_vm7, %v20284_v25, %v20283_v43  ;;  %v20285_v37 = vld [vmem:[#allocation14_spill] sm:$0xff]  ;;  %v20286_v63 = vld [vmem:[#allocation15_spill] sm:$0xff]  ;;  %v7879_v34 = vadd.f32 %v11863_v12, %v18385_v42 }
 0x5b4   :  { %11823 = vpow2.f32 %v2061_v6  ;;  %v3539_v61 = vcombine.high %v3531_v58, %v3531_v58  ;;  %v3540_v52 = vcombine.high %v3538_v60, %v3538_v60  ;;  %v11546_v24 = vrot.slane %v3531_v58, 9 }
 0x5b5   :  { %v11548_v10 = vrot.slane %v3538_v60, 9  ;;  %v18497_v8 = vadd.f32 %v10801_v50, %v20285_v37  ;;  %v18500_v6 = vadd.f32 %v10808_v2, %v20286_v63  ;;  %v18510_v50 = vadd.f32 %v11864_v49, %v18388_v44 }
 0x5b6   :  { %v11547_v39 = vrot.slane %v3539_v61, 9  ;;  %v11549_v48 = vrot.slane %v3540_v52, 9  ;;  %v4917_v20 = vmax.f32 %v3531_v58, %v11546_v24  ;;  %v18513_v2 = vmul.f32 %v20006_v59, %v1372_v45 }
 0x5b7   :  { %v4919_v5 = vmax.f32 %v3538_v60, %v11548_v10  ;;  %v18516_v43 = vmul.f32 %v19745_v47, %v1372_v45  ;;  %vm1773_vm9 = vcmp.gt.f32.partialorder %v18420_v36, 0.0  ;;  %vm1774_vm10 = vcmp.gt.f32.partialorder %v18426_v1, 0.0 }
 0x5b8   :  { %v4918_v58 = vmax.f32 %v3539_v61, %v11547_v39  ;;  %v4920_v60 = vmax.f32 %v3540_v52, %v11549_v48  ;;  %v6858_v24 = vrot.slane %v4917_v20, %v19815_v33  ;;  %v6862_v10 = vrot.slane %v4917_v20, %v19816_v28 }
 0x5b9   :  { %v6874_v42 = vrot.slane %v4919_v5, %v19815_v33  ;;  %v6878_v44 = vrot.slane %v4919_v5, %v19816_v28  ;;  %v8183_v25 = vmul.f32 %v4917_v20, %v4917_v20  ;;  %v8185_v37 = vmul.f32 %v4919_v5, %v4919_v5 }
 0x5ba   :  { %vm1741_vm11 = vcmp.gt.f32.partialorder %v18429_v62, 0.0  ;;  %v6866_v45 = vrot.slane %v4918_v58, %v19815_v33  ;;  %v6870_v61 = vrot.slane %v4918_v58, %v19816_v28  ;;  %v6882_v52 = vrot.slane %v4920_v60, %v19815_v33 }
 0x5bb   :  { %v6886_v63 = vrot.slane %v4920_v60, %v19816_v28  ;;  %v7553_v39 = vsel %vm7197_vm13, %v6858_v24, %v17753_v17  ;;  %v7560_v48 = vsel %vm7197_vm13, %v6862_v10, %v17765_v56  ;;  %v8184_v12 = vmul.f32 %v4918_v58, %v4918_v58 }
 0x5bc   :  { %v8186_v49 = vmul.f32 %v4920_v60, %v4920_v60  ;;  %vm1742_vm12 = vcmp.gt.f32.partialorder %v18441_v7, 0.0  ;;  %v7554_v5 = vsel %vm7199_vm14, %v6866_v45, %v7553_v39  ;;  %v7561_v20 = vsel %vm7199_vm14, %v6870_v61, %v7560_v48 }
 0x5bd   :  { %v10124_v27 = vrot.slane %v8183_v25, %v19815_v33  ;;  %v10128_v22 = vrot.slane %v8183_v25, %v19816_v28  ;;  %v11818_v0 = vpop.eup %11817  ;;  %v7555_v31 = vsel %vm7201_vm15, %v6874_v42, %v7554_v5  ;;  %v7562_v17 = vsel %vm7201_vm15, %v6878_v44, %v7561_v20  ;;  %v20287_v25 = vld [vmem:[#allocation54_spill] sm:$0xff]  ;;  %v20288_v42 = vld [vmem:[#allocation105_spill] sm:$0xff] }
 0x5be   :  { %v10132_v24 = vrot.slane %v8184_v12, %v19815_v33  ;;  %v10136_v56 = vrot.slane %v8184_v12, %v19816_v28  ;;  %v10140_v60 = vrot.slane %v8185_v37, %v19815_v33  ;;  %v10144_v10 = vrot.slane %v8185_v37, %v19816_v28 }
 0x5bf   :  { %v11820_v58 = vpop.eup %11819  ;;  %v10148_v45 = vrot.slane %v8186_v49, %v19815_v33  ;;  %v10152_v61 = vrot.slane %v8186_v49, %v19816_v28  ;;  %v10812_v48 = vsel %vm7197_vm13, %v10124_v27, %v20287_v25  ;;  %v10819_v44 = vsel %vm7197_vm13, %v10128_v22, %v20288_v42 }
 0x5c0   :  { %v11822_v39 = vpop.eup %11821  ;;  %v11306_v5 = vadd.f32 -1.0, %v11818_v0  ;;  %v11307_v20 = vadd.f32 -1.0, %v11820_v58  ;;  %v10813_v12 = vsel %vm7199_vm14, %v10132_v24, %v10812_v48  ;;  %v10820_v30 = vsel %vm7199_vm14, %v10136_v56, %v10819_v44 }
 0x5c1   :  { %v11824_v19 = vpop.eup %11823  ;;  %v11274_v4 = vadd.f32 -1.0, %v11822_v39  ;;  %v7556_v37 = vsel %vm7203_vm0, %v6882_v52, %v7555_v31  ;;  %v10814_v55 = vsel %vm7201_vm15, %v10140_v60, %v10813_v12  ;;  %v10821_v49 = vsel %vm7201_vm15, %v10144_v10, %v10820_v30 }
 0x5c2   :  { %v2413_v27 = vsel %vm1773_vm9, %v18420_v36, %v11306_v5  ;;  %v2414_v22 = vsel %vm1774_vm10, %v18426_v1, %v11307_v20  ;;  %7746 = vst [vmem:[%s19394_s3 + $0x1a0] sm:$0xff] %v7556_v37  ;;  %v11275_v56 = vadd.f32 -1.0, %v11824_v19  ;;  %v7563_v30 = vsel %vm7203_vm0, %v6886_v63, %v7562_v17  ;;  %v20292_v20 = vld [vmem:[#allocation38_spill] sm:$0xff] }
 0x5c3   :  { %v3416_v0 = vcombine.low %v2413_v27, %v2414_v22  ;;  %v3417_v24 = vcombine.high %v2413_v27, %v2414_v22  ;;  %v2381_v31 = vsel %vm1741_vm11, %v18429_v62, %v11274_v4  ;;  %v18568_v52 = vadd.f32 %v7879_v34, %v7556_v37  ;;  %7747 = vst [vmem:[%s19394_s3 + $0x1a8] sm:$0xff] %v7563_v30 }
 0x5c4   :  { %v10815_v36 = vsel %vm7203_vm0, %v10148_v45, %v10814_v55  ;;  %v10822_v58 = vsel %vm7203_vm0, %v10152_v61, %v10821_v49  ;;  %v2382_v19 = vsel %vm1742_vm12, %v18441_v7, %v11275_v56  ;;  %v18581_v62 = vadd.f32 %v18510_v50, %v7563_v30 }
 0x5c5   :  { %v3424_v1 = vrot.slane %v3416_v0, %v19814_v51  ;;  %v3431_v60 = vrot.slane %v3417_v24, %v19814_v51  ;;  %v3130_v4 = vcombine.low %v2381_v31, %v2382_v19  ;;  %v3131_v34 = vcombine.high %v2381_v31, %v2382_v19 }
 0x5c6   :  { %v18584_v55 = vadd.f32 %v18497_v8, %v10815_v36  ;;  %v18587_v63 = vadd.f32 %v18500_v6, %v10822_v58  ;;  %v10368_v17 = vrot.slane %v18339_v23, %v19816_v28  ;;  %v20289_v61 = vrot.slane %v18192_v21, %v19815_v33  ;;  %v20293_v58 = vld [vmem:[#allocation134_spill] sm:$0xff] }
 0x5c7   :  { %v3432_v10 = vcombine.high %v3424_v1, %v3424_v1  ;;  %v11523_v7 = vrot.slane %v3424_v1, 9  ;;  %v11525_v45 = vrot.slane %v3431_v60, 9  ;;  %v20290_v8 = vrot.slane %v18181_v29, %v19816_v28 }
 0x5c8   :  { %v18596_v50 = vsel %vm7193_vm5, %v20289_v61, %v18487_v15  ;;  %v20291_v6 = vrot.slane %v18185_v32, %v19816_v28  ;;  %v3138_v25 = vrot.slane %v3130_v4, %v19814_v51  ;;  %v3145_v48 = vrot.slane %v3131_v34, %v19814_v51 }
 0x5c9   :  { %v11524_v42 = vrot.slane %v3432_v10, 9  ;;  %v4894_v44 = vmax.f32 %v3424_v1, %v11523_v7  ;;  %v4896_v5 = vmax.f32 %v3431_v60, %v11525_v45  ;;  %v18611_v15 = vadd.f32 %v18513_v2, %v20292_v20  ;;  %v20295_v20 = vld [vmem:[#allocation141_spill] sm:$0xff] }
 0x5ca   :  { %v18605_v39 = vsel %vm7191_vm4, %v20291_v6, %v20290_v8  ;;  %v3146_v12 = vcombine.high %v3138_v25, %v3138_v25  ;;  %v11461_v37 = vrot.slane %v3138_v25, 9  ;;  %v11463_v29 = vrot.slane %v3145_v48, 9 }
 0x5cb   :  { %v18615_v32 = vadd.f32 %v18516_v43, %v18120_v40  ;;  %v4895_v49 = vmax.f32 %v3432_v10, %v11524_v42  ;;  %v6674_v27 = vrot.slane %v4894_v44, %v19815_v33  ;;  %v6678_v22 = vrot.slane %v4894_v44, %v19816_v28  ;;  %v20294_v43 = vld [vmem:[#allocation135_spill] sm:$0xff] }
 0x5cc   :  { %v6690_v0 = vrot.slane %v4896_v5, %v19815_v33  ;;  %v6694_v24 = vrot.slane %v4896_v5, %v19816_v28  ;;  %v8160_v56 = vmul.f32 %v4894_v44, %v4894_v44  ;;  %v8162_v31 = vmul.f32 %v4896_v5, %v4896_v5 }
 0x5cd   :  { %v11462_v2 = vrot.slane %v3146_v12, 9  ;;  %v6682_v30 = vrot.slane %v4895_v49, %v19815_v33  ;;  %v6686_v36 = vrot.slane %v4895_v49, %v19816_v28  ;;  %v7513_v40 = vsel %vm7197_vm13, %v6674_v27, %v20293_v58 }
 0x5ce   :  { %v7519_v1 = vsel %vm7197_vm13, %v6678_v22, %v20294_v43  ;;  %v8161_v60 = vmul.f32 %v4895_v49, %v4895_v49  ;;  %v9940_v19 = vrot.slane %v8160_v56, %v19815_v33  ;;  %v9944_v4 = vrot.slane %v8160_v56, %v19816_v28  ;;  %v20296_v49 = vld [vmem:[#allocation142_spill] sm:$0xff] }
 0x5cf   :  { %v9956_v34 = vrot.slane %v8162_v31, %v19815_v33  ;;  %v7514_v10 = vsel %vm7199_vm14, %v6682_v30, %v7513_v40  ;;  %v7520_v7 = vsel %vm7199_vm14, %v6686_v36, %v7519_v1  ;;  %v9960_v45 = vrot.slane %v8162_v31, %v19816_v28  ;;  %v1380_v40 = vpop.permute.xlu1 %1379 }
 0x5d0   :  { %v4832_v61 = vmax.f32 %v3138_v25, %v11461_v37  ;;  %v7515_v8 = vsel %vm7201_vm15, %v6690_v0, %v7514_v10  ;;  %v7521_v6 = vsel %vm7201_vm15, %v6694_v24, %v7520_v7  ;;  %v9948_v42 = vrot.slane %v8161_v60, %v19815_v33  ;;  %v11866_v10 = vld [vmem:[%s19394_s3 + $0xe8] sm:$0xff] }
 0x5d1   :  { %v9952_v44 = vrot.slane %v8161_v60, %v19816_v28  ;;  %7740 = vst [vmem:[%s19394_s3 + $0x170] sm:$0x7f] %v7515_v8  ;;  %7741 = vst [vmem:[%s19394_s3 + $0x178] sm:$0x7f] %v7521_v6  ;;  %v7861_v5 = vsel %vm7760_vm3, %v7515_v8, 0.0  ;;  %v7871_v25 = vsel %vm7760_vm3, %v7521_v6, 0.0  ;;  %v10772_v37 = vsel %vm7197_vm13, %v9940_v19, %v20295_v20 }
 0x5d2   :  { %v10778_v27 = vsel %vm7197_vm13, %v9944_v4, %v20296_v49  ;;  %v18650_v22 = vadd.f32 %v7861_v5, %v18352_v13  ;;  %v18653_v0 = vadd.f32 %v7871_v25, %v18356_v46  ;;  %v10773_v24 = vsel %vm7199_vm14, %v9948_v42, %v10772_v37  ;;  %v11865_v13 = vld [vmem:[%s19394_s3 + $0xe0] sm:$0xff] }
 0x5d3   :  { %v10779_v56 = vsel %vm7199_vm14, %v9952_v44, %v10778_v27  ;;  %v10774_v31 = vsel %vm7201_vm15, %v9956_v34, %v10773_v24  ;;  %v4833_v36 = vmax.f32 %v3146_v12, %v11462_v2  ;;  %v4834_v58 = vmax.f32 %v3145_v48, %v11463_v29  ;;  %v20297_v46 = vld [vmem:[#allocation68_spill] sm:$0xff]  ;;  %v20298_v7 = vld [vmem:[#allocation117_spill] sm:$0xff]  ;;  %v20299_v44 = vld [vmem:[#allocation127_spill] sm:$0xff] }
 0x5d4   :  { %v10780_v30 = vsel %vm7201_vm15, %v9960_v45, %v10779_v56  ;;  %v11055_v43 = vsel %vm7760_vm3, %v10774_v31, 0.0  ;;  %v7820_v60 = vadd.f32 %v11865_v13, %v20297_v46  ;;  %v1917_v19 = vmin.f32 %v18611_v15, 0.0  ;;  %v20300_v25 = vld [vmem:[#allocation128_spill] sm:$0xff] }
 0x5d5   :  { %v11065_v1 = vsel %vm7760_vm3, %v10780_v30, 0.0  ;;  %v18667_v4 = vadd.f32 %v11055_v43, %v18360_v26  ;;  %v6178_v48 = vrot.slane %v4832_v61, %v19815_v33  ;;  %v6182_v12 = vrot.slane %v4832_v61, %v19816_v28  ;;  %v1400_v30 = vpop.permute.xlu1 %1399 }
 0x5d6   :  { %v18670_v34 = vadd.f32 %v11065_v1, %v18410_v11  ;;  %v6186_v29 = vrot.slane %v4833_v36, %v19815_v33  ;;  %v6190_v2 = vrot.slane %v4833_v36, %v19816_v28  ;;  %v7830_v45 = vadd.f32 %v11866_v10, %v20298_v7  ;;  %v20302_v7 = vld [vmem:[#allocation111_spill] sm:$0xff] }
 0x5d7   :  { %v1537_v26 = vmul.f32 %v20006_v59, %v1380_v40  ;;  %v6194_v8 = vrot.slane %v4834_v58, %v19815_v33  ;;  %v6198_v11 = vrot.slane %v4834_v58, %v19816_v28  ;;  %v1918_v6 = vmin.f32 %v18615_v32, 0.0 }
 0x5d8   :  { %v1538_v42 = vmul.f32 %v19745_v47, %v1380_v40  ;;  %v7405_v5 = vsel %vm7197_vm13, %v6178_v48, %v20299_v44  ;;  %v7411_v20 = vsel %vm7197_vm13, %v6182_v12, %v20300_v25  ;;  %v8098_v37 = vmul.f32 %v4832_v61, %v4832_v61 }
 0x5d9   :  { %v8099_v49 = vmul.f32 %v4833_v36, %v4833_v36  ;;  %v7406_v27 = vsel %vm7199_vm14, %v6186_v29, %v7405_v5  ;;  %v7412_v24 = vsel %vm7199_vm14, %v6190_v2, %v7411_v20  ;;  %v8100_v56 = vmul.f32 %v4834_v58, %v4834_v58  ;;  %v20301_v2 = vld [vmem:[#allocation110_spill] sm:$0xff] }
 0x5da   :  { %v2155_v31 = vmul.f32 1.442695, %v1917_v19  ;;  %v7407_v43 = vsel %vm7201_vm15, %v6194_v8, %v7406_v27  ;;  %v7413_v1 = vsel %vm7201_vm15, %v6198_v11, %v7412_v24  ;;  %v9444_v40 = vrot.slane %v8098_v37, %v19815_v33  ;;  %v20305_v27 = vld [vmem:[#allocation29_spill] sm:$0xff]  ;;  %v1308_v24 = vpop.permute.xlu1 %1307 }
 0x5db   :  { %v9448_v13 = vrot.slane %v8098_v37, %v19816_v28  ;;  %7724 = vst [vmem:[%s19394_s3 + $0xf0] sm:$0x7f] %v7407_v43  ;;  %7725 = vst [vmem:[%s19394_s3 + $0xf8] sm:$0x7f] %v7413_v1  ;;  %v7821_v61 = vsel %vm7760_vm3, %v7407_v43, 0.0  ;;  %v7831_v36 = vsel %vm7760_vm3, %v7413_v1, 0.0  ;;  %v9452_v58 = vrot.slane %v8099_v49, %v19815_v33 }
 0x5dc   :  { %v9456_v46 = vrot.slane %v8099_v49, %v19816_v28  ;;  %v7822_v19 = vadd.f32 %v7821_v61, %v7820_v60  ;;  %v7832_v48 = vadd.f32 %v7831_v36, %v7830_v45  ;;  %v9460_v12 = vrot.slane %v8100_v56, %v19815_v33  ;;  %v20304_v60 = vld [vmem:[#allocation40_spill] sm:$0xff] }
 0x5dd   :  { %v9464_v29 = vrot.slane %v8100_v56, %v19816_v28  ;;  %v10664_v10 = vsel %vm7197_vm13, %v9444_v40, %v20301_v2  ;;  %v10670_v8 = vsel %vm7197_vm13, %v9448_v13, %v20302_v7  ;;  %11825 = vpow2.f32 %v2155_v31 }
 0x5de   :  { %v2157_v11 = vmul.f32 1.442695, %v1918_v6  ;;  %v20303_v44 = vrot.slane %v18192_v21, %v19816_v28  ;;  %v1015_v45 = vmul.f32 %v20304_v60, %v18364_v18  ;;  %v10665_v25 = vsel %vm7199_vm14, %v9452_v58, %v10664_v10 }
 0x5df   :  { %v10671_v20 = vsel %vm7199_vm14, %v9456_v46, %v10670_v8  ;;  %v10666_v37 = vsel %vm7201_vm15, %v9460_v12, %v10665_v25  ;;  %v18723_v6 = vadd.f32 %v1537_v26, %v20305_v27  ;;  %v20306_v21 = vrot.slane %v18339_v23, %v19815_v33  ;;  %v20307_v26 = vld [vmem:[#allocation32_spill] sm:$0xff]  ;;  %v874_v25 = vpop.permute.xlu1 %873 }
 0x5e0   :  { %v10871_v5 = vsel %vm7193_vm5, %v20303_v44, %v18605_v39  ;;  %v10672_v49 = vsel %vm7201_vm15, %v9464_v29, %v10671_v20  ;;  %11827 = vpow2.f32 %v2157_v11  ;;  %v7823_v56 = vrot.slane %v7822_v19, 4  ;;  %v20309_v29 = vld [vmem:[#allocation139_spill] sm:$0xff]  ;;  %v20310_v44 = vld [vmem:[#allocation30_spill] sm:$0xff]  ;;  %v20312_v27 = vld [vmem:[#allocation140_spill] sm:$0xff] }
 0x5e1   :  { %v18730_v39 = vsel %vm7195_vm7, %v20306_v21, %v18596_v50  ;;  %v11015_v31 = vsel %vm7760_vm3, %v10666_v37, 0.0  ;;  %v11025_v43 = vsel %vm7760_vm3, %v10672_v49, 0.0  ;;  %v7833_v1 = vrot.slane %v7832_v48, 4  ;;  %v20308_v50 = vld [vmem:[#allocation42_spill] sm:$0xff] }
 0x5e2   :  { %v11016_v40 = vadd.f32 %v11015_v31, %v18460_v9  ;;  %v11026_v13 = vadd.f32 %v11025_v43, %v18466_v38  ;;  %v18737_v61 = vadd.f32 %v1538_v42, %v20307_v26  ;;  %v18743_v36 = vsel %vm7195_vm7, %v10368_v17, %v10871_v5  ;;  %v20313_v43 = vld [vmem:[#allocation21_spill] sm:$0xff] }
 0x5e3   :  { %v1016_v58 = vmul.f32 %v20308_v50, %v18364_v18  ;;  %v1921_v46 = vmin.f32 %v18723_v6, 0.0  ;;  %v1547_v12 = vmul.f32 %v20006_v59, %v1400_v30  ;;  %v18750_v9 = vadd.f32 %v1015_v45, %v20309_v29  ;;  %v20311_v45 = vld [vmem:[#allocation97_spill] sm:$0xff] }
 0x5e4   :  { %v7863_v38 = vrot.slane %v18650_v22, 4  ;;  %v11017_v42 = vrot.slane %v11016_v40, 4  ;;  %v1922_v2 = vmin.f32 %v18737_v61, 0.0  ;;  %v7873_v23 = vrot.slane %v18653_v0, 4 }
 0x5e5   :  { %v11027_v10 = vrot.slane %v11026_v13, 4  ;;  %v2163_v17 = vmul.f32 1.442695, %v1921_v46  ;;  %v1548_v7 = vmul.f32 %v19745_v47, %v1400_v30  ;;  %v7824_v8 = vadd.f32 %v7823_v56, %v7822_v19  ;;  %v20314_v30 = vld [vmem:[#allocation13_spill] sm:$0xff] }
 0x5e6   :  { %v7834_v18 = vadd.f32 %v7833_v1, %v7832_v48  ;;  %v2165_v11 = vmul.f32 1.442695, %v1922_v2  ;;  %v18757_v5 = vadd.f32 %v1547_v12, %v20310_v44  ;;  %v1501_v37 = vmul.f32 %v20006_v59, %v1308_v24  ;;  %v20316_v1 = vld [vmem:[#allocation130_spill] sm:$0xff] }
 0x5e7   :  { %11829 = vpow2.f32 %v2163_v17  ;;  %v18760_v20 = vadd.f32 %v1548_v7, %v20311_v45  ;;  %v1502_v49 = vmul.f32 %v19745_v47, %v1308_v24  ;;  %v1144_v21 = vadd.f32 %v1016_v58, %v20312_v27  ;;  %v20318_v24 = vld [vmem:[#allocation103_spill] sm:$0xff]  ;;  %v1396_v45 = vpop.permute.xlu1 %1395 }
 0x5e8   :  { %v11018_v31 = vadd.f32 %v11017_v42, %v11016_v40  ;;  %v20315_v19 = vrot.slane %v20314_v30, %v19815_v33  ;;  %11831 = vpow2.f32 %v2165_v11  ;;  %v11028_v56 = vadd.f32 %v11027_v10, %v11026_v13  ;;  %v20319_v13 = vld [vmem:[#allocation17_spill] sm:$0xff] }
 0x5e9   :  { %v20317_v26 = vrot.slane %v20314_v30, %v19816_v28  ;;  %vm1789_vm1 = vcmp.gt.f32.partialorder %v18611_v15, 0.0  ;;  %v18781_v40 = vadd.f32 %v1501_v37, %v20318_v24  ;;  %v18784_v58 = vadd.f32 %v7863_v38, %v18650_v22 }
 0x5ea   :  { %v18770_v48 = vsel %vm7195_vm7, %v20315_v19, %v20313_v43  ;;  %vm1790_vm2 = vcmp.gt.f32.partialorder %v18615_v32, 0.0  ;;  %v1931_v12 = vmin.f32 %v18757_v5, 0.0  ;;  %v18789_v29 = vadd.f32 %v1502_v49, %v20319_v13  ;;  %v11826_v42 = vpop.eup %11825  ;;  %v20320_v43 = vld [vmem:[#allocation98_spill] sm:$0xff] }
 0x5eb   :  { %v18777_v46 = vsel %vm7195_vm7, %v20317_v26, %v20316_v1  ;;  %v18792_v2 = vadd.f32 %v7873_v23, %v18653_v0  ;;  %v7825_v10 = vrot.slane %v7824_v8, 2  ;;  %v7835_v17 = vrot.slane %v7834_v18, 2  ;;  %v20321_v0 = vld [vmem:[#allocation121_spill] sm:$0xff] }
 0x5ec   :  { %v1932_v7 = vmin.f32 %v18760_v20, 0.0  ;;  %v11019_v44 = vrot.slane %v11018_v31, 2  ;;  %v11322_v22 = vadd.f32 -1.0, %v11826_v42  ;;  %v1885_v38 = vmin.f32 %v18781_v40, 0.0 }
 0x5ed   :  { %v11828_v37 = vpop.eup %11827  ;;  %v11029_v49 = vrot.slane %v11028_v56, 2  ;;  %v18800_v30 = vadd.f32 %v20320_v43, %v18323_v16  ;;  %v18804_v23 = vadd.f32 %v20321_v0, %v18326_v57  ;;  %vm1793_vm6 = vcmp.gt.f32.partialorder %v18723_v6, 0.0 }
 0x5ee   :  { %v11323_v19 = vadd.f32 -1.0, %v11828_v37  ;;  %v2429_v1 = vsel %vm1789_vm1, %v18611_v15, %v11322_v22  ;;  %v2183_v26 = vmul.f32 1.442695, %v1931_v12  ;;  %v1886_v24 = vmin.f32 %v18789_v29, 0.0 }
 0x5ef   :  { %v18811_v13 = vadd.f32 %v7825_v10, %v7824_v8  ;;  %v18813_v42 = vadd.f32 %v7835_v17, %v7834_v18  ;;  %vm1794_vm8 = vcmp.gt.f32.partialorder %v18737_v61, 0.0  ;;  %v2185_v16 = vmul.f32 1.442695, %v1932_v7  ;;  %v20322_v18 = vld [vmem:[#allocation35_spill] sm:$0xff] }
 0x5f0   :  { %v1545_v57 = vmul.f32 %v20006_v59, %v1396_v45  ;;  %v18817_v43 = vadd.f32 %v11019_v44, %v11018_v31  ;;  %v2430_v15 = vsel %vm1790_vm2, %v18615_v32, %v11323_v19  ;;  %v2091_v22 = vmul.f32 1.442695, %v1885_v38 }
 0x5f1   :  { %v1546_v12 = vmul.f32 %v19745_v47, %v1396_v45  ;;  %v18823_v37 = vadd.f32 %v11029_v49, %v11028_v56  ;;  %v3559_v8 = vcombine.low %v2429_v1, %v2430_v15  ;;  %v3560_v10 = vcombine.high %v2429_v1, %v2430_v15  ;;  %v20323_v56 = vld [vmem:[#allocation77_spill] sm:$0xff]  ;;  %v18839_v49 = vpop.permute.xlu1 %1403  ;;  %v20324_v15 = vld [vmem:[#allocation47_spill] sm:$0xff] }
 0x5f2   :  { %v18827_v17 = vadd.f32 %v20322_v18, %v18278_v3  ;;  %11833 = vpow2.f32 %v2183_v26  ;;  %v2093_v7 = vmul.f32 1.442695, %v1886_v24  ;;  %v1019_v31 = vmul.f32 %v20304_v60, %v874_v25 }
 0x5f3   :  { %v18831_v44 = vadd.f32 %v1545_v57, %v18750_v9  ;;  %v3567_v32 = vrot.slane %v3559_v8, %v19814_v51  ;;  %v3574_v38 = vrot.slane %v3560_v10, %v19814_v51  ;;  %11835 = vpow2.f32 %v2185_v16 }
 0x5f4   :  { %v18837_v45 = vadd.f32 %v20323_v56, %v18281_v53  ;;  %v11830_v3 = vpop.eup %11829  ;;  %11837 = vpow2.f32 %v2091_v22  ;;  %v1020_v0 = vmul.f32 %v20308_v50, %v874_v25  ;;  %v18842_v19 = vadd.f32 %v1546_v12, %v1144_v21  ;;  %v20325_v21 = vld [vmem:[#allocation48_spill] sm:$0xff] }
 0x5f5   :  { %v1929_v60 = vmin.f32 %v18831_v44, 0.0  ;;  %v11832_v9 = vpop.eup %11831  ;;  %v3575_v1 = vcombine.high %v3567_v32, %v3567_v32  ;;  %v11554_v26 = vrot.slane %v3567_v32, 9  ;;  %v11556_v24 = vrot.slane %v3574_v38, 9 }
 0x5f6   :  { %v11326_v57 = vadd.f32 -1.0, %v11830_v3  ;;  %v11327_v16 = vadd.f32 -1.0, %v11832_v9  ;;  %11839 = vpow2.f32 %v2093_v7  ;;  %v1147_v53 = vadd.f32 %v1019_v31, %v20324_v15 }
 0x5f7   :  { %v1549_v8 = vmul.f32 %v20006_v59, %v18839_v49  ;;  %v11555_v10 = vrot.slane %v3575_v1, 9  ;;  %v4925_v22 = vmax.f32 %v3567_v32, %v11554_v26  ;;  %v4927_v18 = vmax.f32 %v3574_v38, %v11556_v24 }
 0x5f8   :  { %v2433_v50 = vsel %vm1793_vm6, %v18723_v6, %v11326_v57  ;;  %v2434_v25 = vsel %vm1794_vm8, %v18737_v61, %v11327_v16  ;;  %v18855_v12 = vadd.f32 %v1020_v0, %v20325_v21  ;;  %v1930_v7 = vmin.f32 %v18842_v19, 0.0 }
 0x5f9   :  { %v2179_v31 = vmul.f32 1.442695, %v1929_v60  ;;  %v4926_v56 = vmax.f32 %v3575_v1, %v11555_v10  ;;  %v6922_v59 = vrot.slane %v4925_v22, %v19815_v33  ;;  %v6926_v32 = vrot.slane %v4925_v22, %v19816_v28 }
 0x5fa   :  { %v6938_v38 = vrot.slane %v4927_v18, %v19815_v33  ;;  %v6942_v3 = vrot.slane %v4927_v18, %v19816_v28  ;;  %v8191_v6 = vmul.f32 %v4925_v22, %v4925_v22  ;;  %v8193_v9 = vmul.f32 %v4927_v18, %v4927_v18 }
 0x5fb   :  { %v3594_v26 = vcombine.low %v2433_v50, %v2434_v25  ;;  %v6930_v61 = vrot.slane %v4926_v56, %v19815_v33  ;;  %v6934_v0 = vrot.slane %v4926_v56, %v19816_v28  ;;  %v7567_v24 = vsel %vm7197_vm13, %v6922_v59, %v18770_v48 }
 0x5fc   :  { %v7573_v60 = vsel %vm7197_vm13, %v6926_v32, %v18777_v46  ;;  %v8192_v1 = vmul.f32 %v4926_v56, %v4926_v56  ;;  %v10188_v57 = vrot.slane %v8191_v6, %v19815_v33  ;;  %v10192_v16 = vrot.slane %v8191_v6, %v19816_v28 }
 0x5fd   :  { %v10204_v15 = vrot.slane %v8193_v9, %v19815_v33  ;;  %v7568_v10 = vsel %vm7199_vm14, %v6930_v61, %v7567_v24  ;;  %v7574_v22 = vsel %vm7199_vm14, %v6934_v0, %v7573_v60  ;;  %v10208_v18 = vrot.slane %v8193_v9, %v19816_v28 }
 0x5fe   :  { %v3595_v21 = vcombine.high %v2433_v50, %v2434_v25  ;;  %v7569_v27 = vsel %vm7201_vm15, %v6938_v38, %v7568_v10  ;;  %v7575_v48 = vsel %vm7201_vm15, %v6942_v3, %v7574_v22  ;;  %v10196_v46 = vrot.slane %v8192_v1, %v19815_v33 }
 0x5ff   :  { %v10200_v56 = vrot.slane %v8192_v1, %v19816_v28  ;;  %v11834_v59 = vpop.eup %11833  ;;  %7748 = vst [vmem:[%s19394_s3 + $0x1b0] sm:$0x7f] %v7569_v27  ;;  %7749 = vst [vmem:[%s19394_s3 + $0x1b8] sm:$0x7f] %v7575_v48  ;;  %v7881_v32 = vsel %vm7760_vm3, %v7569_v27, 0.0  ;;  %v7891_v50 = vsel %vm7760_vm3, %v7575_v48, 0.0  ;;  %v10826_v25 = vsel %vm7197_vm13, %v10188_v57, %v18481_v41 }
 0x600   :  { %v10832_v38 = vsel %vm7197_vm13, %v10192_v16, %v18494_v35  ;;  %v11836_v3 = vpop.eup %11835  ;;  %v18891_v6 = vadd.f32 %v7881_v32, %v18568_v52  ;;  %v18894_v9 = vadd.f32 %v7891_v50, %v18581_v62  ;;  %v10827_v61 = vsel %vm7199_vm14, %v10196_v46, %v10826_v25 }
 0x601   :  { %v10833_v0 = vsel %vm7199_vm14, %v10200_v56, %v10832_v38  ;;  %v11838_v27 = vpop.eup %11837  ;;  %v10828_v24 = vsel %vm7201_vm15, %v10204_v15, %v10827_v61  ;;  %v3602_v41 = vrot.slane %v3594_v26, %v19814_v51  ;;  %v3609_v35 = vrot.slane %v3595_v21, %v19814_v51 }
 0x602   :  { %v10834_v60 = vsel %vm7201_vm15, %v10208_v18, %v10833_v0  ;;  %v11075_v1 = vsel %vm7760_vm3, %v10828_v24, 0.0  ;;  %v18906_v62 = vmul.f32 %v19745_v47, %v18839_v49  ;;  %v18915_v48 = vadd.f32 %v1549_v8, %v1147_v53 }
 0x603   :  { %v11085_v52 = vsel %vm7760_vm3, %v10834_v60, 0.0  ;;  %v11840_v16 = vpop.eup %11839  ;;  %v18910_v10 = vadd.f32 %v11075_v1, %v18584_v55  ;;  %v3610_v26 = vcombine.high %v3602_v41, %v3602_v41  ;;  %v3611_v22 = vcombine.high %v3609_v35, %v3609_v35  ;;  %v20326_v60 = vld [vmem:[#allocation144_spill] sm:$0xff] }
 0x604   :  { %v18913_v15 = vadd.f32 %v11085_v52, %v18587_v63  ;;  %v11561_v18 = vrot.slane %v3602_v41, 9  ;;  %v11563_v21 = vrot.slane %v3609_v35, 9  ;;  %11841 = vpow2.f32 %v2179_v31 }
 0x605   :  { %v11562_v56 = vrot.slane %v3610_v26, 9  ;;  %v11564_v47 = vrot.slane %v3611_v22, 9  ;;  %v18918_v49 = vmul.f32 1.442695, %v1930_v7  ;;  %vm1803_vm9 = vcmp.gt.f32.partialorder %v18757_v5, 0.0 }
 0x606   :  { %v4932_v32 = vmax.f32 %v3602_v41, %v11561_v18  ;;  %v4934_v50 = vmax.f32 %v3609_v35, %v11563_v21  ;;  %vm1804_vm10 = vcmp.gt.f32.partialorder %v18760_v20, 0.0  ;;  %v11336_v55 = vadd.f32 -1.0, %v11834_v59  ;;  %v20327_v35 = vld [vmem:[#allocation84_spill] sm:$0xff] }
 0x607   :  { %v11337_v63 = vadd.f32 -1.0, %v11836_v3  ;;  %v4933_v25 = vmax.f32 %v3610_v26, %v11562_v56  ;;  %v4935_v38 = vmax.f32 %v3611_v22, %v11564_v47  ;;  %v11290_v61 = vadd.f32 -1.0, %v11838_v27 }
 0x608   :  { %v11291_v53 = vadd.f32 -1.0, %v11840_v16  ;;  %v6978_v8 = vrot.slane %v4932_v32, %v19815_v33  ;;  %v6982_v0 = vrot.slane %v4932_v32, %v19816_v28  ;;  %v6994_v31 = vrot.slane %v4934_v50, %v19815_v33 }
 0x609   :  { %v6998_v7 = vrot.slane %v4934_v50, %v19816_v28  ;;  %vm1757_vm11 = vcmp.gt.f32.partialorder %v18781_v40, 0.0  ;;  %vm1758_vm12 = vcmp.gt.f32.partialorder %v18789_v29, 0.0  ;;  %v6986_v24 = vrot.slane %v4933_v25, %v19815_v33 }
 0x60a   :  { %v6990_v59 = vrot.slane %v4933_v25, %v19816_v28  ;;  %v7002_v3 = vrot.slane %v4935_v38, %v19815_v33  ;;  %v7006_v27 = vrot.slane %v4935_v38, %v19816_v28  ;;  %v7579_v41 = vsel %vm7197_vm13, %v6978_v8, %v20326_v60 }
 0x60b   :  { %v7586_v1 = vsel %vm7197_vm13, %v6982_v0, %v20327_v35  ;;  %v8198_v52 = vmul.f32 %v4932_v32, %v4932_v32  ;;  %v8199_v16 = vmul.f32 %v4933_v25, %v4933_v25  ;;  %v7580_v26 = vsel %vm7199_vm14, %v6986_v24, %v7579_v41  ;;  %v20328_v24 = vld [vmem:[#allocation138_spill] sm:$0xff] }
 0x60c   :  { %v7587_v22 = vsel %vm7199_vm14, %v6990_v59, %v7586_v1  ;;  %v8200_v18 = vmul.f32 %v4934_v50, %v4934_v50  ;;  %v8201_v21 = vmul.f32 %v4935_v38, %v4935_v38  ;;  %v7581_v56 = vsel %vm7201_vm15, %v6994_v31, %v7580_v26 }
 0x60d   :  { %v7588_v47 = vsel %vm7201_vm15, %v6998_v7, %v7587_v22  ;;  %v10244_v11 = vrot.slane %v8198_v52, %v19815_v33  ;;  %v10248_v46 = vrot.slane %v8198_v52, %v19816_v28  ;;  %v18943_v8 = vsel %vm7203_vm0, %v7002_v3, %v7581_v56  ;;  %v20329_v3 = vld [vmem:[#allocation123_spill] sm:$0xff] }
 0x60e   :  { %v18946_v32 = vsel %vm7203_vm0, %v7006_v27, %v7588_v47  ;;  %v10252_v25 = vrot.slane %v8199_v16, %v19815_v33  ;;  %v10256_v0 = vrot.slane %v8199_v16, %v19816_v28  ;;  %7750 = vst [vmem:[%s19394_s3 + $0x1c0] sm:$0xff] %v18943_v8  ;;  %v10260_v50 = vrot.slane %v8200_v18, %v19815_v33 }
 0x60f   :  { %7751 = vst [vmem:[%s19394_s3 + $0x1c8] sm:$0xff] %v18946_v32  ;;  %v10264_v38 = vrot.slane %v8200_v18, %v19816_v28  ;;  %v10268_v31 = vrot.slane %v8201_v21, %v19815_v33  ;;  %v10272_v7 = vrot.slane %v8201_v21, %v19816_v28  ;;  %v10838_v59 = vsel %vm7197_vm13, %v10244_v11, %v20328_v24 }
 0x610   :  { %v10845_v27 = vsel %vm7197_vm13, %v10248_v46, %v20329_v3  ;;  %v2443_v60 = vsel %vm1803_vm9, %v18757_v5, %v11336_v55  ;;  %v2444_v41 = vsel %vm1804_vm10, %v18760_v20, %v11337_v63  ;;  %v10839_v35 = vsel %vm7199_vm14, %v10252_v25, %v10838_v59 }
 0x611   :  { %v10846_v1 = vsel %vm7199_vm14, %v10256_v0, %v10845_v27  ;;  %v3684_v52 = vcombine.low %v2443_v60, %v2444_v41  ;;  %v3685_v16 = vcombine.high %v2443_v60, %v2444_v41  ;;  %v10840_v26 = vsel %vm7201_vm15, %v10260_v50, %v10839_v35  ;;  %v11842_v55 = vpop.eup %11841 }
 0x612   :  { %v10847_v11 = vsel %vm7201_vm15, %v10264_v38, %v10846_v1  ;;  %v2397_v46 = vsel %vm1757_vm11, %v18781_v40, %v11290_v61  ;;  %v2398_v5 = vsel %vm1758_vm12, %v18789_v29, %v11291_v53  ;;  %v18983_v20 = vsel %vm7203_vm0, %v10268_v31, %v10840_v26 }
 0x613   :  { %v18986_v63 = vsel %vm7203_vm0, %v10272_v7, %v10847_v11  ;;  %v3692_v22 = vrot.slane %v3684_v52, %v19814_v51  ;;  %v3699_v18 = vrot.slane %v3685_v16, %v19814_v51  ;;  %v7883_v21 = vrot.slane %v18891_v6, 4 }
 0x614   :  { %v7893_v56 = vrot.slane %v18894_v9, 4  ;;  %v3273_v40 = vcombine.low %v2397_v46, %v2398_v5  ;;  %v3274_v61 = vcombine.high %v2397_v46, %v2398_v5  ;;  %vm1801_vm1 = vcmp.gt.f32.partialorder %v18831_v44, 0.0 }
 0x615   :  { %v3700_v47 = vcombine.high %v3692_v22, %v3692_v22  ;;  %v3701_v25 = vcombine.high %v3699_v18, %v3699_v18  ;;  %v11581_v29 = vrot.slane %v3692_v22, 9  ;;  %v11583_v53 = vrot.slane %v3699_v18, 9 }
 0x616   :  { %v3281_v0 = vrot.slane %v3273_v40, %v19814_v51  ;;  %v11334_v50 = vadd.f32 -1.0, %v11842_v55  ;;  %v18996_v38 = vadd.f32 %v18906_v62, %v18855_v12  ;;  %v3288_v59 = vrot.slane %v3274_v61, %v19814_v51 }
 0x617   :  { %v11582_v31 = vrot.slane %v3700_v47, 9  ;;  %v11584_v7 = vrot.slane %v3701_v25, 9  ;;  %v4952_v24 = vmax.f32 %v3692_v22, %v11581_v29  ;;  %v19000_v3 = vadd.f32 %v7883_v21, %v18891_v6 }
 0x618   :  { %v19003_v27 = vadd.f32 %v7893_v56, %v18894_v9  ;;  %v19006_v41 = vmax.f32 %v3699_v18, %v11583_v53  ;;  %11843 = vpow2.f32 %v18918_v49  ;;  %v3289_v52 = vcombine.high %v3281_v0, %v3281_v0 }
 0x619   :  { %v4953_v1 = vmax.f32 %v3700_v47, %v11582_v31  ;;  %v19009_v12 = vmax.f32 %v3701_v25, %v11584_v7  ;;  %v19012_v62 = vmul.f32 %v4952_v24, %v4952_v24  ;;  %v19017_v6 = vsel %vm1801_vm1, %v18831_v44, %v11334_v50 }
 0x61a   :  { %v1933_v9 = vmin.f32 %v18915_v48, 0.0  ;;  %v11492_v11 = vrot.slane %v3281_v0, 9  ;;  %v11494_v46 = vrot.slane %v3288_v59, 9  ;;  %v7138_v5 = vrot.slane %v4952_v24, %v19815_v33 }
 0x61b   :  { %v7146_v16 = vrot.slane %v4953_v1, %v19815_v33  ;;  %v7150_v26 = vrot.slane %v4953_v1, %v19816_v28  ;;  %v19023_v55 = vmul.f32 %v4953_v1, %v4953_v1  ;;  %v19027_v49 = vmul.f32 %v19006_v41, %v19006_v41 }
 0x61c   :  { %v7142_v44 = vrot.slane %v4952_v24, %v19816_v28  ;;  %v19041_v61 = vmul.f32 %v19009_v12, %v19009_v12  ;;  %v10404_v47 = vrot.slane %v19012_v62, %v19815_v33  ;;  %v11493_v50 = vrot.slane %v3289_v52, 9 }
 0x61d   :  { %v7618_v29 = vsel %vm7191_vm4, %v7146_v16, %v7138_v5  ;;  %v4863_v31 = vmax.f32 %v3281_v0, %v11492_v11  ;;  %v10412_v7 = vrot.slane %v19023_v55, %v19815_v33  ;;  %v4865_v35 = vmax.f32 %v3288_v59, %v11494_v46  ;;  %v20330_v46 = vld [vmem:[#allocation122_spill] sm:$0xff] }
 0x61e   :  { %v7624_v53 = vsel %vm7191_vm4, %v7150_v26, %v7142_v44  ;;  %v10416_v60 = vrot.slane %v19023_v55, %v19816_v28  ;;  %v4864_v57 = vmax.f32 %v3289_v52, %v11493_v50  ;;  %v2187_v5 = vmul.f32 1.442695, %v1933_v9  ;;  %v20331_v50 = vld [vmem:[#allocation125_spill] sm:$0xff] }
 0x61f   :  { %v6426_v16 = vrot.slane %v4863_v31, %v19815_v33  ;;  %v6430_v26 = vrot.slane %v4863_v31, %v19816_v28  ;;  %v6442_v0 = vrot.slane %v4865_v35, %v19815_v33  ;;  %v6446_v11 = vrot.slane %v4865_v35, %v19816_v28 }
 0x620   :  { %v8129_v44 = vmul.f32 %v4863_v31, %v4863_v31  ;;  %vm1802_vm2 = vcmp.gt.f32.partialorder %v18842_v19, 0.0  ;;  %v6434_v40 = vrot.slane %v4864_v57, %v19815_v33  ;;  %v6438_v59 = vrot.slane %v4864_v57, %v19816_v28 }
 0x621   :  { %v7459_v55 = vsel %vm7197_vm13, %v6426_v16, %v20330_v46  ;;  %v8130_v52 = vmul.f32 %v4864_v57, %v4864_v57  ;;  %v7465_v9 = vsel %vm7197_vm13, %v6430_v26, %v20331_v50  ;;  %v8131_v56 = vmul.f32 %v4865_v35, %v4865_v35 }
 0x622   :  { %v9692_v1 = vrot.slane %v8129_v44, %v19815_v33  ;;  %v9696_v24 = vrot.slane %v8129_v44, %v19816_v28  ;;  %v7460_v31 = vsel %vm7199_vm14, %v6434_v40, %v7459_v55  ;;  %v7466_v25 = vsel %vm7199_vm14, %v6438_v59, %v7465_v9  ;;  %v20332_v59 = vld [vmem:[#allocation36_spill] sm:$0xff] }
 0x623   :  { %v9700_v21 = vrot.slane %v8130_v52, %v19815_v33  ;;  %v9704_v18 = vrot.slane %v8130_v52, %v19816_v28  ;;  %v7461_v16 = vsel %vm7201_vm15, %v6442_v0, %v7460_v31  ;;  %v7467_v57 = vsel %vm7201_vm15, %v6446_v11, %v7466_v25  ;;  %v20333_v25 = vld [vmem:[#allocation63_spill] sm:$0xff] }
 0x624   :  { %v9708_v26 = vrot.slane %v8131_v56, %v19815_v33  ;;  %v9712_v35 = vrot.slane %v8131_v56, %v19816_v28  ;;  %7732 = vst [vmem:[%s19394_s3 + $0x130] sm:$0x7f] %v7461_v16  ;;  %7733 = vst [vmem:[%s19394_s3 + $0x138] sm:$0x7f] %v7467_v57  ;;  %v7841_v40 = vsel %vm7760_vm3, %v7461_v16, 0.0  ;;  %v7851_v44 = vsel %vm7760_vm3, %v7467_v57, 0.0 }
 0x625   :  { %v11844_v22 = vpop.eup %11843  ;;  %v10718_v0 = vsel %vm7197_vm13, %v9692_v1, %v20332_v59  ;;  %v10724_v11 = vsel %vm7197_vm13, %v9696_v24, %v20333_v25  ;;  %v7842_v56 = vadd.f32 %v7841_v40, %v18827_v17  ;;  %v7852_v46 = vadd.f32 %v7851_v44, %v18837_v45 }
 0x626   :  { %v10719_v55 = vsel %vm7199_vm14, %v9700_v21, %v10718_v0  ;;  %v10725_v52 = vsel %vm7199_vm14, %v9704_v18, %v10724_v11  ;;  %v11335_v31 = vadd.f32 -1.0, %v11844_v22  ;;  %11845 = vpow2.f32 %v2187_v5 }
 0x627   :  { %v10720_v50 = vsel %vm7201_vm15, %v9708_v26, %v10719_v55  ;;  %v10726_v9 = vsel %vm7201_vm15, %v9712_v35, %v10725_v52  ;;  %v7843_v16 = vrot.slane %v7842_v56, 4  ;;  %v7853_v57 = vrot.slane %v7852_v46, 4 }
 0x628   :  { %v11035_v1 = vsel %vm7760_vm3, %v10720_v50, 0.0  ;;  %v11045_v24 = vsel %vm7760_vm3, %v10726_v9, 0.0  ;;  %v2442_v18 = vsel %vm1802_vm2, %v18842_v19, %v11335_v31  ;;  %v20334_v21 = vmin.f32 %v18996_v38, 0.0 }
 0x629   :  { %v11036_v17 = vadd.f32 %v11035_v1, %v18800_v30  ;;  %v11046_v45 = vadd.f32 %v11045_v24, %v18804_v23  ;;  %v20335_v22 = vrot.slane %v19006_v41, %v19815_v33  ;;  %v10877_v35 = vsel %vm7191_vm4, %v10412_v7, %v10404_v47 }
 0x62a   :  { %v2189_v26 = vmul.f32 1.442695, %v20334_v21  ;;  %v3666_v40 = vcombine.low %v19017_v6, %v2442_v18  ;;  %v3667_v30 = vcombine.high %v19017_v6, %v2442_v18  ;;  %v20336_v23 = vrot.slane %v19006_v41, %v19816_v28 }
 0x62b   :  { %v7619_v5 = vsel %vm7193_vm5, %v20335_v22, %v7618_v29  ;;  %v19116_v19 = vadd.f32 %v7843_v16, %v7842_v56  ;;  %v11037_v59 = vrot.slane %v11036_v17, 4  ;;  %v10428_v0 = vrot.slane %v19041_v61, %v19815_v33 }
 0x62c   :  { %v7625_v44 = vsel %vm7193_vm5, %v20336_v23, %v7624_v53  ;;  %11847 = vpow2.f32 %v2189_v26  ;;  %v20337_v29 = vrot.slane %v19012_v62, %v19816_v28  ;;  %v3674_v7 = vrot.slane %v3666_v40, %v19814_v51  ;;  %v11868_v23 = vld [vmem:[%s19394_s3 + $0x1d8] sm:$0xff] }
 0x62d   :  { %v3681_v6 = vrot.slane %v3667_v30, %v19814_v51  ;;  %v10432_v41 = vrot.slane %v19041_v61, %v19816_v28  ;;  %v20338_v53 = vrot.slane %v19027_v49, %v19815_v33  ;;  %v19132_v11 = vadd.f32 %v7853_v57, %v7852_v46 }
 0x62e   :  { %v10883_v47 = vsel %vm7191_vm4, %v10416_v60, %v20337_v29  ;;  %v11047_v56 = vrot.slane %v11046_v45, 4  ;;  %v3682_v55 = vcombine.high %v3674_v7, %v3674_v7  ;;  %v11577_v62 = vrot.slane %v3674_v7, 9 }
 0x62f   :  { %v10878_v25 = vsel %vm7193_vm5, %v20338_v53, %v10877_v35  ;;  %v3683_v52 = vcombine.high %v3681_v6, %v3681_v6  ;;  %v11579_v50 = vrot.slane %v3681_v6, 9  ;;  %v20339_v60 = vrot.slane %v19027_v49, %v19816_v28  ;;  %v20342_v53 = vld [vmem:[#allocation59_spill] sm:$0xff] }
 0x630   :  { %v7845_v31 = vrot.slane %v19116_v19, 2  ;;  %v19139_v16 = vadd.f32 %v11037_v59, %v11036_v17  ;;  %v20340_v1 = vrot.slane %v19009_v12, %v19815_v33  ;;  %v11578_v57 = vrot.slane %v3682_v55, 9 }
 0x631   :  { %v10884_v9 = vsel %vm7193_vm5, %v20339_v60, %v10883_v47  ;;  %v11580_v24 = vrot.slane %v3683_v52, 9  ;;  %v4948_v18 = vmax.f32 %v3674_v7, %v11577_v62  ;;  %v4950_v21 = vmax.f32 %v3681_v6, %v11579_v50 }
 0x632   :  { %v19145_v46 = vsel %vm7195_vm7, %v20340_v1, %v7619_v5  ;;  %v7855_v26 = vrot.slane %v19132_v11, 2  ;;  %v19148_v22 = vadd.f32 %v11047_v56, %v11046_v45  ;;  %v19152_v49 = vadd.f32 %v18249_v14, %v18983_v20 }
 0x633   :  { %v19156_v17 = vadd.f32 %v18252_v54, %v18986_v63  ;;  %v4949_v35 = vmax.f32 %v3682_v55, %v11578_v57  ;;  %v7106_v5 = vrot.slane %v4948_v18, %v19815_v33  ;;  %v7110_v40 = vrot.slane %v4948_v18, %v19816_v28  ;;  %v11867_v54 = vld [vmem:[%s19394_s3 + $0x1d0] sm:$0xff]  ;;  %v11846_v29 = vpop.eup %11845 }
 0x634   :  { %vm1805_vm6 = vcmp.gt.f32.partialorder %v18915_v48, 0.0  ;;  %vm1806_vm8 = vcmp.gt.f32.partialorder %v18996_v38, 0.0  ;;  %v20341_v45 = vrot.slane %v19009_v12, %v19816_v28  ;;  %v11039_v14 = vrot.slane %v19139_v16, 2 }
 0x635   :  { %v8214_v20 = vmul.f32 %v4948_v18, %v4948_v18  ;;  %v7899_v63 = vadd.f32 %v11867_v54, %v18943_v8  ;;  %v7909_v59 = vadd.f32 %v11868_v23, %v18946_v32  ;;  %v4951_v12 = vmax.f32 %v3683_v52, %v11580_v24  ;;  %v20343_v8 = vld [vmem:[#allocation60_spill] sm:$0xff] }
 0x636   :  { %v19166_v30 = vsel %vm7195_vm7, %v20341_v45, %v7625_v44  ;;  %v7114_v44 = vrot.slane %v4949_v35, %v19815_v33  ;;  %v7118_v47 = vrot.slane %v4949_v35, %v19816_v28  ;;  %v7122_v7 = vrot.slane %v4950_v21, %v19815_v33 }
 0x637   :  { %v7126_v6 = vrot.slane %v4950_v21, %v19816_v28  ;;  %v7607_v56 = vsel %vm7197_vm13, %v7106_v5, %v20342_v53  ;;  %v7614_v55 = vsel %vm7197_vm13, %v7110_v40, %v20343_v8  ;;  %v8215_v62 = vmul.f32 %v4949_v35, %v4949_v35 }
 0x638   :  { %v7608_v50 = vsel %vm7199_vm14, %v7114_v44, %v7607_v56  ;;  %v7615_v32 = vsel %vm7199_vm14, %v7118_v47, %v7614_v55  ;;  %v10372_v52 = vrot.slane %v8214_v20, %v19815_v33  ;;  %v10376_v60 = vrot.slane %v8214_v20, %v19816_v28 }
 0x639   :  { %v7609_v1 = vsel %vm7201_vm15, %v7122_v7, %v7608_v50  ;;  %v7616_v57 = vsel %vm7201_vm15, %v7126_v6, %v7615_v32  ;;  %v10380_v24 = vrot.slane %v8215_v62, %v19815_v33  ;;  %v10384_v18 = vrot.slane %v8215_v62, %v19816_v28  ;;  %v11848_v5 = vpop.eup %11847 }
 0x63a   :  { %v7130_v40 = vrot.slane %v4951_v12, %v19815_v33  ;;  %v7134_v35 = vrot.slane %v4951_v12, %v19816_v28  ;;  %v8216_v45 = vmul.f32 %v4950_v21, %v4950_v21  ;;  %v8217_v54 = vmul.f32 %v4951_v12, %v4951_v12 }
 0x63b   :  { %v10866_v23 = vsel %vm7197_vm13, %v10372_v52, %v18730_v39  ;;  %v10873_v20 = vsel %vm7197_vm13, %v10376_v60, %v18743_v36  ;;  %v11338_v44 = vadd.f32 -1.0, %v11846_v29  ;;  %v11339_v47 = vadd.f32 -1.0, %v11848_v5 }
 0x63c   :  { %v7610_v7 = vsel %vm7203_vm0, %v7130_v40, %v7609_v1  ;;  %v7617_v6 = vsel %vm7203_vm0, %v7134_v35, %v7616_v57  ;;  %v19205_v53 = vsel %vm7195_vm7, %v10428_v0, %v10878_v25  ;;  %v19208_v21 = vsel %vm7195_vm7, %v10432_v41, %v10884_v9 }
 0x63d   :  { %v10867_v39 = vsel %vm7199_vm14, %v10380_v24, %v10866_v23  ;;  %v10874_v12 = vsel %vm7199_vm14, %v10384_v18, %v10873_v20  ;;  %v2445_v36 = vsel %vm1805_vm6, %v18915_v48, %v11338_v44  ;;  %v2446_v29 = vsel %vm1806_vm8, %v18996_v38, %v11339_v47  ;;  %7754 = vst [vmem:[%s19394_s3 + $0x1e0] sm:$0xff] %v7610_v7 }
 0x63e   :  { %7755 = vst [vmem:[%s19394_s3 + $0x1e8] sm:$0xff] %v7617_v6  ;;  %v10388_v61 = vrot.slane %v8216_v45, %v19815_v33  ;;  %v10392_v0 = vrot.slane %v8216_v45, %v19816_v28  ;;  %v3702_v41 = vcombine.low %v2445_v36, %v2446_v29  ;;  %v3703_v25 = vcombine.high %v2445_v36, %v2446_v29 }
 0x63f   :  { %v10396_v48 = vrot.slane %v8217_v54, %v19815_v33  ;;  %v10400_v9 = vrot.slane %v8217_v54, %v19816_v28  ;;  %v20344_v38 = vrot.slane %v18811_v13, 1  ;;  %v7846_v8 = vadd.f32 %v7845_v31, %v19116_v19 }
 0x640   :  { %v10868_v55 = vsel %vm7201_vm15, %v10388_v61, %v10867_v39  ;;  %v10875_v62 = vsel %vm7201_vm15, %v10392_v0, %v10874_v12  ;;  %v3710_v50 = vrot.slane %v3702_v41, %v19814_v51  ;;  %v3717_v32 = vrot.slane %v3703_v25, %v19814_v51 }
 0x641   :  { %v19231_v56 = vadd.f32 %v20344_v38, %v18811_v13  ;;  %v7847_v52 = vrot.slane %v7846_v8, 1  ;;  %v7856_v60 = vadd.f32 %v7855_v26, %v19132_v11  ;;  %v7865_v13 = vrot.slane %v18784_v58, 2 }
 0x642   :  { %v7875_v1 = vrot.slane %v18792_v2, 2  ;;  %v3718_v57 = vcombine.high %v3710_v50, %v3710_v50  ;;  %v11585_v24 = vrot.slane %v3710_v50, 9  ;;  %v11587_v19 = vrot.slane %v3717_v32, 9 }
 0x643   :  { %v7885_v31 = vrot.slane %v19000_v3, 2  ;;  %v7900_v18 = vadd.f32 %v7899_v63, %v7610_v7  ;;  %v7910_v5 = vadd.f32 %v7909_v59, %v7617_v6  ;;  %v7857_v40 = vrot.slane %v7856_v60, 1 }
 0x644   :  { %v7866_v35 = vadd.f32 %v7865_v13, %v18784_v58  ;;  %v11586_v51 = vrot.slane %v3718_v57, 9  ;;  %v4956_v45 = vmax.f32 %v3710_v50, %v11585_v24  ;;  %v4958_v54 = vmax.f32 %v3717_v32, %v11587_v19 }
 0x645   :  { %v19248_v23 = vsel %vm7203_vm0, %v10396_v48, %v10868_v55  ;;  %v19251_v11 = vsel %vm7203_vm0, %v10400_v9, %v10875_v62  ;;  %v20345_v26 = vrot.slane %v18813_v42, 1  ;;  %v19258_v44 = vadd.f32 %v7847_v52, %v7846_v8 }
 0x646   :  { %v7876_v63 = vadd.f32 %v7875_v1, %v18792_v2  ;;  %v4957_v59 = vmax.f32 %v3718_v57, %v11586_v51  ;;  %v7170_v58 = vrot.slane %v4956_v45, %v19815_v33  ;;  %v7174_v47 = vrot.slane %v4956_v45, %v19816_v28 }
 0x647   :  { %v19256_v20 = vadd.f32 %v20345_v26, %v18813_v42  ;;  %v7886_v7 = vadd.f32 %v7885_v31, %v19000_v3  ;;  %v7186_v6 = vrot.slane %v4958_v54, %v19815_v33  ;;  %v8222_v39 = vmul.f32 %v4956_v45, %v4956_v45 }
 0x648   :  { %v19265_v12 = vadd.f32 %v7857_v40, %v7856_v60  ;;  %v7867_v36 = vrot.slane %v7866_v35, 1  ;;  %v7178_v42 = vrot.slane %v4957_v59, %v19815_v33  ;;  %v7182_v29 = vrot.slane %v4957_v59, %v19816_v28 }
 0x649   :  { %v7621_v2 = vsel %vm7197_vm13, %v7170_v58, %v19145_v46  ;;  %v7627_v61 = vsel %vm7197_vm13, %v7174_v47, %v19166_v30  ;;  %v7190_v0 = vrot.slane %v4958_v54, %v19816_v28  ;;  %v8223_v41 = vmul.f32 %v4957_v59, %v4957_v59 }
 0x64a   :  { %v10436_v3 = vrot.slane %v8222_v39, %v19815_v33  ;;  %v10440_v25 = vrot.slane %v8222_v39, %v19816_v28  ;;  %v7622_v48 = vsel %vm7199_vm14, %v7178_v42, %v7621_v2  ;;  %v7628_v9 = vsel %vm7199_vm14, %v7182_v29, %v7627_v61  ;;  %v20347_v39 = vld [vmem:[#allocation118_spill] sm:$0xff] }
 0x64b   :  { %v8224_v38 = vmul.f32 %v4958_v54, %v4958_v54  ;;  %v7895_v8 = vrot.slane %v19003_v27, 2  ;;  %v7623_v55 = vsel %vm7201_vm15, %v7186_v6, %v7622_v48  ;;  %v7629_v46 = vsel %vm7201_vm15, %v7190_v0, %v7628_v9 }
 0x64c   :  { %v10444_v30 = vrot.slane %v8223_v41, %v19815_v33  ;;  %v7877_v62 = vrot.slane %v7876_v63, 1  ;;  %7756 = vst [vmem:[%s19394_s3 + $0x1f0] sm:$0x7f] %v7623_v55  ;;  %7757 = vst [vmem:[%s19394_s3 + $0x1f8] sm:$0x7f] %v7629_v46  ;;  %v7901_v50 = vsel %vm7760_vm3, %v7623_v55, 0.0  ;;  %v10448_v52 = vrot.slane %v8223_v41, %v19816_v28 }
 0x64d   :  { %v7911_v32 = vsel %vm7760_vm3, %v7629_v46, 0.0  ;;  %v10880_v60 = vsel %vm7197_vm13, %v10436_v3, %v19205_v53  ;;  %v7902_v13 = vadd.f32 %v7901_v50, %v7900_v18  ;;  %v10886_v24 = vsel %vm7197_vm13, %v10440_v25, %v19208_v21  ;;  %v20346_v21 = vld [vmem:[#allocation52_spill] sm:$0xff]  ;;  %v20351_v25 = vld [vmem:[#allocation119_spill] sm:$0xff]  ;;  %s11938_s3 = smov [#allocation7]  }
 0x64e   :  { %v7912_v1 = vadd.f32 %v7911_v32, %v7910_v5  ;;  %v10881_v57 = vsel %vm7199_vm14, %v10444_v30, %v10880_v60  ;;  %v10452_v19 = vrot.slane %v8224_v38, %v19815_v33  ;;  %v7868_v31 = vadd.f32 %v7867_v36, %v7866_v35  ;;  %v20349_v36 = vld [vmem:[#allocation57_spill] sm:$0xff]  ;;  %v20350_v3 = vld [vmem:[#allocation124_spill] sm:$0xff]  ;;  %s11200_s21 = sshll.u32 %s11938_s3, 4  ;;  %s11201_s21 = int_to_ptr.vmem [resolvable:$true] %s11200_s21 }
 0x64f   :  { %v7887_v40 = vrot.slane %v7886_v7, 1  ;;  %v7896_v51 = vadd.f32 %v7895_v8, %v19003_v27  ;;  %v7903_v45 = vrot.slane %v7902_v13, 4  ;;  %v10456_v26 = vrot.slane %v8224_v38, %v19816_v28  ;;  %v20353_v38 = vld [vmem:[#allocation72_spill] sm:$0xff]  ;;  %s11909_s22 = scalar_lea.vmem %s11201_s21, 64  ;;  %p11914_p11 = scmp.lt.s32.totalorder %s11201_s21, %s11201_s21 }
 0x650   :  { %v7913_v54 = vrot.slane %v7912_v1, 4  ;;  %v7878_v59 = vadd.f32 %v7877_v62, %v7876_v63  ;;  %v10882_v53 = vsel %vm7201_vm15, %v10452_v19, %v10881_v57  ;;  %v10887_v18 = vsel %vm7199_vm14, %v10448_v52, %v10886_v24  ;;  %p11910_p10 = scmp.ne.s32.totalorder %s11201_s21, %s11909_s22  ;;  %p11915_p12 = scmp.lt.s32.totalorder %s11909_s22, %s11909_s22 }
 0x651   :  { %v7888_v5 = vadd.f32 %v7887_v40, %v7886_v7  ;;  %v7897_v58 = vrot.slane %v7896_v51, 1  ;;  %v7904_v47 = vadd.f32 %v7903_v45, %v7902_v13  ;;  %v20348_v33 = vrot.slane %v20347_v39, 7 }
 0x652   :  { %v7914_v6 = vadd.f32 %v7913_v54, %v7912_v1  ;;  %v7937_v27 = vrot.slane %v20349_v36, 6  ;;  %v7939_v29 = vrot.slane %v19231_v56, 5  ;;  %v7941_v28 = vrot.slane %v19258_v44, 4  ;;  %p11916_p13 = por %p11915_p12, %p11914_p11 }
 0x653   :  { %v7936_v35 = vsel %vm7191_vm4, %v20348_v33, %v20346_v21  ;;  %v7898_v42 = vadd.f32 %v7897_v58, %v7896_v51  ;;  %v7943_v63 = vrot.slane %v7868_v31, 3  ;;  %v7905_v2 = vrot.slane %v7904_v47, 2 }
 0x654   :  { %v7915_v61 = vrot.slane %v7914_v6, 2  ;;  %v7938_v7 = vsel %vm7193_vm5, %v7937_v27, %v7936_v35  ;;  %v7945_v0 = vrot.slane %v7888_v5, 2  ;;  %v20352_v48 = vrot.slane %v20351_v25, 7  ;;  %p11917_p0 = pnand %p11916_p13, %p11910_p10 }
 0x655   :  { %v7940_v41 = vsel %vm7195_vm7, %v7939_v29, %v7938_v7  ;;  %v7951_v8 = vrot.slane %v20353_v38, 6  ;;  %v7953_v55 = vrot.slane %v19256_v20, 5  ;;  %v7906_v56 = vadd.f32 %v7905_v2, %v7904_v47  ;;  %v20360_v7 = vld [vmem:[#allocation106_spill] sm:$0xff] }
 0x656   :  { %v7950_v9 = vsel %vm7191_vm4, %v20352_v48, %v20350_v3  ;;  %v7916_v46 = vadd.f32 %v7915_v61, %v7914_v6  ;;  %v7942_v44 = vsel %vm7197_vm13, %v7941_v28, %v7940_v41  ;;  %v7955_v30 = vrot.slane %v19265_v12, 4  ;;  %v20362_v3 = vld [vmem:[#allocation99_spill] sm:$0xff] }
 0x657   :  { %v10888_v62 = vsel %vm7201_vm15, %v10456_v26, %v10887_v18  ;;  %v7944_v50 = vsel %vm7199_vm14, %v7943_v63, %v7942_v44  ;;  %v7952_v32 = vsel %vm7193_vm5, %v7951_v8, %v7950_v9  ;;  %v7957_v52 = vrot.slane %v7878_v59, 3  ;;  %v20354_v18 = vld [vmem:[#allocation150_spill] sm:$0xff] }
 0x658   :  { %v7907_v60 = vrot.slane %v7906_v56, 1  ;;  %v7917_v13 = vrot.slane %v7916_v46, 1  ;;  %v7946_v1 = vsel %vm7201_vm15, %v7945_v0, %v7944_v50  ;;  %v7954_v57 = vsel %vm7195_vm7, %v7953_v55, %v7952_v32 }
 0x659   :  { %v11049_v20 = vrot.slane %v19148_v22, 2  ;;  %v11095_v24 = vsel %vm7760_vm3, %v10882_v53, 0.0  ;;  %v7956_v19 = vsel %vm7197_vm13, %v7955_v30, %v7954_v57  ;;  %v7959_v12 = vrot.slane %v7898_v42, 2 }
 0x65a   :  { %v11105_v31 = vsel %vm7760_vm3, %v10888_v62, 0.0  ;;  %v7908_v40 = vadd.f32 %v7907_v60, %v7906_v56  ;;  %v7918_v51 = vadd.f32 %v7917_v13, %v7916_v46  ;;  %v7958_v45 = vsel %vm7199_vm14, %v7957_v52, %v7956_v19 }
 0x65b   :  { %v11094_v54 = vadd.f32 %v19152_v49, %v19248_v23  ;;  %v11104_v26 = vadd.f32 %v19156_v17, %v19251_v11  ;;  %v7960_v59 = vsel %vm7201_vm15, %v7959_v12, %v7958_v45  ;;  %v11040_v53 = vadd.f32 %v11039_v14, %v19139_v16  ;;  %v20364_v12 = vld [vmem:[#allocation70_spill] sm:$0xff] }
 0x65c   :  { %v20355_v5 = vrot.slane %v20354_v18, 1  ;;  %v7947_v47 = vrot.slane %v7908_v40, 1  ;;  %v7961_v6 = vrot.slane %v7918_v51, 1  ;;  %v20356_v21 = vrot.slane %v18667_v4, 4 }
 0x65d   :  { %v11096_v23 = vadd.f32 %v11095_v24, %v11094_v54  ;;  %v11106_v39 = vadd.f32 %v11105_v31, %v11104_v26  ;;  %v20357_v17 = vrot.slane %v18670_v34, 4  ;;  %v20358_v16 = vrot.slane %v18910_v10, 4  ;;  %v20365_v26 = vld [vmem:[#allocation79_spill] sm:$0xff] }
 0x65e   :  { %v19339_v58 = vadd.f32 %v20355_v5, %v20354_v18  ;;  %v11058_v49 = vadd.f32 %v20356_v21, %v18667_v4  ;;  %v7948_v33 = vsel %vm7203_vm0, %v7947_v47, %v7946_v1  ;;  %v19352_v35 = vsel %vm7203_vm0, %v7961_v6, %v7960_v59 }
 0x65f   :  { %v11068_v11 = vadd.f32 %v20357_v17, %v18670_v34  ;;  %v11078_v14 = vadd.f32 %v20358_v16, %v18910_v10  ;;  %v20359_v27 = vrot.slane %v18913_v15, 4  ;;  %v11021_v42 = vrot.slane %v18817_v43, 1 }
 0x660   :  { %v11059_v36 = vrot.slane %v11058_v49, 2  ;;  %v11031_v29 = vrot.slane %v18823_v37, 1  ;;  %v11041_v28 = vrot.slane %v11040_v53, 1  ;;  %v11050_v34 = vadd.f32 %v11049_v20, %v19148_v22 }
 0x661   :  { %v11088_v4 = vadd.f32 %v20359_v27, %v18913_v15  ;;  %v11069_v2 = vrot.slane %v11068_v11, 2  ;;  %v11079_v10 = vrot.slane %v11078_v14, 2  ;;  %v20361_v0 = vrot.slane %v20360_v7, 1 }
 0x662   :  { %v11060_v63 = vadd.f32 %v11059_v36, %v11058_v49  ;;  %v20363_v25 = vrot.slane %v20362_v3, 1  ;;  %v11097_v15 = vrot.slane %v11096_v23, 4  ;;  %v11107_v9 = vrot.slane %v11106_v39, 4 }
 0x663   :  { %v11089_v61 = vrot.slane %v11088_v4, 2  ;;  %v11002_v41 = vadd.f32 %v20361_v0, %v20360_v7  ;;  %v11070_v8 = vadd.f32 %v11069_v2, %v11068_v11  ;;  %v11080_v55 = vadd.f32 %v11079_v10, %v11078_v14 }
 0x664   :  { %v11012_v48 = vadd.f32 %v20363_v25, %v20362_v3  ;;  %v11061_v38 = vrot.slane %v11060_v63, 1  ;;  %v7965_v46 = vrot.slane %v7948_v33, 4  ;;  %v11051_v22 = vrot.slane %v11050_v34, 1 }
 0x665   :  { %v11090_v56 = vadd.f32 %v11089_v61, %v11088_v4  ;;  %v11098_v44 = vadd.f32 %v11097_v15, %v11096_v23  ;;  %v11108_v30 = vadd.f32 %v11107_v9, %v11106_v39  ;;  %v11022_v62 = vadd.f32 %v11021_v42, %v18817_v43  ;;  %v20366_v39 = vld [vmem:[#allocation71_spill] sm:$0xff] }
 0x666   :  { %v11032_v50 = vadd.f32 %v11031_v29, %v18823_v37  ;;  %v11042_v32 = vadd.f32 %v11041_v28, %v11040_v53  ;;  %v11081_v52 = vrot.slane %v11080_v55, 1  ;;  %v11071_v60 = vrot.slane %v11070_v8, 1 }
 0x667   :  { %v11091_v13 = vrot.slane %v11090_v56, 1  ;;  %v11099_v1 = vrot.slane %v11098_v44, 2  ;;  %v11109_v57 = vrot.slane %v11108_v30, 2  ;;  %v7971_v20 = vrot.slane %v19352_v35, 4 }
 0x668   :  { %v11062_v24 = vadd.f32 %v11061_v38, %v11060_v63  ;;  %v11082_v19 = vadd.f32 %v11081_v52, %v11080_v55  ;;  %v11129_v31 = vrot.slane %v20364_v12, 7  ;;  %v7966_v40 = vadd.f32 %v7965_v46, %v7948_v33 }
 0x669   :  { %v11052_v51 = vadd.f32 %v11051_v22, %v11050_v34  ;;  %v11100_v45 = vadd.f32 %v11099_v1, %v11098_v44  ;;  %v11110_v54 = vadd.f32 %v11109_v57, %v11108_v30  ;;  %v11131_v37 = vrot.slane %v11002_v41, 6 }
 0x66a   :  { %v11130_v43 = vsel %vm7191_vm4, %v11129_v31, %v20365_v26  ;;  %v11133_v59 = vrot.slane %v11022_v62, 5  ;;  %v11135_v53 = vrot.slane %v11042_v32, 4  ;;  %v11072_v18 = vadd.f32 %v11071_v60, %v11070_v8 }
 0x66b   :  { %v11092_v5 = vadd.f32 %v11091_v13, %v11090_v56  ;;  %v11101_v47 = vrot.slane %v11100_v45, 1  ;;  %v11111_v6 = vrot.slane %v11110_v54, 1  ;;  %v11132_v21 = vsel %vm7193_vm5, %v11131_v37, %v11130_v43 }
 0x66c   :  { %v11137_v49 = vrot.slane %v11062_v24, 3  ;;  %v11139_v23 = vrot.slane %v11082_v19, 2  ;;  %v11143_v17 = vrot.slane %v20366_v39, 7  ;;  %v11134_v14 = vsel %vm7195_vm7, %v11133_v59, %v11132_v21 }
 0x66d   :  { %v11102_v11 = vadd.f32 %v11101_v47, %v11100_v45  ;;  %v11112_v16 = vadd.f32 %v11111_v6, %v11110_v54  ;;  %v11145_v33 = vrot.slane %v11012_v48, 6  ;;  %v11136_v36 = vsel %vm7197_vm13, %v11135_v53, %v11134_v14 }
 0x66e   :  { %v11144_v27 = vsel %vm7191_vm4, %v11143_v17, %v19339_v58  ;;  %v11147_v4 = vrot.slane %v11032_v50, 5  ;;  %v11149_v42 = vrot.slane %v11052_v51, 4  ;;  %v11138_v29 = vsel %vm7199_vm14, %v11137_v49, %v11136_v36 }
 0x66f   :  { %v11141_v28 = vrot.slane %v11102_v11, 1  ;;  %v11146_v34 = vsel %vm7193_vm5, %v11145_v33, %v11144_v27  ;;  %v11140_v63 = vsel %vm7201_vm15, %v11139_v23, %v11138_v29  ;;  %v11151_v10 = vrot.slane %v11072_v18, 3 }
 0x670   :  { %v11148_v2 = vsel %vm7195_vm7, %v11147_v4, %v11146_v34  ;;  %v11155_v61 = vrot.slane %v11112_v16, 1  ;;  %v7972_v7 = vadd.f32 %v7971_v20, %v19352_v35  ;;  %v11153_v58 = vrot.slane %v11092_v5, 2 }
 0x671   :  { %v11142_v0 = vsel %vm7203_vm0, %v11141_v28, %v11140_v63  ;;  %v11150_v41 = vsel %vm7197_vm13, %v11149_v42, %v11148_v2  ;;  %v7967_v3 = vrot.slane %v7966_v40, 2  ;;  %vm11177_vm4 = vcmask 1040384  }
 0x672   :  { %v11152_v25 = vsel %vm7199_vm14, %v11151_v10, %v11150_v41  ;;  %v11159_v48 = vrot.slane %v11142_v0, 4  ;;  %v7973_v8 = vrot.slane %v7972_v7, 2 }
 0x673   :  { %v11154_v15 = vsel %vm7201_vm15, %v11153_v58, %v11152_v25  ;;  %v7968_v56 = vadd.f32 %v7967_v3, %v7966_v40 }
 0x674   :  { %v11156_v9 = vsel %vm7203_vm0, %v11155_v61, %v11154_v15  ;;  %v11160_v38 = vadd.f32 %v11159_v48, %v11142_v0  ;;  %v7974_v44 = vadd.f32 %v7973_v8, %v7972_v7 }
 0x675   :  { %v11165_v55 = vrot.slane %v11156_v9, 4  ;;  %v7969_v62 = vrot.slane %v7968_v56, 1 }
 0x676   :  { %v11161_v46 = vrot.slane %v11160_v38, 2  ;;  %v7975_v60 = vrot.slane %v7974_v44, 1 }
 0x677   :  { %v11166_v22 = vadd.f32 %v11165_v55, %v11156_v9  ;;  %v7970_v1 = vadd.f32 %v7969_v62, %v7968_v56 }
 0x678   :  { %v11162_v35 = vadd.f32 %v11161_v46, %v11160_v38  ;;  %v7976_v19 = vadd.f32 %v7975_v60, %v7974_v44 }
 0x679   :  { %v11167_v30 = vrot.slane %v11166_v22, 2 }
 0x67a   :  { %v11163_v50 = vrot.slane %v11162_v35, 1 }
 0x67b   :  { %v11168_v32 = vadd.f32 %v11167_v30, %v11166_v22 }
 0x67c   :  { %v11164_v52 = vadd.f32 %v11163_v50, %v11162_v35 }
 0x67d   :  { %v11169_v13 = vrot.slane %v11168_v32, 1 }
 0x67e   :  { %v11173_v57 = vrot.slane %v11164_v52, 7 }
 0x67f   :  { %v11170_v20 = vadd.f32 %v11169_v13, %v11168_v32 }
 0x680   :  { %v11178_v24 = vsel %vm11177_vm4, %v7970_v1, %v11173_v57 }
 0x681   :  { %v11174_v12 = vrot.slane %v11170_v20, 7 }
 0x683   :  { %v11179_v31 = vsel %vm11177_vm4, %v7976_v19, %v11174_v12 }
 0x684   :  { %v11182_v40 = vcombine.low %v11178_v24, %v11179_v31 }
 0x686   :  { %11588 = vst.sshfl [vmem:[#allocation7] sm:$0x33 pattern:$0x76325410] %v11182_v40 }
 0x687   :  { %11920 = shalt.err (!%p11917_p0)
}
 0x688   :  { %11203 = dma.vmem_to_hbm [thread:$0]  %s11201_s21, 64, %s19395_s4, [#allocation4]  }
 0x689   :  { %11933 = dma.done.wait [#allocation4], 64  }
 0x68a   :  { %11934 = vsyncadd [#allocation4], 4294967232 }
 0x68b   :  { %11209 = vsyncpa [#allocation3], 1 }
 0x68c   :  { %11210 = vsyncpa [#allocation6], 1 }
 0x68d   :  { %11211 = vsyncpa [#allocation4], 1 }

</bundles_post_ra>
